<compile_context>
chip_gen: v7x
topology: tpu7x:2x2x1
jax: 0.10.0
libtpu: 0.0.40
codegen_flags: <defaults>
</compile_context>

<pallas_src>
import math

import jax
import jax.numpy as jnp
from jax.experimental import pallas as pl
from jax.experimental.pallas import tpu as pltpu


# ----------------------------------------------------------------------------
# Fused Pallas kernel
# ----------------------------------------------------------------------------
def _make_fused_kernel(width):
    """Builds the fused 5-layer kernel; `width` (W) is needed for tap shifts."""
    neg_slope = 0.2
    eps = 1e-5

    def kernel(mask_ref, z_ref, w1_ref, w2_ref, w3_ref, w4_ref, w5_ref,
               b5_ref, gamma_ref, beta_ref, o_ref):

        def im2col(act):
            # act: (Cin, M) f32 -> (9*Cin, M) bf16, rows ordered (ky, kx, cin).
            m_total = act.shape[1]
            taps = []
            tap_idx = 0
            for dy in (-1, 0, 1):
                for dx in (-1, 0, 1):
                    s = dy * width + dx          # tap reads act[:, m + s]
                    if s == 0:
                        v = act                  # centre tap: no shift, all valid
                    else:
                        # pltpu.roll == jnp.roll: result[m] = act[(m + s) mod M]
                        v = pltpu.roll(act, (-s) % m_total, axis=1)
                        v = v * mask_ref[tap_idx:tap_idx + 1, :]  # zero OOB taps
                    taps.append(v)
                    tap_idx += 1
            return jnp.concatenate(taps, axis=0).astype(jnp.bfloat16)

        def conv_bn_lrelu(act, w_ref, layer):
            # Conv3x3 as one K=9*Cin matmul (bf16 in, f32 acc) -> (nf, M).
            y = jnp.dot(w_ref[...], im2col(act),
                        preferred_element_type=jnp.float32)
            # BatchNorm2d, training mode (module default right after __init__):
            # biased batch statistics over (N, H, W) == the lane axis.
            mean = jnp.mean(y, axis=1, keepdims=True)
            var = jnp.mean(jnp.square(y - mean), axis=1, keepdims=True)
            inv = jax.lax.rsqrt(var + eps)
            scale = gamma_ref[:, layer:layer + 1] * inv
            shift = beta_ref[:, layer:layer + 1] - scale * mean
            yn = y * scale + shift                            # folded BN affine
            return jnp.where(yn >= 0.0, yn, neg_slope * yn)   # LeakyReLU(0.2)

        x = z_ref[...]
        x = conv_bn_lrelu(x, w1_ref, 0)
        x = conv_bn_lrelu(x, w2_ref, 1)
        x = conv_bn_lrelu(x, w3_ref, 2)
        x = conv_bn_lrelu(x, w4_ref, 3)
        # Final Conv3x3 (+ bias) -> Tanh, output (n_channels, M): lane-dense store.
        y = jnp.dot(w5_ref[...], im2col(x),
                    preferred_element_type=jnp.float32) + b5_ref[...]
        o_ref[...] = jnp.tanh(y)

    return kernel


# ----------------------------------------------------------------------------
# Wrapper
# ----------------------------------------------------------------------------
def _make_tap_masks(n, h, w):
    """(9, N*H*W) f32: 1.0 where conv tap (dy, dx) stays inside its image."""
    m = jnp.arange(n * h * w, dtype=jnp.int32)
    hh = (m // w) % h
    ww = m % w
    rows = []
    for dy in (-1, 0, 1):
        for dx in (-1, 0, 1):
            ok = ((hh + dy >= 0) & (hh + dy < h) &
                  (ww + dx >= 0) & (ww + dx < w))
            rows.append(ok)
    return jnp.stack(rows).astype(jnp.float32)


def _forward_scale0(z0, p):
    n, c, h, w = z0.shape
    m = n * h * w
    assert m % 128 == 0, "TODO(synk): pad M (with stat correction) when N*H*W % 128 != 0"
    c_pad = p["w1"].shape[1] // 9

    # NCHW -> (C, M) with M on the lane axis; pad channels to a sublane-friendly
    # multiple of 8 (padded channels carry zero weights).
    x_cm = jnp.transpose(z0, (1, 0, 2, 3)).reshape(c, m).astype(jnp.float32)
    x_cm = jnp.pad(x_cm, ((0, c_pad - c), (0, 0)))
    masks = _make_tap_masks(n, h, w)

    weights = [p["w1"], p["w2"], p["w3"], p["w4"], p["w5"]]
    inputs = [masks, x_cm] + weights + [p["b5"], p["gamma"], p["beta"]]

    flops = 2 * m * sum(wk.shape[0] * wk.shape[1] for wk in weights)
    trans = m * c + 4 * p["gamma"].shape[0]
    nbytes = sum(math.prod(a.shape) * a.dtype.itemsize for a in inputs) + m * c * 4

    out_cm = pl.pallas_call(
        _make_fused_kernel(w),
        out_shape=jax.ShapeDtypeStruct((c, m), jnp.float32),
        in_specs=[pl.BlockSpec(memory_space=pltpu.MemorySpace.VMEM)] * len(inputs),
        out_specs=pl.BlockSpec(memory_space=pltpu.MemorySpace.VMEM),
        cost_estimate=pl.CostEstimate(
            flops=flops, transcendentals=trans, bytes_accessed=nbytes),
    )(*inputs)
    return jnp.transpose(out_cm.reshape(c, n, h, w), (1, 0, 2, 3))


_forward_scale0_jit = jax.jit(_forward_scale0)


def generator_forward(z_list, params, img=None):
    """Generator.forward at current_scale == 0: x_list = [first_generator(z[0])]."""
    return [_forward_scale0_jit(z_list[0], params)]


# ----------------------------------------------------------------------------
# Parameters (synthetic, deterministic; PyTorch weight layout -> kernel layout)
# ----------------------------------------------------------------------------
def init_generator_params(key, n_channels=3, nf=32):
    """Raw conv weights use the PyTorch (Cout, Cin, 3, 3) layout and are
    converted to the kernel layout (Cout, 9*Cin), columns ordered (ky, kx, cin),
    via permute(0, 2, 3, 1) — the same permutation a real state_dict import
    would need.  Conv biases of the 4 BN layers are omitted (they cancel in
    training-mode BatchNorm)."""
    c_pad = -(-n_channels // 8) * 8
    cins = [n_channels, nf, nf, nf, nf]
    couts = [nf, nf, nf, nf, n_channels]
    raw_ws = []
    for ci, co in zip(cins, couts):
        key, k1 = jax.random.split(key)
        raw_ws.append(0.1 * jax.random.normal(k1, (co, ci, 3, 3), jnp.float32))
    key, kb = jax.random.split(key)
    b5 = 0.01 * jax.random.normal(kb, (n_channels, 1), jnp.float32)
    gamma = jnp.ones((nf, 4), jnp.float32)   # BatchNorm2d default weight (4 BN layers)
    beta = jnp.zeros((nf, 4), jnp.float32)   # BatchNorm2d default bias

    def to_kernel_layout(wraw, pad_to=None):
        co, ci, kh, kw = wraw.shape
        if pad_to is not None and ci < pad_to:
            wraw = jnp.pad(wraw, ((0, 0), (0, pad_to - ci), (0, 0), (0, 0)))
            ci = pad_to
        return jnp.transpose(wraw, (0, 2, 3, 1)).reshape(co, kh * kw * ci).astype(jnp.bfloat16)

    kernel_params = {
        "w1": to_kernel_layout(raw_ws[0], pad_to=c_pad),
        "w2": to_kernel_layout(raw_ws[1]),
        "w3": to_kernel_layout(raw_ws[2]),
        "w4": to_kernel_layout(raw_ws[3]),
        "w5": to_kernel_layout(raw_ws[4]),
        "b5": b5,
        "gamma": gamma,
        "beta": beta,
    }
    ref_params = {"ws": raw_ws, "b5": b5, "gamma": gamma, "beta": beta}
    return kernel_params, ref_params


# ----------------------------------------------------------------------------
# Pure-JAX reference (independent NHWC / (M, Cout) code path) for checking
# ----------------------------------------------------------------------------
def reference_forward(z0, ref_params):
    ws, b5 = ref_params["ws"], ref_params["b5"]
    gamma, beta = ref_params["gamma"], ref_params["beta"]
    n, c, h, w = z0.shape
    x = jnp.transpose(z0, (0, 2, 3, 1)).astype(jnp.float32)   # NHWC

    def im2col(xx):
        nn, hh, ww, cc = xx.shape
        xp = jnp.pad(xx, ((0, 0), (1, 1), (1, 1), (0, 0)))
        cols = [xp[:, dy:dy + hh, dx:dx + ww, :]
                for dy in range(3) for dx in range(3)]
        return jnp.concatenate(cols, axis=-1).reshape(nn * hh * ww, 9 * cc)

    def conv(xx, wraw):
        co = wraw.shape[0]
        w2d = jnp.transpose(wraw, (0, 2, 3, 1)).reshape(co, -1)
        patches = im2col(xx).astype(jnp.bfloat16)
        return jnp.dot(patches, w2d.astype(jnp.bfloat16).T,
                       preferred_element_type=jnp.float32)     # (M, Cout)

    for layer in range(4):
        y = conv(x, ws[layer])
        mean = jnp.mean(y, axis=0, keepdims=True)
        var = jnp.mean(jnp.square(y - mean), axis=0, keepdims=True)
        yh = (y - mean) * jax.lax.rsqrt(var + 1e-5)
        yh = gamma[:, layer][None, :] * yh + beta[:, layer][None, :]
        yh = jnp.where(yh >= 0.0, yh, 0.2 * yh)
        x = yh.reshape(n, h, w, -1)

    y = jnp.tanh(conv(x, ws[4]) + b5[:, 0][None, :])
    return jnp.transpose(y.reshape(n, h, w, c), (0, 3, 1, 2))


# ----------------------------------------------------------------------------
if __name__ == "__main__":
    key = jax.random.PRNGKey(0)

    # Module config (only scale 0 is active right after __init__).
    img_size_min = 16
    num_scale = 2
    scale_factor = 4.0 / 3.0
    n_channels = 3
    size_list = [int(img_size_min * scale_factor ** i) for i in range(num_scale + 1)]

    batch = 2
    key, kp, kz = jax.random.split(key, 3)
    params, ref_params = init_generator_params(kp, n_channels=n_channels, nf=32)

    # z is a list of noise maps, one per scale; only z[0] is consumed at scale 0.
    z = [jax.random.normal(jax.random.fold_in(kz, i),
                           (batch, n_channels, s, s), jnp.float32)
         for i, s in enumerate(size_list)]

    x_list = generator_forward(z, params)
    out = jax.block_until_ready(x_list[0])

    assert out.shape == (batch, n_channels, img_size_min, img_size_min), out.shape
    assert bool(jnp.all(jnp.isfinite(out)))
    assert bool(jnp.all(jnp.abs(out) <= 1.0 + 1e-6))   # tanh output range

    expected = reference_forward(z[0], ref_params)
    err = float(jnp.max(jnp.abs(out - expected)))
    assert err < 2e-2, f"max abs err vs pure-JAX reference = {err}"

    print("KERNEL_OK")
</pallas_src>

<mosaic_0001>
module attributes {stable_mosaic.version = 11 : i64} {
  func.func @kernel(%arg0: memref<9x512xf32, #tpu.memory_space<vmem>>, %arg1: memref<8x512xf32, #tpu.memory_space<vmem>>, %arg2: memref<32x72xbf16, #tpu.memory_space<vmem>>, %arg3: memref<32x288xbf16, #tpu.memory_space<vmem>>, %arg4: memref<32x288xbf16, #tpu.memory_space<vmem>>, %arg5: memref<32x288xbf16, #tpu.memory_space<vmem>>, %arg6: memref<3x288xbf16, #tpu.memory_space<vmem>>, %arg7: memref<3x1xf32, #tpu.memory_space<vmem>>, %arg8: memref<32x4xf32, #tpu.memory_space<vmem>>, %arg9: memref<32x4xf32, #tpu.memory_space<vmem>>, %arg10: memref<3x512xf32, #tpu.memory_space<vmem>>) attributes {dimension_semantics = [], scalar_prefetch = 0 : i64, scratch_operands = 0 : i64, tpu.core_type = #tpu.core_type<tc>} {
    %c0 = arith.constant 0 : index
    %c0_0 = arith.constant 0 : index
    %0 = vector.load %arg1[%c0, %c0_0] : memref<8x512xf32, #tpu.memory_space<vmem>>, vector<8x512xf32>
    %c0_1 = arith.constant 0 : index
    %c0_2 = arith.constant 0 : index
    %1 = vector.load %arg2[%c0_1, %c0_2] : memref<32x72xbf16, #tpu.memory_space<vmem>>, vector<32x72xbf16>
    %c17_i32 = arith.constant 17 : i32
    %2 = tpu.dynamic_rotate %0 by %c17_i32 dim 1 : vector<8x512xf32>, i32 -> vector<8x512xf32>
    %c0_3 = arith.constant 0 : index
    %c0_4 = arith.constant 0 : index
    %3 = vector.load %arg0[%c0_3, %c0_4] : memref<9x512xf32, #tpu.memory_space<vmem>>, vector<1x512xf32>
    %4 = vector.broadcast %3 : vector<1x512xf32> to vector<8x512xf32>
    %5 = arith.mulf %2, %4 : vector<8x512xf32>
    %c16_i32 = arith.constant 16 : i32
    %6 = tpu.dynamic_rotate %0 by %c16_i32 dim 1 : vector<8x512xf32>, i32 -> vector<8x512xf32>
    %c1 = arith.constant 1 : index
    %c0_5 = arith.constant 0 : index
    %7 = vector.load %arg0[%c1, %c0_5] : memref<9x512xf32, #tpu.memory_space<vmem>>, vector<1x512xf32>
    %8 = vector.broadcast %7 : vector<1x512xf32> to vector<8x512xf32>
    %9 = arith.mulf %6, %8 : vector<8x512xf32>
    %c15_i32 = arith.constant 15 : i32
    %10 = tpu.dynamic_rotate %0 by %c15_i32 dim 1 : vector<8x512xf32>, i32 -> vector<8x512xf32>
    %c2 = arith.constant 2 : index
    %c0_6 = arith.constant 0 : index
    %11 = vector.load %arg0[%c2, %c0_6] : memref<9x512xf32, #tpu.memory_space<vmem>>, vector<1x512xf32>
    %12 = vector.broadcast %11 : vector<1x512xf32> to vector<8x512xf32>
    %13 = arith.mulf %10, %12 : vector<8x512xf32>
    %c1_i32 = arith.constant 1 : i32
    %14 = tpu.dynamic_rotate %0 by %c1_i32 dim 1 : vector<8x512xf32>, i32 -> vector<8x512xf32>
    %c3 = arith.constant 3 : index
    %c0_7 = arith.constant 0 : index
    %15 = vector.load %arg0[%c3, %c0_7] : memref<9x512xf32, #tpu.memory_space<vmem>>, vector<1x512xf32>
    %16 = vector.broadcast %15 : vector<1x512xf32> to vector<8x512xf32>
    %17 = arith.mulf %14, %16 : vector<8x512xf32>
    %c511_i32 = arith.constant 511 : i32
    %18 = tpu.dynamic_rotate %0 by %c511_i32 dim 1 : vector<8x512xf32>, i32 -> vector<8x512xf32>
    %c5 = arith.constant 5 : index
    %c0_8 = arith.constant 0 : index
    %19 = vector.load %arg0[%c5, %c0_8] : memref<9x512xf32, #tpu.memory_space<vmem>>, vector<1x512xf32>
    %20 = vector.broadcast %19 : vector<1x512xf32> to vector<8x512xf32>
    %21 = arith.mulf %18, %20 : vector<8x512xf32>
    %c497_i32 = arith.constant 497 : i32
    %22 = tpu.dynamic_rotate %0 by %c497_i32 dim 1 : vector<8x512xf32>, i32 -> vector<8x512xf32>
    %c6 = arith.constant 6 : index
    %c0_9 = arith.constant 0 : index
    %23 = vector.load %arg0[%c6, %c0_9] : memref<9x512xf32, #tpu.memory_space<vmem>>, vector<1x512xf32>
    %24 = vector.broadcast %23 : vector<1x512xf32> to vector<8x512xf32>
    %25 = arith.mulf %22, %24 : vector<8x512xf32>
    %c496_i32 = arith.constant 496 : i32
    %26 = tpu.dynamic_rotate %0 by %c496_i32 dim 1 : vector<8x512xf32>, i32 -> vector<8x512xf32>
    %c7 = arith.constant 7 : index
    %c0_10 = arith.constant 0 : index
    %27 = vector.load %arg0[%c7, %c0_10] : memref<9x512xf32, #tpu.memory_space<vmem>>, vector<1x512xf32>
    %28 = vector.broadcast %27 : vector<1x512xf32> to vector<8x512xf32>
    %29 = arith.mulf %26, %28 : vector<8x512xf32>
    %c495_i32 = arith.constant 495 : i32
    %30 = tpu.dynamic_rotate %0 by %c495_i32 dim 1 : vector<8x512xf32>, i32 -> vector<8x512xf32>
    %c8 = arith.constant 8 : index
    %c0_11 = arith.constant 0 : index
    %31 = vector.load %arg0[%c8, %c0_11] : memref<9x512xf32, #tpu.memory_space<vmem>>, vector<1x512xf32>
    %32 = vector.broadcast %31 : vector<1x512xf32> to vector<8x512xf32>
    %33 = arith.mulf %30, %32 : vector<8x512xf32>
    %34 = tpu.concatenate %5, %9, %13, %17, %0, %21, %25, %29, %33 in 0 : vector<8x512xf32>, vector<8x512xf32>, vector<8x512xf32>, vector<8x512xf32>, vector<8x512xf32>, vector<8x512xf32>, vector<8x512xf32>, vector<8x512xf32>, vector<8x512xf32> -> vector<72x512xf32>
    %35 = arith.truncf %34 : vector<72x512xf32> to vector<72x512xbf16>
    %cst = arith.constant dense<0.000000e+00> : vector<32x512xf32>
    %36 = tpu.matmul %1, %35, %cst {dimension_numbers = #tpu.dot_dimension_numbers<[1], [0], [0], [1], [0, 0, 1, 1], [], []>} : vector<32x72xbf16>, vector<72x512xbf16>, vector<32x512xf32> -> vector<32x512xf32>
    %cst_12 = arith.constant dense<0.000000e+00> : vector<32xf32>
    %37 = vector.multi_reduction <add>, %36, %cst_12 [1] : vector<32x512xf32> to vector<32xf32>
    %38 = vector.shape_cast %37 : vector<32xf32> to vector<32x1xf32>
    %cst_13 = arith.constant 5.120000e+02 : f32
    %39 = vector.broadcast %cst_13 : f32 to vector<32x1xf32>
    %40 = arith.divf %38, %39 : vector<32x1xf32>
    %41 = vector.broadcast %40 : vector<32x1xf32> to vector<32x512xf32>
    %42 = arith.subf %36, %41 : vector<32x512xf32>
    %43 = arith.mulf %42, %42 : vector<32x512xf32>
    %cst_14 = arith.constant dense<0.000000e+00> : vector<32xf32>
    %44 = vector.multi_reduction <add>, %43, %cst_14 [1] : vector<32x512xf32> to vector<32xf32>
    %45 = vector.shape_cast %44 : vector<32xf32> to vector<32x1xf32>
    %cst_15 = arith.constant 5.120000e+02 : f32
    %46 = vector.broadcast %cst_15 : f32 to vector<32x1xf32>
    %47 = arith.divf %45, %46 : vector<32x1xf32>
    %cst_16 = arith.constant 9.99999974E-6 : f32
    %48 = vector.broadcast %cst_16 : f32 to vector<32x1xf32>
    %49 = arith.addf %47, %48 : vector<32x1xf32>
    %50 = math.rsqrt %49 : vector<32x1xf32>
    %c0_17 = arith.constant 0 : index
    %c0_18 = arith.constant 0 : index
    %51 = vector.load %arg8[%c0_17, %c0_18] : memref<32x4xf32, #tpu.memory_space<vmem>>, vector<32x1xf32>
    %52 = arith.mulf %51, %50 : vector<32x1xf32>
    %c0_19 = arith.constant 0 : index
    %c0_20 = arith.constant 0 : index
    %53 = vector.load %arg9[%c0_19, %c0_20] : memref<32x4xf32, #tpu.memory_space<vmem>>, vector<32x1xf32>
    %54 = arith.mulf %52, %40 : vector<32x1xf32>
    %55 = arith.subf %53, %54 : vector<32x1xf32>
    %56 = vector.broadcast %52 : vector<32x1xf32> to vector<32x512xf32>
    %57 = arith.mulf %36, %56 : vector<32x512xf32>
    %58 = vector.broadcast %55 : vector<32x1xf32> to vector<32x512xf32>
    %59 = arith.addf %57, %58 : vector<32x512xf32>
    %cst_21 = arith.constant 0.000000e+00 : f32
    %60 = vector.broadcast %cst_21 : f32 to vector<32x512xf32>
    %61 = arith.cmpf oge, %59, %60 : vector<32x512xf32>
    %cst_22 = arith.constant 2.000000e-01 : f32
    %62 = vector.broadcast %cst_22 : f32 to vector<32x512xf32>
    %63 = arith.mulf %62, %59 : vector<32x512xf32>
    %64 = arith.select %61, %59, %63 : vector<32x512xi1>, vector<32x512xf32>
    %c0_23 = arith.constant 0 : index
    %c0_24 = arith.constant 0 : index
    %65 = vector.load %arg3[%c0_23, %c0_24] : memref<32x288xbf16, #tpu.memory_space<vmem>>, vector<32x288xbf16>
    %c17_i32_25 = arith.constant 17 : i32
    %66 = tpu.dynamic_rotate %64 by %c17_i32_25 dim 1 : vector<32x512xf32>, i32 -> vector<32x512xf32>
    %c0_26 = arith.constant 0 : index
    %c0_27 = arith.constant 0 : index
    %67 = vector.load %arg0[%c0_26, %c0_27] : memref<9x512xf32, #tpu.memory_space<vmem>>, vector<1x512xf32>
    %68 = vector.broadcast %67 : vector<1x512xf32> to vector<32x512xf32>
    %69 = arith.mulf %66, %68 : vector<32x512xf32>
    %c16_i32_28 = arith.constant 16 : i32
    %70 = tpu.dynamic_rotate %64 by %c16_i32_28 dim 1 : vector<32x512xf32>, i32 -> vector<32x512xf32>
    %c1_29 = arith.constant 1 : index
    %c0_30 = arith.constant 0 : index
    %71 = vector.load %arg0[%c1_29, %c0_30] : memref<9x512xf32, #tpu.memory_space<vmem>>, vector<1x512xf32>
    %72 = vector.broadcast %71 : vector<1x512xf32> to vector<32x512xf32>
    %73 = arith.mulf %70, %72 : vector<32x512xf32>
    %c15_i32_31 = arith.constant 15 : i32
    %74 = tpu.dynamic_rotate %64 by %c15_i32_31 dim 1 : vector<32x512xf32>, i32 -> vector<32x512xf32>
    %c2_32 = arith.constant 2 : index
    %c0_33 = arith.constant 0 : index
    %75 = vector.load %arg0[%c2_32, %c0_33] : memref<9x512xf32, #tpu.memory_space<vmem>>, vector<1x512xf32>
    %76 = vector.broadcast %75 : vector<1x512xf32> to vector<32x512xf32>
    %77 = arith.mulf %74, %76 : vector<32x512xf32>
    %c1_i32_34 = arith.constant 1 : i32
    %78 = tpu.dynamic_rotate %64 by %c1_i32_34 dim 1 : vector<32x512xf32>, i32 -> vector<32x512xf32>
    %c3_35 = arith.constant 3 : index
    %c0_36 = arith.constant 0 : index
    %79 = vector.load %arg0[%c3_35, %c0_36] : memref<9x512xf32, #tpu.memory_space<vmem>>, vector<1x512xf32>
    %80 = vector.broadcast %79 : vector<1x512xf32> to vector<32x512xf32>
    %81 = arith.mulf %78, %80 : vector<32x512xf32>
    %c511_i32_37 = arith.constant 511 : i32
    %82 = tpu.dynamic_rotate %64 by %c511_i32_37 dim 1 : vector<32x512xf32>, i32 -> vector<32x512xf32>
    %c5_38 = arith.constant 5 : index
    %c0_39 = arith.constant 0 : index
    %83 = vector.load %arg0[%c5_38, %c0_39] : memref<9x512xf32, #tpu.memory_space<vmem>>, vector<1x512xf32>
    %84 = vector.broadcast %83 : vector<1x512xf32> to vector<32x512xf32>
    %85 = arith.mulf %82, %84 : vector<32x512xf32>
    %c497_i32_40 = arith.constant 497 : i32
    %86 = tpu.dynamic_rotate %64 by %c497_i32_40 dim 1 : vector<32x512xf32>, i32 -> vector<32x512xf32>
    %c6_41 = arith.constant 6 : index
    %c0_42 = arith.constant 0 : index
    %87 = vector.load %arg0[%c6_41, %c0_42] : memref<9x512xf32, #tpu.memory_space<vmem>>, vector<1x512xf32>
    %88 = vector.broadcast %87 : vector<1x512xf32> to vector<32x512xf32>
    %89 = arith.mulf %86, %88 : vector<32x512xf32>
    %c496_i32_43 = arith.constant 496 : i32
    %90 = tpu.dynamic_rotate %64 by %c496_i32_43 dim 1 : vector<32x512xf32>, i32 -> vector<32x512xf32>
    %c7_44 = arith.constant 7 : index
    %c0_45 = arith.constant 0 : index
    %91 = vector.load %arg0[%c7_44, %c0_45] : memref<9x512xf32, #tpu.memory_space<vmem>>, vector<1x512xf32>
    %92 = vector.broadcast %91 : vector<1x512xf32> to vector<32x512xf32>
    %93 = arith.mulf %90, %92 : vector<32x512xf32>
    %c495_i32_46 = arith.constant 495 : i32
    %94 = tpu.dynamic_rotate %64 by %c495_i32_46 dim 1 : vector<32x512xf32>, i32 -> vector<32x512xf32>
    %c8_47 = arith.constant 8 : index
    %c0_48 = arith.constant 0 : index
    %95 = vector.load %arg0[%c8_47, %c0_48] : memref<9x512xf32, #tpu.memory_space<vmem>>, vector<1x512xf32>
    %96 = vector.broadcast %95 : vector<1x512xf32> to vector<32x512xf32>
    %97 = arith.mulf %94, %96 : vector<32x512xf32>
    %98 = tpu.concatenate %69, %73, %77, %81, %64, %85, %89, %93, %97 in 0 : vector<32x512xf32>, vector<32x512xf32>, vector<32x512xf32>, vector<32x512xf32>, vector<32x512xf32>, vector<32x512xf32>, vector<32x512xf32>, vector<32x512xf32>, vector<32x512xf32> -> vector<288x512xf32>
    %99 = arith.truncf %98 : vector<288x512xf32> to vector<288x512xbf16>
    %cst_49 = arith.constant dense<0.000000e+00> : vector<32x512xf32>
    %100 = tpu.matmul %65, %99, %cst_49 {dimension_numbers = #tpu.dot_dimension_numbers<[1], [0], [0], [1], [0, 0, 1, 1], [], []>} : vector<32x288xbf16>, vector<288x512xbf16>, vector<32x512xf32> -> vector<32x512xf32>
    %cst_50 = arith.constant dense<0.000000e+00> : vector<32xf32>
    %101 = vector.multi_reduction <add>, %100, %cst_50 [1] : vector<32x512xf32> to vector<32xf32>
    %102 = vector.shape_cast %101 : vector<32xf32> to vector<32x1xf32>
    %cst_51 = arith.constant 5.120000e+02 : f32
    %103 = vector.broadcast %cst_51 : f32 to vector<32x1xf32>
    %104 = arith.divf %102, %103 : vector<32x1xf32>
    %105 = vector.broadcast %104 : vector<32x1xf32> to vector<32x512xf32>
    %106 = arith.subf %100, %105 : vector<32x512xf32>
    %107 = arith.mulf %106, %106 : vector<32x512xf32>
    %cst_52 = arith.constant dense<0.000000e+00> : vector<32xf32>
    %108 = vector.multi_reduction <add>, %107, %cst_52 [1] : vector<32x512xf32> to vector<32xf32>
    %109 = vector.shape_cast %108 : vector<32xf32> to vector<32x1xf32>
    %cst_53 = arith.constant 5.120000e+02 : f32
    %110 = vector.broadcast %cst_53 : f32 to vector<32x1xf32>
    %111 = arith.divf %109, %110 : vector<32x1xf32>
    %cst_54 = arith.constant 9.99999974E-6 : f32
    %112 = vector.broadcast %cst_54 : f32 to vector<32x1xf32>
    %113 = arith.addf %111, %112 : vector<32x1xf32>
    %114 = math.rsqrt %113 : vector<32x1xf32>
    %c0_55 = arith.constant 0 : index
    %c1_56 = arith.constant 1 : index
    %115 = vector.load %arg8[%c0_55, %c1_56] : memref<32x4xf32, #tpu.memory_space<vmem>>, vector<32x1xf32>
    %116 = arith.mulf %115, %114 : vector<32x1xf32>
    %c0_57 = arith.constant 0 : index
    %c1_58 = arith.constant 1 : index
    %117 = vector.load %arg9[%c0_57, %c1_58] : memref<32x4xf32, #tpu.memory_space<vmem>>, vector<32x1xf32>
    %118 = arith.mulf %116, %104 : vector<32x1xf32>
    %119 = arith.subf %117, %118 : vector<32x1xf32>
    %120 = vector.broadcast %116 : vector<32x1xf32> to vector<32x512xf32>
    %121 = arith.mulf %100, %120 : vector<32x512xf32>
    %122 = vector.broadcast %119 : vector<32x1xf32> to vector<32x512xf32>
    %123 = arith.addf %121, %122 : vector<32x512xf32>
    %cst_59 = arith.constant 0.000000e+00 : f32
    %124 = vector.broadcast %cst_59 : f32 to vector<32x512xf32>
    %125 = arith.cmpf oge, %123, %124 : vector<32x512xf32>
    %cst_60 = arith.constant 2.000000e-01 : f32
    %126 = vector.broadcast %cst_60 : f32 to vector<32x512xf32>
    %127 = arith.mulf %126, %123 : vector<32x512xf32>
    %128 = arith.select %125, %123, %127 : vector<32x512xi1>, vector<32x512xf32>
    %c0_61 = arith.constant 0 : index
    %c0_62 = arith.constant 0 : index
    %129 = vector.load %arg4[%c0_61, %c0_62] : memref<32x288xbf16, #tpu.memory_space<vmem>>, vector<32x288xbf16>
    %c17_i32_63 = arith.constant 17 : i32
    %130 = tpu.dynamic_rotate %128 by %c17_i32_63 dim 1 : vector<32x512xf32>, i32 -> vector<32x512xf32>
    %c0_64 = arith.constant 0 : index
    %c0_65 = arith.constant 0 : index
    %131 = vector.load %arg0[%c0_64, %c0_65] : memref<9x512xf32, #tpu.memory_space<vmem>>, vector<1x512xf32>
    %132 = vector.broadcast %131 : vector<1x512xf32> to vector<32x512xf32>
    %133 = arith.mulf %130, %132 : vector<32x512xf32>
    %c16_i32_66 = arith.constant 16 : i32
    %134 = tpu.dynamic_rotate %128 by %c16_i32_66 dim 1 : vector<32x512xf32>, i32 -> vector<32x512xf32>
    %c1_67 = arith.constant 1 : index
    %c0_68 = arith.constant 0 : index
    %135 = vector.load %arg0[%c1_67, %c0_68] : memref<9x512xf32, #tpu.memory_space<vmem>>, vector<1x512xf32>
    %136 = vector.broadcast %135 : vector<1x512xf32> to vector<32x512xf32>
    %137 = arith.mulf %134, %136 : vector<32x512xf32>
    %c15_i32_69 = arith.constant 15 : i32
    %138 = tpu.dynamic_rotate %128 by %c15_i32_69 dim 1 : vector<32x512xf32>, i32 -> vector<32x512xf32>
    %c2_70 = arith.constant 2 : index
    %c0_71 = arith.constant 0 : index
    %139 = vector.load %arg0[%c2_70, %c0_71] : memref<9x512xf32, #tpu.memory_space<vmem>>, vector<1x512xf32>
    %140 = vector.broadcast %139 : vector<1x512xf32> to vector<32x512xf32>
    %141 = arith.mulf %138, %140 : vector<32x512xf32>
    %c1_i32_72 = arith.constant 1 : i32
    %142 = tpu.dynamic_rotate %128 by %c1_i32_72 dim 1 : vector<32x512xf32>, i32 -> vector<32x512xf32>
    %c3_73 = arith.constant 3 : index
    %c0_74 = arith.constant 0 : index
    %143 = vector.load %arg0[%c3_73, %c0_74] : memref<9x512xf32, #tpu.memory_space<vmem>>, vector<1x512xf32>
    %144 = vector.broadcast %143 : vector<1x512xf32> to vector<32x512xf32>
    %145 = arith.mulf %142, %144 : vector<32x512xf32>
    %c511_i32_75 = arith.constant 511 : i32
    %146 = tpu.dynamic_rotate %128 by %c511_i32_75 dim 1 : vector<32x512xf32>, i32 -> vector<32x512xf32>
    %c5_76 = arith.constant 5 : index
    %c0_77 = arith.constant 0 : index
    %147 = vector.load %arg0[%c5_76, %c0_77] : memref<9x512xf32, #tpu.memory_space<vmem>>, vector<1x512xf32>
    %148 = vector.broadcast %147 : vector<1x512xf32> to vector<32x512xf32>
    %149 = arith.mulf %146, %148 : vector<32x512xf32>
    %c497_i32_78 = arith.constant 497 : i32
    %150 = tpu.dynamic_rotate %128 by %c497_i32_78 dim 1 : vector<32x512xf32>, i32 -> vector<32x512xf32>
    %c6_79 = arith.constant 6 : index
    %c0_80 = arith.constant 0 : index
    %151 = vector.load %arg0[%c6_79, %c0_80] : memref<9x512xf32, #tpu.memory_space<vmem>>, vector<1x512xf32>
    %152 = vector.broadcast %151 : vector<1x512xf32> to vector<32x512xf32>
    %153 = arith.mulf %150, %152 : vector<32x512xf32>
    %c496_i32_81 = arith.constant 496 : i32
    %154 = tpu.dynamic_rotate %128 by %c496_i32_81 dim 1 : vector<32x512xf32>, i32 -> vector<32x512xf32>
    %c7_82 = arith.constant 7 : index
    %c0_83 = arith.constant 0 : index
    %155 = vector.load %arg0[%c7_82, %c0_83] : memref<9x512xf32, #tpu.memory_space<vmem>>, vector<1x512xf32>
    %156 = vector.broadcast %155 : vector<1x512xf32> to vector<32x512xf32>
    %157 = arith.mulf %154, %156 : vector<32x512xf32>
    %c495_i32_84 = arith.constant 495 : i32
    %158 = tpu.dynamic_rotate %128 by %c495_i32_84 dim 1 : vector<32x512xf32>, i32 -> vector<32x512xf32>
    %c8_85 = arith.constant 8 : index
    %c0_86 = arith.constant 0 : index
    %159 = vector.load %arg0[%c8_85, %c0_86] : memref<9x512xf32, #tpu.memory_space<vmem>>, vector<1x512xf32>
    %160 = vector.broadcast %159 : vector<1x512xf32> to vector<32x512xf32>
    %161 = arith.mulf %158, %160 : vector<32x512xf32>
    %162 = tpu.concatenate %133, %137, %141, %145, %128, %149, %153, %157, %161 in 0 : vector<32x512xf32>, vector<32x512xf32>, vector<32x512xf32>, vector<32x512xf32>, vector<32x512xf32>, vector<32x512xf32>, vector<32x512xf32>, vector<32x512xf32>, vector<32x512xf32> -> vector<288x512xf32>
    %163 = arith.truncf %162 : vector<288x512xf32> to vector<288x512xbf16>
    %cst_87 = arith.constant dense<0.000000e+00> : vector<32x512xf32>
    %164 = tpu.matmul %129, %163, %cst_87 {dimension_numbers = #tpu.dot_dimension_numbers<[1], [0], [0], [1], [0, 0, 1, 1], [], []>} : vector<32x288xbf16>, vector<288x512xbf16>, vector<32x512xf32> -> vector<32x512xf32>
    %cst_88 = arith.constant dense<0.000000e+00> : vector<32xf32>
    %165 = vector.multi_reduction <add>, %164, %cst_88 [1] : vector<32x512xf32> to vector<32xf32>
    %166 = vector.shape_cast %165 : vector<32xf32> to vector<32x1xf32>
    %cst_89 = arith.constant 5.120000e+02 : f32
    %167 = vector.broadcast %cst_89 : f32 to vector<32x1xf32>
    %168 = arith.divf %166, %167 : vector<32x1xf32>
    %169 = vector.broadcast %168 : vector<32x1xf32> to vector<32x512xf32>
    %170 = arith.subf %164, %169 : vector<32x512xf32>
    %171 = arith.mulf %170, %170 : vector<32x512xf32>
    %cst_90 = arith.constant dense<0.000000e+00> : vector<32xf32>
    %172 = vector.multi_reduction <add>, %171, %cst_90 [1] : vector<32x512xf32> to vector<32xf32>
    %173 = vector.shape_cast %172 : vector<32xf32> to vector<32x1xf32>
    %cst_91 = arith.constant 5.120000e+02 : f32
    %174 = vector.broadcast %cst_91 : f32 to vector<32x1xf32>
    %175 = arith.divf %173, %174 : vector<32x1xf32>
    %cst_92 = arith.constant 9.99999974E-6 : f32
    %176 = vector.broadcast %cst_92 : f32 to vector<32x1xf32>
    %177 = arith.addf %175, %176 : vector<32x1xf32>
    %178 = math.rsqrt %177 : vector<32x1xf32>
    %c0_93 = arith.constant 0 : index
    %c2_94 = arith.constant 2 : index
    %179 = vector.load %arg8[%c0_93, %c2_94] : memref<32x4xf32, #tpu.memory_space<vmem>>, vector<32x1xf32>
    %180 = arith.mulf %179, %178 : vector<32x1xf32>
    %c0_95 = arith.constant 0 : index
    %c2_96 = arith.constant 2 : index
    %181 = vector.load %arg9[%c0_95, %c2_96] : memref<32x4xf32, #tpu.memory_space<vmem>>, vector<32x1xf32>
    %182 = arith.mulf %180, %168 : vector<32x1xf32>
    %183 = arith.subf %181, %182 : vector<32x1xf32>
    %184 = vector.broadcast %180 : vector<32x1xf32> to vector<32x512xf32>
    %185 = arith.mulf %164, %184 : vector<32x512xf32>
    %186 = vector.broadcast %183 : vector<32x1xf32> to vector<32x512xf32>
    %187 = arith.addf %185, %186 : vector<32x512xf32>
    %cst_97 = arith.constant 0.000000e+00 : f32
    %188 = vector.broadcast %cst_97 : f32 to vector<32x512xf32>
    %189 = arith.cmpf oge, %187, %188 : vector<32x512xf32>
    %cst_98 = arith.constant 2.000000e-01 : f32
    %190 = vector.broadcast %cst_98 : f32 to vector<32x512xf32>
    %191 = arith.mulf %190, %187 : vector<32x512xf32>
    %192 = arith.select %189, %187, %191 : vector<32x512xi1>, vector<32x512xf32>
    %c0_99 = arith.constant 0 : index
    %c0_100 = arith.constant 0 : index
    %193 = vector.load %arg5[%c0_99, %c0_100] : memref<32x288xbf16, #tpu.memory_space<vmem>>, vector<32x288xbf16>
    %c17_i32_101 = arith.constant 17 : i32
    %194 = tpu.dynamic_rotate %192 by %c17_i32_101 dim 1 : vector<32x512xf32>, i32 -> vector<32x512xf32>
    %c0_102 = arith.constant 0 : index
    %c0_103 = arith.constant 0 : index
    %195 = vector.load %arg0[%c0_102, %c0_103] : memref<9x512xf32, #tpu.memory_space<vmem>>, vector<1x512xf32>
    %196 = vector.broadcast %195 : vector<1x512xf32> to vector<32x512xf32>
    %197 = arith.mulf %194, %196 : vector<32x512xf32>
    %c16_i32_104 = arith.constant 16 : i32
    %198 = tpu.dynamic_rotate %192 by %c16_i32_104 dim 1 : vector<32x512xf32>, i32 -> vector<32x512xf32>
    %c1_105 = arith.constant 1 : index
    %c0_106 = arith.constant 0 : index
    %199 = vector.load %arg0[%c1_105, %c0_106] : memref<9x512xf32, #tpu.memory_space<vmem>>, vector<1x512xf32>
    %200 = vector.broadcast %199 : vector<1x512xf32> to vector<32x512xf32>
    %201 = arith.mulf %198, %200 : vector<32x512xf32>
    %c15_i32_107 = arith.constant 15 : i32
    %202 = tpu.dynamic_rotate %192 by %c15_i32_107 dim 1 : vector<32x512xf32>, i32 -> vector<32x512xf32>
    %c2_108 = arith.constant 2 : index
    %c0_109 = arith.constant 0 : index
    %203 = vector.load %arg0[%c2_108, %c0_109] : memref<9x512xf32, #tpu.memory_space<vmem>>, vector<1x512xf32>
    %204 = vector.broadcast %203 : vector<1x512xf32> to vector<32x512xf32>
    %205 = arith.mulf %202, %204 : vector<32x512xf32>
    %c1_i32_110 = arith.constant 1 : i32
    %206 = tpu.dynamic_rotate %192 by %c1_i32_110 dim 1 : vector<32x512xf32>, i32 -> vector<32x512xf32>
    %c3_111 = arith.constant 3 : index
    %c0_112 = arith.constant 0 : index
    %207 = vector.load %arg0[%c3_111, %c0_112] : memref<9x512xf32, #tpu.memory_space<vmem>>, vector<1x512xf32>
    %208 = vector.broadcast %207 : vector<1x512xf32> to vector<32x512xf32>
    %209 = arith.mulf %206, %208 : vector<32x512xf32>
    %c511_i32_113 = arith.constant 511 : i32
    %210 = tpu.dynamic_rotate %192 by %c511_i32_113 dim 1 : vector<32x512xf32>, i32 -> vector<32x512xf32>
    %c5_114 = arith.constant 5 : index
    %c0_115 = arith.constant 0 : index
    %211 = vector.load %arg0[%c5_114, %c0_115] : memref<9x512xf32, #tpu.memory_space<vmem>>, vector<1x512xf32>
    %212 = vector.broadcast %211 : vector<1x512xf32> to vector<32x512xf32>
    %213 = arith.mulf %210, %212 : vector<32x512xf32>
    %c497_i32_116 = arith.constant 497 : i32
    %214 = tpu.dynamic_rotate %192 by %c497_i32_116 dim 1 : vector<32x512xf32>, i32 -> vector<32x512xf32>
    %c6_117 = arith.constant 6 : index
    %c0_118 = arith.constant 0 : index
    %215 = vector.load %arg0[%c6_117, %c0_118] : memref<9x512xf32, #tpu.memory_space<vmem>>, vector<1x512xf32>
    %216 = vector.broadcast %215 : vector<1x512xf32> to vector<32x512xf32>
    %217 = arith.mulf %214, %216 : vector<32x512xf32>
    %c496_i32_119 = arith.constant 496 : i32
    %218 = tpu.dynamic_rotate %192 by %c496_i32_119 dim 1 : vector<32x512xf32>, i32 -> vector<32x512xf32>
    %c7_120 = arith.constant 7 : index
    %c0_121 = arith.constant 0 : index
    %219 = vector.load %arg0[%c7_120, %c0_121] : memref<9x512xf32, #tpu.memory_space<vmem>>, vector<1x512xf32>
    %220 = vector.broadcast %219 : vector<1x512xf32> to vector<32x512xf32>
    %221 = arith.mulf %218, %220 : vector<32x512xf32>
    %c495_i32_122 = arith.constant 495 : i32
    %222 = tpu.dynamic_rotate %192 by %c495_i32_122 dim 1 : vector<32x512xf32>, i32 -> vector<32x512xf32>
    %c8_123 = arith.constant 8 : index
    %c0_124 = arith.constant 0 : index
    %223 = vector.load %arg0[%c8_123, %c0_124] : memref<9x512xf32, #tpu.memory_space<vmem>>, vector<1x512xf32>
    %224 = vector.broadcast %223 : vector<1x512xf32> to vector<32x512xf32>
    %225 = arith.mulf %222, %224 : vector<32x512xf32>
    %226 = tpu.concatenate %197, %201, %205, %209, %192, %213, %217, %221, %225 in 0 : vector<32x512xf32>, vector<32x512xf32>, vector<32x512xf32>, vector<32x512xf32>, vector<32x512xf32>, vector<32x512xf32>, vector<32x512xf32>, vector<32x512xf32>, vector<32x512xf32> -> vector<288x512xf32>
    %227 = arith.truncf %226 : vector<288x512xf32> to vector<288x512xbf16>
    %cst_125 = arith.constant dense<0.000000e+00> : vector<32x512xf32>
    %228 = tpu.matmul %193, %227, %cst_125 {dimension_numbers = #tpu.dot_dimension_numbers<[1], [0], [0], [1], [0, 0, 1, 1], [], []>} : vector<32x288xbf16>, vector<288x512xbf16>, vector<32x512xf32> -> vector<32x512xf32>
    %cst_126 = arith.constant dense<0.000000e+00> : vector<32xf32>
    %229 = vector.multi_reduction <add>, %228, %cst_126 [1] : vector<32x512xf32> to vector<32xf32>
    %230 = vector.shape_cast %229 : vector<32xf32> to vector<32x1xf32>
    %cst_127 = arith.constant 5.120000e+02 : f32
    %231 = vector.broadcast %cst_127 : f32 to vector<32x1xf32>
    %232 = arith.divf %230, %231 : vector<32x1xf32>
    %233 = vector.broadcast %232 : vector<32x1xf32> to vector<32x512xf32>
    %234 = arith.subf %228, %233 : vector<32x512xf32>
    %235 = arith.mulf %234, %234 : vector<32x512xf32>
    %cst_128 = arith.constant dense<0.000000e+00> : vector<32xf32>
    %236 = vector.multi_reduction <add>, %235, %cst_128 [1] : vector<32x512xf32> to vector<32xf32>
    %237 = vector.shape_cast %236 : vector<32xf32> to vector<32x1xf32>
    %cst_129 = arith.constant 5.120000e+02 : f32
    %238 = vector.broadcast %cst_129 : f32 to vector<32x1xf32>
    %239 = arith.divf %237, %238 : vector<32x1xf32>
    %cst_130 = arith.constant 9.99999974E-6 : f32
    %240 = vector.broadcast %cst_130 : f32 to vector<32x1xf32>
    %241 = arith.addf %239, %240 : vector<32x1xf32>
    %242 = math.rsqrt %241 : vector<32x1xf32>
    %c0_131 = arith.constant 0 : index
    %c3_132 = arith.constant 3 : index
    %243 = vector.load %arg8[%c0_131, %c3_132] : memref<32x4xf32, #tpu.memory_space<vmem>>, vector<32x1xf32>
    %244 = arith.mulf %243, %242 : vector<32x1xf32>
    %c0_133 = arith.constant 0 : index
    %c3_134 = arith.constant 3 : index
    %245 = vector.load %arg9[%c0_133, %c3_134] : memref<32x4xf32, #tpu.memory_space<vmem>>, vector<32x1xf32>
    %246 = arith.mulf %244, %232 : vector<32x1xf32>
    %247 = arith.subf %245, %246 : vector<32x1xf32>
    %248 = vector.broadcast %244 : vector<32x1xf32> to vector<32x512xf32>
    %249 = arith.mulf %228, %248 : vector<32x512xf32>
    %250 = vector.broadcast %247 : vector<32x1xf32> to vector<32x512xf32>
    %251 = arith.addf %249, %250 : vector<32x512xf32>
    %cst_135 = arith.constant 0.000000e+00 : f32
    %252 = vector.broadcast %cst_135 : f32 to vector<32x512xf32>
    %253 = arith.cmpf oge, %251, %252 : vector<32x512xf32>
    %cst_136 = arith.constant 2.000000e-01 : f32
    %254 = vector.broadcast %cst_136 : f32 to vector<32x512xf32>
    %255 = arith.mulf %254, %251 : vector<32x512xf32>
    %256 = arith.select %253, %251, %255 : vector<32x512xi1>, vector<32x512xf32>
    %c0_137 = arith.constant 0 : index
    %c0_138 = arith.constant 0 : index
    %257 = vector.load %arg6[%c0_137, %c0_138] : memref<3x288xbf16, #tpu.memory_space<vmem>>, vector<3x288xbf16>
    %c17_i32_139 = arith.constant 17 : i32
    %258 = tpu.dynamic_rotate %256 by %c17_i32_139 dim 1 : vector<32x512xf32>, i32 -> vector<32x512xf32>
    %c0_140 = arith.constant 0 : index
    %c0_141 = arith.constant 0 : index
    %259 = vector.load %arg0[%c0_140, %c0_141] : memref<9x512xf32, #tpu.memory_space<vmem>>, vector<1x512xf32>
    %260 = vector.broadcast %259 : vector<1x512xf32> to vector<32x512xf32>
    %261 = arith.mulf %258, %260 : vector<32x512xf32>
    %c16_i32_142 = arith.constant 16 : i32
    %262 = tpu.dynamic_rotate %256 by %c16_i32_142 dim 1 : vector<32x512xf32>, i32 -> vector<32x512xf32>
    %c1_143 = arith.constant 1 : index
    %c0_144 = arith.constant 0 : index
    %263 = vector.load %arg0[%c1_143, %c0_144] : memref<9x512xf32, #tpu.memory_space<vmem>>, vector<1x512xf32>
    %264 = vector.broadcast %263 : vector<1x512xf32> to vector<32x512xf32>
    %265 = arith.mulf %262, %264 : vector<32x512xf32>
    %c15_i32_145 = arith.constant 15 : i32
    %266 = tpu.dynamic_rotate %256 by %c15_i32_145 dim 1 : vector<32x512xf32>, i32 -> vector<32x512xf32>
    %c2_146 = arith.constant 2 : index
    %c0_147 = arith.constant 0 : index
    %267 = vector.load %arg0[%c2_146, %c0_147] : memref<9x512xf32, #tpu.memory_space<vmem>>, vector<1x512xf32>
    %268 = vector.broadcast %267 : vector<1x512xf32> to vector<32x512xf32>
    %269 = arith.mulf %266, %268 : vector<32x512xf32>
    %c1_i32_148 = arith.constant 1 : i32
    %270 = tpu.dynamic_rotate %256 by %c1_i32_148 dim 1 : vector<32x512xf32>, i32 -> vector<32x512xf32>
    %c3_149 = arith.constant 3 : index
    %c0_150 = arith.constant 0 : index
    %271 = vector.load %arg0[%c3_149, %c0_150] : memref<9x512xf32, #tpu.memory_space<vmem>>, vector<1x512xf32>
    %272 = vector.broadcast %271 : vector<1x512xf32> to vector<32x512xf32>
    %273 = arith.mulf %270, %272 : vector<32x512xf32>
    %c511_i32_151 = arith.constant 511 : i32
    %274 = tpu.dynamic_rotate %256 by %c511_i32_151 dim 1 : vector<32x512xf32>, i32 -> vector<32x512xf32>
    %c5_152 = arith.constant 5 : index
    %c0_153 = arith.constant 0 : index
    %275 = vector.load %arg0[%c5_152, %c0_153] : memref<9x512xf32, #tpu.memory_space<vmem>>, vector<1x512xf32>
    %276 = vector.broadcast %275 : vector<1x512xf32> to vector<32x512xf32>
    %277 = arith.mulf %274, %276 : vector<32x512xf32>
    %c497_i32_154 = arith.constant 497 : i32
    %278 = tpu.dynamic_rotate %256 by %c497_i32_154 dim 1 : vector<32x512xf32>, i32 -> vector<32x512xf32>
    %c6_155 = arith.constant 6 : index
    %c0_156 = arith.constant 0 : index
    %279 = vector.load %arg0[%c6_155, %c0_156] : memref<9x512xf32, #tpu.memory_space<vmem>>, vector<1x512xf32>
    %280 = vector.broadcast %279 : vector<1x512xf32> to vector<32x512xf32>
    %281 = arith.mulf %278, %280 : vector<32x512xf32>
    %c496_i32_157 = arith.constant 496 : i32
    %282 = tpu.dynamic_rotate %256 by %c496_i32_157 dim 1 : vector<32x512xf32>, i32 -> vector<32x512xf32>
    %c7_158 = arith.constant 7 : index
    %c0_159 = arith.constant 0 : index
    %283 = vector.load %arg0[%c7_158, %c0_159] : memref<9x512xf32, #tpu.memory_space<vmem>>, vector<1x512xf32>
    %284 = vector.broadcast %283 : vector<1x512xf32> to vector<32x512xf32>
    %285 = arith.mulf %282, %284 : vector<32x512xf32>
    %c495_i32_160 = arith.constant 495 : i32
    %286 = tpu.dynamic_rotate %256 by %c495_i32_160 dim 1 : vector<32x512xf32>, i32 -> vector<32x512xf32>
    %c8_161 = arith.constant 8 : index
    %c0_162 = arith.constant 0 : index
    %287 = vector.load %arg0[%c8_161, %c0_162] : memref<9x512xf32, #tpu.memory_space<vmem>>, vector<1x512xf32>
    %288 = vector.broadcast %287 : vector<1x512xf32> to vector<32x512xf32>
    %289 = arith.mulf %286, %288 : vector<32x512xf32>
    %290 = tpu.concatenate %261, %265, %269, %273, %256, %277, %281, %285, %289 in 0 : vector<32x512xf32>, vector<32x512xf32>, vector<32x512xf32>, vector<32x512xf32>, vector<32x512xf32>, vector<32x512xf32>, vector<32x512xf32>, vector<32x512xf32>, vector<32x512xf32> -> vector<288x512xf32>
    %291 = arith.truncf %290 : vector<288x512xf32> to vector<288x512xbf16>
    %cst_163 = arith.constant dense<0.000000e+00> : vector<3x512xf32>
    %292 = tpu.matmul %257, %291, %cst_163 {dimension_numbers = #tpu.dot_dimension_numbers<[1], [0], [0], [1], [0, 0, 1, 1], [], []>} : vector<3x288xbf16>, vector<288x512xbf16>, vector<3x512xf32> -> vector<3x512xf32>
    %c0_164 = arith.constant 0 : index
    %c0_165 = arith.constant 0 : index
    %293 = vector.load %arg7[%c0_164, %c0_165] : memref<3x1xf32, #tpu.memory_space<vmem>>, vector<3x1xf32>
    %294 = vector.broadcast %293 : vector<3x1xf32> to vector<3x512xf32>
    %295 = arith.addf %292, %294 : vector<3x512xf32>
    %296 = math.tanh %295 : vector<3x512xf32>
    %c0_166 = arith.constant 0 : index
    %c0_167 = arith.constant 0 : index
    %297 = vector.load %arg10[%c0_166, %c0_167] : memref<3x512xf32, #tpu.memory_space<vmem>>, vector<3x512xf32>
    tpu.vector_store %arg10[%c0_166, %c0_167], %296 {strides = array<i32>} : memref<3x512xf32, #tpu.memory_space<vmem>>, vector<3x512xf32>,
    return
  }
}

</mosaic_0001>

<bundles_post_ra>
// kernel: _forward_scale0.1
= control target key start
LH: loop header
LB: loop body
LE: loop exit
PB: predicated region body
PF: predicated region fallthrough
CT: control target
= control target key end

     0   :  { %s4946_s15 = smov 16   ;;  %s4947_s16 = smov 17   ;;  %v9729_v4 = vmov 0   ;;  %v52_v5 = vlaneseq  ;;  %vm402_vm8 = vcmask 1043456   ;;  %vm395_vm9 = vcmask 588800   ;;  %s9718_s1 = inlined_call_operand.vmem [shape: f32[8,512], index: 1, kind: input, shape index: {}]   ;;  %s9719_s2 = inlined_call_operand.vmem [shape: bf16[32,72], index: 2, kind: input, shape index: {}]   ;;  %s9720_s0 = inlined_call_operand.vmem [shape: f32[9,512], index: 0, kind: input, shape index: {}]   ;;  %s9721_s8 = inlined_call_operand.vmem [shape: f32[32,4], index: 8, kind: input, shape index: {}]   ;;  %s9722_s9 = inlined_call_operand.vmem [shape: f32[32,4], index: 9, kind: input, shape index: {}]   ;;  %s9723_s3 = inlined_call_operand.vmem [shape: bf16[32,288], index: 3, kind: input, shape index: {}]   ;;  %s9724_s4 = inlined_call_operand.vmem [shape: bf16[32,288], index: 4, kind: input, shape index: {}]   ;;  %s9725_s5 = inlined_call_operand.vmem [shape: bf16[32,288], index: 5, kind: input, shape index: {}]   ;;  %s9726_s6 = inlined_call_operand.vmem [shape: bf16[3,288], index: 6, kind: input, shape index: {}]   ;;  %s9727_s7 = inlined_call_operand.vmem [shape: f32[3,1], index: 7, kind: input, shape index: {}]   ;;  %s9728_s10 = inlined_call_operand.vmem [shape: f32[3,512], index: 10, kind: output, shape index: {}]  }
   0x1   :  { %v5017_v0 = vld [vmem:[%s9718_s1] sm:$0xff]  ;;  %v5026_v1 = vld [vmem:[%s9718_s1 + $0x8] sm:$0xff]  ;;  %v5035_v2 = vld [vmem:[%s9718_s1 + $0x18] sm:$0xff]  ;;  %s4948_s23 = smov 15   ;;  %s4949_s24 = smov 1   ;;  %447 = vmatprep.mubr.bf16.mxu0 %v9729_v4  ;;  %500 = vmatprep.mubr.bf16.mxu1 %v9729_v4 }
   0x2   :  { %85 = vrot.lane.b32.xlu1 %v5017_v0, %s4946_s15  ;;  %44 = vrot.lane.b32.xlu0 %v5017_v0, %s4947_s16  ;;  %v5044_v3 = vld [vmem:[%s9718_s1 + $0x10] sm:$0xff]  ;;  %s4950_s1 = smov 127   ;;  %s4951_s25 = smov 113   ;;  %v5102_v6 = vshrl.u32 %v52_v5, 7  ;;  %v5104_v7 = vand.u32 127, %v52_v5 }
   0x3   :  { %s4952_s26 = smov 112   ;;  %4846 = vset.pattern.permute.xlu1 %v9729_v4  ;;  %4847 = vset.pattern.permute.xlu0 %v9729_v4  ;;  %s4954_s27 = smov 111   ;;  %v59_v9 = vld [vmem:[%s9720_s0] ss:$8 sm:$0xf] }
   0x4   :  { %10010 = vst [vmem:[#allocation2_spill] sm:$0xff] %v5102_v6  ;;  %v5107_v8 = vsub.s32 1, %v5102_v6  ;;  %v4726_v10 = vld [vmem:[%s9720_s0 + $0x1] ss:$8 sm:$0xf]  ;;  %vm93_vm0 = vcmp.lt.s32.totalorder %v5104_v7, 16 }
   0x5   :  { %vm54_vm1 = vcmp.lt.s32.totalorder %v5104_v7, 17  ;;  %v5124_v15 = vsub.s32 0, %v5102_v6  ;;  %v5131_v20 = vsub.s32 3, %v5102_v6  ;;  %v5134_v21 = vsub.s32 2, %v5102_v6 }
   0x6   :  { %87 = vrot.lane.b32.xlu1 %v5026_v1, %s4946_s15  ;;  %46 = vrot.lane.b32.xlu0 %v5026_v1, %s4947_s16  ;;  %v5118_v13 = vrot.slane %v59_v9, %v5107_v8  ;;  %v5121_v14 = vrot.slane %v4726_v10, %v5107_v8  ;;  %v4727_v48 = vld [vmem:[%s9720_s0 + $0x2] ss:$8 sm:$0xf]  ;;  %v4728_v49 = vld [vmem:[%s9720_s0 + $0x3] ss:$8 sm:$0xf] }
   0x7   :  { %v5139_v24 = vrot.slane %v59_v9, %v5124_v15  ;;  %v5142_v25 = vrot.slane %v4726_v10, %v5124_v15  ;;  %v5149_v31 = vrot.slane %v59_v9, %v5131_v20  ;;  %v5152_v32 = vrot.slane %v4726_v10, %v5131_v20 }
   0x8   :  { %10011 = vst [vmem:[#allocation3_spill] sm:$0xff] %v5118_v13  ;;  %v5157_v35 = vrot.slane %v59_v9, %v5134_v21  ;;  %v5160_v36 = vrot.slane %v4726_v10, %v5134_v21  ;;  %vm133_vm2 = vcmp.lt.s32.totalorder %v5104_v7, 15  ;;  %vm173_vm3 = vcmp.lt.s32.totalorder %v5104_v7, 1 }
   0x9   :  { %10012 = vst [vmem:[#allocation4_spill] sm:$0xff] %v5139_v24  ;;  %10013 = vst [vmem:[#allocation5_spill] sm:$0xff] %v5142_v25  ;;  %v5183_v54 = vrot.slane %v4727_v48, %v5107_v8  ;;  %v5186_v55 = vrot.slane %v4728_v49, %v5107_v8  ;;  %v5195_v62 = vrot.slane %v4728_v49, %v5124_v15  ;;  %vm213_vm4 = vcmp.lt.s32.totalorder %v5104_v7, 127 }
   0xa   :  { %91 = vrot.lane.b32.xlu1 %v5035_v2, %s4946_s15  ;;  %50 = vrot.lane.b32.xlu0 %v5035_v2, %s4947_s16  ;;  %10014 = vst [vmem:[#allocation6_spill] sm:$0xff] %v5152_v32  ;;  %10015 = vst [vmem:[#allocation7_spill] sm:$0xff] %v5160_v36  ;;  %v5198_v63 = vrot.slane %v4727_v48, %v5124_v15  ;;  %vm253_vm5 = vcmp.lt.s32.totalorder %v5104_v7, 113  ;;  %vm293_vm6 = vcmp.lt.s32.totalorder %v5104_v7, 112  ;;  %vm333_vm7 = vcmp.lt.s32.totalorder %v5104_v7, 111 }
   0xb   :  { %10016 = vst [vmem:[#allocation8_spill] sm:$0xff] %v5183_v54  ;;  %10017 = vst [vmem:[#allocation9_spill] sm:$0xff] %v5186_v55 }
   0xc   :  { %10018 = vst [vmem:[#allocation10_spill] sm:$0xff] %v5195_v62  ;;  %10019 = vst [vmem:[#allocation11_spill] sm:$0xff] %v5198_v63 }
   0xe   :  { %89 = vrot.lane.b32.xlu1 %v5044_v3, %s4946_s15  ;;  %48 = vrot.lane.b32.xlu0 %v5044_v3, %s4947_s16 }
  0x12   :  { %127 = vrot.lane.b32.xlu1 %v5026_v1, %s4948_s23  ;;  %125 = vrot.lane.b32.xlu0 %v5017_v0, %s4948_s23 }
  0x16   :  { %167 = vrot.lane.b32.xlu1 %v5026_v1, %s4949_s24  ;;  %165 = vrot.lane.b32.xlu0 %v5017_v0, %s4949_s24 }
  0x1a   :  { %171 = vrot.lane.b32.xlu1 %v5035_v2, %s4949_s24  ;;  %131 = vrot.lane.b32.xlu0 %v5035_v2, %s4948_s23 }
  0x1e   :  { %169 = vrot.lane.b32.xlu1 %v5044_v3, %s4949_s24  ;;  %129 = vrot.lane.b32.xlu0 %v5044_v3, %s4948_s23 }
  0x22   :  { %209 = vrot.lane.b32.xlu1 %v5044_v3, %s4950_s1  ;;  %207 = vrot.lane.b32.xlu0 %v5026_v1, %s4950_s1 }
  0x26   :  { %211 = vrot.lane.b32.xlu1 %v5035_v2, %s4950_s1  ;;  %205 = vrot.lane.b32.xlu0 %v5017_v0, %s4950_s1 }
  0x2a   :  { %249 = vrot.lane.b32.xlu1 %v5044_v3, %s4951_s25  ;;  %247 = vrot.lane.b32.xlu0 %v5026_v1, %s4951_s25 }
  0x2e   :  { %289 = vrot.lane.b32.xlu1 %v5044_v3, %s4952_s26  ;;  %287 = vrot.lane.b32.xlu0 %v5026_v1, %s4952_s26 }
  0x32   :  { %285 = vrot.lane.b32.xlu1 %v5017_v0, %s4952_s26  ;;  %245 = vrot.lane.b32.xlu0 %v5017_v0, %s4951_s25 }
  0x36   :  { %291 = vrot.lane.b32.xlu1 %v5035_v2, %s4952_s26  ;;  %251 = vrot.lane.b32.xlu0 %v5035_v2, %s4951_s25 }
  0x3a   :  { %327 = vrot.lane.b32.xlu1 %v5026_v1, %s4954_s27  ;;  %325 = vrot.lane.b32.xlu0 %v5017_v0, %s4954_s27 }
  0x3e   :  { %331 = vrot.lane.b32.xlu1 %v5035_v2, %s4954_s27  ;;  %329 = vrot.lane.b32.xlu0 %v5044_v3, %s4954_s27 }
  0x74   :  { %v86_v11 = vpop.permute.xlu1 %85  ;;  %v45_v12 = vpop.permute.xlu0 %44 }
  0x78   :  { %v88_v16 = vpop.permute.xlu1 %87  ;;  %v47_v17 = vpop.permute.xlu0 %46 }
  0x79   :  { %v57_v18 = vsel %vm54_vm1, %v45_v12, %v47_v17  ;;  %v96_v19 = vsel %vm93_vm0, %v86_v11, %v88_v16 }
  0x7a   :  { %v82_v22 = vmul.f32 %v5118_v13, %v57_v18  ;;  %v122_v23 = vmul.f32 %v5121_v14, %v96_v19  ;;  %v4729_v18 = vld [vmem:[%s9720_s0 + $0x5] ss:$8 sm:$0xf] }
  0x7c   :  { %v92_v26 = vpop.permute.xlu1 %91  ;;  %v51_v27 = vpop.permute.xlu0 %50  ;;  %v366_v28 = vpack.c.bf16 %v122_v23, %v82_v22  ;;  %v5216_v23 = vrot.slane %v4727_v48, %v5134_v21 }
  0x7d   :  { %v97_v29 = vsel %vm93_vm0, %v92_v26, %v86_v11  ;;  %v58_v30 = vsel %vm54_vm1, %v51_v27, %v45_v12 }
  0x7e   :  { %415 = vmatprep.subr.bf16.mxu0 %v366_v28  ;;  %v81_v33 = vmul.f32 %v5139_v24, %v58_v30  ;;  %v121_v34 = vmul.f32 %v5142_v25, %v97_v29  ;;  %10022 = vst [vmem:[#allocation14_spill] sm:$0xff] %v5216_v23  ;;  %v5223_v30 = vrot.slane %v4729_v18, %v5107_v8 }
  0x80   :  { %v90_v37 = vpop.permute.xlu1 %89  ;;  %v49_v38 = vpop.permute.xlu0 %48  ;;  %v365_v39 = vpack.c.bf16 %v121_v34, %v81_v33  ;;  %10024 = vst [vmem:[#allocation16_spill] sm:$0xff] %v5223_v30 }
  0x81   :  { %v95_v40 = vsel %vm93_vm0, %v88_v16, %v90_v37  ;;  %v56_v41 = vsel %vm54_vm1, %v47_v17, %v49_v38  ;;  %v55_v42 = vsel %vm54_vm1, %v49_v38, %v51_v27  ;;  %v94_v43 = vsel %vm93_vm0, %v90_v37, %v92_v26 }
  0x82   :  { %416 = vmatpush1.bf16.msra.mxu0 %v365_v39  ;;  %v84_v44 = vmul.f32 %v5149_v31, %v55_v42  ;;  %v124_v45 = vmul.f32 %v5152_v32, %v94_v43  ;;  %v83_v46 = vmul.f32 %v5157_v35, %v56_v41  ;;  %v123_v47 = vmul.f32 %v5160_v36, %v95_v40 }
  0x83   :  { %v5205_v16 = vrot.slane %v4728_v49, %v5134_v21  ;;  %v5208_v17 = vrot.slane %v4728_v49, %v5131_v20  ;;  %v5219_v26 = vrot.slane %v4727_v48, %v5131_v20  ;;  %v5241_v49 = vrot.slane %v4729_v18, %v5134_v21 }
  0x84   :  { %v128_v50 = vpop.permute.xlu1 %127  ;;  %v126_v51 = vpop.permute.xlu0 %125  ;;  %v368_v52 = vpack.c.bf16 %v124_v45, %v84_v44  ;;  %v367_v53 = vpack.c.bf16 %v123_v47, %v83_v46 }
  0x85   :  { %v136_v56 = vsel %vm133_vm2, %v126_v51, %v128_v50  ;;  %10020 = vst [vmem:[#allocation12_spill] sm:$0xff] %v5205_v16  ;;  %10021 = vst [vmem:[#allocation13_spill] sm:$0xff] %v5208_v17 }
  0x86   :  { %468 = vmatprep.subr.bf16.mxu1 %v368_v52  ;;  %v162_v60 = vmul.f32 %v5183_v54, %v136_v56  ;;  %10023 = vst [vmem:[#allocation15_spill] sm:$0xff] %v5219_v26  ;;  %10025 = vst [vmem:[#allocation17_spill] sm:$0xff] %v5241_v49 }
  0x87   :  { %469 = vmatpush1.bf16.msra.mxu1 %v367_v53 }
  0x88   :  { %v168_v57 = vpop.permute.xlu1 %167  ;;  %v166_v58 = vpop.permute.xlu0 %165 }
  0x89   :  { %v176_v59 = vsel %vm173_vm3, %v166_v58, %v168_v57 }
  0x8a   :  { %v202_v61 = vmul.f32 %v5186_v55, %v176_v59 }
  0x8c   :  { %v172_v5 = vpop.permute.xlu1 %171  ;;  %v132_v9 = vpop.permute.xlu0 %131  ;;  %v370_v10 = vpack.c.bf16 %v202_v61, %v162_v60 }
  0x8d   :  { %v177_v11 = vsel %vm173_vm3, %v172_v5, %v166_v58  ;;  %v137_v12 = vsel %vm133_vm2, %v132_v9, %v126_v51  ;;  %v5247_v51 = vrot.slane %v4729_v18, %v5131_v20 }
  0x8e   :  { %v201_v19 = vmul.f32 %v5195_v62, %v177_v11  ;;  %v161_v22 = vmul.f32 %v5198_v63, %v137_v12  ;;  %417 = vmatprep.subr.bf16.mxu0 %v370_v10 }
  0x8f   :  { %10027 = vst [vmem:[#allocation19_spill] sm:$0xff] %v5247_v51 }
  0x90   :  { %v170_v27 = vpop.permute.xlu1 %169  ;;  %v130_v28 = vpop.permute.xlu0 %129  ;;  %v369_v29 = vpack.c.bf16 %v201_v19, %v161_v22 }
  0x91   :  { %v174_v33 = vsel %vm173_vm3, %v170_v27, %v172_v5  ;;  %v175_v34 = vsel %vm173_vm3, %v168_v57, %v170_v27  ;;  %v134_v37 = vsel %vm133_vm2, %v130_v28, %v132_v9  ;;  %v135_v38 = vsel %vm133_vm2, %v128_v50, %v130_v28  ;;  %v4731_v9 = vld [vmem:[%s9720_s0 + $0x7] ss:$8 sm:$0xf] }
  0x92   :  { %v203_v39 = vmul.f32 %v5205_v16, %v175_v34  ;;  %v204_v40 = vmul.f32 %v5208_v17, %v174_v33  ;;  %v163_v41 = vmul.f32 %v5216_v23, %v135_v38  ;;  %v164_v42 = vmul.f32 %v5219_v26, %v134_v37  ;;  %418 = vmatpush1.bf16.msra.mxu0 %v369_v29 }
  0x93   :  { %v5244_v50 = vrot.slane %v4729_v18, %v5124_v15  ;;  %v5274_v27 = vrot.slane %v4731_v9, %v5107_v8  ;;  %v5283_v34 = vrot.slane %v4731_v9, %v5124_v15 }
  0x94   :  { %v210_v43 = vpop.permute.xlu1 %209  ;;  %v208_v44 = vpop.permute.xlu0 %207  ;;  %v372_v45 = vpack.c.bf16 %v204_v40, %v164_v42  ;;  %v371_v46 = vpack.c.bf16 %v203_v39, %v163_v41 }
  0x95   :  { %v215_v47 = vsel %vm213_vm4, %v208_v44, %v210_v43  ;;  %10026 = vst [vmem:[#allocation18_spill] sm:$0xff] %v5244_v50  ;;  %10029 = vst [vmem:[#allocation21_spill] sm:$0xff] %v5274_v27 }
  0x96   :  { %v242_v48 = vmul.f32 %v5223_v30, %v215_v47  ;;  %470 = vmatprep.subr.bf16.mxu1 %v372_v45  ;;  %10030 = vst [vmem:[#allocation22_spill] sm:$0xff] %v5283_v34  ;;  %v4732_v45 = vld [vmem:[%s9720_s0 + $0x20] ss:$8 sm:$0xf] }
  0x97   :  { %471 = vmatpush1.bf16.msra.mxu1 %v371_v46 }
  0x98   :  { %v212_v52 = vpop.permute.xlu1 %211  ;;  %v206_v53 = vpop.permute.xlu0 %205  ;;  %v374_v56 = vpack.c.bf16 %v242_v48, %v5026_v1  ;;  %v4730_v1 = vld [vmem:[%s9720_s0 + $0x6] ss:$8 sm:$0xf] }
  0x99   :  { %v214_v57 = vsel %vm213_vm4, %v210_v43, %v212_v52  ;;  %v216_v58 = vsel %vm213_vm4, %v206_v53, %v208_v44  ;;  %v217_v59 = vsel %vm213_vm4, %v212_v52, %v206_v53  ;;  %v5271_v22 = vrot.slane %v4730_v1, %v5107_v8 }
  0x9a   :  { %v243_v60 = vmul.f32 %v5241_v49, %v214_v57  ;;  %v241_v61 = vmul.f32 %v5244_v50, %v216_v58  ;;  %v244_v5 = vmul.f32 %v5247_v51, %v217_v59  ;;  %419 = vmatprep.subr.bf16.mxu0 %v374_v56  ;;  %v5286_v37 = vrot.slane %v4730_v1, %v5124_v15 }
  0x9b   :  { %10028 = vst [vmem:[#allocation20_spill] sm:$0xff] %v5271_v22  ;;  %v5293_v43 = vrot.slane %v4731_v9, %v5134_v21  ;;  %v5296_v44 = vrot.slane %v4731_v9, %v5131_v20  ;;  %v5304_v48 = vrot.slane %v4730_v1, %v5134_v21  ;;  %v5307_v52 = vrot.slane %v4730_v1, %v5131_v20 }
  0x9c   :  { %v250_v10 = vpop.permute.xlu1 %249  ;;  %v248_v11 = vpop.permute.xlu0 %247  ;;  %v373_v12 = vpack.c.bf16 %v241_v61, %v5017_v0  ;;  %v376_v18 = vpack.c.bf16 %v244_v5, %v5035_v2  ;;  %v375_v19 = vpack.c.bf16 %v243_v60, %v5044_v3  ;;  %10031 = vst [vmem:[#allocation23_spill] sm:$0xff] %v5286_v37  ;;  %v5311_v58 = vrot.slane %v4732_v45, %v5124_v15 }
  0x9d   :  { %v255_v28 = vsel %vm253_vm5, %v248_v11, %v250_v10  ;;  %10032 = vst [vmem:[#allocation24_spill] sm:$0xff] %v5293_v43  ;;  %10033 = vst [vmem:[#allocation25_spill] sm:$0xff] %v5296_v44 }
  0x9e   :  { %420 = vmatpush1.bf16.msra.mxu0 %v373_v12  ;;  %472 = vmatprep.subr.bf16.mxu1 %v376_v18  ;;  %v282_v3 = vmul.f32 %v5271_v22, %v255_v28  ;;  %10034 = vst [vmem:[#allocation26_spill] sm:$0xff] %v5304_v48  ;;  %10035 = vst [vmem:[#allocation27_spill] sm:$0xff] %v5307_v52 }
  0x9f   :  { %473 = vmatpush1.bf16.msra.mxu1 %v375_v19  ;;  %10036 = vst [vmem:[#allocation28_spill] sm:$0xff] %v5311_v58 }
  0xa0   :  { %v290_v29 = vpop.permute.xlu1 %289  ;;  %v288_v0 = vpop.permute.xlu0 %287 }
  0xa1   :  { %v295_v2 = vsel %vm293_vm6, %v288_v0, %v290_v29 }
  0xa2   :  { %v322_v33 = vmul.f32 %v5274_v27, %v295_v2 }
  0xa4   :  { %v286_v38 = vpop.permute.xlu1 %285  ;;  %v246_v39 = vpop.permute.xlu0 %245  ;;  %v378_v40 = vpack.c.bf16 %v322_v33, %v282_v3  ;;  %v5335_v3 = vrot.slane %v4732_v45, %v5134_v21 }
  0xa5   :  { %v296_v41 = vsel %vm293_vm6, %v286_v38, %v288_v0  ;;  %v256_v42 = vsel %vm253_vm5, %v246_v39, %v248_v11  ;;  %v5331_v0 = vrot.slane %v4732_v45, %v5107_v8 }
  0xa6   :  { %v321_v46 = vmul.f32 %v5283_v34, %v296_v41  ;;  %v281_v47 = vmul.f32 %v5286_v37, %v256_v42  ;;  %421 = vmatprep.subr.bf16.mxu0 %v378_v40  ;;  %10039 = vst [vmem:[#allocation31_spill] sm:$0xff] %v5335_v3 }
  0xa7   :  { %10038 = vst [vmem:[#allocation30_spill] sm:$0xff] %v5331_v0 }
  0xa8   :  { %v292_v53 = vpop.permute.xlu1 %291  ;;  %v252_v56 = vpop.permute.xlu0 %251  ;;  %v377_v57 = vpack.c.bf16 %v321_v46, %v281_v47 }
  0xa9   :  { %v294_v59 = vsel %vm293_vm6, %v290_v29, %v292_v53  ;;  %v297_v60 = vsel %vm293_vm6, %v292_v53, %v286_v38  ;;  %v254_v61 = vsel %vm253_vm5, %v250_v10, %v252_v56  ;;  %v257_v5 = vsel %vm253_vm5, %v252_v56, %v246_v39 }
  0xaa   :  { %v323_v1 = vmul.f32 %v5293_v43, %v294_v59  ;;  %v324_v9 = vmul.f32 %v5296_v44, %v297_v60  ;;  %v283_v11 = vmul.f32 %v5304_v48, %v254_v61  ;;  %v284_v15 = vmul.f32 %v5307_v52, %v257_v5  ;;  %422 = vmatpush1.bf16.msra.mxu0 %v377_v57  ;;  %v4855_v57 = vld [vmem:[%s9719_s2] sm:$0xff]   ;;  %v4856_v59 = vld [vmem:[%s9719_s2 + $0x8] sm:$0xff]  }
  0xab   :  { %v5328_v10 = vrot.slane %v4732_v45, %v5131_v20 }
  0xac   :  { %v328_v12 = vpop.permute.xlu1 %327  ;;  %v326_v18 = vpop.permute.xlu0 %325  ;;  %v380_v19 = vpack.c.bf16 %v324_v9, %v284_v15  ;;  %v379_v28 = vpack.c.bf16 %v323_v1, %v283_v11 }
  0xad   :  { %v336_v29 = vsel %vm333_vm7, %v326_v18, %v328_v12  ;;  %10037 = vst [vmem:[#allocation29_spill] sm:$0xff] %v5328_v10 }
  0xae   :  { %474 = vmatprep.subr.bf16.mxu1 %v380_v19  ;;  %v361_v2 = vmul.f32 %v5311_v58, %v336_v29 }
  0xaf   :  { %475 = vmatpush1.bf16.msra.mxu1 %v379_v28 }
  0xb0   :  { %v332_v33 = vpop.permute.xlu1 %331  ;;  %v330_v38 = vpop.permute.xlu0 %329  ;;  %v381_v42 = vpack.c.bf16 %v361_v2, %v361_v2 }
  0xb1   :  { %v337_v39 = vsel %vm333_vm7, %v332_v33, %v326_v18  ;;  %v334_v40 = vsel %vm333_vm7, %v330_v38, %v332_v33  ;;  %v335_v20 = vsel %vm333_vm7, %v328_v12, %v330_v38 }
  0xb2   :  { %v364_v8 = vmul.f32 %v5328_v10, %v337_v39  ;;  %v362_v41 = vmul.f32 %v5331_v0, %v335_v20  ;;  %v363_v21 = vmul.f32 %v5335_v3, %v334_v40  ;;  %v404_v53 = vsel %vm402_vm8, %v381_v42, 0 }
  0xb4   :  { %v384_v45 = vpack.c.bf16 %v364_v8, %v364_v8  ;;  %v382_v46 = vpack.c.bf16 %v362_v41, %v362_v41  ;;  %v383_v47 = vpack.c.bf16 %v363_v21, %v363_v21 }
  0xb6   :  { %4735 = vmatprep.subr.msk.bf16.mxu0 %vm402_vm8, %v382_v46  ;;  %4738 = vmatprep.subr.msk.bf16.mxu1 %vm402_vm8, %v384_v45  ;;  %v410_v56 = vsel %vm402_vm8, %v383_v47, 0 }
  0xb7   :  { %424 = vmatpush1.bf16.msra.mxu0 %v404_v53  ;;  %477 = vmatpush1.bf16.msra.mxu1 %v410_v56 }
  0xba   :  { %4736 = vmatmul.mubr.msk.bf16.vlgmr.msra.gmra.mrb[0].mxu0 %vm395_vm9, %v4855_v57  ;;  %4739 = vmatmul.mubr.msk.bf16.vlgmr.msra.gmra.mrb[0].mxu1 %vm395_vm9, %v4855_v57 }
  0xbb   :  { %457 = vmatprep.mubr.bf16.mxu0 %v9729_v4  ;;  %510 = vmatprep.mubr.bf16.mxu1 %v9729_v4 }
  0xc2   :  { %4737 = vmatmul.mubr.msk.bf16.gmra.mrb[4].mxu0 %vm395_vm9, %v4856_v59  ;;  %4740 = vmatmul.mubr.msk.bf16.gmra.mrb[4].mxu1 %vm395_vm9, %v4856_v59 }
 0x18d   :  { %v5354_v60 = vpop.f32.mrb[0].mxu0  ;;  %v5356_v61 = vpop.f32.mrb[0].mxu1 }
 0x18e   :  { %v5358_v5 = vpop.f32.mrb[1].mxu0  ;;  %v5360_v1 = vpop.f32.mrb[1].mxu1 }
 0x18f   :  { %v521_v9 = vadd.f32 %v5358_v5, %v5354_v60  ;;  %v5364_v11 = vpop.f32.mrb[2].mxu0  ;;  %v5366_v15 = vpop.f32.mrb[2].mxu1 }
 0x190   :  { %v5368_v12 = vpop.f32.mrb[3].mxu0  ;;  %v5370_v18 = vpop.f32.mrb[3].mxu1 }
 0x191   :  { %v526_v19 = vadd.f32 %v5368_v12, %v5364_v11  ;;  %v522_v28 = vadd.f32 %v521_v9, %v5356_v61 }
 0x193   :  { %v523_v29 = vadd.f32 %v522_v28, %v5360_v1  ;;  %v527_v2 = vadd.f32 %v526_v19, %v5366_v15 }
 0x195   :  { %524 = vadd.xlane.f32.xlu0 %v523_v29  ;;  %v5377_v33 = vpop.f32.mrb[4].mxu0  ;;  %v528_v38 = vadd.f32 %v527_v2, %v5370_v18  ;;  %v5380_v39 = vpop.f32.mrb[4].mxu1 }
 0x196   :  { %v5382_v40 = vpop.f32.mrb[5].mxu0  ;;  %v5384_v20 = vpop.f32.mrb[5].mxu1 }
 0x197   :  { %v531_v8 = vadd.f32 %v5382_v40, %v5377_v33  ;;  %529 = vadd.xlane.f32.xlu1 %v528_v38  ;;  %v5388_v41 = vpop.f32.mrb[6].mxu0  ;;  %v5390_v42 = vpop.f32.mrb[6].mxu1 }
 0x198   :  { %v5392_v21 = vpop.f32.mrb[7].mxu0  ;;  %v5394_v45 = vpop.f32.mrb[7].mxu1 }
 0x199   :  { %v536_v46 = vadd.f32 %v5392_v21, %v5388_v41  ;;  %v532_v47 = vadd.f32 %v531_v8, %v5380_v39 }
 0x19b   :  { %v533_v53 = vadd.f32 %v532_v47, %v5384_v20  ;;  %v537_v56 = vadd.f32 %v536_v46, %v5390_v42 }
 0x19d   :  { %534 = vadd.xlane.f32.xlu0 %v533_v53  ;;  %v538_v57 = vadd.f32 %v537_v56, %v5394_v45 }
 0x1a1   :  { %539 = vadd.xlane.f32.xlu0 %v538_v57 }
 0x222   :  { %v525_v59 = vpop.xlane.xlu0 %524 }
 0x223   :  { %v5402_v9 = vmul.f32 0.001953125, %v525_v59 }
 0x224   :  { %v530_v19 = vpop.xlane.xlu1 %529 }
 0x225   :  { %v5404_v28 = vmul.f32 0.001953125, %v530_v19  ;;  %v546_v29 = vsub.f32 %v5354_v60, %v5402_v9  ;;  %v547_v2 = vsub.f32 %v5358_v5, %v5402_v9  ;;  %v548_v38 = vsub.f32 %v5356_v61, %v5402_v9 }
 0x226   :  { %v549_v8 = vsub.f32 %v5360_v1, %v5402_v9 }
 0x227   :  { %v562_v46 = vmul.f32 %v546_v29, %v546_v29  ;;  %v563_v47 = vmul.f32 %v547_v2, %v547_v2  ;;  %v550_v53 = vsub.f32 %v5364_v11, %v5404_v28  ;;  %v551_v56 = vsub.f32 %v5368_v12, %v5404_v28 }
 0x228   :  { %v552_v57 = vsub.f32 %v5366_v15, %v5404_v28  ;;  %v564_v59 = vmul.f32 %v548_v38, %v548_v38  ;;  %v553_v3 = vsub.f32 %v5370_v18, %v5404_v28  ;;  %v565_v29 = vmul.f32 %v549_v8, %v549_v8 }
 0x229   :  { %v578_v19 = vadd.f32 %v563_v47, %v562_v46  ;;  %v566_v4 = vmul.f32 %v550_v53, %v550_v53  ;;  %v567_v10 = vmul.f32 %v551_v56, %v551_v56 }
 0x22a   :  { %v535_v6 = vpop.xlane.xlu0 %534  ;;  %v568_v0 = vmul.f32 %v552_v57, %v552_v57  ;;  %v569_v53 = vmul.f32 %v553_v3, %v553_v3 }
 0x22b   :  { %v5422_v58 = vmul.f32 0.001953125, %v535_v6  ;;  %v579_v2 = vadd.f32 %v578_v19, %v564_v59  ;;  %v583_v43 = vadd.f32 %v567_v10, %v566_v4 }
 0x22d   :  { %v580_v44 = vadd.f32 %v579_v2, %v565_v29  ;;  %v554_v34 = vsub.f32 %v5377_v33, %v5422_v58  ;;  %v555_v38 = vsub.f32 %v5382_v40, %v5422_v58  ;;  %v556_v46 = vsub.f32 %v5380_v39, %v5422_v58 }
 0x22e   :  { %v540_v47 = vpop.xlane.xlu0 %539  ;;  %v584_v27 = vadd.f32 %v583_v43, %v568_v0  ;;  %v557_v6 = vsub.f32 %v5384_v20, %v5422_v58 }
 0x22f   :  { %v5432_v8 = vmul.f32 0.001953125, %v540_v47  ;;  %581 = vadd.xlane.f32.xlu1 %v580_v44  ;;  %v570_v4 = vmul.f32 %v554_v34, %v554_v34  ;;  %v571_v10 = vmul.f32 %v555_v38, %v555_v38  ;;  %v572_v57 = vmul.f32 %v556_v46, %v556_v46 }
 0x230   :  { %v585_v56 = vadd.f32 %v584_v27, %v569_v53  ;;  %v573_v0 = vmul.f32 %v557_v6, %v557_v6 }
 0x231   :  { %v588_v59 = vadd.f32 %v571_v10, %v570_v4  ;;  %v558_v19 = vsub.f32 %v5388_v41, %v5432_v8  ;;  %v559_v29 = vsub.f32 %v5392_v21, %v5432_v8  ;;  %v560_v43 = vsub.f32 %v5390_v42, %v5432_v8 }
 0x232   :  { %586 = vadd.xlane.f32.xlu0 %v585_v56  ;;  %v561_v44 = vsub.f32 %v5394_v45, %v5432_v8 }
 0x233   :  { %v589_v3 = vadd.f32 %v588_v59, %v572_v57  ;;  %v574_v34 = vmul.f32 %v558_v19, %v558_v19  ;;  %v575_v2 = vmul.f32 %v559_v29, %v559_v29  ;;  %v576_v38 = vmul.f32 %v560_v43, %v560_v43  ;;  %v610_v43 = vld [vmem:[%s9721_s8] sm:$0xff] }
 0x234   :  { %v577_v47 = vmul.f32 %v561_v44, %v561_v44 }
 0x235   :  { %v590_v27 = vadd.f32 %v589_v3, %v573_v0  ;;  %v593_v46 = vadd.f32 %v575_v2, %v574_v34 }
 0x237   :  { %591 = vadd.xlane.f32.xlu1 %v590_v27  ;;  %v594_v53 = vadd.f32 %v593_v46, %v576_v38  ;;  %v619_v46 = vld [vmem:[%s9722_s9 + $0x8] sm:$0xff] }
 0x239   :  { %v595_v4 = vadd.f32 %v594_v53, %v577_v47 }
 0x23b   :  { %596 = vadd.xlane.f32.xlu0 %v595_v4 }
 0x2bc   :  { %v582_v10 = vpop.xlane.xlu1 %581 }
 0x2bd   :  { %v598_v48 = vmul.f32 0.001953125, %v582_v10  ;;  %v612_v10 = vld [vmem:[%s9721_s8 + $0x10] sm:$0xff] }
 0x2bf   :  { %v602_v52 = vadd.f32 1e-05, %v598_v48  ;;  %v587_v37 = vpop.xlane.xlu0 %586  ;;  %v618_v48 = vld [vmem:[%s9722_s9] sm:$0xff] }
 0x2c0   :  { %v599_v56 = vmul.f32 0.001953125, %v587_v37  ;;  %v611_v37 = vld [vmem:[%s9721_s8 + $0x8] sm:$0xff] }
 0x2c1   :  { %4882 = vrsqrt.f32 %v602_v52 }
 0x2c2   :  { %v603_v6 = vadd.f32 1e-05, %v599_v56 }
 0x2c4   :  { %4884 = vrsqrt.f32 %v603_v6  ;;  %v592_v57 = vpop.xlane.xlu1 %591  ;;  %v613_v6 = vld [vmem:[%s9721_s8 + $0x18] sm:$0xff] }
 0x2c5   :  { %v600_v59 = vmul.f32 0.001953125, %v592_v57 }
 0x2c7   :  { %v604_v19 = vadd.f32 1e-05, %v600_v59 }
 0x2c8   :  { %v597_v29 = vpop.xlane.xlu0 %596 }
 0x2c9   :  { %v601_v0 = vmul.f32 0.001953125, %v597_v29  ;;  %4886 = vrsqrt.f32 %v604_v19 }
 0x2cb   :  { %v4883_v3 = vpop.eup %4882  ;;  %v605_v44 = vadd.f32 1e-05, %v601_v0  ;;  %v621_v0 = vld [vmem:[%s9722_s9 + $0x18] sm:$0xff] }
 0x2cc   :  { %v614_v34 = vmul.f32 %v4883_v3, %v610_v43 }
 0x2cd   :  { %4888 = vrsqrt.f32 %v605_v44 }
 0x2ce   :  { %v4885_v52 = vpop.eup %4884  ;;  %632 = vperm.xlu1 %4846, %v614_v34   ;;  %v622_v2 = vmul.f32 %v614_v34, %v5402_v9 }
 0x2cf   :  { %v615_v27 = vmul.f32 %v4885_v52, %v611_v37 }
 0x2d0   :  { %v626_v38 = vsub.f32 %v618_v48, %v622_v2 }
 0x2d1   :  { %637 = vperm.xlu0 %4847, %v615_v27   ;;  %v623_v47 = vmul.f32 %v615_v27, %v5404_v28  ;;  %v620_v28 = vld [vmem:[%s9722_s9 + $0x10] sm:$0xff] }
 0x2d2   :  { %668 = vperm.xlu1 %4846, %v626_v38  }
 0x2d3   :  { %v627_v53 = vsub.f32 %v619_v46, %v623_v47  ;;  %v4887_v4 = vpop.eup %4886 }
 0x2d4   :  { %v616_v56 = vmul.f32 %v4887_v4, %v612_v10 }
 0x2d6   :  { %673 = vperm.xlu1 %4846, %v627_v53   ;;  %v624_v59 = vmul.f32 %v616_v56, %v5422_v58 }
 0x2d7   :  { %v4889_v9 = vpop.eup %4888 }
 0x2d8   :  { %v617_v57 = vmul.f32 %v4889_v9, %v613_v6  ;;  %v628_v19 = vsub.f32 %v620_v28, %v624_v59 }
 0x2da   :  { %642 = vperm.xlu1 %4846, %v616_v56   ;;  %v625_v29 = vmul.f32 %v617_v57, %v5432_v8 }
 0x2dc   :  { %v629_v43 = vsub.f32 %v621_v0, %v625_v29 }
 0x2de   :  { %647 = vperm.xlu1 %4846, %v617_v57  }
 0x2e2   :  { %678 = vperm.xlu1 %4846, %v628_v19  }
 0x2e6   :  { %683 = vperm.xlu1 %4846, %v629_v43  }
 0x34d   :  { %v633_v3 = vpop.permute.xlu1 %632 }
 0x34e   :  { %v650_v44 = vmul.f32 %v633_v3, %v5354_v60  ;;  %v651_v58 = vmul.f32 %v633_v3, %v5358_v5  ;;  %v653_v34 = vmul.f32 %v633_v3, %v5360_v1  ;;  %v652_v8 = vmul.f32 %v633_v3, %v5356_v61 }
 0x350   :  { %v638_v37 = vpop.permute.xlu0 %637 }
 0x351   :  { %v669_v48 = vpop.permute.xlu1 %668  ;;  %v654_v38 = vmul.f32 %v638_v37, %v5364_v11  ;;  %v655_v46 = vmul.f32 %v638_v37, %v5368_v12  ;;  %v657_v61 = vmul.f32 %v638_v37, %v5370_v18  ;;  %v656_v19 = vmul.f32 %v638_v37, %v5366_v15 }
 0x352   :  { %v686_v52 = vadd.f32 %v669_v48, %v650_v44  ;;  %v687_v2 = vadd.f32 %v669_v48, %v651_v58  ;;  %v689_v27 = vadd.f32 %v669_v48, %v653_v34  ;;  %v688_v4 = vadd.f32 %v669_v48, %v652_v8 }
 0x354   :  { %vm702_vm10 = vcmp.ge.f32.partialorder %v686_v52, 0.0  ;;  %vm703_vm11 = vcmp.ge.f32.partialorder %v687_v2, 0.0  ;;  %v718_v47 = vmul.f32 0.2, %v686_v52  ;;  %v719_v53 = vmul.f32 0.2, %v687_v2 }
 0x355   :  { %v674_v60 = vpop.permute.xlu1 %673  ;;  %v721_v10 = vmul.f32 0.2, %v689_v27  ;;  %vm705_vm12 = vcmp.ge.f32.partialorder %v689_v27, 0.0  ;;  %v720_v12 = vmul.f32 0.2, %v688_v4  ;;  %vm704_vm14 = vcmp.ge.f32.partialorder %v688_v4, 0.0 }
 0x356   :  { %v690_v5 = vadd.f32 %v674_v60, %v654_v38  ;;  %v5476_v1 = vsel %vm702_vm10, %v686_v52, %v718_v47  ;;  %v5478_v56 = vsel %vm703_vm11, %v687_v2, %v719_v53  ;;  %v691_v9 = vadd.f32 %v674_v60, %v655_v46 }
 0x357   :  { %10040 = vst [vmem:[#allocation32_spill] sm:$0xff] %v5476_v1  ;;  %766 = vrot.lane.b32.xlu0 %v5478_v56, %s4947_s16  ;;  %758 = vrot.lane.b32.xlu1 %v5476_v1, %s4947_s16  ;;  %v5485_v6 = vsel %vm705_vm12, %v689_v27, %v721_v10  ;;  %v693_v57 = vadd.f32 %v674_v60, %v657_v61 }
 0x358   :  { %vm706_vm13 = vcmp.ge.f32.partialorder %v690_v5, 0.0  ;;  %v722_v11 = vmul.f32 0.2, %v690_v5  ;;  %10041 = vst [vmem:[#allocation33_spill] sm:$0xff] %v5485_v6  ;;  %v723_v59 = vmul.f32 0.2, %v691_v9  ;;  %v5494_v29 = vsel %vm704_vm14, %v688_v4, %v720_v12 }
 0x359   :  { %vm707_vm15 = vcmp.ge.f32.partialorder %v691_v9, 0.0  ;;  %10043 = vst [vmem:[#allocation35_spill] sm:$0xff] %v5494_v29  ;;  %v692_v18 = vadd.f32 %v674_v60, %v656_v19  ;;  %v725_v0 = vmul.f32 0.2, %v693_v57  ;;  %vm709_vm8 = vcmp.ge.f32.partialorder %v693_v57, 0.0  ;;  %v643_v58 = vpop.permute.xlu1 %642 }
 0x35a   :  { %v5487_v28 = vsel %vm706_vm13, %v690_v5, %v722_v11  ;;  %v5496_v43 = vsel %vm707_vm15, %v691_v9, %v723_v59  ;;  %v658_v52 = vmul.f32 %v643_v58, %v5377_v33  ;;  %v659_v38 = vmul.f32 %v643_v58, %v5382_v40 }
 0x35b   :  { %10042 = vst [vmem:[#allocation34_spill] sm:$0xff] %v5487_v28  ;;  %782 = vrot.lane.b32.xlu0 %v5485_v6, %s4947_s16  ;;  %760 = vrot.lane.b32.xlu1 %v5487_v28, %s4947_s16  ;;  %10044 = vst [vmem:[#allocation36_spill] sm:$0xff] %v5496_v43  ;;  %v724_v3 = vmul.f32 0.2, %v692_v18  ;;  %v5502_v44 = vsel %vm709_vm8, %v693_v57, %v725_v0  ;;  %vm708_vm9 = vcmp.ge.f32.partialorder %v692_v18, 0.0 }
 0x35c   :  { %10045 = vst [vmem:[#allocation37_spill] sm:$0xff] %v5502_v44  ;;  %v661_v4 = vmul.f32 %v643_v58, %v5384_v20  ;;  %v660_v40 = vmul.f32 %v643_v58, %v5380_v39 }
 0x35d   :  { %v5508_v15 = vsel %vm708_vm9, %v692_v18, %v724_v3  ;;  %v5594_v34 = vpop.permute.xlu1 %647 }
 0x35e   :  { %10046 = vst [vmem:[#allocation38_spill] sm:$0xff] %v5508_v15  ;;  %v662_v33 = vmul.f32 %v5594_v34, %v5388_v41  ;;  %v663_v59 = vmul.f32 %v5594_v34, %v5392_v21  ;;  %v665_v0 = vmul.f32 %v5594_v34, %v5394_v45 }
 0x35f   :  { %774 = vrot.lane.b32.xlu0 %v5494_v29, %s4947_s16  ;;  %768 = vrot.lane.b32.xlu1 %v5496_v43, %s4947_s16 }
 0x361   :  { %v679_v37 = vpop.permute.xlu1 %678 }
 0x362   :  { %v694_v8 = vadd.f32 %v679_v37, %v658_v52  ;;  %v695_v53 = vadd.f32 %v679_v37, %v659_v38  ;;  %v697_v10 = vadd.f32 %v679_v37, %v661_v4  ;;  %v696_v39 = vadd.f32 %v679_v37, %v660_v40 }
 0x363   :  { %822 = vrot.lane.b32.xlu0 %v5476_v1, %s4946_s15  ;;  %784 = vrot.lane.b32.xlu1 %v5502_v44, %s4947_s16 }
 0x364   :  { %v726_v60 = vmul.f32 0.2, %v694_v8  ;;  %vm710_vm10 = vcmp.ge.f32.partialorder %v694_v8, 0.0  ;;  %v727_v11 = vmul.f32 0.2, %v695_v53  ;;  %vm711_vm11 = vcmp.ge.f32.partialorder %v695_v53, 0.0 }
 0x365   :  { %v5608_v48 = vpop.permute.xlu1 %683  ;;  %v729_v3 = vmul.f32 0.2, %v697_v10  ;;  %vm713_vm12 = vcmp.ge.f32.partialorder %v697_v10, 0.0  ;;  %vm712_vm14 = vcmp.ge.f32.partialorder %v696_v39, 0.0 }
 0x366   :  { %v5630_v20 = vsel %vm710_vm10, %v694_v8, %v726_v60  ;;  %v698_v12 = vadd.f32 %v5608_v48, %v662_v33  ;;  %v699_v21 = vadd.f32 %v5608_v48, %v663_v59  ;;  %v5650_v38 = vsel %vm711_vm11, %v695_v53, %v727_v11 }
 0x367   :  { %830 = vrot.lane.b32.xlu0 %v5478_v56, %s4946_s15  ;;  %776 = vrot.lane.b32.xlu1 %v5508_v15, %s4947_s16  ;;  %10047 = vst [vmem:[#allocation39_spill] sm:$0xff] %v5630_v20  ;;  %10048 = vst [vmem:[#allocation40_spill] sm:$0xff] %v5650_v38  ;;  %v728_v53 = vmul.f32 0.2, %v696_v39  ;;  %vm1372_vm10 = vcmask 261120  }
 0x368   :  { %v730_v60 = vmul.f32 0.2, %v698_v12  ;;  %vm714_vm13 = vcmp.ge.f32.partialorder %v698_v12, 0.0  ;;  %v731_v40 = vmul.f32 0.2, %v699_v21  ;;  %vm715_vm15 = vcmp.ge.f32.partialorder %v699_v21, 0.0 }
 0x36a   :  { %v5670_v59 = vsel %vm714_vm13, %v698_v12, %v730_v60  ;;  %v664_v12 = vmul.f32 %v5594_v34, %v5390_v42 }
 0x36b   :  { %846 = vrot.lane.b32.xlu0 %v5485_v6, %s4946_s15  ;;  %824 = vrot.lane.b32.xlu1 %v5487_v28, %s4946_s15 }
 0x36c   :  { %v700_v60 = vadd.f32 %v5608_v48, %v664_v12 }
 0x36e   :  { %vm716_vm9 = vcmp.ge.f32.partialorder %v700_v60, 0.0 }
 0x36f   :  { %838 = vrot.lane.b32.xlu0 %v5494_v29, %s4946_s15  ;;  %832 = vrot.lane.b32.xlu1 %v5496_v43, %s4946_s15 }
 0x373   :  { %886 = vrot.lane.b32.xlu0 %v5476_v1, %s4948_s23  ;;  %848 = vrot.lane.b32.xlu1 %v5502_v44, %s4946_s15 }
 0x377   :  { %894 = vrot.lane.b32.xlu0 %v5478_v56, %s4948_s23  ;;  %840 = vrot.lane.b32.xlu1 %v5508_v15, %s4946_s15 }
 0x37b   :  { %910 = vrot.lane.b32.xlu0 %v5485_v6, %s4948_s23  ;;  %888 = vrot.lane.b32.xlu1 %v5487_v28, %s4948_s23 }
 0x37f   :  { %902 = vrot.lane.b32.xlu0 %v5494_v29, %s4948_s23  ;;  %896 = vrot.lane.b32.xlu1 %v5496_v43, %s4948_s23 }
 0x383   :  { %950 = vrot.lane.b32.xlu0 %v5476_v1, %s4949_s24  ;;  %912 = vrot.lane.b32.xlu1 %v5502_v44, %s4948_s23 }
 0x387   :  { %958 = vrot.lane.b32.xlu0 %v5478_v56, %s4949_s24  ;;  %904 = vrot.lane.b32.xlu1 %v5508_v15, %s4948_s23 }
 0x38b   :  { %974 = vrot.lane.b32.xlu0 %v5485_v6, %s4949_s24  ;;  %952 = vrot.lane.b32.xlu1 %v5487_v28, %s4949_s24 }
 0x38f   :  { %966 = vrot.lane.b32.xlu0 %v5494_v29, %s4949_s24  ;;  %960 = vrot.lane.b32.xlu1 %v5496_v43, %s4949_s24 }
 0x393   :  { %1022 = vrot.lane.b32.xlu0 %v5478_v56, %s4950_s1  ;;  %976 = vrot.lane.b32.xlu1 %v5502_v44, %s4949_s24 }
 0x397   :  { %1030 = vrot.lane.b32.xlu0 %v5494_v29, %s4950_s1  ;;  %968 = vrot.lane.b32.xlu1 %v5508_v15, %s4949_s24 }
 0x39b   :  { %1014 = vrot.lane.b32.xlu0 %v5476_v1, %s4950_s1  ;;  %1024 = vrot.lane.b32.xlu1 %v5496_v43, %s4950_s1 }
 0x39f   :  { %1038 = vrot.lane.b32.xlu0 %v5485_v6, %s4950_s1  ;;  %1032 = vrot.lane.b32.xlu1 %v5508_v15, %s4950_s1 }
 0x3a3   :  { %1086 = vrot.lane.b32.xlu0 %v5478_v56, %s4951_s25  ;;  %1016 = vrot.lane.b32.xlu1 %v5487_v28, %s4950_s1 }
 0x3a7   :  { %1094 = vrot.lane.b32.xlu0 %v5494_v29, %s4951_s25  ;;  %1040 = vrot.lane.b32.xlu1 %v5502_v44, %s4950_s1 }
 0x3ab   :  { %1078 = vrot.lane.b32.xlu0 %v5476_v1, %s4951_s25  ;;  %1088 = vrot.lane.b32.xlu1 %v5496_v43, %s4951_s25 }
 0x3af   :  { %1102 = vrot.lane.b32.xlu0 %v5485_v6, %s4951_s25  ;;  %1096 = vrot.lane.b32.xlu1 %v5508_v15, %s4951_s25 }
 0x3b3   :  { %1150 = vrot.lane.b32.xlu0 %v5478_v56, %s4952_s26  ;;  %1080 = vrot.lane.b32.xlu1 %v5487_v28, %s4951_s25 }
 0x3b7   :  { %1158 = vrot.lane.b32.xlu0 %v5494_v29, %s4952_s26  ;;  %1104 = vrot.lane.b32.xlu1 %v5502_v44, %s4951_s25 }
 0x3bb   :  { %1142 = vrot.lane.b32.xlu0 %v5476_v1, %s4952_s26  ;;  %1152 = vrot.lane.b32.xlu1 %v5496_v43, %s4952_s26 }
 0x3bf   :  { %1166 = vrot.lane.b32.xlu0 %v5485_v6, %s4952_s26  ;;  %1160 = vrot.lane.b32.xlu1 %v5508_v15, %s4952_s26 }
 0x3c3   :  { %1214 = vrot.lane.b32.xlu0 %v5478_v56, %s4954_s27  ;;  %1144 = vrot.lane.b32.xlu1 %v5487_v28, %s4952_s26 }
 0x3c7   :  { %1222 = vrot.lane.b32.xlu0 %v5494_v29, %s4954_s27  ;;  %1168 = vrot.lane.b32.xlu1 %v5502_v44, %s4952_s26 }
 0x3c9   :  { %v759_v2 = vpop.permute.xlu1 %758  ;;  %v767_v27 = vpop.permute.xlu0 %766 }
 0x3ca   :  { %v798_v5 = vsel %vm54_vm1, %v759_v2, %v767_v27 }
 0x3cb   :  { %1206 = vrot.lane.b32.xlu0 %v5476_v1, %s4954_s27  ;;  %1216 = vrot.lane.b32.xlu1 %v5496_v43, %s4954_s27  ;;  %v807_v41 = vmul.f32 %v798_v5, %v5118_v13  ;;  %v701_v5 = vadd.f32 %v5608_v48, %v665_v0 }
 0x3cd   :  { %v761_v46 = vpop.permute.xlu1 %760  ;;  %v783_v47 = vpop.permute.xlu0 %782  ;;  %vm717_vm8 = vcmp.ge.f32.partialorder %v701_v5, 0.0 }
 0x3ce   :  { %v802_v18 = vsel %vm54_vm1, %v783_v47, %v759_v2 }
 0x3cf   :  { %1230 = vrot.lane.b32.xlu0 %v5485_v6, %s4954_s27  ;;  %1224 = vrot.lane.b32.xlu1 %v5508_v15, %s4954_s27  ;;  %v806_v2 = vmul.f32 %v802_v18, %v5139_v24 }
 0x3d1   :  { %v769_v9 = vpop.permute.xlu1 %768  ;;  %v775_v61 = vpop.permute.xlu0 %774 }
 0x3d2   :  { %v799_v57 = vsel %vm54_vm1, %v761_v46, %v769_v9  ;;  %v794_v45 = vsel %vm54_vm1, %v767_v27, %v775_v61  ;;  %v790_v33 = vsel %vm54_vm1, %v775_v61, %v783_v47 }
 0x3d3   :  { %v811_v19 = vmul.f32 %v799_v57, %v5118_v13  ;;  %762 = vrot.lane.b32.xlu0 %v5630_v20, %s4947_s16  ;;  %1208 = vrot.lane.b32.xlu1 %v5487_v28, %s4954_s27 }
 0x3d5   :  { %v785_v58 = vpop.permute.xlu1 %784  ;;  %v5648_v52 = vpop.permute.xlu0 %822  ;;  %v1271_v8 = vpack.c.bf16 %v811_v19, %v807_v41  ;;  %v808_v41 = vmul.f32 %v794_v45, %v5157_v35 }
 0x3d6   :  { %v803_v37 = vsel %vm54_vm1, %v785_v58, %v761_v46  ;;  %v5664_v46 = vsel %vm713_vm12, %v697_v10, %v729_v3  ;;  %v809_v10 = vmul.f32 %v790_v33, %v5149_v31 }
 0x3d7   :  { %v810_v4 = vmul.f32 %v803_v37, %v5139_v24  ;;  %770 = vrot.lane.b32.xlu0 %v5650_v38, %s4947_s16  ;;  %1232 = vrot.lane.b32.xlu1 %v5502_v44, %s4954_s27  ;;  %10049 = vst [vmem:[#allocation41_spill] sm:$0xff] %v5664_v46  ;;  %v733_v37 = vmul.f32 0.2, %v701_v5 }
 0x3d8   :  { %1379 = vmatprep.subr.bf16.mxu0 %v1271_v8  ;;  %v5691_v8 = vsel %vm712_vm14, %v696_v39, %v728_v53  ;;  %v732_v39 = vmul.f32 0.2, %v700_v60 }
 0x3d9   :  { %v1270_v27 = vpack.c.bf16 %v810_v4, %v806_v2  ;;  %v777_v11 = vpop.permute.xlu1 %776  ;;  %v5667_v57 = vpop.permute.xlu0 %830  ;;  %10050 = vst [vmem:[#allocation42_spill] sm:$0xff] %v5691_v8  ;;  %v5694_v2 = vsel %vm715_vm15, %v699_v21, %v731_v40  ;;  %v5704_v45 = vsel %vm717_vm8, %v701_v5, %v733_v37 }
 0x3da   :  { %v791_v19 = vsel %vm54_vm1, %v777_v11, %v785_v58  ;;  %v795_v47 = vsel %vm54_vm1, %v769_v9, %v777_v11  ;;  %10051 = vst [vmem:[#allocation43_spill] sm:$0xff] %v5694_v2  ;;  %v5714_v4 = vsel %vm716_vm9, %v700_v60, %v732_v39 }
 0x3db   :  { %v812_v61 = vmul.f32 %v795_v47, %v5157_v35  ;;  %v813_v18 = vmul.f32 %v791_v19, %v5149_v31  ;;  %786 = vrot.lane.b32.xlu0 %v5664_v46, %s4947_s16  ;;  %764 = vrot.lane.b32.xlu1 %v5670_v59, %s4947_s16  ;;  %10052 = vst [vmem:[#allocation44_spill] sm:$0xff] %v5714_v4 }
 0x3dc   :  { %1380 = vmatpush1.bf16.msra.mxu0 %v1270_v27 }
 0x3dd   :  { %v1272_v0 = vpack.c.bf16 %v812_v61, %v808_v41  ;;  %v5686_v3 = vpop.permute.xlu1 %824  ;;  %v5688_v9 = vpop.permute.xlu0 %846  ;;  %v1273_v58 = vpack.c.bf16 %v813_v18, %v809_v10 }
 0x3de   :  { %v866_v44 = vsel %vm93_vm0, %v5688_v9, %v5648_v52 }
 0x3df   :  { %778 = vrot.lane.b32.xlu0 %v5691_v8, %s4947_s16  ;;  %772 = vrot.lane.b32.xlu1 %v5694_v2, %s4947_s16 }
 0x3e0   :  { %1485 = vmatprep.subr.bf16.mxu1 %v1273_v58 }
 0x3e1   :  { %1486 = vmatpush1.bf16.msra.mxu1 %v1272_v0  ;;  %v5700_v42 = vpop.permute.xlu1 %832  ;;  %v5702_v34 = vpop.permute.xlu0 %838 }
 0x3e3   :  { %826 = vrot.lane.b32.xlu0 %v5630_v20, %s4946_s15  ;;  %788 = vrot.lane.b32.xlu1 %v5704_v45, %s4947_s16 }
 0x3e5   :  { %v5710_v48 = vpop.permute.xlu1 %848  ;;  %v5712_v21 = vpop.permute.xlu0 %886 }
 0x3e7   :  { %834 = vrot.lane.b32.xlu0 %v5650_v38, %s4946_s15  ;;  %780 = vrot.lane.b32.xlu1 %v5714_v4, %s4947_s16 }
 0x3e9   :  { %v5720_v53 = vpop.permute.xlu1 %840  ;;  %v5722_v33 = vpop.permute.xlu0 %894 }
 0x3eb   :  { %850 = vrot.lane.b32.xlu0 %v5664_v46, %s4946_s15  ;;  %828 = vrot.lane.b32.xlu1 %v5670_v59, %s4946_s15 }
 0x3ed   :  { %v5728_v5 = vpop.permute.xlu1 %888  ;;  %v5730_v40 = vpop.permute.xlu0 %910 }
 0x3ef   :  { %842 = vrot.lane.b32.xlu0 %v5691_v8, %s4946_s15  ;;  %836 = vrot.lane.b32.xlu1 %v5694_v2, %s4946_s15 }
 0x3f1   :  { %v5736_v27 = vpop.permute.xlu1 %896  ;;  %v5738_v11 = vpop.permute.xlu0 %902 }
 0x3f3   :  { %890 = vrot.lane.b32.xlu0 %v5630_v20, %s4948_s23  ;;  %852 = vrot.lane.b32.xlu1 %v5704_v45, %s4946_s15 }
 0x3f5   :  { %v5744_v41 = vpop.permute.xlu1 %912  ;;  %v5746_v19 = vpop.permute.xlu0 %950 }
 0x3f7   :  { %898 = vrot.lane.b32.xlu0 %v5650_v38, %s4948_s23  ;;  %844 = vrot.lane.b32.xlu1 %v5714_v4, %s4946_s15 }
 0x3f9   :  { %v5752_v47 = vpop.permute.xlu1 %904  ;;  %v5754_v10 = vpop.permute.xlu0 %958 }
 0x3fb   :  { %914 = vrot.lane.b32.xlu0 %v5664_v46, %s4948_s23  ;;  %892 = vrot.lane.b32.xlu1 %v5670_v59, %s4948_s23 }
 0x3fd   :  { %v5760_v61 = vpop.permute.xlu1 %952  ;;  %v5762_v18 = vpop.permute.xlu0 %974 }
 0x3ff   :  { %906 = vrot.lane.b32.xlu0 %v5691_v8, %s4948_s23  ;;  %900 = vrot.lane.b32.xlu1 %v5694_v2, %s4948_s23 }
 0x401   :  { %v5768_v12 = vpop.permute.xlu1 %960  ;;  %v5770_v0 = vpop.permute.xlu0 %966 }
 0x403   :  { %954 = vrot.lane.b32.xlu0 %v5630_v20, %s4949_s24  ;;  %916 = vrot.lane.b32.xlu1 %v5704_v45, %s4948_s23 }
 0x405   :  { %v5776_v58 = vpop.permute.xlu1 %976  ;;  %v5778_v60 = vpop.permute.xlu0 %1022 }
 0x406   :  { %10053 = vst [vmem:[#allocation45_spill] sm:$0xff] %v5778_v60 }
 0x407   :  { %962 = vrot.lane.b32.xlu0 %v5650_v38, %s4949_s24  ;;  %908 = vrot.lane.b32.xlu1 %v5714_v4, %s4948_s23 }
 0x409   :  { %v5784_v37 = vpop.permute.xlu1 %968  ;;  %v5786_v39 = vpop.permute.xlu0 %1030 }
 0x40a   :  { %10054 = vst [vmem:[#allocation46_spill] sm:$0xff] %v5786_v39 }
 0x40b   :  { %978 = vrot.lane.b32.xlu0 %v5664_v46, %s4949_s24  ;;  %956 = vrot.lane.b32.xlu1 %v5670_v59, %s4949_s24 }
 0x40d   :  { %v5792_v22 = vpop.permute.xlu1 %1024  ;;  %v5794_v51 = vpop.permute.xlu0 %1014 }
 0x40e   :  { %10055 = vst [vmem:[#allocation47_spill] sm:$0xff] %v5794_v51 }
 0x40f   :  { %970 = vrot.lane.b32.xlu0 %v5691_v8, %s4949_s24  ;;  %964 = vrot.lane.b32.xlu1 %v5694_v2, %s4949_s24 }
 0x411   :  { %v5800_v49 = vpop.permute.xlu1 %1032  ;;  %v5802_v50 = vpop.permute.xlu0 %1038 }
 0x412   :  { %10056 = vst [vmem:[#allocation48_spill] sm:$0xff] %v5802_v50 }
 0x413   :  { %1026 = vrot.lane.b32.xlu0 %v5650_v38, %s4950_s1  ;;  %980 = vrot.lane.b32.xlu1 %v5704_v45, %s4949_s24 }
 0x415   :  { %v5808_v30 = vpop.permute.xlu1 %1016  ;;  %v5810_v60 = vpop.permute.xlu0 %1086 }
 0x416   :  { %10057 = vst [vmem:[#allocation49_spill] sm:$0xff] %v5808_v30  ;;  %10058 = vst [vmem:[#allocation50_spill] sm:$0xff] %v5810_v60 }
 0x417   :  { %972 = vrot.lane.b32.xlu1 %v5714_v4, %s4949_s24  ;;  %1034 = vrot.lane.b32.xlu0 %v5691_v8, %s4950_s1 }
 0x419   :  { %v5816_v51 = vpop.permute.xlu1 %1040  ;;  %v5818_v39 = vpop.permute.xlu0 %1094 }
 0x41a   :  { %10059 = vst [vmem:[#allocation51_spill] sm:$0xff] %v5816_v51  ;;  %10060 = vst [vmem:[#allocation52_spill] sm:$0xff] %v5818_v39 }
 0x41b   :  { %1028 = vrot.lane.b32.xlu1 %v5694_v2, %s4950_s1  ;;  %1018 = vrot.lane.b32.xlu0 %v5630_v20, %s4950_s1 }
 0x41d   :  { %v5824_v50 = vpop.permute.xlu1 %1088  ;;  %v5826_v30 = vpop.permute.xlu0 %1078 }
 0x41e   :  { %10061 = vst [vmem:[#allocation53_spill] sm:$0xff] %v5824_v50  ;;  %10062 = vst [vmem:[#allocation54_spill] sm:$0xff] %v5826_v30 }
 0x41f   :  { %1036 = vrot.lane.b32.xlu1 %v5714_v4, %s4950_s1  ;;  %1042 = vrot.lane.b32.xlu0 %v5664_v46, %s4950_s1 }
 0x421   :  { %v5832_v60 = vpop.permute.xlu1 %1096  ;;  %v5834_v51 = vpop.permute.xlu0 %1102 }
 0x422   :  { %10063 = vst [vmem:[#allocation55_spill] sm:$0xff] %v5832_v60  ;;  %10064 = vst [vmem:[#allocation56_spill] sm:$0xff] %v5834_v51 }
 0x423   :  { %1020 = vrot.lane.b32.xlu1 %v5670_v59, %s4950_s1  ;;  %1090 = vrot.lane.b32.xlu0 %v5650_v38, %s4951_s25 }
 0x425   :  { %v5840_v39 = vpop.permute.xlu1 %1080  ;;  %v5842_v50 = vpop.permute.xlu0 %1150 }
 0x426   :  { %10065 = vst [vmem:[#allocation57_spill] sm:$0xff] %v5840_v39  ;;  %10066 = vst [vmem:[#allocation58_spill] sm:$0xff] %v5842_v50 }
 0x427   :  { %1044 = vrot.lane.b32.xlu1 %v5704_v45, %s4950_s1  ;;  %1098 = vrot.lane.b32.xlu0 %v5691_v8, %s4951_s25 }
 0x429   :  { %v5848_v30 = vpop.permute.xlu1 %1104  ;;  %v5850_v60 = vpop.permute.xlu0 %1158 }
 0x42a   :  { %10067 = vst [vmem:[#allocation59_spill] sm:$0xff] %v5848_v30  ;;  %10068 = vst [vmem:[#allocation60_spill] sm:$0xff] %v5850_v60 }
 0x42b   :  { %1092 = vrot.lane.b32.xlu1 %v5694_v2, %s4951_s25  ;;  %1082 = vrot.lane.b32.xlu0 %v5630_v20, %s4951_s25 }
 0x42d   :  { %v5856_v51 = vpop.permute.xlu1 %1152  ;;  %v5858_v39 = vpop.permute.xlu0 %1142 }
 0x42e   :  { %10069 = vst [vmem:[#allocation61_spill] sm:$0xff] %v5856_v51  ;;  %10070 = vst [vmem:[#allocation62_spill] sm:$0xff] %v5858_v39 }
 0x42f   :  { %1100 = vrot.lane.b32.xlu1 %v5714_v4, %s4951_s25  ;;  %1106 = vrot.lane.b32.xlu0 %v5664_v46, %s4951_s25 }
 0x431   :  { %v5864_v50 = vpop.permute.xlu1 %1160  ;;  %v5866_v30 = vpop.permute.xlu0 %1166 }
 0x432   :  { %10071 = vst [vmem:[#allocation63_spill] sm:$0xff] %v5864_v50  ;;  %10072 = vst [vmem:[#allocation64_spill] sm:$0xff] %v5866_v30 }
 0x433   :  { %1084 = vrot.lane.b32.xlu1 %v5670_v59, %s4951_s25  ;;  %1154 = vrot.lane.b32.xlu0 %v5650_v38, %s4952_s26 }
 0x435   :  { %v5872_v60 = vpop.permute.xlu1 %1144  ;;  %v5874_v51 = vpop.permute.xlu0 %1214 }
 0x436   :  { %10073 = vst [vmem:[#allocation65_spill] sm:$0xff] %v5872_v60  ;;  %10074 = vst [vmem:[#allocation66_spill] sm:$0xff] %v5874_v51  ;;  %v4859_v51 = vld [vmem:[%s9723_s3 + $0x4] ss:$12 sps:$4 sm:$0xff]  }
 0x437   :  { %1108 = vrot.lane.b32.xlu1 %v5704_v45, %s4951_s25  ;;  %1162 = vrot.lane.b32.xlu0 %v5691_v8, %s4952_s26 }
 0x438   :  { %1411 = vmatprep.mubr.bf16.mxu0 %v4859_v51  ;;  %1517 = vmatprep.mubr.bf16.mxu1 %v4859_v51 }
 0x439   :  { %v5880_v39 = vpop.permute.xlu1 %1168  ;;  %v5882_v50 = vpop.permute.xlu0 %1222 }
 0x43a   :  { %10075 = vst [vmem:[#allocation67_spill] sm:$0xff] %v5880_v39  ;;  %10076 = vst [vmem:[#allocation68_spill] sm:$0xff] %v5882_v50 }
 0x43b   :  { %1156 = vrot.lane.b32.xlu1 %v5694_v2, %s4952_s26  ;;  %1146 = vrot.lane.b32.xlu0 %v5630_v20, %s4952_s26 }
 0x43d   :  { %v5891_v30 = vpop.permute.xlu1 %1216  ;;  %v5893_v60 = vpop.permute.xlu0 %1206 }
 0x43e   :  { %10077 = vst [vmem:[#allocation69_spill] sm:$0xff] %v5891_v30  ;;  %10078 = vst [vmem:[#allocation70_spill] sm:$0xff] %v5893_v60 }
 0x43f   :  { %1164 = vrot.lane.b32.xlu1 %v5714_v4, %s4952_s26  ;;  %1170 = vrot.lane.b32.xlu0 %v5664_v46, %s4952_s26 }
 0x441   :  { %v5899_v50 = vpop.permute.xlu1 %1224  ;;  %v5901_v39 = vpop.permute.xlu0 %1230 }
 0x442   :  { %10079 = vst [vmem:[#allocation71_spill] sm:$0xff] %v5899_v50  ;;  %10080 = vst [vmem:[#allocation72_spill] sm:$0xff] %v5901_v39 }
 0x443   :  { %1148 = vrot.lane.b32.xlu1 %v5670_v59, %s4952_s26  ;;  %1218 = vrot.lane.b32.xlu0 %v5650_v38, %s4954_s27 }
 0x445   :  { %v5907_v30 = vpop.permute.xlu1 %1208  ;;  %v763_v60 = vpop.permute.xlu0 %762 }
 0x446   :  { %10081 = vst [vmem:[#allocation73_spill] sm:$0xff] %v5907_v30 }
 0x447   :  { %1172 = vrot.lane.b32.xlu1 %v5704_v45, %s4952_s26  ;;  %1226 = vrot.lane.b32.xlu0 %v5691_v8, %s4954_s27 }
 0x449   :  { %v5913_v51 = vpop.permute.xlu1 %1232  ;;  %v771_v50 = vpop.permute.xlu0 %770 }
 0x44a   :  { %10082 = vst [vmem:[#allocation74_spill] sm:$0xff] %v5913_v51  ;;  %v800_v30 = vsel %vm54_vm1, %v763_v60, %v771_v50 }
 0x44b   :  { %1220 = vrot.lane.b32.xlu1 %v5694_v2, %s4954_s27  ;;  %1210 = vrot.lane.b32.xlu0 %v5630_v20, %s4954_s27  ;;  %v863_v2 = vsel %vm93_vm0, %v5686_v3, %v5700_v42 }
 0x44c   :  { %v875_v6 = vmul.f32 %v863_v2, %v5121_v14 }
 0x44d   :  { %v765_v39 = vpop.permute.xlu1 %764  ;;  %v787_v38 = vpop.permute.xlu0 %786 }
 0x44e   :  { %v804_v29 = vsel %vm54_vm1, %v787_v38, %v763_v60 }
 0x44f   :  { %1228 = vrot.lane.b32.xlu1 %v5714_v4, %s4954_s27  ;;  %1234 = vrot.lane.b32.xlu0 %v5664_v46, %s4954_s27  ;;  %v862_v4 = vsel %vm93_vm0, %v5648_v52, %v5667_v57  ;;  %v815_v46 = vmul.f32 %v800_v30, %v5118_v13  ;;  %v855_v52 = vsel %vm93_vm0, %v5720_v53, %v5710_v48 }
 0x450   :  { %v871_v30 = vmul.f32 %v862_v4, %v5121_v14  ;;  %v814_v2 = vmul.f32 %v804_v29, %v5139_v24 }
 0x451   :  { %v773_v8 = vpop.permute.xlu1 %772  ;;  %v779_v51 = vpop.permute.xlu0 %778 }
 0x452   :  { %v801_v20 = vsel %vm54_vm1, %v765_v39, %v773_v8 }
 0x453   :  { %v819_v15 = vmul.f32 %v801_v20, %v5118_v13  ;;  %1212 = vrot.lane.b32.xlu1 %v5670_v59, %s4954_s27  ;;  %v867_v20 = vsel %vm93_vm0, %v5710_v48, %v5686_v3  ;;  %v796_v3 = vsel %vm54_vm1, %v771_v50, %v779_v51  ;;  %v854_v48 = vsel %vm93_vm0, %v5702_v34, %v5688_v9 }
 0x454   :  { %v874_v29 = vmul.f32 %v867_v20, %v5142_v25  ;;  %v816_v9 = vmul.f32 %v796_v3, %v5157_v35 }
 0x455   :  { %v789_v28 = vpop.permute.xlu1 %788  ;;  %v827_v1 = vpop.permute.xlu0 %826  ;;  %v1275_v43 = vpack.c.bf16 %v819_v15, %v815_v46  ;;  %v870_v15 = vmul.f32 %v866_v44, %v5142_v25  ;;  %v792_v46 = vsel %vm54_vm1, %v779_v51, %v787_v38  ;;  %v877_v44 = vmul.f32 %v855_v52, %v5152_v32 }
 0x456   :  { %v805_v60 = vsel %vm54_vm1, %v789_v28, %v765_v39 }
 0x457   :  { %v818_v13 = vmul.f32 %v805_v60, %v5139_v24  ;;  %1236 = vrot.lane.b32.xlu1 %v5704_v45, %s4954_s27  ;;  %1381 = vmatprep.subr.bf16.mxu0 %v1275_v43  ;;  %v1279_v24 = vpack.c.bf16 %v875_v6, %v871_v30  ;;  %v859_v43 = vsel %vm93_vm0, %v5700_v42, %v5720_v53 }
 0x458   :  { %v858_v42 = vsel %vm93_vm0, %v5667_v57, %v5702_v34  ;;  %v1278_v53 = vpack.c.bf16 %v874_v29, %v870_v15  ;;  %v927_v15 = vsel %vm133_vm2, %v5728_v5, %v5736_v27 }
 0x459   :  { %v1274_v4 = vpack.c.bf16 %v818_v13, %v814_v2  ;;  %v781_v39 = vpop.permute.xlu1 %780  ;;  %v835_v60 = vpop.permute.xlu0 %834  ;;  %v817_v13 = vmul.f32 %v792_v46, %v5149_v31  ;;  %v876_v2 = vmul.f32 %v859_v43, %v5160_v36  ;;  %v872_v3 = vmul.f32 %v858_v42, %v5160_v36 }
 0x45a   :  { %v793_v50 = vsel %vm54_vm1, %v781_v39, %v789_v28  ;;  %v797_v38 = vsel %vm54_vm1, %v773_v8, %v781_v39  ;;  %v873_v28 = vmul.f32 %v854_v48, %v5152_v32  ;;  %v926_v43 = vsel %vm133_vm2, %v5712_v21, %v5722_v33 }
 0x45b   :  { %v820_v51 = vmul.f32 %v797_v38, %v5157_v35  ;;  %v821_v6 = vmul.f32 %v793_v50, %v5149_v31  ;;  %1382 = vmatpush1.bf16.msra.mxu0 %v1274_v4  ;;  %v864_v4 = vsel %vm93_vm0, %v827_v1, %v835_v60  ;;  %v1280_v34 = vpack.c.bf16 %v876_v2, %v872_v3 }
 0x45c   :  { %1383 = vmatprep.subr.bf16.mxu0 %v1279_v24  ;;  %v1281_v46 = vpack.c.bf16 %v877_v44, %v873_v28  ;;  %v879_v29 = vmul.f32 %v864_v4, %v5121_v14  ;;  %v930_v50 = vsel %vm133_vm2, %v5730_v40, %v5712_v21  ;;  %v939_v38 = vmul.f32 %v927_v15, %v5183_v54 }
 0x45d   :  { %v1276_v30 = vpack.c.bf16 %v820_v51, %v816_v9  ;;  %v829_v8 = vpop.permute.xlu1 %828  ;;  %v851_v20 = vpop.permute.xlu0 %850  ;;  %v1277_v52 = vpack.c.bf16 %v821_v6, %v817_v13  ;;  %v931_v6 = vsel %vm133_vm2, %v5744_v41, %v5728_v5  ;;  %v919_v21 = vsel %vm133_vm2, %v5752_v47, %v5744_v41 }
 0x45e   :  { %v868_v44 = vsel %vm93_vm0, %v851_v20, %v827_v1  ;;  %v935_v1 = vmul.f32 %v926_v43, %v5183_v54  ;;  %v938_v41 = vmul.f32 %v931_v6, %v5198_v63 }
 0x45f   :  { %1384 = vmatpush1.bf16.msra.mxu0 %v1278_v53  ;;  %1487 = vmatprep.subr.bf16.mxu1 %v1277_v52  ;;  %v878_v28 = vmul.f32 %v868_v44, %v5142_v25  ;;  %v918_v52 = vsel %vm133_vm2, %v5738_v11, %v5730_v40 }
 0x460   :  { %1488 = vmatpush1.bf16.msra.mxu1 %v1276_v30  ;;  %v934_v30 = vmul.f32 %v930_v50, %v5198_v63  ;;  %v1287_v4 = vpack.c.bf16 %v939_v38, %v935_v1  ;;  %v991_v1 = vsel %vm173_vm3, %v5760_v61, %v5768_v12 }
 0x461   :  { %v837_v57 = vpop.permute.xlu1 %836  ;;  %1489 = vmatprep.subr.bf16.mxu1 %v1281_v46  ;;  %v843_v24 = vpop.permute.xlu0 %842 }
 0x462   :  { %v865_v48 = vsel %vm93_vm0, %v829_v8, %v837_v57  ;;  %v856_v5 = vsel %vm93_vm0, %v843_v24, %v851_v20  ;;  %v941_v20 = vmul.f32 %v919_v21, %v5219_v26 }
 0x463   :  { %v883_v39 = vmul.f32 %v865_v48, %v5121_v14  ;;  %v881_v15 = vmul.f32 %v856_v5, %v5152_v32 }
 0x464   :  { %1490 = vmatpush1.bf16.msra.mxu1 %v1280_v34  ;;  %v923_v34 = vsel %vm133_vm2, %v5736_v27, %v5752_v47  ;;  %v922_v27 = vsel %vm133_vm2, %v5722_v33, %v5738_v11  ;;  %v937_v47 = vmul.f32 %v918_v52, %v5219_v26  ;;  %v1003_v52 = vmul.f32 %v991_v1, %v5186_v55 }
 0x465   :  { %v853_v9 = vpop.permute.xlu1 %852  ;;  %v891_v13 = vpop.permute.xlu0 %890  ;;  %v1283_v51 = vpack.c.bf16 %v883_v39, %v879_v29  ;;  %v1286_v39 = vpack.c.bf16 %v938_v41, %v934_v30  ;;  %v940_v38 = vmul.f32 %v923_v34, %v5216_v23  ;;  %v990_v30 = vsel %vm173_vm3, %v5746_v19, %v5754_v10 }
 0x466   :  { %v869_v42 = vsel %vm93_vm0, %v853_v9, %v829_v8  ;;  %v860_v8 = vsel %vm93_vm0, %v835_v60, %v843_v24 }
 0x467   :  { %v882_v53 = vmul.f32 %v869_v42, %v5142_v25  ;;  %1385 = vmatprep.subr.bf16.mxu0 %v1283_v51  ;;  %v880_v40 = vmul.f32 %v860_v8, %v5160_v36  ;;  %v936_v51 = vmul.f32 %v922_v27, %v5216_v23  ;;  %v994_v8 = vsel %vm173_vm3, %v5762_v18, %v5746_v19 }
 0x468   :  { %v983_v19 = vsel %vm173_vm3, %v5784_v37, %v5776_v58 }
 0x469   :  { %v1282_v2 = vpack.c.bf16 %v882_v53, %v878_v28  ;;  %v845_v46 = vpop.permute.xlu1 %844  ;;  %v899_v3 = vpop.permute.xlu0 %898  ;;  %v1288_v42 = vpack.c.bf16 %v940_v38, %v936_v51 }
 0x46a   :  { %v857_v60 = vsel %vm93_vm0, %v845_v46, %v853_v9  ;;  %v861_v24 = vsel %vm93_vm0, %v837_v57, %v845_v46  ;;  %v1289_v9 = vpack.c.bf16 %v941_v20, %v937_v47  ;;  %v928_v6 = vsel %vm133_vm2, %v891_v13, %v899_v3 }
 0x46b   :  { %v884_v48 = vmul.f32 %v861_v24, %v5160_v36  ;;  %v885_v29 = vmul.f32 %v857_v60, %v5152_v32  ;;  %1386 = vmatpush1.bf16.msra.mxu0 %v1282_v2  ;;  %v943_v28 = vmul.f32 %v928_v6, %v5183_v54  ;;  %v998_v24 = vmul.f32 %v994_v8, %v5195_v62 }
 0x46c   :  { %1387 = vmatprep.subr.bf16.mxu0 %v1287_v4  ;;  %v995_v4 = vsel %vm173_vm3, %v5776_v58, %v5760_v61 }
 0x46d   :  { %v1284_v43 = vpack.c.bf16 %v884_v48, %v880_v40  ;;  %v893_v57 = vpop.permute.xlu1 %892  ;;  %v915_v44 = vpop.permute.xlu0 %914  ;;  %v1285_v50 = vpack.c.bf16 %v885_v29, %v881_v15  ;;  %v982_v15 = vsel %vm173_vm3, %v5770_v0, %v5762_v18  ;;  %v1002_v58 = vmul.f32 %v995_v4, %v5195_v62 }
 0x46e   :  { %v932_v5 = vsel %vm133_vm2, %v915_v44, %v891_v13  ;;  %v999_v13 = vmul.f32 %v990_v30, %v5186_v55 }
 0x46f   :  { %1388 = vmatpush1.bf16.msra.mxu0 %v1286_v39  ;;  %1491 = vmatprep.subr.bf16.mxu1 %v1285_v50  ;;  %v942_v20 = vmul.f32 %v932_v5, %v5198_v63  ;;  %v987_v39 = vsel %vm173_vm3, %v5768_v12, %v5784_v37  ;;  %v986_v12 = vsel %vm173_vm3, %v5754_v10, %v5770_v0 }
 0x470   :  { %1492 = vmatpush1.bf16.msra.mxu1 %v1284_v43  ;;  %v1295_v47 = vpack.c.bf16 %v1003_v52, %v999_v13  ;;  %v1005_v43 = vmul.f32 %v983_v19, %v5208_v17  ;;  %v1001_v37 = vmul.f32 %v982_v15, %v5208_v17 }
 0x471   :  { %v901_v33 = vpop.permute.xlu1 %900  ;;  %1493 = vmatprep.subr.bf16.mxu1 %v1289_v9  ;;  %v907_v11 = vpop.permute.xlu0 %906  ;;  %v1294_v9 = vpack.c.bf16 %v1002_v58, %v998_v24 }
 0x472   :  { %v929_v21 = vsel %vm133_vm2, %v893_v57, %v901_v33  ;;  %v920_v61 = vsel %vm133_vm2, %v907_v11, %v915_v44  ;;  %v924_v40 = vsel %vm133_vm2, %v899_v3, %v907_v11  ;;  %v1297_v1 = vpack.c.bf16 %v1005_v43, %v1001_v37  ;;  %v10089_v37 = vld [vmem:[#allocation38_spill] sm:$0xff] }
 0x473   :  { %v947_v53 = vmul.f32 %v929_v21, %v5183_v54  ;;  %v944_v18 = vmul.f32 %v924_v40, %v5216_v23  ;;  %v945_v44 = vmul.f32 %v920_v61, %v5219_v26  ;;  %v1000_v21 = vmul.f32 %v986_v12, %v5205_v16  ;;  %v10088_v12 = vld [vmem:[#allocation35_spill] sm:$0xff] }
 0x474   :  { %1494 = vmatpush1.bf16.msra.mxu1 %v1288_v42  ;;  %v1004_v42 = vmul.f32 %v987_v39, %v5205_v16  ;;  %v1051_v40 = vsel %vm213_vm4, %v5792_v22, %v5800_v49 }
 0x475   :  { %v917_v41 = vpop.permute.xlu1 %916  ;;  %v955_v2 = vpop.permute.xlu0 %954  ;;  %v1291_v46 = vpack.c.bf16 %v947_v53, %v943_v28 }
 0x476   :  { %v933_v34 = vsel %vm133_vm2, %v917_v41, %v893_v57  ;;  %v1296_v53 = vpack.c.bf16 %v1004_v42, %v1000_v21  ;;  %v10092_v21 = vld [vmem:[#allocation40_spill] sm:$0xff] }
 0x477   :  { %v946_v60 = vmul.f32 %v933_v34, %v5198_v63  ;;  %1389 = vmatprep.subr.bf16.mxu0 %v1291_v46 }
 0x479   :  { %v1290_v48 = vpack.c.bf16 %v946_v60, %v942_v20  ;;  %v909_v29 = vpop.permute.xlu1 %908  ;;  %v963_v27 = vpop.permute.xlu0 %962 }
 0x47a   :  { %v921_v3 = vsel %vm133_vm2, %v909_v29, %v917_v41  ;;  %v925_v57 = vsel %vm133_vm2, %v901_v33, %v909_v29  ;;  %v992_v28 = vsel %vm173_vm3, %v955_v2, %v963_v27 }
 0x47b   :  { %v948_v50 = vmul.f32 %v925_v57, %v5216_v23  ;;  %v949_v38 = vmul.f32 %v921_v3, %v5219_v26  ;;  %1390 = vmatpush1.bf16.msra.mxu0 %v1290_v48  ;;  %v1007_v5 = vmul.f32 %v992_v28, %v5186_v55  ;;  %v10083_v48 = vld [vmem:[#allocation36_spill] sm:$0xff]  ;;  %v10085_v57 = vld [vmem:[#allocation34_spill] sm:$0xff]  ;;  %v10093_v28 = vld [vmem:[#allocation43_spill] sm:$0xff] }
 0x47c   :  { %1391 = vmatprep.subr.bf16.mxu0 %v1295_v47  ;;  %v1303_v29 = vpack.c.bf16 %v10083_v48, %v5478_v56  ;;  %v10084_v3 = vld [vmem:[#allocation32_spill] sm:$0xff]  ;;  %v10090_v56 = vld [vmem:[#allocation46_spill] sm:$0xff] }
 0x47d   :  { %v1292_v51 = vpack.c.bf16 %v948_v50, %v944_v18  ;;  %v957_v6 = vpop.permute.xlu1 %956  ;;  %v979_v33 = vpop.permute.xlu0 %978  ;;  %v1293_v11 = vpack.c.bf16 %v949_v38, %v945_v44  ;;  %v1302_v18 = vpack.c.bf16 %v10085_v57, %v10084_v3  ;;  %v10086_v44 = vld [vmem:[#allocation33_spill] sm:$0xff]  ;;  %v10105_v3 = vld [vmem:[#allocation55_spill] sm:$0xff] }
 0x47e   :  { %v996_v52 = vsel %vm173_vm3, %v979_v33, %v955_v2  ;;  %v10087_v50 = vld [vmem:[#allocation37_spill] sm:$0xff] }
 0x47f   :  { %1392 = vmatpush1.bf16.msra.mxu0 %v1294_v9  ;;  %1495 = vmatprep.subr.bf16.mxu1 %v1293_v11  ;;  %v1006_v13 = vmul.f32 %v996_v52, %v5195_v62  ;;  %v1305_v38 = vpack.c.bf16 %v10087_v50, %v10086_v44  ;;  %v1304_v9 = vpack.c.bf16 %v10089_v37, %v10088_v12  ;;  %v10106_v57 = vld [vmem:[#allocation53_spill] sm:$0xff]  ;;  %v10107_v12 = vld [vmem:[#allocation19_spill] sm:$0xff] }
 0x480   :  { %1496 = vmatpush1.bf16.msra.mxu1 %v1292_v51  ;;  %v10091_v51 = vld [vmem:[#allocation45_spill] sm:$0xff] }
 0x481   :  { %v965_v10 = vpop.permute.xlu1 %964  ;;  %1497 = vmatprep.subr.bf16.mxu1 %v1297_v1  ;;  %v971_v0 = vpop.permute.xlu0 %970 }
 0x482   :  { %v993_v30 = vsel %vm173_vm3, %v957_v6, %v965_v10  ;;  %v984_v20 = vsel %vm173_vm3, %v971_v0, %v979_v33  ;;  %v988_v60 = vsel %vm173_vm3, %v963_v27, %v971_v0  ;;  %v10094_v0 = vld [vmem:[#allocation47_spill] sm:$0xff] }
 0x483   :  { %v1011_v8 = vmul.f32 %v993_v30, %v5186_v55  ;;  %v1008_v27 = vmul.f32 %v988_v60, %v5205_v16  ;;  %v1009_v47 = vmul.f32 %v984_v20, %v5208_v17  ;;  %v10095_v30 = vld [vmem:[#allocation16_spill] sm:$0xff]  ;;  %v10100_v60 = vld [vmem:[#allocation42_spill] sm:$0xff] }
 0x484   :  { %1498 = vmatpush1.bf16.msra.mxu1 %v1296_v53  ;;  %v1054_v53 = vsel %vm213_vm4, %v10094_v0, %v10091_v51 }
 0x485   :  { %v981_v41 = vpop.permute.xlu1 %980  ;;  %v6127_v46 = vpop.permute.xlu0 %1026  ;;  %v1299_v4 = vpack.c.bf16 %v1011_v8, %v1007_v5  ;;  %v1067_v5 = vmul.f32 %v1051_v40, %v10095_v30  ;;  %v10096_v8 = vld [vmem:[#allocation49_spill] sm:$0xff] }
 0x486   :  { %v997_v34 = vsel %vm173_vm3, %v981_v41, %v957_v6  ;;  %v1050_v6 = vsel %vm213_vm4, %v10091_v51, %v10090_v56  ;;  %v1055_v52 = vsel %vm213_vm4, %v10096_v8, %v5792_v22  ;;  %v10109_v51 = vld [vmem:[#allocation50_spill] sm:$0xff] }
 0x487   :  { %v1010_v19 = vmul.f32 %v997_v34, %v5195_v62  ;;  %1393 = vmatprep.subr.bf16.mxu0 %v1299_v4  ;;  %v10098_v34 = vld [vmem:[#allocation51_spill] sm:$0xff]  ;;  %v1063_v40 = vmul.f32 %v1050_v6, %v10095_v30 }
 0x488   :  { %v1059_v22 = vsel %vm213_vm4, %v10098_v34, %v10096_v8 }
 0x489   :  { %v1298_v2 = vpack.c.bf16 %v1010_v19, %v1006_v13  ;;  %v973_v24 = vpop.permute.xlu1 %972  ;;  %v6137_v61 = vpop.permute.xlu0 %1034  ;;  %v1047_v13 = vsel %vm213_vm4, %v5800_v49, %v10098_v34  ;;  %v10099_v19 = vld [vmem:[#allocation41_spill] sm:$0xff]  ;;  %v1311_v50 = vpack.c.bf16 %v1067_v5, %v1063_v40  ;;  %v1069_v37 = vmul.f32 %v1059_v22, %v10107_v12  ;;  %v10111_v5 = vld [vmem:[#allocation20_spill] sm:$0xff] }
 0x48a   :  { %v985_v15 = vsel %vm173_vm3, %v973_v24, %v981_v41  ;;  %v989_v58 = vsel %vm173_vm3, %v965_v10, %v973_v24  ;;  %v1307_v10 = vpack.c.bf16 %v10093_v28, %v10092_v21  ;;  %v10097_v41 = vld [vmem:[#allocation39_spill] sm:$0xff]  ;;  %v1309_v20 = vpack.c.bf16 %v5704_v45, %v10099_v19  ;;  %v10103_v45 = vld [vmem:[#allocation48_spill] sm:$0xff]  ;;  %v10112_v19 = vld [vmem:[#allocation57_spill] sm:$0xff] }
 0x48b   :  { %v1012_v39 = vmul.f32 %v989_v58, %v5205_v16  ;;  %v1013_v43 = vmul.f32 %v985_v15, %v5208_v17  ;;  %1394 = vmatpush1.bf16.msra.mxu0 %v1298_v2  ;;  %v1306_v4 = vpack.c.bf16 %v5670_v59, %v10097_v41  ;;  %v10101_v2 = vld [vmem:[#allocation44_spill] sm:$0xff]  ;;  %v1052_v49 = vsel %vm213_vm4, %v6127_v46, %v6137_v61  ;;  %v10102_v59 = vld [vmem:[#allocation18_spill] sm:$0xff] }
 0x48c   :  { %1395 = vmatprep.subr.bf16.mxu0 %v1303_v29  ;;  %v1308_v24 = vpack.c.bf16 %v10101_v2, %v10100_v60  ;;  %v1062_v15 = vmul.f32 %v1054_v53, %v10102_v59  ;;  %v1046_v58 = vsel %vm213_vm4, %v10090_v56, %v10103_v45  ;;  %v1058_v48 = vsel %vm213_vm4, %v10103_v45, %v10094_v0  ;;  %v10108_v56 = vld [vmem:[#allocation52_spill] sm:$0xff]  ;;  %v10110_v0 = vld [vmem:[#allocation54_spill] sm:$0xff]  ;;  %v10113_v60 = vld [vmem:[#allocation59_spill] sm:$0xff] }
 0x48d   :  { %v1300_v33 = vpack.c.bf16 %v1012_v39, %v1008_v27  ;;  %v1029_v11 = vpop.permute.xlu1 %1028  ;;  %v1019_v42 = vpop.permute.xlu0 %1018  ;;  %v1301_v1 = vpack.c.bf16 %v1013_v43, %v1009_v47  ;;  %v1066_v29 = vmul.f32 %v1055_v52, %v10102_v59  ;;  %v10104_v39 = vld [vmem:[#allocation17_spill] sm:$0xff]  ;;  %v1114_v6 = vsel %vm253_vm5, %v10109_v51, %v10108_v56 }
 0x48e   :  { %v1068_v43 = vmul.f32 %v1047_v13, %v10104_v39  ;;  %v1065_v21 = vmul.f32 %v1058_v48, %v10107_v12  ;;  %v1056_v28 = vsel %vm213_vm4, %v1019_v42, %v6127_v46  ;;  %v1118_v53 = vsel %vm253_vm5, %v10110_v0, %v10109_v51 }
 0x48f   :  { %1396 = vmatpush1.bf16.msra.mxu0 %v1302_v18  ;;  %1499 = vmatprep.subr.bf16.mxu1 %v1301_v1  ;;  %v1115_v18 = vsel %vm253_vm5, %v10106_v57, %v10105_v3  ;;  %v1064_v1 = vmul.f32 %v1046_v58, %v10104_v39  ;;  %v1127_v13 = vmul.f32 %v1114_v6, %v10111_v5  ;;  %v10115_v58 = vld [vmem:[#allocation56_spill] sm:$0xff] }
 0x490   :  { %1397 = vmatprep.subr.bf16.mxu0 %v1307_v10  ;;  %1500 = vmatpush1.bf16.msra.mxu1 %v1300_v33  ;;  %v1310_v10 = vpack.c.bf16 %v1066_v29, %v1062_v15  ;;  %v1131_v8 = vmul.f32 %v1115_v18, %v10111_v5  ;;  %v1119_v46 = vsel %vm253_vm5, %v10112_v19, %v10106_v57 }
 0x491   :  { %v1037_v27 = vpop.permute.xlu1 %1036  ;;  %1501 = vmatprep.subr.bf16.mxu1 %v1305_v38  ;;  %v1043_v47 = vpop.permute.xlu0 %1042  ;;  %v1071_v38 = vmul.f32 %v1052_v49, %v10095_v30  ;;  %v1312_v34 = vpack.c.bf16 %v1068_v43, %v1064_v1  ;;  %v1123_v2 = vsel %vm253_vm5, %v10113_v60, %v10112_v19  ;;  %v1313_v22 = vpack.c.bf16 %v1069_v37, %v1065_v21  ;;  %v10114_v49 = vld [vmem:[#allocation23_spill] sm:$0xff] }
 0x492   :  { %v1053_v44 = vsel %vm213_vm4, %v1029_v11, %v1037_v27  ;;  %v1126_v15 = vmul.f32 %v1118_v53, %v10114_v49  ;;  %v1048_v45 = vsel %vm213_vm4, %v6137_v61, %v1043_v47  ;;  %v1122_v48 = vsel %vm253_vm5, %v10115_v58, %v10110_v0  ;;  %v10117_v0 = vld [vmem:[#allocation26_spill] sm:$0xff]  ;;  %v10118_v19 = vld [vmem:[#allocation63_spill] sm:$0xff] }
 0x493   :  { %v1075_v33 = vmul.f32 %v1053_v44, %v10095_v30  ;;  %1398 = vmatpush1.bf16.msra.mxu0 %v1306_v4  ;;  %v1130_v29 = vmul.f32 %v1119_v46, %v10114_v49  ;;  %v1319_v44 = vpack.c.bf16 %v1131_v8, %v1127_v13  ;;  %v1111_v61 = vsel %vm253_vm5, %v10105_v3, %v10113_v60  ;;  %v10119_v46 = vld [vmem:[#allocation61_spill] sm:$0xff] }
 0x494   :  { %1399 = vmatprep.subr.bf16.mxu0 %v1311_v50  ;;  %1502 = vmatpush1.bf16.msra.mxu1 %v1304_v9  ;;  %v1072_v37 = vmul.f32 %v1048_v45, %v10104_v39  ;;  %v1110_v3 = vsel %vm253_vm5, %v10108_v56, %v10115_v58  ;;  %v1132_v53 = vmul.f32 %v1111_v61, %v10117_v0  ;;  %v10124_v61 = vld [vmem:[#allocation65_spill] sm:$0xff] }
 0x495   :  { %v1021_v52 = vpop.permute.xlu1 %1020  ;;  %1503 = vmatprep.subr.bf16.mxu1 %v1309_v20  ;;  %v1091_v41 = vpop.permute.xlu0 %1090  ;;  %v1315_v4 = vpack.c.bf16 %v1075_v33, %v1071_v38  ;;  %v1070_v20 = vmul.f32 %v1056_v28, %v10102_v59  ;;  %v1318_v33 = vpack.c.bf16 %v1130_v29, %v1126_v15 }
 0x496   :  { %v1057_v9 = vsel %vm213_vm4, %v1021_v52, %v1029_v11  ;;  %v1060_v11 = vsel %vm213_vm4, %v1043_v47, %v1019_v42  ;;  %v10116_v42 = vld [vmem:[#allocation27_spill] sm:$0xff] }
 0x497   :  { %v1074_v40 = vmul.f32 %v1057_v9, %v10102_v59  ;;  %1400 = vmatpush1.bf16.msra.mxu0 %v1310_v10  ;;  %v1133_v47 = vmul.f32 %v1123_v2, %v10116_v42  ;;  %v1073_v51 = vmul.f32 %v1060_v11, %v10107_v12  ;;  %v1179_v9 = vsel %vm293_vm6, %v10119_v46, %v10118_v19  ;;  %v10122_v11 = vld [vmem:[#allocation62_spill] sm:$0xff] }
 0x498   :  { %1401 = vmatprep.subr.bf16.mxu0 %v1315_v4  ;;  %1504 = vmatpush1.bf16.msra.mxu1 %v1308_v24 }
 0x499   :  { %v1314_v43 = vpack.c.bf16 %v1074_v40, %v1070_v20  ;;  %v1045_v57 = vpop.permute.xlu1 %1044  ;;  %1505 = vmatprep.subr.bf16.mxu1 %v1313_v22  ;;  %v1099_v18 = vpop.permute.xlu0 %1098  ;;  %v10120_v40 = vld [vmem:[#allocation60_spill] sm:$0xff]  ;;  %v10121_v22 = vld [vmem:[#allocation58_spill] sm:$0xff] }
 0x49a   :  { %v1049_v24 = vsel %vm213_vm4, %v1037_v27, %v1045_v57  ;;  %v1061_v50 = vsel %vm213_vm4, %v1045_v57, %v1021_v52  ;;  %v1129_v27 = vmul.f32 %v1122_v48, %v10116_v42  ;;  %v1128_v52 = vmul.f32 %v1110_v3, %v10117_v0  ;;  %v10123_v48 = vld [vmem:[#allocation21_spill] sm:$0xff] }
 0x49b   :  { %v1076_v6 = vmul.f32 %v1049_v24, %v10104_v39  ;;  %v1077_v38 = vmul.f32 %v1061_v50, %v10107_v12  ;;  %1402 = vmatpush1.bf16.msra.mxu0 %v1314_v43  ;;  %v1116_v4 = vsel %vm253_vm5, %v1091_v41, %v1099_v18  ;;  %v1178_v15 = vsel %vm293_vm6, %v10121_v22, %v10120_v40  ;;  %v10125_v50 = vld [vmem:[#allocation67_spill] sm:$0xff] }
 0x49c   :  { %1403 = vmatprep.subr.bf16.mxu0 %v1319_v44  ;;  %1506 = vmatpush1.bf16.msra.mxu1 %v1312_v34  ;;  %v1321_v8 = vpack.c.bf16 %v1133_v47, %v1129_v27  ;;  %v1320_v13 = vpack.c.bf16 %v1132_v53, %v1128_v52  ;;  %v1135_v2 = vmul.f32 %v1116_v4, %v10111_v5 }
 0x49d   :  { %v1316_v1 = vpack.c.bf16 %v1076_v6, %v1072_v37  ;;  %v1093_v21 = vpop.permute.xlu1 %1092  ;;  %v1083_v28 = vpop.permute.xlu0 %1082  ;;  %v1317_v10 = vpack.c.bf16 %v1077_v38, %v1073_v51  ;;  %v1182_v58 = vsel %vm293_vm6, %v10122_v11, %v10121_v22  ;;  %v1195_v29 = vmul.f32 %v1179_v9, %v10123_v48  ;;  %v10126_v38 = vld [vmem:[#allocation22_spill] sm:$0xff] }
 0x49e   :  { %v1120_v45 = vsel %vm253_vm5, %v1083_v28, %v1091_v41  ;;  %v1183_v47 = vsel %vm293_vm6, %v10124_v61, %v10119_v46  ;;  %v1191_v41 = vmul.f32 %v1178_v15, %v10123_v48  ;;  %v1187_v37 = vsel %vm293_vm6, %v10125_v50, %v10124_v61 }
 0x49f   :  { %1404 = vmatpush1.bf16.msra.mxu0 %v1318_v33  ;;  %1507 = vmatprep.subr.bf16.mxu1 %v1317_v10  ;;  %v1134_v51 = vmul.f32 %v1120_v45, %v10114_v49  ;;  %v1190_v3 = vmul.f32 %v1182_v58, %v10126_v38  ;;  %v1194_v10 = vmul.f32 %v1183_v47, %v10126_v38 }
 0x4a0   :  { %1508 = vmatpush1.bf16.msra.mxu1 %v1316_v1  ;;  %v10127_v1 = vld [vmem:[#allocation64_spill] sm:$0xff]  ;;  %v1327_v4 = vpack.c.bf16 %v1195_v29, %v1191_v41 }
 0x4a1   :  { %v1101_v56 = vpop.permute.xlu1 %1100  ;;  %1509 = vmatprep.subr.bf16.mxu1 %v1321_v8  ;;  %v1107_v34 = vpop.permute.xlu0 %1106  ;;  %v1326_v22 = vpack.c.bf16 %v1194_v10, %v1190_v3  ;;  %v10129_v29 = vld [vmem:[#allocation24_spill] sm:$0xff] }
 0x4a2   :  { %v1117_v60 = vsel %vm253_vm5, %v1093_v21, %v1101_v56  ;;  %v1112_v27 = vsel %vm253_vm5, %v1099_v18, %v1107_v34  ;;  %v1124_v33 = vsel %vm253_vm5, %v1107_v34, %v1083_v28  ;;  %v10128_v18 = vld [vmem:[#allocation25_spill] sm:$0xff] }
 0x4a3   :  { %v1139_v20 = vmul.f32 %v1117_v60, %v10111_v5  ;;  %v1197_v46 = vmul.f32 %v1187_v37, %v10128_v18  ;;  %v1136_v9 = vmul.f32 %v1112_v27, %v10117_v0  ;;  %v1137_v60 = vmul.f32 %v1124_v33, %v10116_v42  ;;  %v10131_v37 = vld [vmem:[#allocation69_spill] sm:$0xff]  ;;  %v10132_v33 = vld [vmem:[#allocation68_spill] sm:$0xff] }
 0x4a4   :  { %1510 = vmatpush1.bf16.msra.mxu1 %v1320_v13  ;;  %v1175_v13 = vsel %vm293_vm6, %v10118_v19, %v10125_v50  ;;  %v1174_v19 = vsel %vm293_vm6, %v10120_v40, %v10127_v1  ;;  %v10130_v50 = vld [vmem:[#allocation71_spill] sm:$0xff] }
 0x4a5   :  { %v1085_v43 = vpop.permute.xlu1 %1084  ;;  %v1155_v57 = vpop.permute.xlu0 %1154  ;;  %v1323_v44 = vpack.c.bf16 %v1139_v20, %v1135_v2  ;;  %v1192_v61 = vmul.f32 %v1174_v19, %v10129_v29 }
 0x4a6   :  { %v1121_v24 = vsel %vm253_vm5, %v1085_v43, %v1093_v21  ;;  %v1186_v21 = vsel %vm293_vm6, %v10127_v1, %v10122_v11  ;;  %v10133_v1 = vld [vmem:[#allocation66_spill] sm:$0xff] }
 0x4a7   :  { %v1138_v6 = vmul.f32 %v1121_v24, %v10114_v49  ;;  %1405 = vmatprep.subr.bf16.mxu0 %v1323_v44 }
 0x4a9   :  { %v1322_v53 = vpack.c.bf16 %v1138_v6, %v1134_v51  ;;  %v1109_v8 = vpop.permute.xlu1 %1108  ;;  %v1163_v52 = vpop.permute.xlu0 %1162  ;;  %v1243_v51 = vsel %vm333_vm7, %v10131_v37, %v10130_v50 }
 0x4aa   :  { %v1113_v28 = vsel %vm253_vm5, %v1101_v56, %v1109_v8  ;;  %v1125_v34 = vsel %vm253_vm5, %v1109_v8, %v1085_v43  ;;  %v1193_v56 = vmul.f32 %v1186_v21, %v10128_v18  ;;  %v1196_v43 = vmul.f32 %v1175_v13, %v10129_v29 }
 0x4ab   :  { %v1140_v2 = vmul.f32 %v1113_v28, %v10117_v0  ;;  %v1141_v20 = vmul.f32 %v1125_v34, %v10116_v42  ;;  %1406 = vmatpush1.bf16.msra.mxu0 %v1322_v53  ;;  %v1180_v47 = vsel %vm293_vm6, %v1155_v57, %v1163_v52  ;;  %v1242_v21 = vsel %vm333_vm7, %v10133_v1, %v10132_v33  ;;  %v10134_v53 = vld [vmem:[#allocation70_spill] sm:$0xff] }
 0x4ac   :  { %1407 = vmatprep.subr.bf16.mxu0 %v1327_v4  ;;  %v1329_v44 = vpack.c.bf16 %v1197_v46, %v1193_v56  ;;  %v1328_v41 = vpack.c.bf16 %v1196_v43, %v1192_v61  ;;  %v1199_v3 = vmul.f32 %v1180_v47, %v10123_v48  ;;  %v1246_v8 = vsel %vm333_vm7, %v10134_v53, %v10133_v1  ;;  %v10135_v4 = vld [vmem:[#allocation30_spill] sm:$0xff] }
 0x4ad   :  { %v1324_v15 = vpack.c.bf16 %v1140_v2, %v1136_v9  ;;  %v1157_v45 = vpop.permute.xlu1 %1156  ;;  %v1147_v11 = vpop.permute.xlu0 %1146  ;;  %v1325_v58 = vpack.c.bf16 %v1141_v20, %v1137_v60  ;;  %v1259_v13 = vmul.f32 %v1243_v51, %v10135_v4  ;;  %v10136_v9 = vld [vmem:[#allocation73_spill] sm:$0xff]  ;;  %v10137_v20 = vld [vmem:[#allocation74_spill] sm:$0xff] }
 0x4ae   :  { %v1184_v10 = vsel %vm293_vm6, %v1147_v11, %v1155_v57  ;;  %v1247_v60 = vsel %vm333_vm7, %v10136_v9, %v10131_v37  ;;  %v1255_v57 = vmul.f32 %v1242_v21, %v10135_v4  ;;  %v1251_v19 = vsel %vm333_vm7, %v10137_v20, %v10136_v9  ;;  %v4857_v1 = vld [vmem:[%s9723_s3] ss:$12 sps:$4 sm:$0xff]  }
 0x4af   :  { %1408 = vmatpush1.bf16.msra.mxu0 %v1326_v22  ;;  %1511 = vmatprep.subr.bf16.mxu1 %v1325_v58  ;;  %v1198_v56 = vmul.f32 %v1184_v10, %v10126_v38 }
 0x4b0   :  { %1512 = vmatpush1.bf16.msra.mxu1 %v1324_v15  ;;  %v10138_v15 = vld [vmem:[#allocation28_spill] sm:$0xff] }
 0x4b1   :  { %v1165_v40 = vpop.permute.xlu1 %1164  ;;  %1513 = vmatprep.subr.bf16.mxu1 %v1329_v44  ;;  %v1171_v24 = vpop.permute.xlu0 %1170  ;;  %v1254_v58 = vmul.f32 %v1246_v8, %v10138_v15  ;;  %v10139_v44 = vld [vmem:[#allocation72_spill] sm:$0xff]  ;;  %v1258_v47 = vmul.f32 %v1247_v60, %v10138_v15  ;;  %v4860_v8 = vld [vmem:[%s9723_s3 + $0x1c] ss:$12 sps:$4 sm:$0xff]  }
 0x4b2   :  { %v1181_v6 = vsel %vm293_vm6, %v1157_v45, %v1165_v40  ;;  %v1176_v43 = vsel %vm293_vm6, %v1163_v52, %v1171_v24  ;;  %v1250_v61 = vsel %vm333_vm7, %v10139_v44, %v10134_v53  ;;  %v10140_v52 = vld [vmem:[#allocation29_spill] sm:$0xff] }
 0x4b3   :  { %v1203_v27 = vmul.f32 %v1181_v6, %v10123_v48  ;;  %v1335_v6 = vpack.c.bf16 %v1259_v13, %v1255_v57  ;;  %v1200_v21 = vmul.f32 %v1176_v43, %v10129_v29  ;;  %v1257_v13 = vmul.f32 %v1250_v61, %v10140_v52 }
 0x4b4   :  { %1514 = vmatpush1.bf16.msra.mxu1 %v1328_v41 }
 0x4b5   :  { %v1149_v46 = vpop.permute.xlu1 %1148  ;;  %v1219_v28 = vpop.permute.xlu0 %1218  ;;  %v1331_v34 = vpack.c.bf16 %v1203_v27, %v1199_v3  ;;  %v1239_v3 = vsel %vm333_vm7, %v10130_v50, %v10137_v20  ;;  %v1261_v27 = vmul.f32 %v1251_v19, %v10140_v52 }
 0x4b6   :  { %v1185_v2 = vsel %vm293_vm6, %v1149_v46, %v1157_v45  ;;  %v1188_v45 = vsel %vm293_vm6, %v1171_v24, %v1147_v11 }
 0x4b7   :  { %v1202_v22 = vmul.f32 %v1185_v2, %v10126_v38  ;;  %1409 = vmatprep.subr.bf16.mxu0 %v1331_v34  ;;  %v1201_v10 = vmul.f32 %v1188_v45, %v10128_v18  ;;  %v10141_v2 = vld [vmem:[#allocation31_spill] sm:$0xff]  ;;  %v1337_v19 = vpack.c.bf16 %v1261_v27, %v1257_v13  ;;  %v4862_v45 = vld [vmem:[%s9723_s3 + $0x18] ss:$12 sps:$4 sm:$0xff]  }
 0x4b8   :  { %v1260_v57 = vmul.f32 %v1239_v3, %v10141_v2 }
 0x4b9   :  { %v1330_v41 = vpack.c.bf16 %v1202_v22, %v1198_v56  ;;  %v1173_v37 = vpop.permute.xlu1 %1172  ;;  %v1227_v51 = vpop.permute.xlu0 %1226 }
 0x4ba   :  { %v1177_v11 = vsel %vm293_vm6, %v1165_v40, %v1173_v37  ;;  %v1189_v24 = vsel %vm293_vm6, %v1173_v37, %v1149_v46  ;;  %v1238_v40 = vsel %vm333_vm7, %v10132_v33, %v10139_v44  ;;  %v1334_v46 = vpack.c.bf16 %v1258_v47, %v1254_v58 }
 0x4bb   :  { %v1204_v53 = vmul.f32 %v1177_v11, %v10129_v29  ;;  %v1205_v50 = vmul.f32 %v1189_v24, %v10128_v18  ;;  %1410 = vmatpush1.bf16.msra.mxu0 %v1330_v41  ;;  %v1256_v33 = vmul.f32 %v1238_v40, %v10141_v2  ;;  %v1244_v56 = vsel %vm333_vm7, %v1219_v28, %v1227_v51 }
 0x4bc   :  { %1432 = vmatprep.subr.bf16.mxu0 %v1335_v6  ;;  %v1263_v44 = vmul.f32 %v1244_v56, %v10135_v4 }
 0x4bd   :  { %v1332_v34 = vpack.c.bf16 %v1204_v53, %v1200_v21  ;;  %v1221_v9 = vpop.permute.xlu1 %1220  ;;  %v1333_v60 = vpack.c.bf16 %v1205_v50, %v1201_v10  ;;  %v1211_v20 = vpop.permute.xlu0 %1210  ;;  %v1336_v58 = vpack.c.bf16 %v1260_v57, %v1256_v33 }
 0x4be   :  { %1412 = vmatmul.mubr.bf16.vlgmr.msra.gmra.mrb[8].mxu0 %v4857_v1  ;;  %v1248_v47 = vsel %vm333_vm7, %v1211_v20, %v1219_v28 }
 0x4bf   :  { %1433 = vmatpush1.bf16.msra.mxu0 %v1334_v46  ;;  %1515 = vmatprep.subr.bf16.mxu1 %v1333_v60  ;;  %v1262_v27 = vmul.f32 %v1248_v47, %v10138_v15  ;;  %v4864_v60 = vld [vmem:[%s9723_s3 + $0x20] ss:$12 sps:$4 sm:$0xff]  }
 0x4c0   :  { %1516 = vmatpush1.bf16.msra.mxu1 %v1332_v34  ;;  %1421 = vmatprep.mubr.bf16.mxu0 %v4860_v8 }
 0x4c1   :  { %v1229_v22 = vpop.permute.xlu1 %1228  ;;  %1538 = vmatprep.subr.bf16.mxu1 %v1337_v19  ;;  %v1235_v41 = vpop.permute.xlu0 %1234 }
 0x4c2   :  { %v1245_v43 = vsel %vm333_vm7, %v1221_v9, %v1229_v22  ;;  %v1240_v11 = vsel %vm333_vm7, %v1227_v51, %v1235_v41  ;;  %v1252_v28 = vsel %vm333_vm7, %v1235_v41, %v1211_v20  ;;  %v4863_v51 = vld [vmem:[%s9723_s3 + $0x8] ss:$12 sps:$4 sm:$0xff]  }
 0x4c3   :  { %v1267_v61 = vmul.f32 %v1245_v43, %v10135_v4  ;;  %1518 = vmatmul.mubr.bf16.vlgmr.msra.gmra.mrb[8].mxu1 %v4857_v1  ;;  %v10142_v1 = vmov 0   ;;  %v1264_v53 = vmul.f32 %v1240_v11, %v10141_v2 }
 0x4c4   :  { %1539 = vmatpush1.bf16.msra.mxu1 %v1336_v58  ;;  %1527 = vmatprep.mubr.bf16.mxu1 %v4860_v8  ;;  %v1265_v8 = vmul.f32 %v1252_v28, %v10140_v52 }
 0x4c5   :  { %v1213_v37 = vpop.permute.xlu1 %1212  ;;  %v1339_v6 = vpack.c.bf16 %v1267_v61, %v1263_v44 }
 0x4c6   :  { %v1249_v3 = vsel %vm333_vm7, %v1213_v37, %v1221_v9  ;;  %1422 = vmatmul.mubr.bf16.gmra.mrb[12].mxu0 %v4862_v45 }
 0x4c7   :  { %v1266_v24 = vmul.f32 %v1249_v3, %v10138_v15  ;;  %1434 = vmatprep.subr.bf16.mxu0 %v1339_v6  ;;  %1464 = vmatprep.mubr.bf16.mxu0 %v10142_v1 }
 0x4c9   :  { %v1338_v21 = vpack.c.bf16 %v1266_v24, %v1262_v27  ;;  %v1237_v10 = vpop.permute.xlu1 %1236 }
 0x4ca   :  { %v1241_v50 = vsel %vm333_vm7, %v1229_v22, %v1237_v10  ;;  %v1253_v40 = vsel %vm333_vm7, %v1237_v10, %v1213_v37 }
 0x4cb   :  { %v1268_v13 = vmul.f32 %v1241_v50, %v10141_v2  ;;  %v1269_v46 = vmul.f32 %v1253_v40, %v10140_v52  ;;  %1435 = vmatpush1.bf16.msra.mxu0 %v1338_v21  ;;  %1528 = vmatmul.mubr.bf16.gmra.mrb[12].mxu1 %v4862_v45 }
 0x4cc   :  { %1570 = vmatprep.mubr.bf16.mxu1 %v10142_v1 }
 0x4cd   :  { %v1340_v34 = vpack.c.bf16 %v1268_v13, %v1264_v53  ;;  %v1341_v9 = vpack.c.bf16 %v1269_v46, %v1265_v8 }
 0x4ce   :  { %4747 = vmatmul.mubr.msk.bf16.vlgmr.msra.gmra.mrb[8].mxu0 %vm1372_vm10, %v4863_v51 }
 0x4cf   :  { %1540 = vmatprep.subr.bf16.mxu1 %v1341_v9  ;;  %1474 = vmatprep.mubr.bf16.mxu0 %v10142_v1 }
 0x4d0   :  { %1541 = vmatpush1.bf16.msra.mxu1 %v1340_v34 }
 0x4d3   :  { %4749 = vmatmul.mubr.msk.bf16.vlgmr.msra.gmra.mrb[8].mxu1 %vm1372_vm10, %v4863_v51 }
 0x4d4   :  { %1580 = vmatprep.mubr.bf16.mxu1 %v10142_v1 }
 0x4d6   :  { %4748 = vmatmul.mubr.msk.bf16.gmra.mrb[12].mxu0 %vm1372_vm10, %v4864_v60 }
 0x4db   :  { %4750 = vmatmul.mubr.msk.bf16.gmra.mrb[12].mxu1 %vm1372_vm10, %v4864_v60 }
 0x5a1   :  { %v6446_v57 = vpop.f32.mrb[8].mxu0 }
 0x5a2   :  { %v6448_v20 = vpop.f32.mrb[9].mxu0 }
 0x5a3   :  { %v1591_v19 = vadd.f32 %v6448_v20, %v6446_v57  ;;  %v6452_v33 = vpop.f32.mrb[10].mxu0 }
 0x5a4   :  { %v6454_v56 = vpop.f32.mrb[11].mxu0 }
 0x5a5   :  { %v1596_v22 = vadd.f32 %v6454_v56, %v6452_v33 }
 0x5a6   :  { %v6458_v58 = vpop.f32.mrb[8].mxu1 }
 0x5a7   :  { %v1592_v43 = vadd.f32 %v1591_v19, %v6458_v58  ;;  %v6461_v45 = vpop.f32.mrb[9].mxu1 }
 0x5a8   :  { %v6463_v44 = vpop.f32.mrb[10].mxu1 }
 0x5a9   :  { %v1593_v61 = vadd.f32 %v1592_v43, %v6461_v45  ;;  %v1597_v47 = vadd.f32 %v1596_v22, %v6463_v44  ;;  %v6467_v41 = vpop.f32.mrb[12].mxu0  ;;  %v6469_v37 = vpop.f32.mrb[11].mxu1 }
 0x5aa   :  { %v6471_v6 = vpop.f32.mrb[13].mxu0 }
 0x5ab   :  { %v1598_v3 = vadd.f32 %v1597_v47, %v6469_v37  ;;  %v1601_v27 = vadd.f32 %v6471_v6, %v6467_v41  ;;  %v6476_v11 = vpop.f32.mrb[14].mxu0  ;;  %1594 = vadd.xlane.f32.xlu0 %v1593_v61 }
 0x5ac   :  { %v6478_v24 = vpop.f32.mrb[15].mxu0 }
 0x5ad   :  { %v1606_v28 = vadd.f32 %v6478_v24, %v6476_v11  ;;  %1599 = vadd.xlane.f32.xlu1 %v1598_v3 }
 0x5ae   :  { %v6482_v21 = vpop.f32.mrb[12].mxu1 }
 0x5af   :  { %v1602_v10 = vadd.f32 %v1601_v27, %v6482_v21  ;;  %v6485_v53 = vpop.f32.mrb[13].mxu1 }
 0x5b0   :  { %v6487_v50 = vpop.f32.mrb[14].mxu1 }
 0x5b1   :  { %v1603_v40 = vadd.f32 %v1602_v10, %v6485_v53  ;;  %v1607_v51 = vadd.f32 %v1606_v28, %v6487_v50  ;;  %v6491_v8 = vpop.f32.mrb[15].mxu1 }
 0x5b3   :  { %v1608_v13 = vadd.f32 %v1607_v51, %v6491_v8  ;;  %1604 = vadd.xlane.f32.xlu0 %v1603_v40 }
 0x5b7   :  { %1609 = vadd.xlane.f32.xlu0 %v1608_v13 }
 0x638   :  { %v1595_v46 = vpop.xlane.xlu0 %1594 }
 0x639   :  { %v6494_v34 = vmul.f32 0.001953125, %v1595_v46 }
 0x63a   :  { %v1600_v9 = vpop.xlane.xlu1 %1599 }
 0x63b   :  { %v6496_v60 = vmul.f32 0.001953125, %v1600_v9  ;;  %v1615_v19 = vsub.f32 %v6446_v57, %v6494_v34  ;;  %v1616_v22 = vsub.f32 %v6448_v20, %v6494_v34  ;;  %v1617_v43 = vsub.f32 %v6458_v58, %v6494_v34 }
 0x63c   :  { %v1618_v61 = vsub.f32 %v6461_v45, %v6494_v34 }
 0x63d   :  { %v1631_v47 = vmul.f32 %v1615_v19, %v1615_v19  ;;  %v1632_v3 = vmul.f32 %v1616_v22, %v1616_v22  ;;  %v1619_v27 = vsub.f32 %v6452_v33, %v6496_v60  ;;  %v1620_v28 = vsub.f32 %v6454_v56, %v6496_v60 }
 0x63e   :  { %v1621_v10 = vsub.f32 %v6463_v44, %v6496_v60  ;;  %v1633_v40 = vmul.f32 %v1617_v43, %v1617_v43  ;;  %v1622_v9 = vsub.f32 %v6469_v37, %v6496_v60  ;;  %v1634_v19 = vmul.f32 %v1618_v61, %v1618_v61 }
 0x63f   :  { %v1647_v51 = vadd.f32 %v1632_v3, %v1631_v47  ;;  %v1635_v13 = vmul.f32 %v1619_v27, %v1619_v27  ;;  %v1636_v1 = vmul.f32 %v1620_v28, %v1620_v28 }
 0x640   :  { %v1605_v46 = vpop.xlane.xlu0 %1604  ;;  %v1637_v52 = vmul.f32 %v1621_v10, %v1621_v10  ;;  %v1638_v27 = vmul.f32 %v1622_v9, %v1622_v9 }
 0x641   :  { %v6514_v2 = vmul.f32 0.001953125, %v1605_v46  ;;  %v1648_v22 = vadd.f32 %v1647_v51, %v1633_v40  ;;  %v1652_v15 = vadd.f32 %v1636_v1, %v1635_v13 }
 0x643   :  { %v1649_v4 = vadd.f32 %v1648_v22, %v1634_v19  ;;  %v1623_v29 = vsub.f32 %v6467_v41, %v6514_v2  ;;  %v1624_v43 = vsub.f32 %v6471_v6, %v6514_v2  ;;  %v1625_v47 = vsub.f32 %v6482_v21, %v6514_v2 }
 0x644   :  { %v1610_v3 = vpop.xlane.xlu0 %1609  ;;  %v1653_v18 = vadd.f32 %v1652_v15, %v1637_v52  ;;  %v1626_v28 = vsub.f32 %v6485_v53, %v6514_v2 }
 0x645   :  { %v6524_v61 = vmul.f32 0.001953125, %v1610_v3  ;;  %1650 = vadd.xlane.f32.xlu1 %v1649_v4  ;;  %v1639_v1 = vmul.f32 %v1623_v29, %v1623_v29  ;;  %v1640_v10 = vmul.f32 %v1624_v43, %v1624_v43  ;;  %v1641_v51 = vmul.f32 %v1625_v47, %v1625_v47 }
 0x646   :  { %v1654_v40 = vadd.f32 %v1653_v18, %v1638_v27  ;;  %v1642_v52 = vmul.f32 %v1626_v28, %v1626_v28 }
 0x647   :  { %v1657_v13 = vadd.f32 %v1640_v10, %v1639_v1  ;;  %v1627_v46 = vsub.f32 %v6476_v11, %v6524_v61  ;;  %v1628_v19 = vsub.f32 %v6478_v24, %v6524_v61  ;;  %v1629_v15 = vsub.f32 %v6487_v50, %v6524_v61 }
 0x648   :  { %1655 = vadd.xlane.f32.xlu0 %v1654_v40  ;;  %v1630_v4 = vsub.f32 %v6491_v8, %v6524_v61  ;;  %v4955_v10 = vmov 1  }
 0x649   :  { %v1658_v9 = vadd.f32 %v1657_v13, %v1641_v51  ;;  %v1643_v29 = vmul.f32 %v1627_v46, %v1627_v46  ;;  %v1644_v22 = vmul.f32 %v1628_v19, %v1628_v19  ;;  %v1645_v43 = vmul.f32 %v1629_v15, %v1629_v15  ;;  %4848 = vset.pattern.permute.xlu1 %v4955_v10 }
 0x64a   :  { %v1646_v3 = vmul.f32 %v1630_v4, %v1630_v4  ;;  %4849 = vset.pattern.permute.xlu0 %v4955_v10  ;;  %v4925_v10 = vld [vmem:[%s9722_s9 + $0x8] sm:$0xff] }
 0x64b   :  { %v1659_v18 = vadd.f32 %v1658_v9, %v1642_v52  ;;  %v1662_v47 = vadd.f32 %v1644_v22, %v1643_v29  ;;  %v4922_v22 = vld [vmem:[%s9721_s8] sm:$0xff] }
 0x64d   :  { %1660 = vadd.xlane.f32.xlu1 %v1659_v18  ;;  %v1663_v27 = vadd.f32 %v1662_v47, %v1645_v43 }
 0x64f   :  { %v1664_v1 = vadd.f32 %v1663_v27, %v1646_v3  ;;  %v4924_v3 = vld [vmem:[%s9722_s9] sm:$0xff] }
 0x651   :  { %1665 = vadd.xlane.f32.xlu0 %v1664_v1 }
 0x6d2   :  { %v1651_v38 = vpop.xlane.xlu1 %1650 }
 0x6d3   :  { %v1667_v40 = vmul.f32 0.001953125, %v1651_v38 }
 0x6d5   :  { %v1671_v28 = vadd.f32 1e-05, %v1667_v40  ;;  %v1656_v51 = vpop.xlane.xlu0 %1655 }
 0x6d6   :  { %v1668_v13 = vmul.f32 0.001953125, %v1656_v51 }
 0x6d7   :  { %4890 = vrsqrt.f32 %v1671_v28  ;;  %v4926_v28 = vld [vmem:[%s9721_s8 + $0x10] sm:$0xff] }
 0x6d8   :  { %v1672_v48 = vadd.f32 1e-05, %v1668_v13 }
 0x6da   :  { %4892 = vrsqrt.f32 %v1672_v48  ;;  %v1661_v46 = vpop.xlane.xlu1 %1660  ;;  %v4923_v48 = vld [vmem:[%s9721_s8 + $0x8] sm:$0xff] }
 0x6db   :  { %v1669_v19 = vmul.f32 0.001953125, %v1661_v46  ;;  %v4927_v46 = vld [vmem:[%s9721_s8 + $0x18] sm:$0xff] }
 0x6dd   :  { %v1673_v15 = vadd.f32 1e-05, %v1669_v19 }
 0x6de   :  { %v1666_v52 = vpop.xlane.xlu0 %1665 }
 0x6df   :  { %v1670_v9 = vmul.f32 0.001953125, %v1666_v52  ;;  %4894 = vrsqrt.f32 %v1673_v15  ;;  %v4928_v15 = vld [vmem:[%s9722_s9 + $0x10] sm:$0xff] }
 0x6e1   :  { %v4891_v4 = vpop.eup %4890  ;;  %v1674_v29 = vadd.f32 1e-05, %v1670_v9 }
 0x6e2   :  { %v1679_v18 = vmul.f32 %v4922_v22, %v4891_v4  ;;  %v4929_v4 = vld [vmem:[%s9722_s9 + $0x18] sm:$0xff] }
 0x6e3   :  { %4896 = vrsqrt.f32 %v1674_v29 }
 0x6e4   :  { %v4893_v38 = vpop.eup %4892  ;;  %1693 = vperm.xlu1 %4848, %v1679_v18   ;;  %v1683_v43 = vmul.f32 %v1679_v18, %v6494_v34 }
 0x6e5   :  { %v1680_v47 = vmul.f32 %v4923_v48, %v4893_v38 }
 0x6e6   :  { %v1687_v27 = vsub.f32 %v4924_v3, %v1683_v43 }
 0x6e7   :  { %1698 = vperm.xlu0 %4849, %v1680_v47   ;;  %v1684_v1 = vmul.f32 %v1680_v47, %v6496_v60 }
 0x6e8   :  { %1729 = vperm.xlu1 %4848, %v1687_v27  }
 0x6e9   :  { %v1688_v34 = vsub.f32 %v4925_v10, %v1684_v1  ;;  %v4895_v40 = vpop.eup %4894 }
 0x6ea   :  { %v1681_v51 = vmul.f32 %v4926_v28, %v4895_v40 }
 0x6ec   :  { %1734 = vperm.xlu1 %4848, %v1688_v34   ;;  %v1685_v19 = vmul.f32 %v1681_v51, %v6514_v2 }
 0x6ed   :  { %v4897_v13 = vpop.eup %4896 }
 0x6ee   :  { %v1682_v60 = vmul.f32 %v4927_v46, %v4897_v13  ;;  %v1689_v52 = vsub.f32 %v4928_v15, %v1685_v19 }
 0x6f0   :  { %1703 = vperm.xlu1 %4848, %v1681_v51   ;;  %v1686_v9 = vmul.f32 %v1682_v60, %v6524_v61 }
 0x6f2   :  { %v1690_v29 = vsub.f32 %v4929_v4, %v1686_v9 }
 0x6f4   :  { %1708 = vperm.xlu1 %4848, %v1682_v60  }
 0x6f8   :  { %1739 = vperm.xlu1 %4848, %v1689_v52  }
 0x6fc   :  { %1744 = vperm.xlu1 %4848, %v1690_v29  }
 0x763   :  { %v1694_v22 = vpop.permute.xlu1 %1693 }
 0x764   :  { %v1711_v18 = vmul.f32 %v1694_v22, %v6446_v57  ;;  %v1712_v2 = vmul.f32 %v1694_v22, %v6448_v20  ;;  %v1714_v3 = vmul.f32 %v1694_v22, %v6461_v45  ;;  %v1713_v20 = vmul.f32 %v1694_v22, %v6458_v58 }
 0x766   :  { %v1699_v38 = vpop.permute.xlu0 %1698 }
 0x767   :  { %v1730_v43 = vpop.permute.xlu1 %1729  ;;  %v1715_v61 = vmul.f32 %v1699_v38, %v6452_v33  ;;  %v1716_v27 = vmul.f32 %v1699_v38, %v6454_v56  ;;  %v1718_v33 = vmul.f32 %v1699_v38, %v6469_v37  ;;  %v1717_v58 = vmul.f32 %v1699_v38, %v6463_v44 }
 0x768   :  { %v1747_v48 = vadd.f32 %v1730_v43, %v1711_v18  ;;  %v1748_v47 = vadd.f32 %v1730_v43, %v1712_v2  ;;  %v1750_v34 = vadd.f32 %v1730_v43, %v1714_v3  ;;  %v1749_v13 = vadd.f32 %v1730_v43, %v1713_v20 }
 0x76a   :  { %vm1763_vm11 = vcmp.ge.f32.partialorder %v1747_v48, 0.0  ;;  %v1779_v1 = vmul.f32 0.2, %v1747_v48  ;;  %v1780_v28 = vmul.f32 0.2, %v1748_v47  ;;  %vm1764_vm12 = vcmp.ge.f32.partialorder %v1748_v47, 0.0 }
 0x76b   :  { %v1735_v10 = vpop.permute.xlu1 %1734  ;;  %v1782_v56 = vmul.f32 0.2, %v1750_v34  ;;  %vm1766_vm14 = vcmp.ge.f32.partialorder %v1750_v34, 0.0  ;;  %v1781_v37 = vmul.f32 0.2, %v1749_v13  ;;  %vm1765_vm8 = vcmp.ge.f32.partialorder %v1749_v13, 0.0 }
 0x76c   :  { %v1751_v40 = vadd.f32 %v1735_v10, %v1715_v61  ;;  %v6567_v51 = vsel %vm1763_vm11, %v1747_v48, %v1779_v1  ;;  %v1752_v57 = vadd.f32 %v1735_v10, %v1716_v27  ;;  %v6573_v46 = vsel %vm1764_vm12, %v1748_v47, %v1780_v28 }
 0x76d   :  { %10143 = vst [vmem:[#allocation36_spill] sm:$0xff] %v6567_v51  ;;  %1819 = vrot.lane.b32.xlu1 %v6567_v51, %s4947_s16  ;;  %v1754_v60 = vadd.f32 %v1735_v10, %v1718_v33  ;;  %v6582_v52 = vsel %vm1766_vm14, %v1750_v34, %v1782_v56  ;;  %v1753_v9 = vadd.f32 %v1735_v10, %v1717_v58 }
 0x76e   :  { %vm1767_vm13 = vcmp.ge.f32.partialorder %v1751_v40, 0.0  ;;  %v1783_v45 = vmul.f32 0.2, %v1751_v40  ;;  %v1784_v19 = vmul.f32 0.2, %v1752_v57  ;;  %vm1768_vm15 = vcmp.ge.f32.partialorder %v1752_v57, 0.0 }
 0x76f   :  { %10145 = vst [vmem:[#allocation34_spill] sm:$0xff] %v6582_v52  ;;  %v1786_v4 = vmul.f32 0.2, %v1754_v60  ;;  %vm1770_vm9 = vcmp.ge.f32.partialorder %v1754_v60, 0.0  ;;  %v6590_v22 = vsel %vm1765_vm8, %v1749_v13, %v1781_v37  ;;  %v1785_v18 = vmul.f32 0.2, %v1753_v9  ;;  %v1704_v38 = vpop.permute.xlu1 %1703 }
 0x770   :  { %v6575_v15 = vsel %vm1767_vm13, %v1751_v40, %v1783_v45  ;;  %v6584_v29 = vsel %vm1768_vm15, %v1752_v57, %v1784_v19  ;;  %10146 = vst [vmem:[#allocation33_spill] sm:$0xff] %v6590_v22  ;;  %vm1769_vm11 = vcmp.ge.f32.partialorder %v1753_v9, 0.0  ;;  %v1719_v61 = vmul.f32 %v1704_v38, %v6467_v41 }
 0x771   :  { %10144 = vst [vmem:[#allocation32_spill] sm:$0xff] %v6575_v15  ;;  %1827 = vrot.lane.b32.xlu1 %v6573_v46, %s4947_s16  ;;  %1821 = vrot.lane.b32.xlu0 %v6575_v15, %s4947_s16  ;;  %v6592_v2 = vsel %vm1770_vm9, %v1754_v60, %v1786_v4  ;;  %v6598_v44 = vsel %vm1769_vm11, %v1753_v9, %v1785_v18  ;;  %v10149_v60 = vld [vmem:[#allocation3_spill] sm:$0xff] }
 0x772   :  { %10147 = vst [vmem:[#allocation37_spill] sm:$0xff] %v6592_v2  ;;  %10148 = vst [vmem:[#allocation35_spill] sm:$0xff] %v6598_v44  ;;  %v1720_v34 = vmul.f32 %v1704_v38, %v6471_v6  ;;  %v1722_v33 = vmul.f32 %v1704_v38, %v6485_v53  ;;  %v1721_v53 = vmul.f32 %v1704_v38, %v6482_v21  ;;  %v10151_v38 = vld [vmem:[#allocation4_spill] sm:$0xff] }
 0x773   :  { %v6684_v43 = vpop.permute.xlu1 %1708 }
 0x774   :  { %v1723_v40 = vmul.f32 %v6684_v43, %v6476_v11  ;;  %v1724_v56 = vmul.f32 %v6684_v43, %v6478_v24  ;;  %v1726_v24 = vmul.f32 %v6684_v43, %v6491_v8 }
 0x775   :  { %1843 = vrot.lane.b32.xlu1 %v6582_v52, %s4947_s16  ;;  %1829 = vrot.lane.b32.xlu0 %v6584_v29, %s4947_s16 }
 0x777   :  { %v1740_v48 = vpop.permute.xlu1 %1739 }
 0x778   :  { %v1755_v10 = vadd.f32 %v1740_v48, %v1719_v61  ;;  %v1756_v57 = vadd.f32 %v1740_v48, %v1720_v34  ;;  %v1758_v58 = vadd.f32 %v1740_v48, %v1722_v33 }
 0x779   :  { %1835 = vrot.lane.b32.xlu1 %v6590_v22, %s4947_s16  ;;  %1845 = vrot.lane.b32.xlu0 %v6592_v2, %s4947_s16 }
 0x77a   :  { %v1787_v45 = vmul.f32 0.2, %v1755_v10  ;;  %vm1771_vm12 = vcmp.ge.f32.partialorder %v1755_v10, 0.0  ;;  %v1788_v9 = vmul.f32 0.2, %v1756_v57  ;;  %vm1772_vm13 = vcmp.ge.f32.partialorder %v1756_v57, 0.0 }
 0x77b   :  { %v6698_v47 = vpop.permute.xlu1 %1744  ;;  %vm1774_vm15 = vcmp.ge.f32.partialorder %v1758_v58, 0.0 }
 0x77c   :  { %v1759_v6 = vadd.f32 %v6698_v47, %v1723_v40  ;;  %v1760_v4 = vadd.f32 %v6698_v47, %v1724_v56  ;;  %v6736_v40 = vsel %vm1771_vm12, %v1755_v10, %v1787_v45  ;;  %v1757_v10 = vadd.f32 %v1740_v48, %v1721_v53 }
 0x77d   :  { %1883 = vrot.lane.b32.xlu1 %v6567_v51, %s4946_s15  ;;  %1837 = vrot.lane.b32.xlu0 %v6598_v44, %s4947_s16  ;;  %10150 = vst [vmem:[#allocation38_spill] sm:$0xff] %v6736_v40  ;;  %v1790_v45 = vmul.f32 0.2, %v1758_v58  ;;  %v1762_v56 = vadd.f32 %v6698_v47, %v1726_v24 }
 0x77e   :  { %vm1775_vm14 = vcmp.ge.f32.partialorder %v1759_v6, 0.0  ;;  %vm1776_vm8 = vcmp.ge.f32.partialorder %v1760_v4, 0.0  ;;  %vm1773_vm9 = vcmp.ge.f32.partialorder %v1757_v10, 0.0 }
 0x77f   :  { %vm1778_vm11 = vcmp.ge.f32.partialorder %v1762_v56, 0.0 }
 0x781   :  { %1891 = vrot.lane.b32.xlu1 %v6573_v46, %s4946_s15  ;;  %1885 = vrot.lane.b32.xlu0 %v6575_v15, %s4946_s15 }
 0x785   :  { %1907 = vrot.lane.b32.xlu1 %v6582_v52, %s4946_s15  ;;  %1893 = vrot.lane.b32.xlu0 %v6584_v29, %s4946_s15 }
 0x789   :  { %1899 = vrot.lane.b32.xlu1 %v6590_v22, %s4946_s15  ;;  %1909 = vrot.lane.b32.xlu0 %v6592_v2, %s4946_s15 }
 0x78d   :  { %1947 = vrot.lane.b32.xlu1 %v6567_v51, %s4948_s23  ;;  %1901 = vrot.lane.b32.xlu0 %v6598_v44, %s4946_s15 }
 0x791   :  { %1955 = vrot.lane.b32.xlu1 %v6573_v46, %s4948_s23  ;;  %1949 = vrot.lane.b32.xlu0 %v6575_v15, %s4948_s23 }
 0x795   :  { %1971 = vrot.lane.b32.xlu1 %v6582_v52, %s4948_s23  ;;  %1957 = vrot.lane.b32.xlu0 %v6584_v29, %s4948_s23 }
 0x799   :  { %1963 = vrot.lane.b32.xlu1 %v6590_v22, %s4948_s23  ;;  %1973 = vrot.lane.b32.xlu0 %v6592_v2, %s4948_s23 }
 0x79d   :  { %2011 = vrot.lane.b32.xlu1 %v6567_v51, %s4949_s24  ;;  %1965 = vrot.lane.b32.xlu0 %v6598_v44, %s4948_s23 }
 0x7a1   :  { %2019 = vrot.lane.b32.xlu1 %v6573_v46, %s4949_s24  ;;  %2013 = vrot.lane.b32.xlu0 %v6575_v15, %s4949_s24 }
 0x7a5   :  { %2035 = vrot.lane.b32.xlu1 %v6582_v52, %s4949_s24  ;;  %2021 = vrot.lane.b32.xlu0 %v6584_v29, %s4949_s24 }
 0x7a9   :  { %2027 = vrot.lane.b32.xlu1 %v6590_v22, %s4949_s24  ;;  %2037 = vrot.lane.b32.xlu0 %v6592_v2, %s4949_s24 }
 0x7ad   :  { %2083 = vrot.lane.b32.xlu1 %v6573_v46, %s4950_s1  ;;  %2029 = vrot.lane.b32.xlu0 %v6598_v44, %s4949_s24 }
 0x7b1   :  { %2091 = vrot.lane.b32.xlu1 %v6590_v22, %s4950_s1  ;;  %2085 = vrot.lane.b32.xlu0 %v6584_v29, %s4950_s1 }
 0x7b5   :  { %2075 = vrot.lane.b32.xlu1 %v6567_v51, %s4950_s1  ;;  %2093 = vrot.lane.b32.xlu0 %v6598_v44, %s4950_s1 }
 0x7b9   :  { %2099 = vrot.lane.b32.xlu1 %v6582_v52, %s4950_s1  ;;  %2077 = vrot.lane.b32.xlu0 %v6575_v15, %s4950_s1 }
 0x7bd   :  { %2147 = vrot.lane.b32.xlu1 %v6573_v46, %s4951_s25  ;;  %2101 = vrot.lane.b32.xlu0 %v6592_v2, %s4950_s1 }
 0x7c1   :  { %2155 = vrot.lane.b32.xlu1 %v6590_v22, %s4951_s25  ;;  %2149 = vrot.lane.b32.xlu0 %v6584_v29, %s4951_s25 }
 0x7c5   :  { %2139 = vrot.lane.b32.xlu1 %v6567_v51, %s4951_s25  ;;  %2157 = vrot.lane.b32.xlu0 %v6598_v44, %s4951_s25 }
 0x7c9   :  { %2163 = vrot.lane.b32.xlu1 %v6582_v52, %s4951_s25  ;;  %2141 = vrot.lane.b32.xlu0 %v6575_v15, %s4951_s25 }
 0x7cd   :  { %2211 = vrot.lane.b32.xlu1 %v6573_v46, %s4952_s26  ;;  %2165 = vrot.lane.b32.xlu0 %v6592_v2, %s4951_s25 }
 0x7d1   :  { %2219 = vrot.lane.b32.xlu1 %v6590_v22, %s4952_s26  ;;  %2213 = vrot.lane.b32.xlu0 %v6584_v29, %s4952_s26 }
 0x7d5   :  { %2203 = vrot.lane.b32.xlu1 %v6567_v51, %s4952_s26  ;;  %2221 = vrot.lane.b32.xlu0 %v6598_v44, %s4952_s26 }
 0x7d9   :  { %2227 = vrot.lane.b32.xlu1 %v6582_v52, %s4952_s26  ;;  %2205 = vrot.lane.b32.xlu0 %v6575_v15, %s4952_s26 }
 0x7dd   :  { %2275 = vrot.lane.b32.xlu1 %v6573_v46, %s4954_s27  ;;  %2229 = vrot.lane.b32.xlu0 %v6592_v2, %s4952_s26 }
 0x7df   :  { %v1820_v3 = vpop.permute.xlu1 %1819 }
 0x7e1   :  { %2283 = vrot.lane.b32.xlu1 %v6590_v22, %s4954_s27  ;;  %2277 = vrot.lane.b32.xlu0 %v6584_v29, %s4954_s27 }
 0x7e3   :  { %v1828_v27 = vpop.permute.xlu1 %1827  ;;  %v1822_v1 = vpop.permute.xlu0 %1821 }
 0x7e4   :  { %v1859_v28 = vsel %vm54_vm1, %v1820_v3, %v1828_v27 }
 0x7e5   :  { %2267 = vrot.lane.b32.xlu1 %v6567_v51, %s4954_s27  ;;  %2285 = vrot.lane.b32.xlu0 %v6598_v44, %s4954_s27  ;;  %v1868_v11 = vmul.f32 %v1859_v28, %v10149_v60  ;;  %v1791_v28 = vmul.f32 0.2, %v1759_v6 }
 0x7e7   :  { %v1844_v20 = vpop.permute.xlu1 %1843  ;;  %v1830_v41 = vpop.permute.xlu0 %1829 }
 0x7e8   :  { %v1860_v13 = vsel %vm54_vm1, %v1822_v1, %v1830_v41  ;;  %v1863_v37 = vsel %vm54_vm1, %v1844_v20, %v1820_v3 }
 0x7e9   :  { %v1872_v19 = vmul.f32 %v1860_v13, %v10149_v60  ;;  %2291 = vrot.lane.b32.xlu1 %v6582_v52, %s4954_s27  ;;  %2269 = vrot.lane.b32.xlu0 %v6575_v15, %s4954_s27  ;;  %v1867_v33 = vmul.f32 %v1863_v37, %v10151_v38  ;;  %v6750_v13 = vsel %vm1772_vm13, %v1756_v57, %v1788_v9 }
 0x7ea   :  { %10152 = vst [vmem:[#allocation46_spill] sm:$0xff] %v6750_v13 }
 0x7eb   :  { %v1836_v18 = vpop.permute.xlu1 %1835  ;;  %v1846_v61 = vpop.permute.xlu0 %1845  ;;  %v2332_v34 = vpack.c.bf16 %v1872_v19, %v1868_v11 }
 0x7ec   :  { %v1864_v21 = vsel %vm54_vm1, %v1846_v61, %v1822_v1  ;;  %v1855_v3 = vsel %vm54_vm1, %v1828_v27, %v1836_v18  ;;  %v1851_v1 = vsel %vm54_vm1, %v1836_v18, %v1844_v20  ;;  %v1792_v27 = vmul.f32 0.2, %v1760_v4 }
 0x7ed   :  { %v1871_v8 = vmul.f32 %v1864_v21, %v10151_v38  ;;  %1823 = vrot.lane.b32.xlu1 %v6736_v40, %s4947_s16  ;;  %2293 = vrot.lane.b32.xlu0 %v6592_v2, %s4954_s27  ;;  %v6756_v21 = vsel %vm1775_vm14, %v1759_v6, %v1791_v28  ;;  %v1869_v48 = vmul.f32 %v1855_v3, %v5157_v35  ;;  %v1789_v18 = vmul.f32 0.2, %v1757_v10 }
 0x7ee   :  { %2439 = vmatprep.subr.bf16.mxu0 %v2332_v34  ;;  %v1870_v57 = vmul.f32 %v1851_v1, %v5149_v31  ;;  %v1725_v6 = vmul.f32 %v6684_v43, %v6487_v50  ;;  %v6781_v1 = vsel %vm1776_vm8, %v1760_v4, %v1792_v27 }
 0x7ef   :  { %v2331_v11 = vpack.c.bf16 %v1871_v8, %v1867_v33  ;;  %v6753_v19 = vpop.permute.xlu1 %1883  ;;  %v1838_v37 = vpop.permute.xlu0 %1837  ;;  %v6777_v33 = vsel %vm1774_vm15, %v1758_v58, %v1790_v45  ;;  %v1794_v8 = vmul.f32 0.2, %v1762_v56  ;;  %10154 = vst [vmem:[#allocation40_spill] sm:$0xff] %v6781_v1  ;;  %v6791_v58 = vsel %vm1773_vm9, %v1757_v10, %v1789_v18 }
 0x7f0   :  { %v1852_v53 = vsel %vm54_vm1, %v1838_v37, %v1846_v61  ;;  %v1856_v20 = vsel %vm54_vm1, %v1830_v41, %v1838_v37  ;;  %10153 = vst [vmem:[#allocation45_spill] sm:$0xff] %v6777_v33  ;;  %v1761_v3 = vadd.f32 %v6698_v47, %v1725_v6  ;;  %10155 = vst [vmem:[#allocation43_spill] sm:$0xff] %v6791_v58 }
 0x7f1   :  { %v1873_v24 = vmul.f32 %v1856_v20, %v5157_v35  ;;  %v1874_v9 = vmul.f32 %v1852_v53, %v5149_v31  ;;  %1831 = vrot.lane.b32.xlu1 %v6750_v13, %s4947_s16  ;;  %1825 = vrot.lane.b32.xlu0 %v6756_v21, %s4947_s16  ;;  %v6793_v45 = vsel %vm1778_vm11, %v1762_v56, %v1794_v8 }
 0x7f2   :  { %2440 = vmatpush1.bf16.msra.mxu0 %v2331_v11  ;;  %v1793_v47 = vmul.f32 0.2, %v1761_v3  ;;  %vm1777_vm12 = vcmp.ge.f32.partialorder %v1761_v3, 0.0 }
 0x7f3   :  { %v2333_v61 = vpack.c.bf16 %v1873_v24, %v1869_v48  ;;  %v6772_v41 = vpop.permute.xlu1 %1891  ;;  %v6774_v34 = vpop.permute.xlu0 %1885  ;;  %v2334_v28 = vpack.c.bf16 %v1874_v9, %v1870_v57 }
 0x7f4   :  { %v6803_v11 = vsel %vm1777_vm12, %v1761_v3, %v1793_v47 }
 0x7f5   :  { %1847 = vrot.lane.b32.xlu1 %v6777_v33, %s4947_s16  ;;  %1833 = vrot.lane.b32.xlu0 %v6781_v1, %s4947_s16  ;;  %10156 = vst [vmem:[#allocation47_spill] sm:$0xff] %v6803_v11 }
 0x7f6   :  { %2545 = vmatprep.subr.bf16.mxu1 %v2334_v28 }
 0x7f7   :  { %2546 = vmatpush1.bf16.msra.mxu1 %v2333_v61  ;;  %v6787_v50 = vpop.permute.xlu1 %1907  ;;  %v6789_v43 = vpop.permute.xlu0 %1893 }
 0x7f8   :  { %v1927_v15 = vsel %vm93_vm0, %v6787_v50, %v6753_v19 }
 0x7f9   :  { %1839 = vrot.lane.b32.xlu1 %v6791_v58, %s4947_s16  ;;  %1849 = vrot.lane.b32.xlu0 %v6793_v45, %s4947_s16 }
 0x7fb   :  { %v6799_v4 = vpop.permute.xlu1 %1899  ;;  %v6801_v27 = vpop.permute.xlu0 %1909 }
 0x7fd   :  { %1887 = vrot.lane.b32.xlu1 %v6736_v40, %s4946_s15  ;;  %1841 = vrot.lane.b32.xlu0 %v6803_v11, %s4947_s16 }
 0x7ff   :  { %v6809_v10 = vpop.permute.xlu1 %1947  ;;  %v6811_v56 = vpop.permute.xlu0 %1901 }
 0x801   :  { %1895 = vrot.lane.b32.xlu1 %v6750_v13, %s4946_s15  ;;  %1889 = vrot.lane.b32.xlu0 %v6756_v21, %s4946_s15 }
 0x803   :  { %v6817_v37 = vpop.permute.xlu1 %1955  ;;  %v6819_v48 = vpop.permute.xlu0 %1949 }
 0x805   :  { %1911 = vrot.lane.b32.xlu1 %v6777_v33, %s4946_s15  ;;  %1897 = vrot.lane.b32.xlu0 %v6781_v1, %s4946_s15 }
 0x807   :  { %v6825_v53 = vpop.permute.xlu1 %1971  ;;  %v6827_v20 = vpop.permute.xlu0 %1957 }
 0x809   :  { %1903 = vrot.lane.b32.xlu1 %v6791_v58, %s4946_s15  ;;  %1913 = vrot.lane.b32.xlu0 %v6793_v45, %s4946_s15 }
 0x80b   :  { %v6833_v57 = vpop.permute.xlu1 %1963  ;;  %v6835_v24 = vpop.permute.xlu0 %1973 }
 0x80d   :  { %1951 = vrot.lane.b32.xlu1 %v6736_v40, %s4948_s23  ;;  %1905 = vrot.lane.b32.xlu0 %v6803_v11, %s4946_s15 }
 0x80f   :  { %v6841_v9 = vpop.permute.xlu1 %2011  ;;  %v6843_v6 = vpop.permute.xlu0 %1965 }
 0x811   :  { %1959 = vrot.lane.b32.xlu1 %v6750_v13, %s4948_s23  ;;  %1953 = vrot.lane.b32.xlu0 %v6756_v21, %s4948_s23 }
 0x813   :  { %v6849_v18 = vpop.permute.xlu1 %2019  ;;  %v6851_v61 = vpop.permute.xlu0 %2013 }
 0x815   :  { %1975 = vrot.lane.b32.xlu1 %v6777_v33, %s4948_s23  ;;  %1961 = vrot.lane.b32.xlu0 %v6781_v1, %s4948_s23 }
 0x817   :  { %v6857_v28 = vpop.permute.xlu1 %2035  ;;  %v6859_v3 = vpop.permute.xlu0 %2021 }
 0x819   :  { %1967 = vrot.lane.b32.xlu1 %v6791_v58, %s4948_s23  ;;  %1977 = vrot.lane.b32.xlu0 %v6793_v45, %s4948_s23 }
 0x81b   :  { %v6865_v8 = vpop.permute.xlu1 %2027  ;;  %v6867_v47 = vpop.permute.xlu0 %2037 }
 0x81d   :  { %2015 = vrot.lane.b32.xlu1 %v6736_v40, %s4949_s24  ;;  %1969 = vrot.lane.b32.xlu0 %v6803_v11, %s4948_s23 }
 0x81f   :  { %v6873_v0 = vpop.permute.xlu1 %2083  ;;  %v6875_v42 = vpop.permute.xlu0 %2029 }
 0x820   :  { %10157 = vst [vmem:[#allocation49_spill] sm:$0xff] %v6873_v0 }
 0x821   :  { %2023 = vrot.lane.b32.xlu1 %v6750_v13, %s4949_s24  ;;  %2017 = vrot.lane.b32.xlu0 %v6756_v21, %s4949_s24 }
 0x823   :  { %v6881_v49 = vpop.permute.xlu1 %2091  ;;  %v6883_v5 = vpop.permute.xlu0 %2085 }
 0x824   :  { %10158 = vst [vmem:[#allocation39_spill] sm:$0xff] %v6881_v49 }
 0x825   :  { %2039 = vrot.lane.b32.xlu1 %v6777_v33, %s4949_s24  ;;  %2025 = vrot.lane.b32.xlu0 %v6781_v1, %s4949_s24 }
 0x827   :  { %v6889_v12 = vpop.permute.xlu1 %2075  ;;  %v6891_v39 = vpop.permute.xlu0 %2093 }
 0x828   :  { %10159 = vst [vmem:[#allocation51_spill] sm:$0xff] %v6889_v12 }
 0x829   :  { %2031 = vrot.lane.b32.xlu1 %v6791_v58, %s4949_s24  ;;  %2041 = vrot.lane.b32.xlu0 %v6793_v45, %s4949_s24 }
 0x82b   :  { %v6897_v59 = vpop.permute.xlu1 %2099  ;;  %v6899_v44 = vpop.permute.xlu0 %2077 }
 0x82c   :  { %10160 = vst [vmem:[#allocation41_spill] sm:$0xff] %v6897_v59  ;;  %10161 = vst [vmem:[#allocation42_spill] sm:$0xff] %v6899_v44 }
 0x82d   :  { %2087 = vrot.lane.b32.xlu1 %v6750_v13, %s4950_s1  ;;  %2033 = vrot.lane.b32.xlu0 %v6803_v11, %s4949_s24 }
 0x82f   :  { %v6905_v22 = vpop.permute.xlu1 %2147  ;;  %v6907_v12 = vpop.permute.xlu0 %2101 }
 0x830   :  { %10162 = vst [vmem:[#allocation44_spill] sm:$0xff] %v6905_v22  ;;  %10163 = vst [vmem:[#allocation48_spill] sm:$0xff] %v6907_v12 }
 0x831   :  { %2095 = vrot.lane.b32.xlu1 %v6791_v58, %s4950_s1  ;;  %2089 = vrot.lane.b32.xlu0 %v6781_v1, %s4950_s1 }
 0x833   :  { %v6913_v30 = vpop.permute.xlu1 %2155  ;;  %v6915_v59 = vpop.permute.xlu0 %2149 }
 0x834   :  { %10164 = vst [vmem:[#allocation55_spill] sm:$0xff] %v6913_v30  ;;  %10165 = vst [vmem:[#allocation53_spill] sm:$0xff] %v6915_v59 }
 0x835   :  { %2079 = vrot.lane.b32.xlu1 %v6736_v40, %s4950_s1  ;;  %2097 = vrot.lane.b32.xlu0 %v6803_v11, %s4950_s1 }
 0x837   :  { %v6921_v44 = vpop.permute.xlu1 %2139  ;;  %v6923_v22 = vpop.permute.xlu0 %2157 }
 0x838   :  { %10166 = vst [vmem:[#allocation52_spill] sm:$0xff] %v6921_v44  ;;  %10167 = vst [vmem:[#allocation50_spill] sm:$0xff] %v6923_v22 }
 0x839   :  { %2103 = vrot.lane.b32.xlu1 %v6777_v33, %s4950_s1  ;;  %2081 = vrot.lane.b32.xlu0 %v6756_v21, %s4950_s1 }
 0x83b   :  { %v6929_v12 = vpop.permute.xlu1 %2163  ;;  %v6931_v30 = vpop.permute.xlu0 %2141 }
 0x83c   :  { %10168 = vst [vmem:[#allocation54_spill] sm:$0xff] %v6929_v12  ;;  %10169 = vst [vmem:[#allocation57_spill] sm:$0xff] %v6931_v30 }
 0x83d   :  { %2151 = vrot.lane.b32.xlu1 %v6750_v13, %s4951_s25  ;;  %2105 = vrot.lane.b32.xlu0 %v6793_v45, %s4950_s1 }
 0x83f   :  { %v6937_v59 = vpop.permute.xlu1 %2211  ;;  %v6939_v44 = vpop.permute.xlu0 %2165 }
 0x840   :  { %10170 = vst [vmem:[#allocation59_spill] sm:$0xff] %v6937_v59  ;;  %10171 = vst [vmem:[#allocation56_spill] sm:$0xff] %v6939_v44 }
 0x841   :  { %2159 = vrot.lane.b32.xlu1 %v6791_v58, %s4951_s25  ;;  %2153 = vrot.lane.b32.xlu0 %v6781_v1, %s4951_s25 }
 0x843   :  { %v6945_v22 = vpop.permute.xlu1 %2219  ;;  %v6947_v12 = vpop.permute.xlu0 %2213 }
 0x844   :  { %10172 = vst [vmem:[#allocation63_spill] sm:$0xff] %v6945_v22  ;;  %10173 = vst [vmem:[#allocation61_spill] sm:$0xff] %v6947_v12 }
 0x845   :  { %2143 = vrot.lane.b32.xlu1 %v6736_v40, %s4951_s25  ;;  %2161 = vrot.lane.b32.xlu0 %v6803_v11, %s4951_s25 }
 0x847   :  { %v6953_v30 = vpop.permute.xlu1 %2203  ;;  %v6955_v59 = vpop.permute.xlu0 %2221 }
 0x848   :  { %10174 = vst [vmem:[#allocation60_spill] sm:$0xff] %v6953_v30  ;;  %10175 = vst [vmem:[#allocation58_spill] sm:$0xff] %v6955_v59 }
 0x849   :  { %2167 = vrot.lane.b32.xlu1 %v6777_v33, %s4951_s25  ;;  %2145 = vrot.lane.b32.xlu0 %v6756_v21, %s4951_s25 }
 0x84b   :  { %v6961_v44 = vpop.permute.xlu1 %2227  ;;  %v6963_v22 = vpop.permute.xlu0 %2205 }
 0x84c   :  { %10176 = vst [vmem:[#allocation62_spill] sm:$0xff] %v6961_v44  ;;  %10177 = vst [vmem:[#allocation65_spill] sm:$0xff] %v6963_v22  ;;  %v4867_v44 = vld [vmem:[%s9724_s4 + $0x4] ss:$12 sps:$4 sm:$0xff]  }
 0x84d   :  { %2215 = vrot.lane.b32.xlu1 %v6750_v13, %s4952_s26  ;;  %2169 = vrot.lane.b32.xlu0 %v6793_v45, %s4951_s25 }
 0x84e   :  { %2471 = vmatprep.mubr.bf16.mxu0 %v4867_v44  ;;  %2577 = vmatprep.mubr.bf16.mxu1 %v4867_v44 }
 0x84f   :  { %v6969_v12 = vpop.permute.xlu1 %2275  ;;  %v6971_v30 = vpop.permute.xlu0 %2229 }
 0x850   :  { %10178 = vst [vmem:[#allocation67_spill] sm:$0xff] %v6969_v12  ;;  %10179 = vst [vmem:[#allocation64_spill] sm:$0xff] %v6971_v30 }
 0x851   :  { %2223 = vrot.lane.b32.xlu1 %v6791_v58, %s4952_s26  ;;  %2217 = vrot.lane.b32.xlu0 %v6781_v1, %s4952_s26 }
 0x853   :  { %v6980_v22 = vpop.permute.xlu1 %2283  ;;  %v6982_v59 = vpop.permute.xlu0 %2277 }
 0x854   :  { %10180 = vst [vmem:[#allocation71_spill] sm:$0xff] %v6980_v22  ;;  %10181 = vst [vmem:[#allocation69_spill] sm:$0xff] %v6982_v59 }
 0x855   :  { %2207 = vrot.lane.b32.xlu1 %v6736_v40, %s4952_s26  ;;  %2225 = vrot.lane.b32.xlu0 %v6803_v11, %s4952_s26 }
 0x857   :  { %v6988_v12 = vpop.permute.xlu1 %2267  ;;  %v6990_v30 = vpop.permute.xlu0 %2285 }
 0x858   :  { %10182 = vst [vmem:[#allocation68_spill] sm:$0xff] %v6988_v12  ;;  %10183 = vst [vmem:[#allocation66_spill] sm:$0xff] %v6990_v30 }
 0x859   :  { %2231 = vrot.lane.b32.xlu1 %v6777_v33, %s4952_s26  ;;  %2209 = vrot.lane.b32.xlu0 %v6756_v21, %s4952_s26 }
 0x85b   :  { %v6996_v22 = vpop.permute.xlu1 %2291  ;;  %v6998_v59 = vpop.permute.xlu0 %2269 }
 0x85c   :  { %10184 = vst [vmem:[#allocation70_spill] sm:$0xff] %v6996_v22  ;;  %10185 = vst [vmem:[#allocation73_spill] sm:$0xff] %v6998_v59 }
 0x85d   :  { %2279 = vrot.lane.b32.xlu1 %v6750_v13, %s4954_s27  ;;  %2233 = vrot.lane.b32.xlu0 %v6793_v45, %s4952_s26 }
 0x85f   :  { %v1824_v44 = vpop.permute.xlu1 %1823  ;;  %v7004_v12 = vpop.permute.xlu0 %2293 }
 0x860   :  { %10186 = vst [vmem:[#allocation74_spill] sm:$0xff] %v7004_v12  ;;  %v1924_v12 = vsel %vm93_vm0, %v6774_v34, %v6789_v43 }
 0x861   :  { %2287 = vrot.lane.b32.xlu1 %v6791_v58, %s4954_s27  ;;  %2281 = vrot.lane.b32.xlu0 %v6781_v1, %s4954_s27  ;;  %v1936_v51 = vmul.f32 %v1924_v12, %v5121_v14 }
 0x863   :  { %v1832_v30 = vpop.permute.xlu1 %1831  ;;  %v1826_v2 = vpop.permute.xlu0 %1825 }
 0x864   :  { %v1861_v22 = vsel %vm54_vm1, %v1824_v44, %v1832_v30 }
 0x865   :  { %2271 = vrot.lane.b32.xlu1 %v6736_v40, %s4954_s27  ;;  %2289 = vrot.lane.b32.xlu0 %v6803_v11, %s4954_s27  ;;  %v1923_v40 = vsel %vm93_vm0, %v6753_v19, %v6772_v41  ;;  %v1876_v11 = vmul.f32 %v1861_v22, %v10149_v60  ;;  %v1916_v19 = vsel %vm93_vm0, %v6811_v56, %v6801_v27 }
 0x867   :  { %v1848_v59 = vpop.permute.xlu1 %1847  ;;  %v1834_v13 = vpop.permute.xlu0 %1833 }
 0x868   :  { %v1862_v58 = vsel %vm54_vm1, %v1826_v2, %v1834_v13  ;;  %v1865_v52 = vsel %vm54_vm1, %v1848_v59, %v1824_v44 }
 0x869   :  { %v1880_v1 = vmul.f32 %v1862_v58, %v10149_v60  ;;  %2295 = vrot.lane.b32.xlu1 %v6777_v33, %s4954_s27  ;;  %2273 = vrot.lane.b32.xlu0 %v6756_v21, %s4954_s27  ;;  %v1932_v58 = vmul.f32 %v1923_v40, %v5121_v14  ;;  %v1928_v60 = vsel %vm93_vm0, %v6801_v27, %v6774_v34 }
 0x86a   :  { %v1875_v12 = vmul.f32 %v1865_v52, %v10151_v38  ;;  %v1931_v40 = vmul.f32 %v1927_v15, %v5142_v25  ;;  %v1935_v52 = vmul.f32 %v1928_v60, %v5142_v25 }
 0x86b   :  { %v1840_v0 = vpop.permute.xlu1 %1839  ;;  %v1850_v22 = vpop.permute.xlu0 %1849  ;;  %v2336_v49 = vpack.c.bf16 %v1880_v1, %v1876_v11  ;;  %v1915_v1 = vsel %vm93_vm0, %v6799_v4, %v6787_v50  ;;  %v1919_v50 = vsel %vm93_vm0, %v6772_v41, %v6799_v4 }
 0x86c   :  { %v1866_v44 = vsel %vm54_vm1, %v1850_v22, %v1826_v2  ;;  %v1853_v34 = vsel %vm54_vm1, %v1840_v0, %v1848_v59  ;;  %v1857_v2 = vsel %vm54_vm1, %v1832_v30, %v1840_v0  ;;  %v1938_v59 = vmul.f32 %v1916_v19, %v5152_v32 }
 0x86d   :  { %v1879_v33 = vmul.f32 %v1866_v44, %v10151_v38  ;;  %2297 = vrot.lane.b32.xlu0 %v6793_v45, %s4954_s27  ;;  %2441 = vmatprep.subr.bf16.mxu0 %v2336_v49  ;;  %v2340_v38 = vpack.c.bf16 %v1936_v51, %v1932_v58  ;;  %v1920_v49 = vsel %vm93_vm0, %v6789_v43, %v6811_v56 }
 0x86e   :  { %v1877_v15 = vmul.f32 %v1857_v2, %v5157_v35  ;;  %v1878_v60 = vmul.f32 %v1853_v34, %v5149_v31  ;;  %v1934_v43 = vmul.f32 %v1915_v1, %v5152_v32  ;;  %v2339_v56 = vpack.c.bf16 %v1935_v52, %v1931_v40 }
 0x86f   :  { %v2335_v27 = vpack.c.bf16 %v1879_v33, %v1875_v12  ;;  %v1888_v11 = vpop.permute.xlu1 %1887  ;;  %v1842_v44 = vpop.permute.xlu0 %1841  ;;  %v1937_v12 = vmul.f32 %v1920_v49, %v5160_v36  ;;  %v1933_v2 = vmul.f32 %v1919_v50, %v5160_v36  ;;  %v1988_v40 = vsel %vm133_vm2, %v6819_v48, %v6827_v20 }
 0x870   :  { %v1854_v30 = vsel %vm54_vm1, %v1842_v44, %v1850_v22  ;;  %v1858_v0 = vsel %vm54_vm1, %v1834_v13, %v1842_v44  ;;  %v2342_v34 = vpack.c.bf16 %v1938_v59, %v1934_v43  ;;  %v1987_v49 = vsel %vm133_vm2, %v6809_v10, %v6817_v37 }
 0x871   :  { %v1881_v33 = vmul.f32 %v1858_v0, %v5157_v35  ;;  %v1882_v51 = vmul.f32 %v1854_v30, %v5149_v31  ;;  %2442 = vmatpush1.bf16.msra.mxu0 %v2335_v27  ;;  %v2341_v4 = vpack.c.bf16 %v1937_v12, %v1933_v2  ;;  %v1991_v30 = vsel %vm133_vm2, %v6825_v53, %v6809_v10 }
 0x872   :  { %2443 = vmatprep.subr.bf16.mxu0 %v2340_v38  ;;  %v2000_v0 = vmul.f32 %v1988_v40, %v5183_v54  ;;  %v1980_v10 = vsel %vm133_vm2, %v6843_v6, %v6835_v24 }
 0x873   :  { %v2337_v22 = vpack.c.bf16 %v1881_v33, %v1877_v15  ;;  %v1896_v13 = vpop.permute.xlu1 %1895  ;;  %v1890_v58 = vpop.permute.xlu0 %1889  ;;  %v2338_v19 = vpack.c.bf16 %v1882_v51, %v1878_v60  ;;  %v1992_v51 = vsel %vm133_vm2, %v6835_v24, %v6819_v48 }
 0x874   :  { %v1925_v27 = vsel %vm93_vm0, %v1888_v11, %v1896_v13  ;;  %v1999_v24 = vmul.f32 %v1992_v51, %v5198_v63 }
 0x875   :  { %2444 = vmatpush1.bf16.msra.mxu0 %v2339_v56  ;;  %2547 = vmatprep.subr.bf16.mxu1 %v2338_v19  ;;  %v1940_v52 = vmul.f32 %v1925_v27, %v5121_v14  ;;  %v1979_v19 = vsel %vm133_vm2, %v6833_v57, %v6825_v53 }
 0x876   :  { %2548 = vmatpush1.bf16.msra.mxu1 %v2337_v22  ;;  %v1995_v22 = vmul.f32 %v1991_v30, %v5198_v63 }
 0x877   :  { %v1912_v41 = vpop.permute.xlu1 %1911  ;;  %2549 = vmatprep.subr.bf16.mxu1 %v2342_v34  ;;  %v1898_v38 = vpop.permute.xlu0 %1897 }
 0x878   :  { %v1926_v1 = vsel %vm93_vm0, %v1890_v58, %v1898_v38  ;;  %v1929_v59 = vsel %vm93_vm0, %v1912_v41, %v1888_v11  ;;  %v1996_v11 = vmul.f32 %v1987_v49, %v5183_v54  ;;  %v2347_v49 = vpack.c.bf16 %v1999_v24, %v1995_v22 }
 0x879   :  { %v1944_v44 = vmul.f32 %v1926_v1, %v5121_v14  ;;  %v1939_v43 = vmul.f32 %v1929_v59, %v5142_v25  ;;  %v2051_v22 = vsel %vm173_vm3, %v6841_v9, %v6849_v18 }
 0x87a   :  { %2550 = vmatpush1.bf16.msra.mxu1 %v2341_v4  ;;  %v2348_v27 = vpack.c.bf16 %v2000_v0, %v1996_v11  ;;  %v1984_v4 = vsel %vm133_vm2, %v6827_v20, %v6843_v6  ;;  %v1983_v20 = vsel %vm133_vm2, %v6817_v37, %v6833_v57  ;;  %v1998_v6 = vmul.f32 %v1979_v19, %v5219_v26 }
 0x87b   :  { %v1904_v15 = vpop.permute.xlu1 %1903  ;;  %v1914_v60 = vpop.permute.xlu0 %1913  ;;  %v2344_v33 = vpack.c.bf16 %v1944_v44, %v1940_v52  ;;  %v2052_v11 = vsel %vm173_vm3, %v6851_v61, %v6859_v3 }
 0x87c   :  { %v1930_v50 = vsel %vm93_vm0, %v1914_v60, %v1890_v58  ;;  %v1917_v48 = vsel %vm93_vm0, %v1904_v15, %v1912_v41  ;;  %v1921_v58 = vsel %vm93_vm0, %v1896_v13, %v1904_v15  ;;  %v2002_v41 = vmul.f32 %v1980_v10, %v5219_v26 }
 0x87d   :  { %v1943_v56 = vmul.f32 %v1930_v50, %v5142_v25  ;;  %2445 = vmatprep.subr.bf16.mxu0 %v2344_v33  ;;  %v1941_v53 = vmul.f32 %v1921_v58, %v5160_v36  ;;  %v1942_v1 = vmul.f32 %v1917_v48, %v5152_v32  ;;  %v2001_v15 = vmul.f32 %v1984_v4, %v5216_v23 }
 0x87e   :  { %v1997_v33 = vmul.f32 %v1983_v20, %v5216_v23  ;;  %v2055_v58 = vsel %vm173_vm3, %v6857_v28, %v6841_v9  ;;  %v2064_v19 = vmul.f32 %v2052_v11, %v5186_v55  ;;  %v2044_v9 = vsel %vm173_vm3, %v6875_v42, %v6867_v47 }
 0x87f   :  { %v2343_v12 = vpack.c.bf16 %v1943_v56, %v1939_v43  ;;  %v1952_v34 = vpop.permute.xlu1 %1951  ;;  %v1906_v2 = vpop.permute.xlu0 %1905 }
 0x880   :  { %v1918_v13 = vsel %vm93_vm0, %v1906_v2, %v1914_v60  ;;  %v1922_v40 = vsel %vm93_vm0, %v1898_v38, %v1906_v2  ;;  %v2350_v60 = vpack.c.bf16 %v2002_v41, %v1998_v6  ;;  %v2349_v50 = vpack.c.bf16 %v2001_v15, %v1997_v33 }
 0x881   :  { %v1945_v52 = vmul.f32 %v1922_v40, %v5160_v36  ;;  %v1946_v44 = vmul.f32 %v1918_v13, %v5152_v32  ;;  %2446 = vmatpush1.bf16.msra.mxu0 %v2343_v12  ;;  %v2059_v40 = vmul.f32 %v2055_v58, %v5195_v62 }
 0x882   :  { %2447 = vmatprep.subr.bf16.mxu0 %v2348_v27  ;;  %v2056_v27 = vsel %vm173_vm3, %v6867_v47, %v6851_v61 }
 0x883   :  { %v2345_v59 = vpack.c.bf16 %v1945_v52, %v1941_v53  ;;  %v1960_v38 = vpop.permute.xlu1 %1959  ;;  %v1954_v30 = vpop.permute.xlu0 %1953  ;;  %v2346_v0 = vpack.c.bf16 %v1946_v44, %v1942_v1  ;;  %v2043_v1 = vsel %vm173_vm3, %v6865_v8, %v6857_v28  ;;  %v2063_v47 = vmul.f32 %v2056_v27, %v5195_v62 }
 0x884   :  { %v1989_v51 = vsel %vm133_vm2, %v1952_v34, %v1960_v38 }
 0x885   :  { %2448 = vmatpush1.bf16.msra.mxu0 %v2347_v49  ;;  %2551 = vmatprep.subr.bf16.mxu1 %v2346_v0  ;;  %v2004_v43 = vmul.f32 %v1989_v51, %v5183_v54  ;;  %v2048_v49 = vsel %vm173_vm3, %v6859_v3, %v6875_v42  ;;  %v2047_v42 = vsel %vm173_vm3, %v6849_v18, %v6865_v8 }
 0x886   :  { %2552 = vmatpush1.bf16.msra.mxu1 %v2345_v59  ;;  %v2066_v59 = vmul.f32 %v2044_v9, %v5208_v17  ;;  %v2062_v3 = vmul.f32 %v2043_v1, %v5208_v17  ;;  %v2355_v33 = vpack.c.bf16 %v2063_v47, %v2059_v40  ;;  %v2065_v11 = vmul.f32 %v2048_v49, %v5205_v16 }
 0x887   :  { %v1976_v37 = vpop.permute.xlu1 %1975  ;;  %2553 = vmatprep.subr.bf16.mxu1 %v2350_v60  ;;  %v1962_v57 = vpop.permute.xlu0 %1961  ;;  %v2112_v1 = vsel %vm213_vm4, %v6883_v5, %v6891_v39 }
 0x888   :  { %v1990_v10 = vsel %vm133_vm2, %v1954_v30, %v1962_v57  ;;  %v1993_v48 = vsel %vm133_vm2, %v1976_v37, %v1952_v34  ;;  %v2060_v34 = vmul.f32 %v2051_v22, %v5186_v55 }
 0x889   :  { %v2008_v56 = vmul.f32 %v1990_v10, %v5183_v54  ;;  %v2003_v41 = vmul.f32 %v1993_v48, %v5198_v63  ;;  %v2358_v10 = vpack.c.bf16 %v2066_v59, %v2062_v3  ;;  %v10193_v3 = vld [vmem:[#allocation16_spill] sm:$0xff] }
 0x88a   :  { %2554 = vmatpush1.bf16.msra.mxu1 %v2349_v50  ;;  %v2356_v6 = vpack.c.bf16 %v2064_v19, %v2060_v34 }
 0x88b   :  { %v1968_v24 = vpop.permute.xlu1 %1967  ;;  %v1978_v12 = vpop.permute.xlu0 %1977  ;;  %v2352_v2 = vpack.c.bf16 %v2008_v56, %v2004_v43  ;;  %v2061_v43 = vmul.f32 %v2047_v42, %v5205_v16  ;;  %v10191_v42 = vld [vmem:[#allocation34_spill] sm:$0xff] }
 0x88c   :  { %v1994_v4 = vsel %vm133_vm2, %v1978_v12, %v1954_v30  ;;  %v1981_v61 = vsel %vm133_vm2, %v1968_v24, %v1976_v37  ;;  %v1985_v53 = vsel %vm133_vm2, %v1960_v38, %v1968_v24 }
 0x88d   :  { %v2007_v13 = vmul.f32 %v1994_v4, %v5198_v63  ;;  %2449 = vmatprep.subr.bf16.mxu0 %v2352_v2  ;;  %v2005_v28 = vmul.f32 %v1985_v53, %v5216_v23  ;;  %v2006_v0 = vmul.f32 %v1981_v61, %v5219_v26  ;;  %v2357_v22 = vpack.c.bf16 %v2065_v11, %v2061_v43  ;;  %v10194_v11 = vld [vmem:[#allocation33_spill] sm:$0xff] }
 0x88f   :  { %v2351_v52 = vpack.c.bf16 %v2007_v13, %v2003_v41  ;;  %v2016_v44 = vpop.permute.xlu1 %2015  ;;  %v1970_v20 = vpop.permute.xlu0 %1969 }
 0x890   :  { %v1982_v38 = vsel %vm133_vm2, %v1970_v20, %v1978_v12  ;;  %v1986_v30 = vsel %vm133_vm2, %v1962_v57, %v1970_v20 }
 0x891   :  { %v2009_v15 = vmul.f32 %v1986_v30, %v5216_v23  ;;  %v2010_v60 = vmul.f32 %v1982_v38, %v5219_v26  ;;  %2450 = vmatpush1.bf16.msra.mxu0 %v2351_v52  ;;  %v10187_v38 = vld [vmem:[#allocation39_spill] sm:$0xff]  ;;  %v10188_v30 = vld [vmem:[#allocation49_spill] sm:$0xff] }
 0x892   :  { %2451 = vmatprep.subr.bf16.mxu0 %v2356_v6 }
 0x893   :  { %v2353_v51 = vpack.c.bf16 %v2009_v15, %v2005_v28  ;;  %v2024_v37 = vpop.permute.xlu1 %2023  ;;  %v2018_v57 = vpop.permute.xlu0 %2017  ;;  %v2354_v50 = vpack.c.bf16 %v2010_v60, %v2006_v0  ;;  %v2111_v28 = vsel %vm213_vm4, %v10188_v30, %v10187_v38  ;;  %v10189_v0 = vld [vmem:[#allocation36_spill] sm:$0xff] }
 0x894   :  { %v2053_v56 = vsel %vm173_vm3, %v2016_v44, %v2024_v37  ;;  %v10190_v15 = vld [vmem:[#allocation32_spill] sm:$0xff] }
 0x895   :  { %2452 = vmatpush1.bf16.msra.mxu0 %v2355_v33  ;;  %2555 = vmatprep.subr.bf16.mxu1 %v2354_v50  ;;  %v2068_v58 = vmul.f32 %v2053_v56, %v5186_v55  ;;  %v2363_v60 = vpack.c.bf16 %v10190_v15, %v10189_v0  ;;  %v2128_v33 = vmul.f32 %v2112_v1, %v10193_v3  ;;  %v10196_v56 = vld [vmem:[#allocation42_spill] sm:$0xff] }
 0x896   :  { %2556 = vmatpush1.bf16.msra.mxu1 %v2353_v51 }
 0x897   :  { %v2040_v18 = vpop.permute.xlu1 %2039  ;;  %2557 = vmatprep.subr.bf16.mxu1 %v2358_v10  ;;  %v2026_v8 = vpop.permute.xlu0 %2025  ;;  %v10195_v10 = vld [vmem:[#allocation35_spill] sm:$0xff] }
 0x898   :  { %v2054_v48 = vsel %vm173_vm3, %v2018_v57, %v2026_v8  ;;  %v2057_v24 = vsel %vm173_vm3, %v2040_v18, %v2016_v44  ;;  %v2364_v44 = vpack.c.bf16 %v6584_v29, %v6573_v46  ;;  %v10192_v46 = vld [vmem:[#allocation37_spill] sm:$0xff]  ;;  %v2365_v43 = vpack.c.bf16 %v10195_v10, %v10194_v11 }
 0x899   :  { %v2072_v19 = vmul.f32 %v2054_v48, %v5186_v55  ;;  %v2067_v34 = vmul.f32 %v2057_v24, %v5195_v62  ;;  %v2366_v29 = vpack.c.bf16 %v10192_v46, %v10191_v42  ;;  %v10200_v24 = vld [vmem:[#allocation45_spill] sm:$0xff] }
 0x89a   :  { %2558 = vmatpush1.bf16.msra.mxu1 %v2357_v22  ;;  %v10198_v22 = vld [vmem:[#allocation40_spill] sm:$0xff] }
 0x89b   :  { %v2032_v12 = vpop.permute.xlu1 %2031  ;;  %v2042_v2 = vpop.permute.xlu0 %2041  ;;  %v2360_v27 = vpack.c.bf16 %v2072_v19, %v2068_v58  ;;  %v10199_v58 = vld [vmem:[#allocation38_spill] sm:$0xff] }
 0x89c   :  { %v2058_v4 = vsel %vm173_vm3, %v2042_v2, %v2018_v57  ;;  %v2045_v41 = vsel %vm173_vm3, %v2032_v12, %v2040_v18  ;;  %v2049_v13 = vsel %vm173_vm3, %v2024_v37, %v2032_v12  ;;  %v2116_v18 = vsel %vm213_vm4, %v10196_v56, %v6883_v5 }
 0x89d   :  { %v2071_v9 = vmul.f32 %v2058_v4, %v5195_v62  ;;  %2453 = vmatprep.subr.bf16.mxu0 %v2360_v27  ;;  %v2069_v20 = vmul.f32 %v2049_v13, %v5205_v16  ;;  %v2070_v6 = vmul.f32 %v2045_v41, %v5208_v17  ;;  %v2367_v19 = vpack.c.bf16 %v6756_v21, %v10199_v58  ;;  %v10201_v27 = vld [vmem:[#allocation48_spill] sm:$0xff]  ;;  %v10204_v13 = vld [vmem:[#allocation18_spill] sm:$0xff] }
 0x89e   :  { %v2370_v12 = vpack.c.bf16 %v6793_v45, %v10200_v24  ;;  %v2108_v4 = vsel %vm213_vm4, %v6891_v39, %v10201_v27  ;;  %v2120_v5 = vsel %vm213_vm4, %v10201_v27, %v10196_v56  ;;  %v10203_v45 = vld [vmem:[#allocation41_spill] sm:$0xff] }
 0x89f   :  { %v2359_v40 = vpack.c.bf16 %v2071_v9, %v2067_v34  ;;  %v2088_v61 = vpop.permute.xlu1 %2087  ;;  %v2034_v53 = vpop.permute.xlu0 %2033  ;;  %v10202_v34 = vld [vmem:[#allocation51_spill] sm:$0xff]  ;;  %v2107_v9 = vsel %vm213_vm4, %v10187_v38, %v10203_v45  ;;  %v10215_v27 = vld [vmem:[#allocation57_spill] sm:$0xff] }
 0x8a0   :  { %v2046_v47 = vsel %vm173_vm3, %v2034_v53, %v2042_v2  ;;  %v2050_v52 = vsel %vm173_vm3, %v2026_v8, %v2034_v53  ;;  %v10197_v8 = vld [vmem:[#allocation46_spill] sm:$0xff]  ;;  %v2124_v2 = vmul.f32 %v2111_v28, %v10193_v3  ;;  %v2115_v21 = vsel %vm213_vm4, %v10202_v34, %v10188_v30  ;;  %v10210_v28 = vld [vmem:[#allocation53_spill] sm:$0xff] }
 0x8a1   :  { %v2073_v49 = vmul.f32 %v2050_v52, %v5205_v16  ;;  %v2074_v59 = vmul.f32 %v2046_v47, %v5208_v17  ;;  %2454 = vmatpush1.bf16.msra.mxu0 %v2359_v40  ;;  %v2368_v48 = vpack.c.bf16 %v10198_v22, %v10197_v8  ;;  %v2119_v41 = vsel %vm213_vm4, %v10203_v45, %v10202_v34  ;;  %v10205_v52 = vld [vmem:[#allocation43_spill] sm:$0xff]  ;;  %v10209_v30 = vld [vmem:[#allocation50_spill] sm:$0xff]  ;;  %v10214_v22 = vld [vmem:[#allocation20_spill] sm:$0xff] }
 0x8a2   :  { %2455 = vmatprep.subr.bf16.mxu0 %v2364_v44  ;;  %v2127_v40 = vmul.f32 %v2116_v18, %v10204_v13  ;;  %v2372_v47 = vpack.c.bf16 %v2128_v33, %v2124_v2  ;;  %v10206_v44 = vld [vmem:[#allocation47_spill] sm:$0xff]  ;;  %v2176_v0 = vsel %vm253_vm5, %v10210_v28, %v10209_v30  ;;  %v10213_v18 = vld [vmem:[#allocation52_spill] sm:$0xff] }
 0x8a3   :  { %v2361_v51 = vpack.c.bf16 %v2073_v49, %v2069_v20  ;;  %v2096_v37 = vpop.permute.xlu1 %2095  ;;  %v2090_v57 = vpop.permute.xlu0 %2089  ;;  %v2362_v50 = vpack.c.bf16 %v2074_v59, %v2070_v6  ;;  %v2369_v20 = vpack.c.bf16 %v10206_v44, %v10205_v52  ;;  %v10207_v6 = vld [vmem:[#allocation17_spill] sm:$0xff]  ;;  %v10208_v59 = vld [vmem:[#allocation19_spill] sm:$0xff]  ;;  %v10216_v34 = vld [vmem:[#allocation56_spill] sm:$0xff] }
 0x8a4   :  { %v2113_v39 = vsel %vm213_vm4, %v2088_v61, %v2096_v37  ;;  %v2129_v49 = vmul.f32 %v2108_v4, %v10207_v6  ;;  %v2130_v38 = vmul.f32 %v2120_v5, %v10208_v59  ;;  %v2125_v42 = vmul.f32 %v2107_v9, %v10207_v6  ;;  %v10217_v9 = vld [vmem:[#allocation23_spill] sm:$0xff] }
 0x8a5   :  { %2456 = vmatpush1.bf16.msra.mxu0 %v2363_v60  ;;  %2559 = vmatprep.subr.bf16.mxu1 %v2362_v50  ;;  %v2123_v60 = vmul.f32 %v2115_v21, %v10204_v13  ;;  %v2132_v46 = vmul.f32 %v2113_v39, %v10193_v3  ;;  %v2126_v33 = vmul.f32 %v2119_v41, %v10208_v59  ;;  %v10212_v50 = vld [vmem:[#allocation44_spill] sm:$0xff] }
 0x8a6   :  { %2457 = vmatprep.subr.bf16.mxu0 %v2368_v48  ;;  %2560 = vmatpush1.bf16.msra.mxu1 %v2361_v51  ;;  %v10211_v51 = vld [vmem:[#allocation55_spill] sm:$0xff]  ;;  %v2179_v8 = vsel %vm253_vm5, %v10213_v18, %v10212_v50  ;;  %v2192_v48 = vmul.f32 %v2176_v0, %v10214_v22  ;;  %v2373_v2 = vpack.c.bf16 %v2129_v49, %v2125_v42 }
 0x8a7   :  { %v2080_v53 = vpop.permute.xlu1 %2079  ;;  %2561 = vmatprep.subr.bf16.mxu1 %v2366_v29  ;;  %v2098_v1 = vpop.permute.xlu0 %2097  ;;  %v2175_v11 = vsel %vm253_vm5, %v10212_v50, %v10211_v51  ;;  %v2371_v56 = vpack.c.bf16 %v2127_v40, %v2123_v60  ;;  %v2374_v4 = vpack.c.bf16 %v2130_v38, %v2126_v33  ;;  %v2184_v21 = vsel %vm253_vm5, %v10216_v34, %v10215_v27  ;;  %v10218_v40 = vld [vmem:[#allocation54_spill] sm:$0xff] }
 0x8a8   :  { %v2114_v15 = vsel %vm213_vm4, %v2090_v57, %v2098_v1  ;;  %v2117_v10 = vsel %vm213_vm4, %v2080_v53, %v2088_v61  ;;  %v2180_v61 = vsel %vm253_vm5, %v10215_v27, %v10210_v28  ;;  %v2188_v5 = vmul.f32 %v2175_v11, %v10214_v22  ;;  %v10221_v27 = vld [vmem:[#allocation58_spill] sm:$0xff] }
 0x8a9   :  { %v2136_v29 = vmul.f32 %v2114_v15, %v10193_v3  ;;  %2458 = vmatpush1.bf16.msra.mxu0 %v2367_v19  ;;  %v2187_v39 = vmul.f32 %v2179_v8, %v10217_v9  ;;  %v2191_v52 = vmul.f32 %v2180_v61, %v10217_v9  ;;  %v10222_v61 = vld [vmem:[#allocation61_spill] sm:$0xff] }
 0x8aa   :  { %2459 = vmatprep.subr.bf16.mxu0 %v2372_v47  ;;  %2562 = vmatpush1.bf16.msra.mxu1 %v2365_v43  ;;  %v2183_v47 = vsel %vm253_vm5, %v10218_v40, %v10213_v18  ;;  %v2380_v28 = vpack.c.bf16 %v2192_v48, %v2188_v5  ;;  %v10220_v18 = vld [vmem:[#allocation26_spill] sm:$0xff] }
 0x8ab   :  { %v2104_v58 = vpop.permute.xlu1 %2103  ;;  %2563 = vmatprep.subr.bf16.mxu1 %v2370_v12  ;;  %v2082_v19 = vpop.permute.xlu0 %2081  ;;  %v2376_v24 = vpack.c.bf16 %v2136_v29, %v2132_v46  ;;  %v2131_v12 = vmul.f32 %v2117_v10, %v10204_v13  ;;  %v2379_v33 = vpack.c.bf16 %v2191_v52, %v2187_v39 }
 0x8ac   :  { %v2118_v43 = vsel %vm213_vm4, %v2082_v19, %v2090_v57  ;;  %v2109_v41 = vsel %vm213_vm4, %v2096_v37, %v2104_v58  ;;  %v2121_v57 = vsel %vm213_vm4, %v2104_v58, %v2080_v53  ;;  %v2172_v37 = vsel %vm253_vm5, %v10209_v30, %v10216_v34  ;;  %v10219_v53 = vld [vmem:[#allocation27_spill] sm:$0xff] }
 0x8ad   :  { %v2135_v45 = vmul.f32 %v2118_v43, %v10204_v13  ;;  %2460 = vmatpush1.bf16.msra.mxu0 %v2371_v56  ;;  %v2194_v0 = vmul.f32 %v2184_v21, %v10219_v53  ;;  %v2133_v60 = vmul.f32 %v2109_v41, %v10207_v6  ;;  %v2134_v42 = vmul.f32 %v2121_v57, %v10208_v59  ;;  %v10223_v21 = vld [vmem:[#allocation63_spill] sm:$0xff]  ;;  %v10225_v41 = vld [vmem:[#allocation60_spill] sm:$0xff] }
 0x8ae   :  { %2461 = vmatprep.subr.bf16.mxu0 %v2376_v24  ;;  %2564 = vmatpush1.bf16.msra.mxu1 %v2369_v20  ;;  %v2171_v30 = vsel %vm253_vm5, %v10211_v51, %v10218_v40  ;;  %v2193_v8 = vmul.f32 %v2172_v37, %v10220_v18  ;;  %v2240_v43 = vsel %vm293_vm6, %v10222_v61, %v10221_v27  ;;  %v10226_v40 = vld [vmem:[#allocation21_spill] sm:$0xff] }
 0x8af   :  { %v2375_v44 = vpack.c.bf16 %v2135_v45, %v2131_v12  ;;  %v2152_v49 = vpop.permute.xlu1 %2151  ;;  %2565 = vmatprep.subr.bf16.mxu1 %v2374_v4  ;;  %v2106_v38 = vpop.permute.xlu0 %2105  ;;  %v2189_v58 = vmul.f32 %v2171_v30, %v10220_v18  ;;  %v10224_v12 = vld [vmem:[#allocation59_spill] sm:$0xff] }
 0x8b0   :  { %v2110_v20 = vsel %vm213_vm4, %v2098_v1, %v2106_v38  ;;  %v2122_v15 = vsel %vm213_vm4, %v2106_v38, %v2082_v19  ;;  %v2190_v1 = vmul.f32 %v2183_v47, %v10219_v53  ;;  %v2239_v45 = vsel %vm293_vm6, %v10224_v12, %v10223_v21 }
 0x8b1   :  { %v2137_v46 = vmul.f32 %v2110_v20, %v10207_v6  ;;  %v2138_v29 = vmul.f32 %v2122_v15, %v10208_v59  ;;  %2462 = vmatpush1.bf16.msra.mxu0 %v2375_v44  ;;  %v2243_v57 = vsel %vm293_vm6, %v10225_v41, %v10224_v12  ;;  %v2256_v47 = vmul.f32 %v2240_v43, %v10226_v40  ;;  %v10228_v20 = vld [vmem:[#allocation64_spill] sm:$0xff] }
 0x8b2   :  { %2463 = vmatprep.subr.bf16.mxu0 %v2380_v28  ;;  %2566 = vmatpush1.bf16.msra.mxu1 %v2373_v2  ;;  %v2382_v48 = vpack.c.bf16 %v2194_v0, %v2190_v1  ;;  %v2381_v2 = vpack.c.bf16 %v2193_v8, %v2189_v58  ;;  %v10227_v28 = vld [vmem:[#allocation65_spill] sm:$0xff] }
 0x8b3   :  { %v2377_v50 = vpack.c.bf16 %v2137_v46, %v2133_v60  ;;  %v2160_v11 = vpop.permute.xlu1 %2159  ;;  %v2154_v10 = vpop.permute.xlu0 %2153  ;;  %v2378_v56 = vpack.c.bf16 %v2138_v29, %v2134_v42  ;;  %v2244_v37 = vsel %vm293_vm6, %v10227_v28, %v10222_v61  ;;  %v2248_v15 = vsel %vm293_vm6, %v10228_v20, %v10227_v28  ;;  %v10229_v46 = vld [vmem:[#allocation22_spill] sm:$0xff] }
 0x8b4   :  { %v2177_v19 = vsel %vm253_vm5, %v2152_v49, %v2160_v11  ;;  %v2251_v29 = vmul.f32 %v2243_v57, %v10229_v46 }
 0x8b5   :  { %2464 = vmatpush1.bf16.msra.mxu0 %v2379_v33  ;;  %2567 = vmatprep.subr.bf16.mxu1 %v2378_v56  ;;  %v2196_v5 = vmul.f32 %v2177_v19, %v10214_v22  ;;  %v10230_v33 = vld [vmem:[#allocation62_spill] sm:$0xff]  ;;  %v2236_v19 = vsel %vm293_vm6, %v10221_v27, %v10228_v20  ;;  %v10234_v20 = vld [vmem:[#allocation69_spill] sm:$0xff] }
 0x8b6   :  { %2568 = vmatpush1.bf16.msra.mxu1 %v2377_v50  ;;  %v2247_v50 = vsel %vm293_vm6, %v10230_v33, %v10225_v41  ;;  %v2235_v27 = vsel %vm293_vm6, %v10223_v21, %v10230_v33 }
 0x8b7   :  { %v2144_v51 = vpop.permute.xlu1 %2143  ;;  %2569 = vmatprep.subr.bf16.mxu1 %v2382_v48  ;;  %v2162_v24 = vpop.permute.xlu0 %2161 }
 0x8b8   :  { %v2178_v4 = vsel %vm253_vm5, %v2154_v10, %v2162_v24  ;;  %v2181_v39 = vsel %vm253_vm5, %v2144_v51, %v2152_v49  ;;  %v2252_v49 = vmul.f32 %v2239_v45, %v10226_v40 }
 0x8b9   :  { %v2200_v34 = vmul.f32 %v2178_v4, %v10214_v22  ;;  %v2195_v60 = vmul.f32 %v2181_v39, %v10217_v9 }
 0x8ba   :  { %2570 = vmatpush1.bf16.msra.mxu1 %v2381_v2  ;;  %v2388_v58 = vpack.c.bf16 %v2256_v47, %v2252_v49  ;;  %v10232_v47 = vld [vmem:[#allocation24_spill] sm:$0xff]  ;;  %v10233_v49 = vld [vmem:[#allocation66_spill] sm:$0xff] }
 0x8bb   :  { %v2168_v52 = vpop.permute.xlu1 %2167  ;;  %v2146_v44 = vpop.permute.xlu0 %2145  ;;  %v2384_v38 = vpack.c.bf16 %v2200_v34, %v2196_v5 }
 0x8bc   :  { %v2182_v0 = vsel %vm253_vm5, %v2146_v44, %v2154_v10  ;;  %v2173_v30 = vsel %vm253_vm5, %v2160_v11, %v2168_v52  ;;  %v2185_v1 = vsel %vm253_vm5, %v2168_v52, %v2144_v51  ;;  %v2255_v10 = vmul.f32 %v2244_v37, %v10229_v46  ;;  %v10231_v11 = vld [vmem:[#allocation25_spill] sm:$0xff] }
 0x8bd   :  { %v2199_v42 = vmul.f32 %v2182_v0, %v10217_v9  ;;  %2465 = vmatprep.subr.bf16.mxu0 %v2384_v38  ;;  %v2258_v2 = vmul.f32 %v2248_v15, %v10231_v11  ;;  %v2197_v43 = vmul.f32 %v2173_v30, %v10220_v18  ;;  %v2198_v4 = vmul.f32 %v2185_v1, %v10219_v53  ;;  %v10235_v30 = vld [vmem:[#allocation71_spill] sm:$0xff] }
 0x8be   :  { %v2387_v12 = vpack.c.bf16 %v2255_v10, %v2251_v29  ;;  %v2257_v52 = vmul.f32 %v2236_v19, %v10232_v47  ;;  %v2253_v38 = vmul.f32 %v2235_v27, %v10232_v47  ;;  %v2304_v15 = vsel %vm333_vm7, %v10234_v20, %v10233_v49  ;;  %v10236_v1 = vld [vmem:[#allocation67_spill] sm:$0xff]  ;;  %v10237_v10 = vld [vmem:[#allocation68_spill] sm:$0xff] }
 0x8bf   :  { %v2383_v56 = vpack.c.bf16 %v2199_v42, %v2195_v60  ;;  %v2216_v8 = vpop.permute.xlu1 %2215  ;;  %v2170_v48 = vpop.permute.xlu0 %2169  ;;  %v2303_v33 = vsel %vm333_vm7, %v10236_v1, %v10235_v30 }
 0x8c0   :  { %v2174_v51 = vsel %vm253_vm5, %v2162_v24, %v2170_v48  ;;  %v2186_v61 = vsel %vm253_vm5, %v2170_v48, %v2146_v44  ;;  %v2254_v24 = vmul.f32 %v2247_v50, %v10231_v11  ;;  %v2389_v0 = vpack.c.bf16 %v2257_v52, %v2253_v38  ;;  %v10238_v48 = vld [vmem:[#allocation30_spill] sm:$0xff] }
 0x8c1   :  { %v2201_v5 = vmul.f32 %v2174_v51, %v10220_v18  ;;  %v2202_v34 = vmul.f32 %v2186_v61, %v10219_v53  ;;  %2466 = vmatpush1.bf16.msra.mxu0 %v2383_v56  ;;  %v2307_v56 = vsel %vm333_vm7, %v10237_v10, %v10236_v1  ;;  %v10239_v61 = vld [vmem:[#allocation73_spill] sm:$0xff]  ;;  %v10242_v52 = vld [vmem:[#allocation70_spill] sm:$0xff] }
 0x8c2   :  { %2467 = vmatprep.subr.bf16.mxu0 %v2388_v58  ;;  %v2390_v44 = vpack.c.bf16 %v2258_v2, %v2254_v24  ;;  %v2320_v58 = vmul.f32 %v2304_v15, %v10238_v48  ;;  %v4865_v1 = vld [vmem:[%s9724_s4] ss:$12 sps:$4 sm:$0xff]  }
 0x8c3   :  { %v2385_v45 = vpack.c.bf16 %v2201_v5, %v2197_v43  ;;  %v2224_v39 = vpop.permute.xlu1 %2223  ;;  %v2218_v41 = vpop.permute.xlu0 %2217  ;;  %v2386_v57 = vpack.c.bf16 %v2202_v34, %v2198_v4  ;;  %v2308_v43 = vsel %vm333_vm7, %v10239_v61, %v10234_v20  ;;  %v10240_v5 = vld [vmem:[#allocation74_spill] sm:$0xff] }
 0x8c4   :  { %v2241_v28 = vsel %vm293_vm6, %v2216_v8, %v2224_v39  ;;  %v2312_v34 = vsel %vm333_vm7, %v10240_v5, %v10239_v61 }
 0x8c5   :  { %2468 = vmatpush1.bf16.msra.mxu0 %v2387_v12  ;;  %2571 = vmatprep.subr.bf16.mxu1 %v2386_v57  ;;  %v2260_v42 = vmul.f32 %v2241_v28, %v10226_v40  ;;  %v10241_v12 = vld [vmem:[#allocation28_spill] sm:$0xff] }
 0x8c6   :  { %2572 = vmatpush1.bf16.msra.mxu1 %v2385_v45  ;;  %v2315_v45 = vmul.f32 %v2307_v56, %v10241_v12  ;;  %v2319_v38 = vmul.f32 %v2308_v43, %v10241_v12  ;;  %v4868_v56 = vld [vmem:[%s9724_s4 + $0x1c] ss:$12 sps:$4 sm:$0xff]  }
 0x8c7   :  { %v2208_v21 = vpop.permute.xlu1 %2207  ;;  %2573 = vmatprep.subr.bf16.mxu1 %v2390_v44  ;;  %v2226_v37 = vpop.permute.xlu0 %2225  ;;  %v2311_v44 = vsel %vm333_vm7, %v10242_v52, %v10237_v10 }
 0x8c8   :  { %v2242_v60 = vsel %vm293_vm6, %v2218_v41, %v2226_v37  ;;  %v2245_v50 = vsel %vm293_vm6, %v2208_v21, %v2216_v8  ;;  %v2316_v8 = vmul.f32 %v2303_v33, %v10238_v48 }
 0x8c9   :  { %v2264_v29 = vmul.f32 %v2242_v60, %v10226_v40  ;;  %v2259_v27 = vmul.f32 %v2245_v50, %v10229_v46  ;;  %v2300_v60 = vsel %vm333_vm7, %v10233_v49, %v10240_v5 }
 0x8ca   :  { %2574 = vmatpush1.bf16.msra.mxu1 %v2389_v0  ;;  %v2396_v15 = vpack.c.bf16 %v2320_v58, %v2316_v8 }
 0x8cb   :  { %v2232_v19 = vpop.permute.xlu1 %2231  ;;  %v2210_v2 = vpop.permute.xlu0 %2209  ;;  %v2392_v51 = vpack.c.bf16 %v2264_v29, %v2260_v42 }
 0x8cc   :  { %v2246_v4 = vsel %vm293_vm6, %v2210_v2, %v2218_v41  ;;  %v2237_v57 = vsel %vm293_vm6, %v2224_v39, %v2232_v19  ;;  %v2249_v41 = vsel %vm293_vm6, %v2232_v19, %v2208_v21  ;;  %v10243_v39 = vld [vmem:[#allocation29_spill] sm:$0xff]  ;;  %v2395_v19 = vpack.c.bf16 %v2319_v38, %v2315_v45 }
 0x8cd   :  { %v2263_v24 = vmul.f32 %v2246_v4, %v10229_v46  ;;  %2469 = vmatprep.subr.bf16.mxu0 %v2392_v51  ;;  %v2322_v42 = vmul.f32 %v2312_v34, %v10243_v39  ;;  %v2261_v33 = vmul.f32 %v2237_v57, %v10232_v47  ;;  %v2262_v50 = vmul.f32 %v2249_v41, %v10231_v11  ;;  %v10244_v4 = vld [vmem:[#allocation31_spill] sm:$0xff]  ;;  %v4870_v41 = vld [vmem:[%s9724_s4 + $0x18] ss:$12 sps:$4 sm:$0xff]  }
 0x8ce   :  { %v2318_v58 = vmul.f32 %v2311_v44, %v10243_v39  ;;  %v2321_v8 = vmul.f32 %v2300_v60, %v10244_v4 }
 0x8cf   :  { %v2391_v28 = vpack.c.bf16 %v2263_v24, %v2259_v27  ;;  %v2280_v0 = vpop.permute.xlu1 %2279  ;;  %v2234_v20 = vpop.permute.xlu0 %2233 }
 0x8d0   :  { %v2238_v21 = vsel %vm293_vm6, %v2226_v37, %v2234_v20  ;;  %v2250_v29 = vsel %vm293_vm6, %v2234_v20, %v2210_v2  ;;  %v2299_v37 = vsel %vm333_vm7, %v10235_v30, %v10242_v52  ;;  %v2398_v5 = vpack.c.bf16 %v2322_v42, %v2318_v58 }
 0x8d1   :  { %v2265_v10 = vmul.f32 %v2238_v21, %v10232_v47  ;;  %v2266_v49 = vmul.f32 %v2250_v29, %v10231_v11  ;;  %2470 = vmatpush1.bf16.msra.mxu0 %v2391_v28  ;;  %v2317_v30 = vmul.f32 %v2299_v37, %v10244_v4 }
 0x8d2   :  { %2492 = vmatprep.subr.bf16.mxu0 %v2396_v15 }
 0x8d3   :  { %v2393_v2 = vpack.c.bf16 %v2265_v10, %v2261_v33  ;;  %v2288_v51 = vpop.permute.xlu1 %2287  ;;  %v2282_v61 = vpop.permute.xlu0 %2281  ;;  %v2394_v43 = vpack.c.bf16 %v2266_v49, %v2262_v50  ;;  %v2397_v45 = vpack.c.bf16 %v2321_v8, %v2317_v30 }
 0x8d4   :  { %2472 = vmatmul.mubr.bf16.vlgmr.msra.gmra.mrb[16].mxu0 %v4865_v1  ;;  %v2305_v34 = vsel %vm333_vm7, %v2280_v0, %v2288_v51 }
 0x8d5   :  { %2493 = vmatpush1.bf16.msra.mxu0 %v2395_v19  ;;  %2575 = vmatprep.subr.bf16.mxu1 %v2394_v43  ;;  %v2324_v52 = vmul.f32 %v2305_v34, %v10238_v48  ;;  %v4872_v43 = vld [vmem:[%s9724_s4 + $0x20] ss:$12 sps:$4 sm:$0xff]  }
 0x8d6   :  { %2576 = vmatpush1.bf16.msra.mxu1 %v2393_v2  ;;  %2481 = vmatprep.mubr.bf16.mxu0 %v4868_v56 }
 0x8d7   :  { %v2272_v27 = vpop.permute.xlu1 %2271  ;;  %2598 = vmatprep.subr.bf16.mxu1 %v2398_v5  ;;  %v2290_v24 = vpop.permute.xlu0 %2289 }
 0x8d8   :  { %v2306_v57 = vsel %vm333_vm7, %v2282_v61, %v2290_v24  ;;  %v2309_v38 = vsel %vm333_vm7, %v2272_v27, %v2280_v0 }
 0x8d9   :  { %v2328_v44 = vmul.f32 %v2306_v57, %v10238_v48  ;;  %2578 = vmatmul.mubr.bf16.vlgmr.msra.gmra.mrb[16].mxu1 %v4865_v1  ;;  %v2323_v42 = vmul.f32 %v2309_v38, %v10241_v12  ;;  %v10245_v1 = vmov 0  }
 0x8da   :  { %2599 = vmatpush1.bf16.msra.mxu1 %v2397_v45  ;;  %2587 = vmatprep.mubr.bf16.mxu1 %v4868_v56  ;;  %v4871_v56 = vld [vmem:[%s9724_s4 + $0x8] ss:$12 sps:$4 sm:$0xff]  }
 0x8db   :  { %v2296_v28 = vpop.permute.xlu1 %2295  ;;  %v2274_v20 = vpop.permute.xlu0 %2273  ;;  %v2400_v15 = vpack.c.bf16 %v2328_v44, %v2324_v52 }
 0x8dc   :  { %v2310_v60 = vsel %vm333_vm7, %v2274_v20, %v2282_v61  ;;  %2482 = vmatmul.mubr.bf16.gmra.mrb[20].mxu0 %v4870_v41  ;;  %v2301_v21 = vsel %vm333_vm7, %v2288_v51, %v2296_v28  ;;  %v2313_v0 = vsel %vm333_vm7, %v2296_v28, %v2272_v27 }
 0x8dd   :  { %v2327_v29 = vmul.f32 %v2310_v60, %v10241_v12  ;;  %2494 = vmatprep.subr.bf16.mxu0 %v2400_v15  ;;  %2524 = vmatprep.mubr.bf16.mxu0 %v10245_v1  ;;  %v2325_v10 = vmul.f32 %v2301_v21, %v10244_v4  ;;  %v2326_v58 = vmul.f32 %v2313_v0, %v10243_v39 }
 0x8df   :  { %v2399_v33 = vpack.c.bf16 %v2327_v29, %v2323_v42  ;;  %v2298_v50 = vpop.permute.xlu0 %2297 }
 0x8e0   :  { %v2302_v49 = vsel %vm333_vm7, %v2290_v24, %v2298_v50  ;;  %v2314_v37 = vsel %vm333_vm7, %v2298_v50, %v2274_v20 }
 0x8e1   :  { %v2329_v19 = vmul.f32 %v2302_v49, %v10244_v4  ;;  %v2330_v2 = vmul.f32 %v2314_v37, %v10243_v39  ;;  %2495 = vmatpush1.bf16.msra.mxu0 %v2399_v33  ;;  %2588 = vmatmul.mubr.bf16.gmra.mrb[20].mxu1 %v4870_v41 }
 0x8e2   :  { %2630 = vmatprep.mubr.bf16.mxu1 %v10245_v1 }
 0x8e3   :  { %v2401_v51 = vpack.c.bf16 %v2329_v19, %v2325_v10  ;;  %v2402_v61 = vpack.c.bf16 %v2330_v2, %v2326_v58 }
 0x8e4   :  { %4757 = vmatmul.mubr.msk.bf16.vlgmr.msra.gmra.mrb[16].mxu0 %vm1372_vm10, %v4871_v56 }
 0x8e5   :  { %2600 = vmatprep.subr.bf16.mxu1 %v2402_v61  ;;  %2534 = vmatprep.mubr.bf16.mxu0 %v10245_v1 }
 0x8e6   :  { %2601 = vmatpush1.bf16.msra.mxu1 %v2401_v51 }
 0x8e9   :  { %4759 = vmatmul.mubr.msk.bf16.vlgmr.msra.gmra.mrb[16].mxu1 %vm1372_vm10, %v4871_v56 }
 0x8ea   :  { %2640 = vmatprep.mubr.bf16.mxu1 %v10245_v1 }
 0x8ec   :  { %4758 = vmatmul.mubr.msk.bf16.gmra.mrb[20].mxu0 %vm1372_vm10, %v4872_v43 }
 0x8f1   :  { %4760 = vmatmul.mubr.msk.bf16.gmra.mrb[20].mxu1 %vm1372_vm10, %v4872_v43 }
 0x9b7   :  { %v7531_v8 = vpop.f32.mrb[16].mxu0 }
 0x9b8   :  { %v7533_v5 = vpop.f32.mrb[17].mxu0 }
 0x9b9   :  { %v2651_v30 = vadd.f32 %v7533_v5, %v7531_v8  ;;  %v7537_v34 = vpop.f32.mrb[18].mxu0 }
 0x9ba   :  { %v7539_v27 = vpop.f32.mrb[19].mxu0 }
 0x9bb   :  { %v2656_v24 = vadd.f32 %v7539_v27, %v7537_v34 }
 0x9bc   :  { %v7543_v45 = vpop.f32.mrb[16].mxu1 }
 0x9bd   :  { %v2652_v57 = vadd.f32 %v2651_v30, %v7543_v45  ;;  %v7546_v41 = vpop.f32.mrb[17].mxu1 }
 0x9be   :  { %v7548_v52 = vpop.f32.mrb[18].mxu1 }
 0x9bf   :  { %v2653_v44 = vadd.f32 %v2652_v57, %v7546_v41  ;;  %v2657_v38 = vadd.f32 %v2656_v24, %v7548_v52  ;;  %v7552_v28 = vpop.f32.mrb[20].mxu0  ;;  %v7554_v20 = vpop.f32.mrb[19].mxu1 }
 0x9c0   :  { %v7556_v15 = vpop.f32.mrb[21].mxu0 }
 0x9c1   :  { %v2658_v60 = vadd.f32 %v2657_v38, %v7554_v20  ;;  %v2661_v42 = vadd.f32 %v7556_v15, %v7552_v28  ;;  %2654 = vadd.xlane.f32.xlu1 %v2653_v44  ;;  %v7561_v21 = vpop.f32.mrb[22].mxu0 }
 0x9c2   :  { %v7563_v29 = vpop.f32.mrb[23].mxu0 }
 0x9c3   :  { %v2666_v0 = vadd.f32 %v7563_v29, %v7561_v21  ;;  %2659 = vadd.xlane.f32.xlu0 %v2658_v60 }
 0x9c4   :  { %v7567_v33 = vpop.f32.mrb[20].mxu1 }
 0x9c5   :  { %v2662_v50 = vadd.f32 %v2661_v42, %v7567_v33  ;;  %v7570_v10 = vpop.f32.mrb[21].mxu1 }
 0x9c6   :  { %v7572_v49 = vpop.f32.mrb[22].mxu1 }
 0x9c7   :  { %v2663_v37 = vadd.f32 %v2662_v50, %v7570_v10  ;;  %v2667_v56 = vadd.f32 %v2666_v0, %v7572_v49  ;;  %v7576_v58 = vpop.f32.mrb[23].mxu1 }
 0x9c9   :  { %v2668_v19 = vadd.f32 %v2667_v56, %v7576_v58  ;;  %2664 = vadd.xlane.f32.xlu0 %v2663_v37 }
 0x9cb   :  { %2669 = vadd.xlane.f32.xlu1 %v2668_v19 }
 0xa4e   :  { %v2655_v2 = vpop.xlane.xlu1 %2654 }
 0xa4f   :  { %v7579_v51 = vmul.f32 0.001953125, %v2655_v2 }
 0xa50   :  { %v2660_v61 = vpop.xlane.xlu0 %2659 }
 0xa51   :  { %v7581_v43 = vmul.f32 0.001953125, %v2660_v61  ;;  %v2675_v30 = vsub.f32 %v7531_v8, %v7579_v51  ;;  %v2676_v24 = vsub.f32 %v7533_v5, %v7579_v51  ;;  %v2677_v57 = vsub.f32 %v7543_v45, %v7579_v51 }
 0xa52   :  { %v2678_v44 = vsub.f32 %v7546_v41, %v7579_v51 }
 0xa53   :  { %v2691_v38 = vmul.f32 %v2675_v30, %v2675_v30  ;;  %v2692_v60 = vmul.f32 %v2676_v24, %v2676_v24  ;;  %v2679_v42 = vsub.f32 %v7537_v34, %v7581_v43  ;;  %v2680_v0 = vsub.f32 %v7539_v27, %v7581_v43 }
 0xa54   :  { %v2681_v50 = vsub.f32 %v7548_v52, %v7581_v43  ;;  %v2693_v37 = vmul.f32 %v2677_v57, %v2677_v57  ;;  %v2682_v61 = vsub.f32 %v7554_v20, %v7581_v43  ;;  %v2694_v30 = vmul.f32 %v2678_v44, %v2678_v44 }
 0xa55   :  { %v2707_v56 = vadd.f32 %v2692_v60, %v2691_v38  ;;  %v2695_v19 = vmul.f32 %v2679_v42, %v2679_v42  ;;  %v2696_v1 = vmul.f32 %v2680_v0, %v2680_v0 }
 0xa56   :  { %v2665_v2 = vpop.xlane.xlu0 %2664  ;;  %v2697_v12 = vmul.f32 %v2681_v50, %v2681_v50  ;;  %v2698_v60 = vmul.f32 %v2682_v61, %v2682_v61 }
 0xa57   :  { %v7599_v4 = vmul.f32 0.001953125, %v2665_v2  ;;  %v2708_v24 = vadd.f32 %v2707_v56, %v2693_v37  ;;  %v2712_v48 = vadd.f32 %v2696_v1, %v2695_v19 }
 0xa58   :  { %v2670_v39 = vpop.xlane.xlu1 %2669 }
 0xa59   :  { %v7601_v47 = vmul.f32 0.001953125, %v2670_v39  ;;  %v2709_v11 = vadd.f32 %v2708_v24, %v2694_v30  ;;  %v2683_v57 = vsub.f32 %v7552_v28, %v7599_v4  ;;  %v2684_v38 = vsub.f32 %v7556_v15, %v7599_v4 }
 0xa5a   :  { %v2713_v42 = vadd.f32 %v2712_v48, %v2697_v12  ;;  %v2685_v0 = vsub.f32 %v7567_v33, %v7599_v4  ;;  %v2686_v44 = vsub.f32 %v7570_v10, %v7599_v4 }
 0xa5b   :  { %2710 = vadd.xlane.f32.xlu0 %v2709_v11  ;;  %v2699_v50 = vmul.f32 %v2683_v57, %v2683_v57  ;;  %v2700_v1 = vmul.f32 %v2684_v38, %v2684_v38  ;;  %v2687_v39 = vsub.f32 %v7561_v21, %v7601_v47  ;;  %v2688_v37 = vsub.f32 %v7563_v29, %v7601_v47 }
 0xa5c   :  { %v2714_v56 = vadd.f32 %v2713_v42, %v2698_v60  ;;  %v2701_v19 = vmul.f32 %v2685_v0, %v2685_v0  ;;  %v2689_v48 = vsub.f32 %v7572_v49, %v7601_v47  ;;  %v2690_v2 = vsub.f32 %v7576_v58, %v7601_v47 }
 0xa5d   :  { %v2717_v12 = vadd.f32 %v2700_v1, %v2699_v50  ;;  %v2703_v61 = vmul.f32 %v2687_v39, %v2687_v39  ;;  %v2704_v30 = vmul.f32 %v2688_v37, %v2688_v37  ;;  %v2702_v11 = vmul.f32 %v2686_v44, %v2686_v44 }
 0xa5e   :  { %2715 = vadd.xlane.f32.xlu1 %v2714_v56  ;;  %v2705_v57 = vmul.f32 %v2689_v48, %v2689_v48  ;;  %v2706_v40 = vmul.f32 %v2690_v2, %v2690_v2  ;;  %v4956_v42 = vmov 2  }
 0xa5f   :  { %v2718_v24 = vadd.f32 %v2717_v12, %v2701_v19  ;;  %v2722_v38 = vadd.f32 %v2704_v30, %v2703_v61  ;;  %4850 = vset.pattern.permute.xlu0 %v4956_v42  ;;  %4851 = vset.pattern.permute.xlu1 %v4956_v42 }
 0xa61   :  { %v2719_v46 = vadd.f32 %v2718_v24, %v2702_v11  ;;  %v2723_v18 = vadd.f32 %v2722_v38, %v2705_v57  ;;  %v4932_v24 = vld [vmem:[%s9722_s9] sm:$0xff] }
 0xa63   :  { %2720 = vadd.xlane.f32.xlu0 %v2719_v46  ;;  %v2724_v60 = vadd.f32 %v2723_v18, %v2706_v40  ;;  %v4930_v18 = vld [vmem:[%s9721_s8] sm:$0xff] }
 0xa65   :  { %2725 = vadd.xlane.f32.xlu1 %v2724_v60  ;;  %v4933_v60 = vld [vmem:[%s9722_s9 + $0x8] sm:$0xff] }
 0xae8   :  { %v2711_v0 = vpop.xlane.xlu0 %2710 }
 0xae9   :  { %v2727_v50 = vmul.f32 0.001953125, %v2711_v0 }
 0xaeb   :  { %v2731_v1 = vadd.f32 1e-05, %v2727_v50  ;;  %v2716_v53 = vpop.xlane.xlu1 %2715 }
 0xaec   :  { %v2728_v39 = vmul.f32 0.001953125, %v2716_v53  ;;  %v4931_v53 = vld [vmem:[%s9721_s8 + $0x8] sm:$0xff] }
 0xaed   :  { %4898 = vrsqrt.f32 %v2731_v1 }
 0xaee   :  { %v2732_v37 = vadd.f32 1e-05, %v2728_v39  ;;  %v4935_v39 = vld [vmem:[%s9721_s8 + $0x18] sm:$0xff] }
 0xaf0   :  { %4900 = vrsqrt.f32 %v2732_v37  ;;  %v2721_v44 = vpop.xlane.xlu0 %2720 }
 0xaf1   :  { %v2729_v56 = vmul.f32 0.001953125, %v2721_v44  ;;  %v4936_v44 = vld [vmem:[%s9722_s9 + $0x10] sm:$0xff] }
 0xaf2   :  { %v2726_v19 = vpop.xlane.xlu1 %2725 }
 0xaf3   :  { %v2733_v48 = vadd.f32 1e-05, %v2729_v56  ;;  %v2730_v12 = vmul.f32 0.001953125, %v2726_v19 }
 0xaf5   :  { %4902 = vrsqrt.f32 %v2733_v48  ;;  %v2734_v61 = vadd.f32 1e-05, %v2730_v12  ;;  %v4937_v48 = vld [vmem:[%s9722_s9 + $0x18] sm:$0xff] }
 0xaf7   :  { %v4899_v2 = vpop.eup %4898  ;;  %4904 = vrsqrt.f32 %v2734_v61 }
 0xaf8   :  { %v2739_v40 = vmul.f32 %v4930_v18, %v4899_v2 }
 0xafa   :  { %v4901_v46 = vpop.eup %4900  ;;  %2753 = vperm.xlu0 %4850, %v2739_v40   ;;  %v2743_v11 = vmul.f32 %v2739_v40, %v7579_v51  ;;  %v4934_v51 = vld [vmem:[%s9721_s8 + $0x10] sm:$0xff] }
 0xafb   :  { %v2740_v30 = vmul.f32 %v4931_v53, %v4901_v46 }
 0xafc   :  { %v2747_v57 = vsub.f32 %v4932_v24, %v2743_v11 }
 0xafd   :  { %2758 = vperm.xlu1 %4851, %v2740_v30   ;;  %v2744_v38 = vmul.f32 %v2740_v30, %v7581_v43 }
 0xaff   :  { %v2748_v42 = vsub.f32 %v4933_v60, %v2744_v38  ;;  %v4903_v0 = vpop.eup %4902 }
 0xb00   :  { %v2741_v50 = vmul.f32 %v4934_v51, %v4903_v0 }
 0xb01   :  { %2789 = vperm.xlu1 %4851, %v2747_v57   ;;  %v4905_v1 = vpop.eup %4904 }
 0xb02   :  { %v2742_v43 = vmul.f32 %v4935_v39, %v4905_v1  ;;  %v2745_v37 = vmul.f32 %v2741_v50, %v7599_v4 }
 0xb04   :  { %v2749_v56 = vsub.f32 %v4936_v44, %v2745_v37  ;;  %v2746_v19 = vmul.f32 %v2742_v43, %v7601_v47 }
 0xb05   :  { %2794 = vperm.xlu1 %4851, %v2748_v42  }
 0xb06   :  { %v2750_v12 = vsub.f32 %v4937_v48, %v2746_v19 }
 0xb09   :  { %2763 = vperm.xlu1 %4851, %v2741_v50  }
 0xb0d   :  { %2768 = vperm.xlu1 %4851, %v2742_v43  }
 0xb11   :  { %2799 = vperm.xlu1 %4851, %v2749_v56  }
 0xb15   :  { %2804 = vperm.xlu1 %4851, %v2750_v12  }
 0xb79   :  { %v2754_v2 = vpop.permute.xlu0 %2753 }
 0xb7a   :  { %v2771_v40 = vmul.f32 %v2754_v2, %v7531_v8  ;;  %v2772_v4 = vmul.f32 %v2754_v2, %v7533_v5  ;;  %v2774_v30 = vmul.f32 %v2754_v2, %v7546_v41  ;;  %v2773_v5 = vmul.f32 %v2754_v2, %v7543_v45 }
 0xb7c   :  { %v2759_v18 = vpop.permute.xlu1 %2758 }
 0xb7d   :  { %v2775_v47 = vmul.f32 %v2759_v18, %v7537_v34  ;;  %v2776_v11 = vmul.f32 %v2759_v18, %v7539_v27  ;;  %v2778_v34 = vmul.f32 %v2759_v18, %v7554_v20  ;;  %v2777_v45 = vmul.f32 %v2759_v18, %v7548_v52 }
 0xb80   :  { %v2790_v46 = vpop.permute.xlu1 %2789 }
 0xb81   :  { %v2807_v61 = vadd.f32 %v2790_v46, %v2771_v40  ;;  %v2808_v53 = vadd.f32 %v2790_v46, %v2772_v4  ;;  %v2810_v38 = vadd.f32 %v2790_v46, %v2774_v30  ;;  %v2809_v51 = vadd.f32 %v2790_v46, %v2773_v5 }
 0xb83   :  { %vm2823_vm13 = vcmp.ge.f32.partialorder %v2807_v61, 0.0  ;;  %v2839_v24 = vmul.f32 0.2, %v2807_v61  ;;  %v2840_v42 = vmul.f32 0.2, %v2808_v53  ;;  %vm2824_vm14 = vcmp.ge.f32.partialorder %v2808_v53, 0.0 }
 0xb84   :  { %v2795_v57 = vpop.permute.xlu1 %2794  ;;  %v2842_v27 = vmul.f32 0.2, %v2810_v38  ;;  %vm2826_vm8 = vcmp.ge.f32.partialorder %v2810_v38, 0.0  ;;  %v2841_v20 = vmul.f32 0.2, %v2809_v51  ;;  %vm2825_vm11 = vcmp.ge.f32.partialorder %v2809_v51, 0.0 }
 0xb85   :  { %v2811_v60 = vadd.f32 %v2795_v57, %v2775_v47  ;;  %v7652_v0 = vsel %vm2823_vm13, %v2807_v61, %v2839_v24  ;;  %v2812_v8 = vadd.f32 %v2795_v57, %v2776_v11  ;;  %v7658_v50 = vsel %vm2824_vm14, %v2808_v53, %v2840_v42 }
 0xb86   :  { %10246 = vst [vmem:[#allocation72_spill] sm:$0xff] %v7652_v0  ;;  %2879 = vrot.lane.b32.xlu1 %v7652_v0, %s4947_s16  ;;  %v2814_v1 = vadd.f32 %v2795_v57, %v2778_v34  ;;  %v7667_v37 = vsel %vm2826_vm8, %v2810_v38, %v2842_v27  ;;  %v2813_v44 = vadd.f32 %v2795_v57, %v2777_v45 }
 0xb87   :  { %vm2827_vm15 = vcmp.ge.f32.partialorder %v2811_v60, 0.0  ;;  %v2843_v41 = vmul.f32 0.2, %v2811_v60  ;;  %v2844_v39 = vmul.f32 0.2, %v2812_v8  ;;  %vm2828_vm9 = vcmp.ge.f32.partialorder %v2812_v8, 0.0 }
 0xb88   :  { %10248 = vst [vmem:[#allocation49_spill] sm:$0xff] %v7667_v37  ;;  %v2846_v56 = vmul.f32 0.2, %v2814_v1  ;;  %vm2830_vm12 = vcmp.ge.f32.partialorder %v2814_v1, 0.0  ;;  %v7675_v48 = vsel %vm2825_vm11, %v2809_v51, %v2841_v20  ;;  %v2845_v12 = vmul.f32 0.2, %v2813_v44  ;;  %v2764_v18 = vpop.permute.xlu1 %2763 }
 0xb89   :  { %v7660_v43 = vsel %vm2827_vm15, %v2811_v60, %v2843_v41  ;;  %v7669_v19 = vsel %vm2828_vm9, %v2812_v8, %v2844_v39  ;;  %10249 = vst [vmem:[#allocation36_spill] sm:$0xff] %v7675_v48  ;;  %vm2829_vm13 = vcmp.ge.f32.partialorder %v2813_v44, 0.0  ;;  %v2779_v53 = vmul.f32 %v2764_v18, %v7552_v28  ;;  %v10252_v51 = vld [vmem:[#allocation3_spill] sm:$0xff] }
 0xb8a   :  { %10247 = vst [vmem:[#allocation39_spill] sm:$0xff] %v7660_v43  ;;  %2887 = vrot.lane.b32.xlu1 %v7658_v50, %s4947_s16  ;;  %2881 = vrot.lane.b32.xlu0 %v7660_v43, %s4947_s16  ;;  %v7677_v2 = vsel %vm2830_vm12, %v2814_v1, %v2846_v56  ;;  %v7683_v52 = vsel %vm2829_vm13, %v2813_v44, %v2845_v12 }
 0xb8b   :  { %10250 = vst [vmem:[#allocation32_spill] sm:$0xff] %v7677_v2  ;;  %10251 = vst [vmem:[#allocation34_spill] sm:$0xff] %v7683_v52  ;;  %v2780_v24 = vmul.f32 %v2764_v18, %v7556_v15  ;;  %v2782_v8 = vmul.f32 %v2764_v18, %v7570_v10  ;;  %v2781_v10 = vmul.f32 %v2764_v18, %v7567_v33  ;;  %v10254_v18 = vld [vmem:[#allocation4_spill] sm:$0xff] }
 0xb8c   :  { %v7769_v40 = vpop.permute.xlu1 %2768 }
 0xb8d   :  { %v2783_v57 = vmul.f32 %v7769_v40, %v7561_v21  ;;  %v2784_v41 = vmul.f32 %v7769_v40, %v7563_v29  ;;  %v2786_v29 = vmul.f32 %v7769_v40, %v7576_v58 }
 0xb8e   :  { %2903 = vrot.lane.b32.xlu1 %v7667_v37, %s4947_s16  ;;  %2889 = vrot.lane.b32.xlu0 %v7669_v19, %s4947_s16 }
 0xb90   :  { %v2800_v4 = vpop.permute.xlu1 %2799 }
 0xb91   :  { %v2815_v11 = vadd.f32 %v2800_v4, %v2779_v53  ;;  %v2816_v60 = vadd.f32 %v2800_v4, %v2780_v24  ;;  %v2818_v1 = vadd.f32 %v2800_v4, %v2782_v8 }
 0xb92   :  { %2895 = vrot.lane.b32.xlu1 %v7675_v48, %s4947_s16  ;;  %2905 = vrot.lane.b32.xlu0 %v7677_v2, %s4947_s16 }
 0xb93   :  { %v2847_v5 = vmul.f32 0.2, %v2815_v11  ;;  %vm2831_vm14 = vcmp.ge.f32.partialorder %v2815_v11, 0.0  ;;  %v2848_v45 = vmul.f32 0.2, %v2816_v60  ;;  %vm2832_vm15 = vcmp.ge.f32.partialorder %v2816_v60, 0.0 }
 0xb94   :  { %v7783_v46 = vpop.permute.xlu1 %2804  ;;  %vm2834_vm9 = vcmp.ge.f32.partialorder %v2818_v1, 0.0 }
 0xb95   :  { %v2819_v15 = vadd.f32 %v7783_v46, %v2783_v57  ;;  %v2820_v20 = vadd.f32 %v7783_v46, %v2784_v41  ;;  %v7821_v53 = vsel %vm2831_vm14, %v2815_v11, %v2847_v5  ;;  %v2817_v11 = vadd.f32 %v2800_v4, %v2781_v10 }
 0xb96   :  { %2943 = vrot.lane.b32.xlu1 %v7652_v0, %s4946_s15  ;;  %2897 = vrot.lane.b32.xlu0 %v7683_v52, %s4947_s16  ;;  %10253 = vst [vmem:[#allocation37_spill] sm:$0xff] %v7821_v53  ;;  %v7835_v8 = vsel %vm2832_vm15, %v2816_v60, %v2848_v45  ;;  %v2822_v5 = vadd.f32 %v7783_v46, %v2786_v29 }
 0xb97   :  { %v2851_v24 = vmul.f32 0.2, %v2819_v15  ;;  %vm2835_vm8 = vcmp.ge.f32.partialorder %v2819_v15, 0.0  ;;  %10255 = vst [vmem:[#allocation33_spill] sm:$0xff] %v7835_v8  ;;  %vm2836_vm11 = vcmp.ge.f32.partialorder %v2820_v20, 0.0  ;;  %vm2833_vm12 = vcmp.ge.f32.partialorder %v2817_v11, 0.0 }
 0xb98   :  { %v2849_v45 = vmul.f32 0.2, %v2817_v11  ;;  %vm2838_vm13 = vcmp.ge.f32.partialorder %v2822_v5, 0.0 }
 0xb9a   :  { %2951 = vrot.lane.b32.xlu1 %v7658_v50, %s4946_s15  ;;  %2945 = vrot.lane.b32.xlu0 %v7660_v43, %s4946_s15 }
 0xb9e   :  { %2967 = vrot.lane.b32.xlu1 %v7667_v37, %s4946_s15  ;;  %2953 = vrot.lane.b32.xlu0 %v7669_v19, %s4946_s15 }
 0xba2   :  { %2959 = vrot.lane.b32.xlu1 %v7675_v48, %s4946_s15  ;;  %2969 = vrot.lane.b32.xlu0 %v7677_v2, %s4946_s15 }
 0xba6   :  { %3007 = vrot.lane.b32.xlu1 %v7652_v0, %s4948_s23  ;;  %2961 = vrot.lane.b32.xlu0 %v7683_v52, %s4946_s15 }
 0xbaa   :  { %3015 = vrot.lane.b32.xlu1 %v7658_v50, %s4948_s23  ;;  %3009 = vrot.lane.b32.xlu0 %v7660_v43, %s4948_s23 }
 0xbae   :  { %3031 = vrot.lane.b32.xlu1 %v7667_v37, %s4948_s23  ;;  %3017 = vrot.lane.b32.xlu0 %v7669_v19, %s4948_s23 }
 0xbb2   :  { %3023 = vrot.lane.b32.xlu1 %v7675_v48, %s4948_s23  ;;  %3033 = vrot.lane.b32.xlu0 %v7677_v2, %s4948_s23 }
 0xbb6   :  { %3071 = vrot.lane.b32.xlu1 %v7652_v0, %s4949_s24  ;;  %3025 = vrot.lane.b32.xlu0 %v7683_v52, %s4948_s23 }
 0xbba   :  { %3079 = vrot.lane.b32.xlu1 %v7658_v50, %s4949_s24  ;;  %3073 = vrot.lane.b32.xlu0 %v7660_v43, %s4949_s24 }
 0xbbe   :  { %3095 = vrot.lane.b32.xlu1 %v7667_v37, %s4949_s24  ;;  %3081 = vrot.lane.b32.xlu0 %v7669_v19, %s4949_s24 }
 0xbc2   :  { %3087 = vrot.lane.b32.xlu1 %v7675_v48, %s4949_s24  ;;  %3097 = vrot.lane.b32.xlu0 %v7677_v2, %s4949_s24 }
 0xbc6   :  { %3143 = vrot.lane.b32.xlu1 %v7658_v50, %s4950_s1  ;;  %3089 = vrot.lane.b32.xlu0 %v7683_v52, %s4949_s24 }
 0xbca   :  { %3151 = vrot.lane.b32.xlu1 %v7675_v48, %s4950_s1  ;;  %3145 = vrot.lane.b32.xlu0 %v7669_v19, %s4950_s1 }
 0xbce   :  { %3135 = vrot.lane.b32.xlu1 %v7652_v0, %s4950_s1  ;;  %3153 = vrot.lane.b32.xlu0 %v7683_v52, %s4950_s1 }
 0xbd2   :  { %3159 = vrot.lane.b32.xlu1 %v7667_v37, %s4950_s1  ;;  %3137 = vrot.lane.b32.xlu0 %v7660_v43, %s4950_s1 }
 0xbd6   :  { %3207 = vrot.lane.b32.xlu1 %v7658_v50, %s4951_s25  ;;  %3161 = vrot.lane.b32.xlu0 %v7677_v2, %s4950_s1 }
 0xbda   :  { %3215 = vrot.lane.b32.xlu1 %v7675_v48, %s4951_s25  ;;  %3209 = vrot.lane.b32.xlu0 %v7669_v19, %s4951_s25 }
 0xbde   :  { %3199 = vrot.lane.b32.xlu1 %v7652_v0, %s4951_s25  ;;  %3217 = vrot.lane.b32.xlu0 %v7683_v52, %s4951_s25 }
 0xbe2   :  { %3223 = vrot.lane.b32.xlu1 %v7667_v37, %s4951_s25  ;;  %3201 = vrot.lane.b32.xlu0 %v7660_v43, %s4951_s25 }
 0xbe6   :  { %3271 = vrot.lane.b32.xlu1 %v7658_v50, %s4952_s26  ;;  %3225 = vrot.lane.b32.xlu0 %v7677_v2, %s4951_s25 }
 0xbea   :  { %3279 = vrot.lane.b32.xlu1 %v7675_v48, %s4952_s26  ;;  %3273 = vrot.lane.b32.xlu0 %v7669_v19, %s4952_s26 }
 0xbee   :  { %3263 = vrot.lane.b32.xlu1 %v7652_v0, %s4952_s26  ;;  %3281 = vrot.lane.b32.xlu0 %v7683_v52, %s4952_s26 }
 0xbf2   :  { %3287 = vrot.lane.b32.xlu1 %v7667_v37, %s4952_s26  ;;  %3265 = vrot.lane.b32.xlu0 %v7660_v43, %s4952_s26 }
 0xbf6   :  { %3335 = vrot.lane.b32.xlu1 %v7658_v50, %s4954_s27  ;;  %3289 = vrot.lane.b32.xlu0 %v7677_v2, %s4952_s26 }
 0xbf8   :  { %v2880_v61 = vpop.permute.xlu1 %2879 }
 0xbfa   :  { %3343 = vrot.lane.b32.xlu1 %v7675_v48, %s4954_s27  ;;  %3337 = vrot.lane.b32.xlu0 %v7669_v19, %s4954_s27 }
 0xbfc   :  { %v2882_v30 = vpop.permute.xlu0 %2881  ;;  %v2888_v47 = vpop.permute.xlu1 %2887 }
 0xbfd   :  { %v2919_v38 = vsel %vm54_vm1, %v2880_v61, %v2888_v47 }
 0xbfe   :  { %3327 = vrot.lane.b32.xlu1 %v7652_v0, %s4954_s27  ;;  %3345 = vrot.lane.b32.xlu0 %v7683_v52, %s4954_s27  ;;  %v2928_v21 = vmul.f32 %v2919_v38, %v10252_v51  ;;  %v2850_v38 = vmul.f32 0.2, %v2818_v1 }
 0xc00   :  { %v2890_v42 = vpop.permute.xlu0 %2889  ;;  %v2904_v28 = vpop.permute.xlu1 %2903 }
 0xc01   :  { %v2920_v34 = vsel %vm54_vm1, %v2882_v30, %v2890_v42  ;;  %v2923_v39 = vsel %vm54_vm1, %v2904_v28, %v2880_v61 }
 0xc02   :  { %v2932_v27 = vmul.f32 %v2920_v34, %v10252_v51  ;;  %3351 = vrot.lane.b32.xlu1 %v7667_v37, %s4954_s27  ;;  %3329 = vrot.lane.b32.xlu0 %v7660_v43, %s4954_s27  ;;  %v2927_v57 = vmul.f32 %v2923_v39, %v10254_v18  ;;  %v2852_v34 = vmul.f32 0.2, %v2820_v20 }
 0xc04   :  { %v2906_v44 = vpop.permute.xlu0 %2905  ;;  %v2896_v56 = vpop.permute.xlu1 %2895  ;;  %v3392_v12 = vpack.c.bf16 %v2932_v27, %v2928_v21  ;;  %v7841_v27 = vsel %vm2835_vm8, %v2819_v15, %v2851_v24  ;;  %v2785_v15 = vmul.f32 %v7769_v40, %v7572_v49  ;;  %v7862_v24 = vsel %vm2834_vm9, %v2818_v1, %v2850_v38 }
 0xc05   :  { %v2924_v33 = vsel %vm54_vm1, %v2906_v44, %v2882_v30  ;;  %v2915_v58 = vsel %vm54_vm1, %v2888_v47, %v2896_v56  ;;  %v2911_v30 = vsel %vm54_vm1, %v2896_v56, %v2904_v28  ;;  %10256 = vst [vmem:[#allocation35_spill] sm:$0xff] %v7862_v24  ;;  %v7876_v1 = vsel %vm2833_vm12, %v2817_v11, %v2849_v45 }
 0xc06   :  { %v2931_v61 = vmul.f32 %v2924_v33, %v10254_v18  ;;  %3353 = vrot.lane.b32.xlu0 %v7677_v2, %s4954_s27  ;;  %2883 = vrot.lane.b32.xlu1 %v7821_v53, %s4947_s16  ;;  %v2929_v4 = vmul.f32 %v2915_v58, %v5157_v35  ;;  %v2930_v60 = vmul.f32 %v2911_v30, %v5149_v31 }
 0xc07   :  { %3499 = vmatprep.subr.bf16.mxu0 %v3392_v12  ;;  %v2821_v33 = vadd.f32 %v7783_v46, %v2785_v15  ;;  %10258 = vst [vmem:[#allocation46_spill] sm:$0xff] %v7876_v1 }
 0xc08   :  { %v3391_v41 = vpack.c.bf16 %v2931_v61, %v2927_v57  ;;  %v2898_v47 = vpop.permute.xlu0 %2897  ;;  %v7838_v21 = vpop.permute.xlu1 %2943  ;;  %v2854_v57 = vmul.f32 0.2, %v2822_v5  ;;  %v7866_v61 = vsel %vm2836_vm11, %v2820_v20, %v2852_v34 }
 0xc09   :  { %v2912_v10 = vsel %vm54_vm1, %v2898_v47, %v2906_v44  ;;  %v2916_v28 = vsel %vm54_vm1, %v2890_v42, %v2898_v47  ;;  %10257 = vst [vmem:[#allocation42_spill] sm:$0xff] %v7866_v61  ;;  %v2853_v46 = vmul.f32 0.2, %v2821_v33  ;;  %vm2837_vm14 = vcmp.ge.f32.partialorder %v2821_v33, 0.0 }
 0xc0a   :  { %v2933_v39 = vmul.f32 %v2916_v28, %v5157_v35  ;;  %v2934_v29 = vmul.f32 %v2912_v10, %v5149_v31  ;;  %2891 = vrot.lane.b32.xlu1 %v7835_v8, %s4947_s16  ;;  %2885 = vrot.lane.b32.xlu0 %v7841_v27, %s4947_s16  ;;  %v7878_v58 = vsel %vm2838_vm13, %v2822_v5, %v2854_v57 }
 0xc0b   :  { %3500 = vmatpush1.bf16.msra.mxu0 %v3391_v41  ;;  %v7888_v30 = vsel %vm2837_vm14, %v2821_v33, %v2853_v46 }
 0xc0c   :  { %v3393_v44 = vpack.c.bf16 %v2933_v39, %v2929_v4  ;;  %v7857_v42 = vpop.permute.xlu0 %2945  ;;  %v7859_v56 = vpop.permute.xlu1 %2951  ;;  %v3394_v12 = vpack.c.bf16 %v2934_v29, %v2930_v60  ;;  %10259 = vst [vmem:[#allocation40_spill] sm:$0xff] %v7888_v30 }
 0xc0e   :  { %2907 = vrot.lane.b32.xlu1 %v7862_v24, %s4947_s16  ;;  %2893 = vrot.lane.b32.xlu0 %v7866_v61, %s4947_s16 }
 0xc0f   :  { %3605 = vmatprep.subr.bf16.mxu1 %v3394_v12 }
 0xc10   :  { %3606 = vmatpush1.bf16.msra.mxu1 %v3393_v44  ;;  %v7872_v49 = vpop.permute.xlu0 %2953  ;;  %v7874_v40 = vpop.permute.xlu1 %2967 }
 0xc11   :  { %v2987_v0 = vsel %vm93_vm0, %v7874_v40, %v7838_v21 }
 0xc12   :  { %2899 = vrot.lane.b32.xlu1 %v7876_v1, %s4947_s16  ;;  %2909 = vrot.lane.b32.xlu0 %v7878_v58, %s4947_s16 }
 0xc14   :  { %v7884_v20 = vpop.permute.xlu0 %2969  ;;  %v7886_v38 = vpop.permute.xlu1 %2959 }
 0xc16   :  { %2947 = vrot.lane.b32.xlu1 %v7821_v53, %s4946_s15  ;;  %2901 = vrot.lane.b32.xlu0 %v7888_v30, %s4947_s16 }
 0xc18   :  { %v7894_v11 = vpop.permute.xlu0 %2961  ;;  %v7896_v5 = vpop.permute.xlu1 %3007 }
 0xc1a   :  { %2955 = vrot.lane.b32.xlu1 %v7835_v8, %s4946_s15  ;;  %2949 = vrot.lane.b32.xlu0 %v7841_v27, %s4946_s15 }
 0xc1c   :  { %v7902_v34 = vpop.permute.xlu0 %3009  ;;  %v7904_v41 = vpop.permute.xlu1 %3015 }
 0xc1e   :  { %2971 = vrot.lane.b32.xlu1 %v7862_v24, %s4946_s15  ;;  %2957 = vrot.lane.b32.xlu0 %v7866_v61, %s4946_s15 }
 0xc20   :  { %v7910_v47 = vpop.permute.xlu0 %3017  ;;  %v7912_v4 = vpop.permute.xlu1 %3031 }
 0xc22   :  { %2963 = vrot.lane.b32.xlu1 %v7876_v1, %s4946_s15  ;;  %2973 = vrot.lane.b32.xlu0 %v7878_v58, %s4946_s15 }
 0xc24   :  { %v7918_v10 = vpop.permute.xlu0 %3033  ;;  %v7920_v28 = vpop.permute.xlu1 %3023 }
 0xc26   :  { %3011 = vrot.lane.b32.xlu1 %v7821_v53, %s4948_s23  ;;  %2965 = vrot.lane.b32.xlu0 %v7888_v30, %s4946_s15 }
 0xc28   :  { %v7926_v60 = vpop.permute.xlu0 %3025  ;;  %v7928_v39 = vpop.permute.xlu1 %3071 }
 0xc2a   :  { %3019 = vrot.lane.b32.xlu1 %v7835_v8, %s4948_s23  ;;  %3013 = vrot.lane.b32.xlu0 %v7841_v27, %s4948_s23 }
 0xc2c   :  { %v7934_v29 = vpop.permute.xlu0 %3073  ;;  %v7936_v15 = vpop.permute.xlu1 %3079 }
 0xc2e   :  { %3035 = vrot.lane.b32.xlu1 %v7862_v24, %s4948_s23  ;;  %3021 = vrot.lane.b32.xlu0 %v7866_v61, %s4948_s23 }
 0xc30   :  { %v7942_v45 = vpop.permute.xlu0 %3081  ;;  %v7944_v44 = vpop.permute.xlu1 %3095 }
 0xc32   :  { %3027 = vrot.lane.b32.xlu1 %v7876_v1, %s4948_s23  ;;  %3037 = vrot.lane.b32.xlu0 %v7878_v58, %s4948_s23 }
 0xc34   :  { %v7950_v12 = vpop.permute.xlu0 %3097  ;;  %v7952_v33 = vpop.permute.xlu1 %3087 }
 0xc36   :  { %3075 = vrot.lane.b32.xlu1 %v7821_v53, %s4949_s24  ;;  %3029 = vrot.lane.b32.xlu0 %v7888_v30, %s4948_s23 }
 0xc38   :  { %v7958_v57 = vpop.permute.xlu0 %3089  ;;  %v7960_v46 = vpop.permute.xlu1 %3143 }
 0xc39   :  { %10260 = vst [vmem:[#allocation38_spill] sm:$0xff] %v7960_v46 }
 0xc3a   :  { %3083 = vrot.lane.b32.xlu1 %v7835_v8, %s4949_s24  ;;  %3077 = vrot.lane.b32.xlu0 %v7841_v27, %s4949_s24 }
 0xc3c   :  { %v7966_v9 = vpop.permute.xlu0 %3145  ;;  %v7968_v22 = vpop.permute.xlu1 %3151 }
 0xc3d   :  { %10261 = vst [vmem:[#allocation45_spill] sm:$0xff] %v7968_v22 }
 0xc3e   :  { %3099 = vrot.lane.b32.xlu1 %v7862_v24, %s4949_s24  ;;  %3085 = vrot.lane.b32.xlu0 %v7866_v61, %s4949_s24 }
 0xc40   :  { %v7974_v59 = vpop.permute.xlu0 %3153  ;;  %v7976_v6 = vpop.permute.xlu1 %3135 }
 0xc41   :  { %10262 = vst [vmem:[#allocation48_spill] sm:$0xff] %v7976_v6 }
 0xc42   :  { %3091 = vrot.lane.b32.xlu1 %v7876_v1, %s4949_s24  ;;  %3101 = vrot.lane.b32.xlu0 %v7878_v58, %s4949_s24 }
 0xc44   :  { %v7982_v13 = vpop.permute.xlu0 %3137  ;;  %v7984_v52 = vpop.permute.xlu1 %3159 }
 0xc45   :  { %10263 = vst [vmem:[#allocation51_spill] sm:$0xff] %v7982_v13  ;;  %10264 = vst [vmem:[#allocation41_spill] sm:$0xff] %v7984_v52 }
 0xc46   :  { %3093 = vrot.lane.b32.xlu0 %v7888_v30, %s4949_s24  ;;  %3147 = vrot.lane.b32.xlu1 %v7835_v8, %s4950_s1 }
 0xc48   :  { %v7990_v48 = vpop.permute.xlu0 %3161  ;;  %v7992_v3 = vpop.permute.xlu1 %3207 }
 0xc49   :  { %10265 = vst [vmem:[#allocation43_spill] sm:$0xff] %v7990_v48  ;;  %10266 = vst [vmem:[#allocation47_spill] sm:$0xff] %v7992_v3 }
 0xc4a   :  { %3149 = vrot.lane.b32.xlu0 %v7866_v61, %s4950_s1  ;;  %3155 = vrot.lane.b32.xlu1 %v7876_v1, %s4950_s1 }
 0xc4c   :  { %v7998_v6 = vpop.permute.xlu0 %3209  ;;  %v8000_v13 = vpop.permute.xlu1 %3215 }
 0xc4d   :  { %10267 = vst [vmem:[#allocation50_spill] sm:$0xff] %v7998_v6  ;;  %10268 = vst [vmem:[#allocation53_spill] sm:$0xff] %v8000_v13 }
 0xc4e   :  { %3157 = vrot.lane.b32.xlu0 %v7888_v30, %s4950_s1  ;;  %3139 = vrot.lane.b32.xlu1 %v7821_v53, %s4950_s1 }
 0xc50   :  { %v8006_v52 = vpop.permute.xlu0 %3217  ;;  %v8008_v48 = vpop.permute.xlu1 %3199 }
 0xc51   :  { %10269 = vst [vmem:[#allocation55_spill] sm:$0xff] %v8006_v52  ;;  %10270 = vst [vmem:[#allocation44_spill] sm:$0xff] %v8008_v48 }
 0xc52   :  { %3141 = vrot.lane.b32.xlu0 %v7841_v27, %s4950_s1  ;;  %3163 = vrot.lane.b32.xlu1 %v7862_v24, %s4950_s1 }
 0xc54   :  { %v8014_v3 = vpop.permute.xlu0 %3201  ;;  %v8016_v6 = vpop.permute.xlu1 %3223 }
 0xc55   :  { %10271 = vst [vmem:[#allocation52_spill] sm:$0xff] %v8014_v3  ;;  %10272 = vst [vmem:[#allocation57_spill] sm:$0xff] %v8016_v6 }
 0xc56   :  { %3165 = vrot.lane.b32.xlu0 %v7878_v58, %s4950_s1  ;;  %3211 = vrot.lane.b32.xlu1 %v7835_v8, %s4951_s25 }
 0xc58   :  { %v8022_v13 = vpop.permute.xlu0 %3225  ;;  %v8024_v52 = vpop.permute.xlu1 %3271 }
 0xc59   :  { %10273 = vst [vmem:[#allocation56_spill] sm:$0xff] %v8022_v13  ;;  %10274 = vst [vmem:[#allocation54_spill] sm:$0xff] %v8024_v52 }
 0xc5a   :  { %3213 = vrot.lane.b32.xlu0 %v7866_v61, %s4951_s25  ;;  %3219 = vrot.lane.b32.xlu1 %v7876_v1, %s4951_s25 }
 0xc5c   :  { %v8030_v48 = vpop.permute.xlu0 %3273  ;;  %v8032_v3 = vpop.permute.xlu1 %3279 }
 0xc5d   :  { %10275 = vst [vmem:[#allocation58_spill] sm:$0xff] %v8030_v48  ;;  %10276 = vst [vmem:[#allocation61_spill] sm:$0xff] %v8032_v3 }
 0xc5e   :  { %3221 = vrot.lane.b32.xlu0 %v7888_v30, %s4951_s25  ;;  %3203 = vrot.lane.b32.xlu1 %v7821_v53, %s4951_s25 }
 0xc60   :  { %v8038_v6 = vpop.permute.xlu0 %3281  ;;  %v8040_v13 = vpop.permute.xlu1 %3263 }
 0xc61   :  { %10277 = vst [vmem:[#allocation63_spill] sm:$0xff] %v8038_v6  ;;  %10278 = vst [vmem:[#allocation59_spill] sm:$0xff] %v8040_v13 }
 0xc62   :  { %3205 = vrot.lane.b32.xlu0 %v7841_v27, %s4951_s25  ;;  %3227 = vrot.lane.b32.xlu1 %v7862_v24, %s4951_s25 }
 0xc64   :  { %v8046_v52 = vpop.permute.xlu0 %3265  ;;  %v8048_v48 = vpop.permute.xlu1 %3287 }
 0xc65   :  { %10279 = vst [vmem:[#allocation60_spill] sm:$0xff] %v8046_v52  ;;  %10280 = vst [vmem:[#allocation65_spill] sm:$0xff] %v8048_v48  ;;  %v4875_v48 = vld [vmem:[%s9725_s5 + $0x4] ss:$12 sps:$4 sm:$0xff]  }
 0xc66   :  { %3229 = vrot.lane.b32.xlu0 %v7878_v58, %s4951_s25  ;;  %3275 = vrot.lane.b32.xlu1 %v7835_v8, %s4952_s26 }
 0xc67   :  { %3531 = vmatprep.mubr.bf16.mxu0 %v4875_v48  ;;  %3637 = vmatprep.mubr.bf16.mxu1 %v4875_v48 }
 0xc68   :  { %v8054_v3 = vpop.permute.xlu0 %3289  ;;  %v8056_v6 = vpop.permute.xlu1 %3335 }
 0xc69   :  { %10281 = vst [vmem:[#allocation64_spill] sm:$0xff] %v8054_v3  ;;  %10282 = vst [vmem:[#allocation62_spill] sm:$0xff] %v8056_v6 }
 0xc6a   :  { %3277 = vrot.lane.b32.xlu0 %v7866_v61, %s4952_s26  ;;  %3283 = vrot.lane.b32.xlu1 %v7876_v1, %s4952_s26 }
 0xc6c   :  { %v8065_v52 = vpop.permute.xlu0 %3337  ;;  %v8067_v13 = vpop.permute.xlu1 %3343 }
 0xc6d   :  { %10283 = vst [vmem:[#allocation66_spill] sm:$0xff] %v8065_v52  ;;  %10284 = vst [vmem:[#allocation69_spill] sm:$0xff] %v8067_v13 }
 0xc6e   :  { %3285 = vrot.lane.b32.xlu0 %v7888_v30, %s4952_s26  ;;  %3267 = vrot.lane.b32.xlu1 %v7821_v53, %s4952_s26 }
 0xc70   :  { %v8073_v6 = vpop.permute.xlu0 %3345  ;;  %v8075_v3 = vpop.permute.xlu1 %3327 }
 0xc71   :  { %10285 = vst [vmem:[#allocation71_spill] sm:$0xff] %v8073_v6  ;;  %10286 = vst [vmem:[#allocation67_spill] sm:$0xff] %v8075_v3 }
 0xc72   :  { %3269 = vrot.lane.b32.xlu0 %v7841_v27, %s4952_s26  ;;  %3291 = vrot.lane.b32.xlu1 %v7862_v24, %s4952_s26 }
 0xc74   :  { %v8081_v52 = vpop.permute.xlu0 %3329  ;;  %v8083_v13 = vpop.permute.xlu1 %3351 }
 0xc75   :  { %10287 = vst [vmem:[#allocation68_spill] sm:$0xff] %v8081_v52  ;;  %10288 = vst [vmem:[#allocation73_spill] sm:$0xff] %v8083_v13 }
 0xc76   :  { %3293 = vrot.lane.b32.xlu0 %v7878_v58, %s4952_s26  ;;  %3339 = vrot.lane.b32.xlu1 %v7835_v8, %s4954_s27 }
 0xc78   :  { %v8089_v48 = vpop.permute.xlu0 %3353  ;;  %v2884_v6 = vpop.permute.xlu1 %2883 }
 0xc79   :  { %10289 = vst [vmem:[#allocation74_spill] sm:$0xff] %v8089_v48 }
 0xc7a   :  { %3341 = vrot.lane.b32.xlu0 %v7866_v61, %s4954_s27  ;;  %3347 = vrot.lane.b32.xlu1 %v7876_v1, %s4954_s27  ;;  %v2984_v61 = vsel %vm93_vm0, %v7857_v42, %v7872_v49 }
 0xc7b   :  { %v2996_v43 = vmul.f32 %v2984_v61, %v5121_v14  ;;  %v2976_v61 = vsel %vm93_vm0, %v7894_v11, %v7884_v20 }
 0xc7c   :  { %v2886_v3 = vpop.permute.xlu0 %2885  ;;  %v2892_v2 = vpop.permute.xlu1 %2891 }
 0xc7d   :  { %v2921_v13 = vsel %vm54_vm1, %v2884_v6, %v2892_v2 }
 0xc7e   :  { %3349 = vrot.lane.b32.xlu0 %v7888_v30, %s4954_s27  ;;  %3331 = vrot.lane.b32.xlu1 %v7821_v53, %s4954_s27  ;;  %v2983_v30 = vsel %vm93_vm0, %v7838_v21, %v7859_v56  ;;  %v2936_v53 = vmul.f32 %v2921_v13, %v10252_v51 }
 0xc80   :  { %v2894_v52 = vpop.permute.xlu0 %2893  ;;  %v2908_v48 = vpop.permute.xlu1 %2907 }
 0xc81   :  { %v2922_v1 = vsel %vm54_vm1, %v2886_v3, %v2894_v52  ;;  %v2925_v37 = vsel %vm54_vm1, %v2908_v48, %v2884_v6 }
 0xc82   :  { %v2940_v8 = vmul.f32 %v2922_v1, %v10252_v51  ;;  %3333 = vrot.lane.b32.xlu0 %v7841_v27, %s4954_s27  ;;  %3355 = vrot.lane.b32.xlu1 %v7862_v24, %s4954_s27  ;;  %v2992_v1 = vmul.f32 %v2983_v30, %v5121_v14  ;;  %v2988_v51 = vsel %vm93_vm0, %v7884_v20, %v7857_v42 }
 0xc83   :  { %v2935_v21 = vmul.f32 %v2925_v37, %v10254_v18  ;;  %v2995_v42 = vmul.f32 %v2988_v51, %v5142_v25  ;;  %v2975_v37 = vsel %vm93_vm0, %v7886_v38, %v7874_v40 }
 0xc84   :  { %v2910_v46 = vpop.permute.xlu0 %2909  ;;  %v2900_v13 = vpop.permute.xlu1 %2899  ;;  %v3396_v22 = vpack.c.bf16 %v2940_v8, %v2936_v53  ;;  %v2991_v53 = vmul.f32 %v2987_v0, %v5142_v25  ;;  %v2998_v0 = vmul.f32 %v2976_v61, %v5152_v32 }
 0xc85   :  { %v2926_v6 = vsel %vm54_vm1, %v2910_v46, %v2886_v3  ;;  %v2913_v8 = vsel %vm54_vm1, %v2900_v13, %v2908_v48  ;;  %v2917_v3 = vsel %vm54_vm1, %v2892_v2, %v2900_v13 }
 0xc86   :  { %v2939_v24 = vmul.f32 %v2926_v6, %v10254_v18  ;;  %3357 = vrot.lane.b32.xlu0 %v7878_v58, %s4954_s27  ;;  %3501 = vmatprep.subr.bf16.mxu0 %v3396_v22  ;;  %v3400_v18 = vpack.c.bf16 %v2996_v43, %v2992_v1  ;;  %v2980_v22 = vsel %vm93_vm0, %v7872_v49, %v7894_v11 }
 0xc87   :  { %v2937_v48 = vmul.f32 %v2917_v3, %v5157_v35  ;;  %v2979_v49 = vsel %vm93_vm0, %v7859_v56, %v7886_v38  ;;  %v3399_v11 = vpack.c.bf16 %v2995_v42, %v2991_v53  ;;  %v3048_v53 = vsel %vm133_vm2, %v7902_v34, %v7910_v47 }
 0xc88   :  { %v3395_v20 = vpack.c.bf16 %v2939_v24, %v2935_v21  ;;  %v2902_v30 = vpop.permute.xlu0 %2901  ;;  %v2948_v6 = vpop.permute.xlu1 %2947  ;;  %v2938_v24 = vmul.f32 %v2913_v8, %v5149_v31  ;;  %v2997_v21 = vmul.f32 %v2980_v22, %v5160_v36  ;;  %v2993_v3 = vmul.f32 %v2979_v49, %v5160_v36 }
 0xc89   :  { %v2914_v2 = vsel %vm54_vm1, %v2902_v30, %v2910_v46  ;;  %v2918_v51 = vsel %vm54_vm1, %v2894_v52, %v2902_v30  ;;  %v2994_v46 = vmul.f32 %v2975_v37, %v5152_v32  ;;  %v3047_v22 = vsel %vm133_vm2, %v7896_v5, %v7904_v41 }
 0xc8a   :  { %v2941_v40 = vmul.f32 %v2918_v51, %v5157_v35  ;;  %v2942_v43 = vmul.f32 %v2914_v2, %v5149_v31  ;;  %3502 = vmatpush1.bf16.msra.mxu0 %v3395_v20  ;;  %v3401_v38 = vpack.c.bf16 %v2997_v21, %v2993_v3  ;;  %v3060_v2 = vmul.f32 %v3048_v53, %v5183_v54 }
 0xc8b   :  { %3503 = vmatprep.subr.bf16.mxu0 %v3400_v18  ;;  %v3402_v8 = vpack.c.bf16 %v2998_v0, %v2994_v46  ;;  %v3051_v51 = vsel %vm133_vm2, %v7912_v4, %v7896_v5 }
 0xc8c   :  { %v3397_v13 = vpack.c.bf16 %v2941_v40, %v2937_v48  ;;  %v2950_v52 = vpop.permute.xlu0 %2949  ;;  %v2956_v1 = vpop.permute.xlu1 %2955  ;;  %v3398_v61 = vpack.c.bf16 %v2942_v43, %v2938_v24  ;;  %v3052_v43 = vsel %vm133_vm2, %v7918_v10, %v7902_v34 }
 0xc8d   :  { %v2985_v20 = vsel %vm93_vm0, %v2948_v6, %v2956_v1 }
 0xc8e   :  { %3504 = vmatpush1.bf16.msra.mxu0 %v3399_v11  ;;  %3607 = vmatprep.subr.bf16.mxu1 %v3398_v61  ;;  %v3000_v37 = vmul.f32 %v2985_v20, %v5121_v14  ;;  %v3040_v11 = vsel %vm133_vm2, %v7926_v60, %v7918_v10  ;;  %v3059_v61 = vmul.f32 %v3052_v43, %v5198_v63 }
 0xc8f   :  { %3608 = vmatpush1.bf16.msra.mxu1 %v3397_v13  ;;  %v3055_v13 = vmul.f32 %v3051_v51, %v5198_v63  ;;  %v3039_v10 = vsel %vm133_vm2, %v7920_v28, %v7912_v4 }
 0xc90   :  { %v2958_v56 = vpop.permute.xlu0 %2957  ;;  %3609 = vmatprep.subr.bf16.mxu1 %v3402_v8  ;;  %v2972_v18 = vpop.permute.xlu1 %2971 }
 0xc91   :  { %v2986_v42 = vsel %vm93_vm0, %v2950_v52, %v2958_v56  ;;  %v2989_v0 = vsel %vm93_vm0, %v2972_v18, %v2948_v6  ;;  %v3056_v6 = vmul.f32 %v3047_v22, %v5183_v54  ;;  %v3058_v22 = vmul.f32 %v3039_v10, %v5219_v26 }
 0xc92   :  { %v3004_v30 = vmul.f32 %v2986_v42, %v5121_v14  ;;  %v2999_v5 = vmul.f32 %v2989_v0, %v5142_v25 }
 0xc93   :  { %3610 = vmatpush1.bf16.msra.mxu1 %v3401_v38  ;;  %v3408_v20 = vpack.c.bf16 %v3060_v2, %v3056_v6  ;;  %v3044_v38 = vsel %vm133_vm2, %v7910_v47, %v7926_v60  ;;  %v3043_v47 = vsel %vm133_vm2, %v7904_v41, %v7920_v28  ;;  %v3407_v60 = vpack.c.bf16 %v3059_v61, %v3055_v13 }
 0xc94   :  { %v2974_v48 = vpop.permute.xlu0 %2973  ;;  %v2964_v24 = vpop.permute.xlu1 %2963  ;;  %v3404_v40 = vpack.c.bf16 %v3004_v30, %v3000_v37  ;;  %v3112_v6 = vsel %vm173_vm3, %v7934_v29, %v7942_v45  ;;  %v3111_v13 = vsel %vm173_vm3, %v7928_v39, %v7936_v15  ;;  %v3115_v61 = vsel %vm173_vm3, %v7944_v44, %v7928_v39 }
 0xc95   :  { %v2990_v49 = vsel %vm93_vm0, %v2974_v48, %v2950_v52  ;;  %v2977_v34 = vsel %vm93_vm0, %v2964_v24, %v2972_v18  ;;  %v2981_v52 = vsel %vm93_vm0, %v2956_v1, %v2964_v24  ;;  %v3062_v18 = vmul.f32 %v3040_v11, %v5219_v26 }
 0xc96   :  { %v3003_v46 = vmul.f32 %v2990_v49, %v5142_v25  ;;  %3505 = vmatprep.subr.bf16.mxu0 %v3404_v40  ;;  %v3001_v42 = vmul.f32 %v2981_v52, %v5160_v36  ;;  %v3002_v4 = vmul.f32 %v2977_v34, %v5152_v32  ;;  %v3057_v40 = vmul.f32 %v3043_v47, %v5216_v23 }
 0xc97   :  { %v3410_v24 = vpack.c.bf16 %v3062_v18, %v3058_v22  ;;  %v3124_v52 = vmul.f32 %v3112_v6, %v5186_v55  ;;  %v3104_v18 = vsel %vm173_vm3, %v7958_v57, %v7950_v12  ;;  %v3108_v22 = vsel %vm173_vm3, %v7942_v45, %v7958_v57 }
 0xc98   :  { %v3403_v21 = vpack.c.bf16 %v3003_v46, %v2999_v5  ;;  %v2966_v8 = vpop.permute.xlu0 %2965  ;;  %v3012_v3 = vpop.permute.xlu1 %3011  ;;  %v3107_v45 = vsel %vm173_vm3, %v7936_v15, %v7952_v33  ;;  %v3125_v6 = vmul.f32 %v3108_v22, %v5205_v16 }
 0xc99   :  { %v2978_v1 = vsel %vm93_vm0, %v2966_v8, %v2974_v48  ;;  %v2982_v53 = vsel %vm93_vm0, %v2958_v56, %v2966_v8  ;;  %v3061_v48 = vmul.f32 %v3044_v38, %v5216_v23 }
 0xc9a   :  { %v3005_v37 = vmul.f32 %v2982_v53, %v5160_v36  ;;  %v3006_v30 = vmul.f32 %v2978_v1, %v5152_v32  ;;  %3506 = vmatpush1.bf16.msra.mxu0 %v3403_v21  ;;  %v3119_v53 = vmul.f32 %v3115_v61, %v5195_v62 }
 0xc9b   :  { %3507 = vmatprep.subr.bf16.mxu0 %v3408_v20  ;;  %v3409_v49 = vpack.c.bf16 %v3061_v48, %v3057_v40  ;;  %v3116_v20 = vsel %vm173_vm3, %v7950_v12, %v7934_v29  ;;  %v3103_v12 = vsel %vm173_vm3, %v7952_v33, %v7944_v44 }
 0xc9c   :  { %v3405_v0 = vpack.c.bf16 %v3005_v37, %v3001_v42  ;;  %v3014_v56 = vpop.permute.xlu0 %3013  ;;  %v3020_v2 = vpop.permute.xlu1 %3019  ;;  %v3406_v51 = vpack.c.bf16 %v3006_v30, %v3002_v4  ;;  %v3123_v4 = vmul.f32 %v3116_v20, %v5195_v62  ;;  %v3122_v40 = vmul.f32 %v3103_v12, %v5208_v17 }
 0xc9d   :  { %v3049_v43 = vsel %vm133_vm2, %v3012_v3, %v3020_v2 }
 0xc9e   :  { %3508 = vmatpush1.bf16.msra.mxu0 %v3407_v60  ;;  %3611 = vmatprep.subr.bf16.mxu1 %v3406_v51  ;;  %v3064_v5 = vmul.f32 %v3049_v43, %v5183_v54  ;;  %v3415_v57 = vpack.c.bf16 %v3123_v4, %v3119_v53  ;;  %v3172_v4 = vsel %vm213_vm4, %v7966_v9, %v7974_v59 }
 0xc9f   :  { %3612 = vmatpush1.bf16.msra.mxu1 %v3405_v0  ;;  %v3126_v0 = vmul.f32 %v3104_v18, %v5208_v17 }
 0xca0   :  { %v3022_v41 = vpop.permute.xlu0 %3021  ;;  %3613 = vmatprep.subr.bf16.mxu1 %v3410_v24  ;;  %v3036_v28 = vpop.permute.xlu1 %3035 }
 0xca1   :  { %v3050_v11 = vsel %vm133_vm2, %v3014_v56, %v3022_v41  ;;  %v3053_v34 = vsel %vm133_vm2, %v3036_v28, %v3012_v3  ;;  %v3120_v3 = vmul.f32 %v3111_v13, %v5186_v55 }
 0xca2   :  { %v3068_v46 = vmul.f32 %v3050_v11, %v5183_v54  ;;  %v3063_v39 = vmul.f32 %v3053_v34, %v5198_v63  ;;  %v3418_v11 = vpack.c.bf16 %v3126_v0, %v3122_v40 }
 0xca3   :  { %3614 = vmatpush1.bf16.msra.mxu1 %v3409_v49  ;;  %v3416_v60 = vpack.c.bf16 %v3124_v52, %v3120_v3 }
 0xca4   :  { %v3038_v10 = vpop.permute.xlu0 %3037  ;;  %v3028_v21 = vpop.permute.xlu1 %3027  ;;  %v3412_v8 = vpack.c.bf16 %v3068_v46, %v3064_v5  ;;  %v3121_v5 = vmul.f32 %v3107_v45, %v5205_v16  ;;  %v10294_v45 = vld [vmem:[#allocation49_spill] sm:$0xff] }
 0xca5   :  { %v3054_v38 = vsel %vm133_vm2, %v3038_v10, %v3014_v56  ;;  %v3041_v29 = vsel %vm133_vm2, %v3028_v21, %v3036_v28  ;;  %v3045_v42 = vsel %vm133_vm2, %v3020_v2, %v3028_v21 }
 0xca6   :  { %v3067_v1 = vmul.f32 %v3054_v38, %v5198_v63  ;;  %3509 = vmatprep.subr.bf16.mxu0 %v3412_v8  ;;  %v3065_v51 = vmul.f32 %v3045_v42, %v5216_v23  ;;  %v3066_v44 = vmul.f32 %v3041_v29, %v5219_v26  ;;  %v3417_v13 = vpack.c.bf16 %v3125_v6, %v3121_v5  ;;  %v10297_v6 = vld [vmem:[#allocation36_spill] sm:$0xff] }
 0xca8   :  { %v3411_v37 = vpack.c.bf16 %v3067_v1, %v3063_v39  ;;  %v3030_v30 = vpop.permute.xlu0 %3029  ;;  %v3076_v47 = vpop.permute.xlu1 %3075 }
 0xca9   :  { %v3042_v56 = vsel %vm133_vm2, %v3030_v30, %v3038_v10  ;;  %v3046_v2 = vsel %vm133_vm2, %v3022_v41, %v3030_v30  ;;  %v3424_v30 = vpack.c.bf16 %v7669_v19, %v7658_v50  ;;  %v10295_v50 = vld [vmem:[#allocation32_spill] sm:$0xff] }
 0xcaa   :  { %v3069_v48 = vmul.f32 %v3046_v2, %v5216_v23  ;;  %v3070_v24 = vmul.f32 %v3042_v56, %v5219_v26  ;;  %3510 = vmatpush1.bf16.msra.mxu0 %v3411_v37  ;;  %v10290_v56 = vld [vmem:[#allocation45_spill] sm:$0xff]  ;;  %v10291_v2 = vld [vmem:[#allocation38_spill] sm:$0xff]  ;;  %v3426_v19 = vpack.c.bf16 %v10295_v50, %v10294_v45 }
 0xcab   :  { %3511 = vmatprep.subr.bf16.mxu0 %v3416_v60 }
 0xcac   :  { %v3413_v43 = vpack.c.bf16 %v3069_v48, %v3065_v51  ;;  %v3078_v41 = vpop.permute.xlu0 %3077  ;;  %v3084_v28 = vpop.permute.xlu1 %3083  ;;  %v3414_v49 = vpack.c.bf16 %v3070_v24, %v3066_v44  ;;  %v3171_v51 = vsel %vm213_vm4, %v10291_v2, %v10290_v56  ;;  %v10292_v44 = vld [vmem:[#allocation72_spill] sm:$0xff]  ;;  %v10293_v48 = vld [vmem:[#allocation39_spill] sm:$0xff] }
 0xcad   :  { %v3113_v46 = vsel %vm173_vm3, %v3076_v47, %v3084_v28  ;;  %v3423_v24 = vpack.c.bf16 %v10293_v48, %v10292_v44 }
 0xcae   :  { %3512 = vmatpush1.bf16.msra.mxu0 %v3415_v57  ;;  %3615 = vmatprep.subr.bf16.mxu1 %v3414_v49  ;;  %v3128_v52 = vmul.f32 %v3113_v46, %v5186_v55  ;;  %v10296_v57 = vld [vmem:[#allocation16_spill] sm:$0xff]  ;;  %v10299_v46 = vld [vmem:[#allocation51_spill] sm:$0xff] }
 0xcaf   :  { %3616 = vmatpush1.bf16.msra.mxu1 %v3413_v43  ;;  %v3188_v40 = vmul.f32 %v3172_v4, %v10296_v57 }
 0xcb0   :  { %v3086_v15 = vpop.permute.xlu0 %3085  ;;  %3617 = vmatprep.subr.bf16.mxu1 %v3418_v11  ;;  %v3100_v33 = vpop.permute.xlu1 %3099  ;;  %v10298_v11 = vld [vmem:[#allocation34_spill] sm:$0xff] }
 0xcb1   :  { %v3114_v34 = vsel %vm173_vm3, %v3078_v41, %v3086_v15  ;;  %v3117_v10 = vsel %vm173_vm3, %v3100_v33, %v3076_v47  ;;  %v3425_v5 = vpack.c.bf16 %v10298_v11, %v10297_v6 }
 0xcb2   :  { %v3132_v61 = vmul.f32 %v3114_v34, %v5186_v55  ;;  %v3127_v3 = vmul.f32 %v3117_v10, %v5195_v62  ;;  %v10303_v10 = vld [vmem:[#allocation35_spill] sm:$0xff] }
 0xcb3   :  { %3618 = vmatpush1.bf16.msra.mxu1 %v3417_v13  ;;  %v10301_v13 = vld [vmem:[#allocation42_spill] sm:$0xff] }
 0xcb4   :  { %v3102_v21 = vpop.permute.xlu0 %3101  ;;  %v3092_v8 = vpop.permute.xlu1 %3091  ;;  %v3420_v20 = vpack.c.bf16 %v3132_v61, %v3128_v52  ;;  %v10302_v52 = vld [vmem:[#allocation37_spill] sm:$0xff] }
 0xcb5   :  { %v3118_v38 = vsel %vm173_vm3, %v3102_v21, %v3078_v41  ;;  %v3105_v39 = vsel %vm173_vm3, %v3092_v8, %v3100_v33  ;;  %v3109_v1 = vsel %vm173_vm3, %v3084_v28, %v3092_v8  ;;  %v10300_v33 = vld [vmem:[#allocation33_spill] sm:$0xff]  ;;  %v3427_v61 = vpack.c.bf16 %v7841_v27, %v10302_v52 }
 0xcb6   :  { %v3131_v18 = vmul.f32 %v3118_v38, %v5195_v62  ;;  %3513 = vmatprep.subr.bf16.mxu0 %v3420_v20  ;;  %v3129_v47 = vmul.f32 %v3109_v1, %v5205_v16  ;;  %v3130_v60 = vmul.f32 %v3105_v39, %v5208_v17  ;;  %v3428_v34 = vpack.c.bf16 %v10301_v13, %v10300_v33  ;;  %v10304_v20 = vld [vmem:[#allocation43_spill] sm:$0xff]  ;;  %v10307_v39 = vld [vmem:[#allocation18_spill] sm:$0xff]  ;;  %v10317_v13 = vld [vmem:[#allocation44_spill] sm:$0xff] }
 0xcb7   :  { %v3184_v8 = vmul.f32 %v3171_v51, %v10296_v57  ;;  %v3168_v38 = vsel %vm213_vm4, %v7974_v59, %v10304_v20  ;;  %v10313_v51 = vld [vmem:[#allocation50_spill] sm:$0xff] }
 0xcb8   :  { %v3419_v53 = vpack.c.bf16 %v3131_v18, %v3127_v3  ;;  %v3094_v29 = vpop.permute.xlu0 %3093  ;;  %v3148_v42 = vpop.permute.xlu1 %3147  ;;  %v10305_v3 = vld [vmem:[#allocation48_spill] sm:$0xff] }
 0xcb9   :  { %v3106_v12 = vsel %vm173_vm3, %v3094_v29, %v3102_v21  ;;  %v3110_v37 = vsel %vm173_vm3, %v3086_v15, %v3094_v29  ;;  %v3176_v15 = vsel %vm213_vm4, %v10299_v46, %v7966_v9  ;;  %v3430_v21 = vpack.c.bf16 %v7878_v58, %v10303_v10  ;;  %v10306_v58 = vld [vmem:[#allocation41_spill] sm:$0xff] }
 0xcba   :  { %v3133_v22 = vmul.f32 %v3110_v37, %v5205_v16  ;;  %v3134_v0 = vmul.f32 %v3106_v12, %v5208_v17  ;;  %3514 = vmatpush1.bf16.msra.mxu0 %v3419_v53  ;;  %v3180_v9 = vsel %vm213_vm4, %v10304_v20, %v10299_v46  ;;  %v3175_v27 = vsel %vm213_vm4, %v10305_v3, %v10291_v2  ;;  %v10308_v37 = vld [vmem:[#allocation46_spill] sm:$0xff]  ;;  %v10312_v2 = vld [vmem:[#allocation55_spill] sm:$0xff]  ;;  %v10318_v20 = vld [vmem:[#allocation52_spill] sm:$0xff] }
 0xcbb   :  { %3515 = vmatprep.subr.bf16.mxu0 %v3424_v30  ;;  %v3167_v18 = vsel %vm213_vm4, %v10290_v56, %v10306_v58  ;;  %v3187_v1 = vmul.f32 %v3176_v15, %v10307_v39  ;;  %v3179_v53 = vsel %vm213_vm4, %v10306_v58, %v10305_v3  ;;  %v3432_v12 = vpack.c.bf16 %v3188_v40, %v3184_v8  ;;  %v10309_v30 = vld [vmem:[#allocation40_spill] sm:$0xff] }
 0xcbc   :  { %v3421_v43 = vpack.c.bf16 %v3133_v22, %v3129_v47  ;;  %v3150_v41 = vpop.permute.xlu0 %3149  ;;  %v3156_v28 = vpop.permute.xlu1 %3155  ;;  %v3422_v49 = vpack.c.bf16 %v3134_v0, %v3130_v60  ;;  %v3429_v47 = vpack.c.bf16 %v10309_v30, %v10308_v37  ;;  %v10310_v60 = vld [vmem:[#allocation17_spill] sm:$0xff]  ;;  %v10311_v0 = vld [vmem:[#allocation19_spill] sm:$0xff]  ;;  %v3236_v44 = vsel %vm253_vm5, %v10313_v51, %v10312_v2  ;;  %v10316_v15 = vld [vmem:[#allocation20_spill] sm:$0xff] }
 0xcbd   :  { %v3173_v59 = vsel %vm213_vm4, %v3148_v42, %v3156_v28  ;;  %v3189_v22 = vmul.f32 %v3168_v38, %v10310_v60  ;;  %v3190_v56 = vmul.f32 %v3180_v9, %v10311_v0  ;;  %v3185_v45 = vmul.f32 %v3167_v18, %v10310_v60  ;;  %v10319_v3 = vld [vmem:[#allocation56_spill] sm:$0xff]  ;;  %v10320_v18 = vld [vmem:[#allocation23_spill] sm:$0xff] }
 0xcbe   :  { %3516 = vmatpush1.bf16.msra.mxu0 %v3423_v24  ;;  %3619 = vmatprep.subr.bf16.mxu1 %v3422_v49  ;;  %v3183_v24 = vmul.f32 %v3175_v27, %v10307_v39  ;;  %v3192_v50 = vmul.f32 %v3173_v59, %v10296_v57  ;;  %v3186_v40 = vmul.f32 %v3179_v53, %v10311_v0  ;;  %v10315_v49 = vld [vmem:[#allocation47_spill] sm:$0xff] }
 0xcbf   :  { %3517 = vmatprep.subr.bf16.mxu0 %v3428_v34  ;;  %3620 = vmatpush1.bf16.msra.mxu1 %v3421_v43  ;;  %v10314_v43 = vld [vmem:[#allocation53_spill] sm:$0xff]  ;;  %v3252_v33 = vmul.f32 %v3236_v44, %v10316_v15  ;;  %v3239_v34 = vsel %vm253_vm5, %v10317_v13, %v10315_v49  ;;  %v3433_v8 = vpack.c.bf16 %v3189_v22, %v3185_v45 }
 0xcc0   :  { %v3158_v29 = vpop.permute.xlu0 %3157  ;;  %3621 = vmatprep.subr.bf16.mxu1 %v3426_v19  ;;  %v3140_v4 = vpop.permute.xlu1 %3139  ;;  %v3235_v6 = vsel %vm253_vm5, %v10315_v49, %v10314_v43  ;;  %v3431_v46 = vpack.c.bf16 %v3187_v1, %v3183_v24  ;;  %v3434_v38 = vpack.c.bf16 %v3190_v56, %v3186_v40  ;;  %v3244_v27 = vsel %vm253_vm5, %v10319_v3, %v10318_v20 }
 0xcc1   :  { %v3174_v48 = vsel %vm213_vm4, %v3150_v41, %v3158_v29  ;;  %v3177_v11 = vsel %vm213_vm4, %v3140_v4, %v3148_v42  ;;  %v3240_v42 = vsel %vm253_vm5, %v10318_v20, %v10313_v51  ;;  %v3248_v9 = vmul.f32 %v3235_v6, %v10316_v15  ;;  %v10324_v20 = vld [vmem:[#allocation63_spill] sm:$0xff] }
 0xcc2   :  { %v3196_v19 = vmul.f32 %v3174_v48, %v10296_v57  ;;  %3518 = vmatpush1.bf16.msra.mxu0 %v3427_v61  ;;  %v3247_v59 = vmul.f32 %v3239_v34, %v10320_v18  ;;  %v3251_v53 = vmul.f32 %v3240_v42, %v10320_v18  ;;  %v10325_v42 = vld [vmem:[#allocation58_spill] sm:$0xff] }
 0xcc3   :  { %3519 = vmatprep.subr.bf16.mxu0 %v3432_v12  ;;  %3622 = vmatpush1.bf16.msra.mxu1 %v3425_v5  ;;  %v10321_v12 = vld [vmem:[#allocation57_spill] sm:$0xff]  ;;  %v3440_v51 = vpack.c.bf16 %v3252_v33, %v3248_v9  ;;  %v10323_v33 = vld [vmem:[#allocation26_spill] sm:$0xff] }
 0xcc4   :  { %v3142_v52 = vpop.permute.xlu0 %3141  ;;  %3623 = vmatprep.subr.bf16.mxu1 %v3430_v21  ;;  %v3164_v61 = vpop.permute.xlu1 %3163  ;;  %v3436_v10 = vpack.c.bf16 %v3196_v19, %v3192_v50  ;;  %v3191_v21 = vmul.f32 %v3177_v11, %v10307_v39  ;;  %v3243_v37 = vsel %vm253_vm5, %v10321_v12, %v10317_v13 }
 0xcc5   :  { %v3178_v5 = vsel %vm213_vm4, %v3142_v52, %v3150_v41  ;;  %v3169_v1 = vsel %vm213_vm4, %v3156_v28, %v3164_v61  ;;  %v3181_v41 = vsel %vm213_vm4, %v3164_v61, %v3140_v4  ;;  %v3232_v28 = vsel %vm253_vm5, %v10312_v2, %v10319_v3  ;;  %v10322_v4 = vld [vmem:[#allocation27_spill] sm:$0xff] }
 0xcc6   :  { %v3195_v58 = vmul.f32 %v3178_v5, %v10307_v39  ;;  %3520 = vmatpush1.bf16.msra.mxu0 %v3431_v46  ;;  %v3254_v44 = vmul.f32 %v3244_v27, %v10322_v4  ;;  %v3193_v24 = vmul.f32 %v3169_v1, %v10310_v60  ;;  %v3194_v45 = vmul.f32 %v3181_v41, %v10311_v0  ;;  %v10326_v27 = vld [vmem:[#allocation61_spill] sm:$0xff] }
 0xcc7   :  { %3521 = vmatprep.subr.bf16.mxu0 %v3436_v10  ;;  %3624 = vmatpush1.bf16.msra.mxu1 %v3429_v47  ;;  %v3231_v2 = vsel %vm253_vm5, %v10314_v43, %v10321_v12  ;;  %v3250_v40 = vmul.f32 %v3243_v37, %v10322_v4  ;;  %v3253_v13 = vmul.f32 %v3232_v28, %v10323_v33  ;;  %v10328_v1 = vld [vmem:[#allocation21_spill] sm:$0xff] }
 0xcc8   :  { %v3435_v30 = vpack.c.bf16 %v3195_v58, %v3191_v21  ;;  %v3166_v22 = vpop.permute.xlu0 %3165  ;;  %3625 = vmatprep.subr.bf16.mxu1 %v3434_v38  ;;  %v3212_v56 = vpop.permute.xlu1 %3211  ;;  %v3300_v5 = vsel %vm293_vm6, %v10325_v42, %v10324_v20  ;;  %v10327_v21 = vld [vmem:[#allocation54_spill] sm:$0xff] }
 0xcc9   :  { %v3170_v47 = vsel %vm213_vm4, %v3158_v29, %v3166_v22  ;;  %v3182_v48 = vsel %vm213_vm4, %v3166_v22, %v3142_v52  ;;  %v3439_v29 = vpack.c.bf16 %v3251_v53, %v3247_v59  ;;  %v3442_v34 = vpack.c.bf16 %v3254_v44, %v3250_v40  ;;  %v10329_v53 = vld [vmem:[#allocation59_spill] sm:$0xff] }
 0xcca   :  { %v3197_v50 = vmul.f32 %v3170_v47, %v10310_v60  ;;  %v3198_v19 = vmul.f32 %v3182_v48, %v10311_v0  ;;  %3522 = vmatpush1.bf16.msra.mxu0 %v3435_v30  ;;  %v3249_v52 = vmul.f32 %v3231_v2, %v10323_v33  ;;  %v3299_v58 = vsel %vm293_vm6, %v10327_v21, %v10326_v27  ;;  %v10331_v47 = vld [vmem:[#allocation64_spill] sm:$0xff] }
 0xccb   :  { %3523 = vmatprep.subr.bf16.mxu0 %v3440_v51  ;;  %3626 = vmatpush1.bf16.msra.mxu1 %v3433_v8  ;;  %v3316_v41 = vmul.f32 %v3300_v5, %v10328_v1  ;;  %v3303_v12 = vsel %vm293_vm6, %v10329_v53, %v10327_v21  ;;  %v10330_v51 = vld [vmem:[#allocation60_spill] sm:$0xff] }
 0xccc   :  { %v3437_v49 = vpack.c.bf16 %v3197_v50, %v3193_v24  ;;  %v3214_v6 = vpop.permute.xlu0 %3213  ;;  %v3220_v11 = vpop.permute.xlu1 %3219  ;;  %v3438_v46 = vpack.c.bf16 %v3198_v19, %v3194_v45  ;;  %v3441_v8 = vpack.c.bf16 %v3253_v13, %v3249_v52  ;;  %v3304_v28 = vsel %vm293_vm6, %v10330_v51, %v10325_v42  ;;  %v10332_v50 = vld [vmem:[#allocation22_spill] sm:$0xff] }
 0xccd   :  { %v3237_v61 = vsel %vm253_vm5, %v3212_v56, %v3220_v11  ;;  %v3308_v48 = vsel %vm293_vm6, %v10331_v47, %v10330_v51  ;;  %v3311_v19 = vmul.f32 %v3303_v12, %v10332_v50  ;;  %v3315_v40 = vmul.f32 %v3304_v28, %v10332_v50  ;;  %v10335_v12 = vld [vmem:[#allocation24_spill] sm:$0xff] }
 0xcce   :  { %3524 = vmatpush1.bf16.msra.mxu0 %v3439_v29  ;;  %3627 = vmatprep.subr.bf16.mxu1 %v3438_v46  ;;  %v3256_v9 = vmul.f32 %v3237_v61, %v10316_v15  ;;  %v3296_v61 = vsel %vm293_vm6, %v10324_v20, %v10331_v47  ;;  %v10337_v47 = vld [vmem:[#allocation66_spill] sm:$0xff] }
 0xccf   :  { %3628 = vmatpush1.bf16.msra.mxu1 %v3437_v49  ;;  %v10333_v49 = vld [vmem:[#allocation65_spill] sm:$0xff]  ;;  %v3447_v21 = vpack.c.bf16 %v3315_v40, %v3311_v19 }
 0xcd0   :  { %v3222_v43 = vpop.permute.xlu0 %3221  ;;  %3629 = vmatprep.subr.bf16.mxu1 %v3442_v34  ;;  %v3204_v10 = vpop.permute.xlu1 %3203  ;;  %v3295_v20 = vsel %vm293_vm6, %v10326_v27, %v10333_v49 }
 0xcd1   :  { %v3238_v38 = vsel %vm253_vm5, %v3214_v6, %v3222_v43  ;;  %v3241_v59 = vsel %vm253_vm5, %v3204_v10, %v3212_v56  ;;  %v3312_v56 = vmul.f32 %v3299_v58, %v10328_v1 }
 0xcd2   :  { %v3260_v3 = vmul.f32 %v3238_v38, %v10316_v15  ;;  %v3255_v24 = vmul.f32 %v3241_v59, %v10320_v18 }
 0xcd3   :  { %3630 = vmatpush1.bf16.msra.mxu1 %v3441_v8  ;;  %v3448_v52 = vpack.c.bf16 %v3316_v41, %v3312_v56  ;;  %v10336_v56 = vld [vmem:[#allocation71_spill] sm:$0xff] }
 0xcd4   :  { %v3206_v37 = vpop.permute.xlu0 %3205  ;;  %v3228_v30 = vpop.permute.xlu1 %3227  ;;  %v3444_v22 = vpack.c.bf16 %v3260_v3, %v3256_v9 }
 0xcd5   :  { %v3242_v44 = vsel %vm253_vm5, %v3206_v37, %v3214_v6  ;;  %v3233_v2 = vsel %vm253_vm5, %v3220_v11, %v3228_v30  ;;  %v3245_v29 = vsel %vm253_vm5, %v3228_v30, %v3204_v10  ;;  %v3307_v6 = vsel %vm293_vm6, %v10333_v49, %v10329_v53  ;;  %v10334_v11 = vld [vmem:[#allocation25_spill] sm:$0xff] }
 0xcd6   :  { %v3259_v45 = vmul.f32 %v3242_v44, %v10320_v18  ;;  %3525 = vmatprep.subr.bf16.mxu0 %v3444_v22  ;;  %v3318_v8 = vmul.f32 %v3308_v48, %v10334_v11  ;;  %v3257_v5 = vmul.f32 %v3233_v2, %v10323_v33  ;;  %v3258_v38 = vmul.f32 %v3245_v29, %v10322_v4  ;;  %v10338_v2 = vld [vmem:[#allocation69_spill] sm:$0xff]  ;;  %v10339_v29 = vld [vmem:[#allocation62_spill] sm:$0xff] }
 0xcd7   :  { %v3313_v22 = vmul.f32 %v3295_v20, %v10335_v12  ;;  %v3364_v48 = vsel %vm333_vm7, %v10337_v47, %v10336_v56  ;;  %v3363_v40 = vsel %vm333_vm7, %v10339_v29, %v10338_v2 }
 0xcd8   :  { %v3443_v46 = vpack.c.bf16 %v3259_v45, %v3255_v24  ;;  %v3230_v13 = vpop.permute.xlu0 %3229  ;;  %v3276_v34 = vpop.permute.xlu1 %3275 }
 0xcd9   :  { %v3234_v10 = vsel %vm253_vm5, %v3222_v43, %v3230_v13  ;;  %v3246_v42 = vsel %vm253_vm5, %v3230_v13, %v3206_v37  ;;  %v3314_v43 = vmul.f32 %v3307_v6, %v10334_v11  ;;  %v3317_v37 = vmul.f32 %v3296_v61, %v10335_v12  ;;  %v10340_v6 = vld [vmem:[#allocation30_spill] sm:$0xff]  ;;  %v10341_v13 = vld [vmem:[#allocation67_spill] sm:$0xff] }
 0xcda   :  { %v3261_v9 = vmul.f32 %v3234_v10, %v10323_v33  ;;  %v3262_v3 = vmul.f32 %v3246_v42, %v10322_v4  ;;  %3526 = vmatpush1.bf16.msra.mxu0 %v3443_v46  ;;  %v3380_v46 = vmul.f32 %v3364_v48, %v10340_v6  ;;  %v10342_v42 = vld [vmem:[#allocation68_spill] sm:$0xff] }
 0xcdb   :  { %3527 = vmatprep.subr.bf16.mxu0 %v3448_v52  ;;  %v3450_v30 = vpack.c.bf16 %v3318_v8, %v3314_v43  ;;  %v3449_v44 = vpack.c.bf16 %v3317_v37, %v3313_v22  ;;  %v3367_v52 = vsel %vm333_vm7, %v10341_v13, %v10339_v29  ;;  %v10344_v43 = vld [vmem:[#allocation28_spill] sm:$0xff]  ;;  %v4873_v29 = vld [vmem:[%s9725_s5] ss:$12 sps:$4 sm:$0xff]  }
 0xcdc   :  { %v3445_v58 = vpack.c.bf16 %v3261_v9, %v3257_v5  ;;  %v3278_v59 = vpop.permute.xlu0 %3277  ;;  %v3284_v41 = vpop.permute.xlu1 %3283  ;;  %v3446_v53 = vpack.c.bf16 %v3262_v3, %v3258_v38  ;;  %v3368_v5 = vsel %vm333_vm7, %v10342_v42, %v10337_v47  ;;  %v10343_v9 = vld [vmem:[#allocation74_spill] sm:$0xff] }
 0xcdd   :  { %v3301_v51 = vsel %vm293_vm6, %v3276_v34, %v3284_v41  ;;  %v3372_v3 = vsel %vm333_vm7, %v10343_v9, %v10342_v42  ;;  %v3379_v37 = vmul.f32 %v3368_v5, %v10344_v43 }
 0xcde   :  { %3528 = vmatpush1.bf16.msra.mxu0 %v3447_v21  ;;  %3631 = vmatprep.subr.bf16.mxu1 %v3446_v53  ;;  %v3320_v45 = vmul.f32 %v3301_v51, %v10328_v1 }
 0xcdf   :  { %3632 = vmatpush1.bf16.msra.mxu1 %v3445_v58  ;;  %v3375_v58 = vmul.f32 %v3367_v52, %v10344_v43 }
 0xce0   :  { %v3286_v27 = vpop.permute.xlu0 %3285  ;;  %3633 = vmatprep.subr.bf16.mxu1 %v3450_v30  ;;  %v3268_v28 = vpop.permute.xlu1 %3267  ;;  %v10345_v30 = vld [vmem:[#allocation73_spill] sm:$0xff] }
 0xce1   :  { %v3302_v24 = vsel %vm293_vm6, %v3278_v59, %v3286_v27  ;;  %v3305_v49 = vsel %vm293_vm6, %v3268_v28, %v3276_v34  ;;  %v3376_v34 = vmul.f32 %v3363_v40, %v10340_v6  ;;  %v3371_v22 = vsel %vm333_vm7, %v10345_v30, %v10341_v13  ;;  %v4876_v13 = vld [vmem:[%s9725_s5 + $0x1c] ss:$12 sps:$4 sm:$0xff]  }
 0xce2   :  { %v3324_v19 = vmul.f32 %v3302_v24, %v10328_v1  ;;  %v3319_v20 = vmul.f32 %v3305_v49, %v10332_v50  ;;  %v3360_v24 = vsel %vm333_vm7, %v10336_v56, %v10343_v9  ;;  %v3455_v52 = vpack.c.bf16 %v3379_v37, %v3375_v58 }
 0xce3   :  { %3634 = vmatpush1.bf16.msra.mxu1 %v3449_v44  ;;  %v3456_v48 = vpack.c.bf16 %v3380_v46, %v3376_v34 }
 0xce4   :  { %v3270_v61 = vpop.permute.xlu0 %3269  ;;  %v3292_v8 = vpop.permute.xlu1 %3291  ;;  %v3452_v10 = vpack.c.bf16 %v3324_v19, %v3320_v45 }
 0xce5   :  { %v3306_v38 = vsel %vm293_vm6, %v3270_v61, %v3278_v59  ;;  %v3297_v53 = vsel %vm293_vm6, %v3284_v41, %v3292_v8  ;;  %v3309_v59 = vsel %vm293_vm6, %v3292_v8, %v3268_v28  ;;  %v10346_v41 = vld [vmem:[#allocation29_spill] sm:$0xff] }
 0xce6   :  { %v3323_v21 = vmul.f32 %v3306_v38, %v10332_v50  ;;  %3529 = vmatprep.subr.bf16.mxu0 %v3452_v10  ;;  %v3382_v45 = vmul.f32 %v3372_v3, %v10346_v41  ;;  %v3321_v40 = vmul.f32 %v3297_v53, %v10335_v12  ;;  %v3322_v49 = vmul.f32 %v3309_v59, %v10334_v11  ;;  %v10347_v38 = vld [vmem:[#allocation31_spill] sm:$0xff]  ;;  %v4878_v59 = vld [vmem:[%s9725_s5 + $0x18] ss:$12 sps:$4 sm:$0xff]  }
 0xce7   :  { %v3381_v34 = vmul.f32 %v3360_v24, %v10347_v38 }
 0xce8   :  { %v3451_v51 = vpack.c.bf16 %v3323_v21, %v3319_v20  ;;  %v3294_v44 = vpop.permute.xlu0 %3293  ;;  %v3340_v47 = vpop.permute.xlu1 %3339 }
 0xce9   :  { %v3298_v28 = vsel %vm293_vm6, %v3286_v27, %v3294_v44  ;;  %v3310_v19 = vsel %vm293_vm6, %v3294_v44, %v3270_v61  ;;  %v3359_v27 = vsel %vm333_vm7, %v10338_v2, %v10345_v30  ;;  %v3378_v61 = vmul.f32 %v3371_v22, %v10346_v41 }
 0xcea   :  { %v3325_v46 = vmul.f32 %v3298_v28, %v10335_v12  ;;  %v3326_v56 = vmul.f32 %v3310_v19, %v10334_v11  ;;  %3530 = vmatpush1.bf16.msra.mxu0 %v3451_v51  ;;  %v3377_v2 = vmul.f32 %v3359_v27, %v10347_v38 }
 0xceb   :  { %3552 = vmatprep.subr.bf16.mxu0 %v3456_v48  ;;  %v3458_v9 = vpack.c.bf16 %v3382_v45, %v3378_v61 }
 0xcec   :  { %v3453_v8 = vpack.c.bf16 %v3325_v46, %v3321_v40  ;;  %v3342_v10 = vpop.permute.xlu0 %3341  ;;  %v3348_v42 = vpop.permute.xlu1 %3347  ;;  %v3454_v5 = vpack.c.bf16 %v3326_v56, %v3322_v49  ;;  %v3457_v58 = vpack.c.bf16 %v3381_v34, %v3377_v2 }
 0xced   :  { %3532 = vmatmul.mubr.bf16.vlgmr.msra.gmra.mrb[24].mxu0 %v4873_v29  ;;  %v3365_v3 = vsel %vm333_vm7, %v3340_v47, %v3348_v42 }
 0xcee   :  { %3553 = vmatpush1.bf16.msra.mxu0 %v3455_v52  ;;  %3635 = vmatprep.subr.bf16.mxu1 %v3454_v5  ;;  %v3384_v37 = vmul.f32 %v3365_v3, %v10340_v6  ;;  %v4880_v5 = vld [vmem:[%s9725_s5 + $0x20] ss:$12 sps:$4 sm:$0xff]  }
 0xcef   :  { %3636 = vmatpush1.bf16.msra.mxu1 %v3453_v8  ;;  %3541 = vmatprep.mubr.bf16.mxu0 %v4876_v13 }
 0xcf0   :  { %v3350_v20 = vpop.permute.xlu0 %3349  ;;  %3658 = vmatprep.subr.bf16.mxu1 %v3458_v9  ;;  %v3332_v21 = vpop.permute.xlu1 %3331 }
 0xcf1   :  { %v3366_v53 = vsel %vm333_vm7, %v3342_v10, %v3350_v20  ;;  %v3369_v22 = vsel %vm333_vm7, %v3332_v21, %v3340_v47 }
 0xcf2   :  { %v3388_v30 = vmul.f32 %v3366_v53, %v10340_v6  ;;  %3638 = vmatmul.mubr.bf16.vlgmr.msra.gmra.mrb[24].mxu1 %v4873_v29  ;;  %v3383_v45 = vmul.f32 %v3369_v22, %v10344_v43  ;;  %v10348_v29 = vmov 0  }
 0xcf3   :  { %3659 = vmatpush1.bf16.msra.mxu1 %v3457_v58  ;;  %3647 = vmatprep.mubr.bf16.mxu1 %v4876_v13  ;;  %v4879_v13 = vld [vmem:[%s9725_s5 + $0x8] ss:$12 sps:$4 sm:$0xff]  }
 0xcf4   :  { %v3334_v51 = vpop.permute.xlu0 %3333  ;;  %v3356_v44 = vpop.permute.xlu1 %3355  ;;  %v3460_v48 = vpack.c.bf16 %v3388_v30, %v3384_v37 }
 0xcf5   :  { %v3370_v24 = vsel %vm333_vm7, %v3334_v51, %v3342_v10  ;;  %3542 = vmatmul.mubr.bf16.gmra.mrb[28].mxu0 %v4878_v59  ;;  %v3361_v19 = vsel %vm333_vm7, %v3348_v42, %v3356_v44  ;;  %v3373_v47 = vsel %vm333_vm7, %v3356_v44, %v3332_v21 }
 0xcf6   :  { %v3387_v28 = vmul.f32 %v3370_v24, %v10344_v43  ;;  %3554 = vmatprep.subr.bf16.mxu0 %v3460_v48  ;;  %3584 = vmatprep.mubr.bf16.mxu0 %v10348_v29  ;;  %v3385_v46 = vmul.f32 %v3361_v19, %v10347_v38  ;;  %v3386_v52 = vmul.f32 %v3373_v47, %v10346_v41 }
 0xcf8   :  { %v3459_v40 = vpack.c.bf16 %v3387_v28, %v3383_v45  ;;  %v3358_v49 = vpop.permute.xlu0 %3357 }
 0xcf9   :  { %v3362_v56 = vsel %vm333_vm7, %v3350_v20, %v3358_v49  ;;  %v3374_v27 = vsel %vm333_vm7, %v3358_v49, %v3334_v51 }
 0xcfa   :  { %v3389_v61 = vmul.f32 %v3362_v56, %v10347_v38  ;;  %v3390_v8 = vmul.f32 %v3374_v27, %v10346_v41  ;;  %3555 = vmatpush1.bf16.msra.mxu0 %v3459_v40  ;;  %3648 = vmatmul.mubr.bf16.gmra.mrb[28].mxu1 %v4878_v59 }
 0xcfb   :  { %3690 = vmatprep.mubr.bf16.mxu1 %v10348_v29 }
 0xcfc   :  { %v3461_v10 = vpack.c.bf16 %v3389_v61, %v3385_v46  ;;  %v3462_v42 = vpack.c.bf16 %v3390_v8, %v3386_v52 }
 0xcfd   :  { %4767 = vmatmul.mubr.msk.bf16.vlgmr.msra.gmra.mrb[24].mxu0 %vm1372_vm10, %v4879_v13 }
 0xcfe   :  { %3660 = vmatprep.subr.bf16.mxu1 %v3462_v42  ;;  %3594 = vmatprep.mubr.bf16.mxu0 %v10348_v29 }
 0xcff   :  { %3661 = vmatpush1.bf16.msra.mxu1 %v3461_v10 }
 0xd02   :  { %4769 = vmatmul.mubr.msk.bf16.vlgmr.msra.gmra.mrb[24].mxu1 %vm1372_vm10, %v4879_v13 }
 0xd03   :  { %3700 = vmatprep.mubr.bf16.mxu1 %v10348_v29 }
 0xd05   :  { %4768 = vmatmul.mubr.msk.bf16.gmra.mrb[28].mxu0 %vm1372_vm10, %v4880_v5 }
 0xd0a   :  { %4770 = vmatmul.mubr.msk.bf16.gmra.mrb[28].mxu1 %vm1372_vm10, %v4880_v5 }
 0xdd0   :  { %v8616_v34 = vpop.f32.mrb[24].mxu0 }
 0xdd1   :  { %v8618_v9 = vpop.f32.mrb[25].mxu0 }
 0xdd2   :  { %v3711_v2 = vadd.f32 %v8618_v9, %v8616_v34  ;;  %v8622_v3 = vpop.f32.mrb[26].mxu0 }
 0xdd3   :  { %v8624_v20 = vpop.f32.mrb[27].mxu0 }
 0xdd4   :  { %v3716_v21 = vadd.f32 %v8624_v20, %v8622_v3 }
 0xdd5   :  { %v8628_v58 = vpop.f32.mrb[24].mxu1 }
 0xdd6   :  { %v3712_v53 = vadd.f32 %v3711_v2, %v8628_v58  ;;  %v8631_v59 = vpop.f32.mrb[25].mxu1 }
 0xdd7   :  { %v8633_v37 = vpop.f32.mrb[26].mxu1 }
 0xdd8   :  { %v3713_v30 = vadd.f32 %v3712_v53, %v8631_v59  ;;  %v3717_v22 = vadd.f32 %v3716_v21, %v8633_v37  ;;  %v8637_v51 = vpop.f32.mrb[28].mxu0  ;;  %v8639_v44 = vpop.f32.mrb[27].mxu1 }
 0xdd9   :  { %v8641_v48 = vpop.f32.mrb[29].mxu0 }
 0xdda   :  { %v3718_v24 = vadd.f32 %v3717_v22, %v8639_v44  ;;  %v3721_v45 = vadd.f32 %v8641_v48, %v8637_v51  ;;  %v8646_v28 = vpop.f32.mrb[30].mxu0  ;;  %3714 = vadd.xlane.f32.xlu1 %v3713_v30 }
 0xddb   :  { %v8648_v19 = vpop.f32.mrb[31].mxu0 }
 0xddc   :  { %v3726_v47 = vadd.f32 %v8648_v19, %v8646_v28  ;;  %3719 = vadd.xlane.f32.xlu0 %v3718_v24 }
 0xddd   :  { %v8652_v40 = vpop.f32.mrb[28].mxu1 }
 0xdde   :  { %v3722_v49 = vadd.f32 %v3721_v45, %v8652_v40  ;;  %v8655_v46 = vpop.f32.mrb[29].mxu1 }
 0xddf   :  { %v8657_v56 = vpop.f32.mrb[30].mxu1 }
 0xde0   :  { %v3723_v27 = vadd.f32 %v3722_v49, %v8655_v46  ;;  %v3727_v13 = vadd.f32 %v3726_v47, %v8657_v56  ;;  %v8661_v52 = vpop.f32.mrb[31].mxu1 }
 0xde2   :  { %v3728_v61 = vadd.f32 %v3727_v13, %v8661_v52  ;;  %3724 = vadd.xlane.f32.xlu0 %v3723_v27 }
 0xde4   :  { %3729 = vadd.xlane.f32.xlu1 %v3728_v61 }
 0xe67   :  { %v3715_v8 = vpop.xlane.xlu1 %3714 }
 0xe68   :  { %v8664_v10 = vmul.f32 0.001953125, %v3715_v8 }
 0xe69   :  { %v3720_v42 = vpop.xlane.xlu0 %3719 }
 0xe6a   :  { %v8666_v5 = vmul.f32 0.001953125, %v3720_v42  ;;  %v3735_v2 = vsub.f32 %v8616_v34, %v8664_v10  ;;  %v3736_v21 = vsub.f32 %v8618_v9, %v8664_v10  ;;  %v3737_v53 = vsub.f32 %v8628_v58, %v8664_v10 }
 0xe6b   :  { %v3738_v30 = vsub.f32 %v8631_v59, %v8664_v10 }
 0xe6c   :  { %v3751_v22 = vmul.f32 %v3735_v2, %v3735_v2  ;;  %v3752_v24 = vmul.f32 %v3736_v21, %v3736_v21  ;;  %v3739_v45 = vsub.f32 %v8622_v3, %v8666_v5  ;;  %v3740_v47 = vsub.f32 %v8624_v20, %v8666_v5 }
 0xe6d   :  { %v3741_v49 = vsub.f32 %v8633_v37, %v8666_v5  ;;  %v3753_v27 = vmul.f32 %v3737_v53, %v3737_v53  ;;  %v3742_v42 = vsub.f32 %v8639_v44, %v8666_v5  ;;  %v3754_v2 = vmul.f32 %v3738_v30, %v3738_v30 }
 0xe6e   :  { %v3767_v13 = vadd.f32 %v3752_v24, %v3751_v22  ;;  %v3755_v61 = vmul.f32 %v3739_v45, %v3739_v45  ;;  %v3756_v16 = vmul.f32 %v3740_v47, %v3740_v47 }
 0xe6f   :  { %v3725_v8 = vpop.xlane.xlu0 %3724  ;;  %v3757_v55 = vmul.f32 %v3741_v49, %v3741_v49  ;;  %v3758_v24 = vmul.f32 %v3742_v42, %v3742_v42 }
 0xe70   :  { %v8684_v62 = vmul.f32 0.001953125, %v3725_v8  ;;  %v3768_v21 = vadd.f32 %v3767_v13, %v3753_v27  ;;  %v3772_v23 = vadd.f32 %v3756_v16, %v3755_v61 }
 0xe71   :  { %v3730_v17 = vpop.xlane.xlu1 %3729 }
 0xe72   :  { %v8686_v63 = vmul.f32 0.001953125, %v3730_v17  ;;  %v3769_v26 = vadd.f32 %v3768_v21, %v3754_v2  ;;  %v3743_v53 = vsub.f32 %v8637_v51, %v8684_v62  ;;  %v3744_v22 = vsub.f32 %v8641_v48, %v8684_v62 }
 0xe73   :  { %v3773_v45 = vadd.f32 %v3772_v23, %v3757_v55  ;;  %v3745_v47 = vsub.f32 %v8652_v40, %v8684_v62  ;;  %v3746_v30 = vsub.f32 %v8655_v46, %v8684_v62 }
 0xe74   :  { %3770 = vadd.xlane.f32.xlu0 %v3769_v26  ;;  %v3759_v49 = vmul.f32 %v3743_v53, %v3743_v53  ;;  %v3760_v16 = vmul.f32 %v3744_v22, %v3744_v22  ;;  %v3747_v17 = vsub.f32 %v8646_v28, %v8686_v63  ;;  %v3748_v27 = vsub.f32 %v8648_v19, %v8686_v63 }
 0xe75   :  { %v3774_v13 = vadd.f32 %v3773_v45, %v3758_v24  ;;  %v3761_v61 = vmul.f32 %v3745_v47, %v3745_v47  ;;  %v3749_v55 = vsub.f32 %v8657_v56, %v8686_v63  ;;  %v3750_v8 = vsub.f32 %v8661_v52, %v8686_v63 }
 0xe76   :  { %v3777_v23 = vadd.f32 %v3760_v16, %v3759_v49  ;;  %v3763_v42 = vmul.f32 %v3747_v17, %v3747_v17  ;;  %v3764_v2 = vmul.f32 %v3748_v27, %v3748_v27  ;;  %v3762_v26 = vmul.f32 %v3746_v30, %v3746_v30 }
 0xe77   :  { %3775 = vadd.xlane.f32.xlu1 %v3774_v13  ;;  %v3765_v53 = vmul.f32 %v3749_v55, %v3749_v55  ;;  %v3766_v36 = vmul.f32 %v3750_v8, %v3750_v8  ;;  %v4957_v45 = vmov 3  }
 0xe78   :  { %v3778_v21 = vadd.f32 %v3777_v23, %v3761_v61  ;;  %v3782_v22 = vadd.f32 %v3764_v2, %v3763_v42  ;;  %4852 = vset.pattern.permute.xlu0 %v4957_v45  ;;  %4853 = vset.pattern.permute.xlu1 %v4957_v45 }
 0xe7a   :  { %v3779_v54 = vadd.f32 %v3778_v21, %v3762_v26  ;;  %v3783_v25 = vadd.f32 %v3782_v22, %v3765_v53  ;;  %v4940_v21 = vld [vmem:[%s9722_s9] sm:$0xff] }
 0xe7c   :  { %3780 = vadd.xlane.f32.xlu0 %v3779_v54  ;;  %v3784_v24 = vadd.f32 %v3783_v25, %v3766_v36  ;;  %v4938_v25 = vld [vmem:[%s9721_s8] sm:$0xff] }
 0xe7e   :  { %3785 = vadd.xlane.f32.xlu1 %v3784_v24  ;;  %v4941_v24 = vld [vmem:[%s9722_s9 + $0x8] sm:$0xff] }
 0xf01   :  { %v3771_v47 = vpop.xlane.xlu0 %3770 }
 0xf02   :  { %v3787_v49 = vmul.f32 0.001953125, %v3771_v47 }
 0xf04   :  { %v3791_v16 = vadd.f32 1e-05, %v3787_v49  ;;  %v3776_v32 = vpop.xlane.xlu1 %3775 }
 0xf05   :  { %v3788_v17 = vmul.f32 0.001953125, %v3776_v32  ;;  %v4939_v32 = vld [vmem:[%s9721_s8 + $0x8] sm:$0xff] }
 0xf06   :  { %4906 = vrsqrt.f32 %v3791_v16 }
 0xf07   :  { %v3792_v27 = vadd.f32 1e-05, %v3788_v17  ;;  %v4943_v17 = vld [vmem:[%s9721_s8 + $0x18] sm:$0xff] }
 0xf09   :  { %4908 = vrsqrt.f32 %v3792_v27  ;;  %v3781_v30 = vpop.xlane.xlu0 %3780 }
 0xf0a   :  { %v3789_v13 = vmul.f32 0.001953125, %v3781_v30  ;;  %v4944_v30 = vld [vmem:[%s9722_s9 + $0x10] sm:$0xff] }
 0xf0b   :  { %v3786_v61 = vpop.xlane.xlu1 %3785 }
 0xf0c   :  { %v3793_v55 = vadd.f32 1e-05, %v3789_v13  ;;  %v3790_v23 = vmul.f32 0.001953125, %v3786_v61 }
 0xf0e   :  { %4910 = vrsqrt.f32 %v3793_v55  ;;  %v3794_v42 = vadd.f32 1e-05, %v3790_v23  ;;  %v4945_v55 = vld [vmem:[%s9722_s9 + $0x18] sm:$0xff] }
 0xf10   :  { %v4907_v8 = vpop.eup %4906  ;;  %4912 = vrsqrt.f32 %v3794_v42 }
 0xf11   :  { %v3799_v36 = vmul.f32 %v4938_v25, %v4907_v8 }
 0xf13   :  { %v4909_v54 = vpop.eup %4908  ;;  %3813 = vperm.xlu0 %4852, %v3799_v36   ;;  %v3803_v26 = vmul.f32 %v3799_v36, %v8664_v10  ;;  %v4942_v10 = vld [vmem:[%s9721_s8 + $0x10] sm:$0xff] }
 0xf14   :  { %v3800_v2 = vmul.f32 %v4939_v32, %v4909_v54 }
 0xf15   :  { %v3807_v53 = vsub.f32 %v4940_v21, %v3803_v26 }
 0xf16   :  { %3818 = vperm.xlu1 %4853, %v3800_v2   ;;  %v3804_v22 = vmul.f32 %v3800_v2, %v8666_v5 }
 0xf17   :  { %4854 = vset.pattern.permute.xlu0 %v10348_v29 }
 0xf18   :  { %v3808_v45 = vsub.f32 %v4941_v24, %v3804_v22  ;;  %v4911_v47 = vpop.eup %4910 }
 0xf19   :  { %v3801_v49 = vmul.f32 %v4942_v10, %v4911_v47 }
 0xf1a   :  { %3849 = vperm.xlu1 %4853, %v3807_v53   ;;  %v4913_v16 = vpop.eup %4912 }
 0xf1b   :  { %v3802_v5 = vmul.f32 %v4943_v17, %v4913_v16  ;;  %v3805_v27 = vmul.f32 %v3801_v49, %v8684_v62 }
 0xf1d   :  { %v3809_v13 = vsub.f32 %v4944_v30, %v3805_v27  ;;  %v3806_v61 = vmul.f32 %v3802_v5, %v8686_v63 }
 0xf1e   :  { %3854 = vperm.xlu1 %4853, %v3808_v45  }
 0xf1f   :  { %v3810_v23 = vsub.f32 %v4945_v55, %v3806_v61 }
 0xf22   :  { %3823 = vperm.xlu1 %4853, %v3801_v49  }
 0xf26   :  { %3828 = vperm.xlu1 %4853, %v3802_v5  }
 0xf2a   :  { %3859 = vperm.xlu1 %4853, %v3809_v13  }
 0xf2e   :  { %3864 = vperm.xlu1 %4853, %v3810_v23  }
 0xf92   :  { %v3814_v8 = vpop.permute.xlu0 %3813 }
 0xf93   :  { %v3831_v36 = vmul.f32 %v3814_v8, %v8616_v34  ;;  %v3832_v62 = vmul.f32 %v3814_v8, %v8618_v9  ;;  %v3833_v2 = vmul.f32 %v3814_v8, %v8628_v58  ;;  %v3834_v9 = vmul.f32 %v3814_v8, %v8631_v59 }
 0xf95   :  { %v3819_v25 = vpop.permute.xlu1 %3818 }
 0xf96   :  { %v3835_v63 = vmul.f32 %v3819_v25, %v8622_v3  ;;  %v3836_v26 = vmul.f32 %v3819_v25, %v8624_v20  ;;  %v3837_v3 = vmul.f32 %v3819_v25, %v8633_v37  ;;  %v3838_v59 = vmul.f32 %v3819_v25, %v8639_v44 }
 0xf99   :  { %v3850_v54 = vpop.permute.xlu1 %3849 }
 0xf9a   :  { %v3867_v42 = vadd.f32 %v3850_v54, %v3831_v36  ;;  %v3868_v32 = vadd.f32 %v3850_v54, %v3832_v62  ;;  %v3869_v22 = vadd.f32 %v3850_v54, %v3833_v2  ;;  %v3870_v10 = vadd.f32 %v3850_v54, %v3834_v9 }
 0xf9c   :  { %vm3883_vm15 = vcmp.ge.f32.partialorder %v3867_v42, 0.0  ;;  %v3899_v21 = vmul.f32 0.2, %v3867_v42  ;;  %v3900_v45 = vmul.f32 0.2, %v3868_v32  ;;  %vm3884_vm8 = vcmp.ge.f32.partialorder %v3868_v32, 0.0 }
 0xf9d   :  { %v3855_v53 = vpop.permute.xlu1 %3854  ;;  %v3901_v20 = vmul.f32 0.2, %v3869_v22  ;;  %vm3885_vm11 = vcmp.ge.f32.partialorder %v3869_v22, 0.0  ;;  %v3902_v37 = vmul.f32 0.2, %v3870_v10  ;;  %vm3886_vm13 = vcmp.ge.f32.partialorder %v3870_v10, 0.0 }
 0xf9e   :  { %v3871_v24 = vadd.f32 %v3855_v53, %v3835_v63  ;;  %v8738_v47 = vsel %vm3883_vm15, %v3867_v42, %v3899_v21  ;;  %v3872_v34 = vadd.f32 %v3855_v53, %v3836_v26  ;;  %v8744_v49 = vsel %vm3884_vm8, %v3868_v32, %v3900_v45 }
 0xf9f   :  { %10349 = vst [vmem:[#allocation70_spill] sm:$0xff] %v8738_v47  ;;  %3932 = vrot.lane.b32.xlu0 %v8738_v47, %s4947_s16  ;;  %10350 = vst [vmem:[#allocation45_spill] sm:$0xff] %v8744_v49  ;;  %v3873_v16 = vadd.f32 %v3855_v53, %v3837_v3  ;;  %v8753_v27 = vsel %vm3885_vm11, %v3869_v22, %v3901_v20  ;;  %v3874_v30 = vadd.f32 %v3855_v53, %v3838_v59 }
 0xfa0   :  { %vm3887_vm9 = vcmp.ge.f32.partialorder %v3871_v24, 0.0  ;;  %v3903_v58 = vmul.f32 0.2, %v3871_v24  ;;  %v3904_v17 = vmul.f32 0.2, %v3872_v34  ;;  %vm3888_vm12 = vcmp.ge.f32.partialorder %v3872_v34, 0.0 }
 0xfa1   :  { %10352 = vst [vmem:[#allocation72_spill] sm:$0xff] %v8753_v27  ;;  %v3905_v13 = vmul.f32 0.2, %v3873_v16  ;;  %vm3889_vm14 = vcmp.ge.f32.partialorder %v3873_v16, 0.0  ;;  %v8761_v55 = vsel %vm3886_vm13, %v3870_v10, %v3902_v37  ;;  %v3906_v23 = vmul.f32 0.2, %v3874_v30  ;;  %v3824_v25 = vpop.permute.xlu1 %3823 }
 0xfa2   :  { %v8746_v5 = vsel %vm3887_vm9, %v3871_v24, %v3903_v58  ;;  %v8755_v61 = vsel %vm3888_vm12, %v3872_v34, %v3904_v17  ;;  %10354 = vst [vmem:[#allocation49_spill] sm:$0xff] %v8761_v55  ;;  %vm3890_vm15 = vcmp.ge.f32.partialorder %v3874_v30, 0.0  ;;  %v3839_v32 = vmul.f32 %v3824_v25, %v8637_v51  ;;  %v10357_v58 = vld [vmem:[#allocation3_spill] sm:$0xff] }
 0xfa3   :  { %10351 = vst [vmem:[#allocation38_spill] sm:$0xff] %v8746_v5  ;;  %3940 = vrot.lane.b32.xlu0 %v8744_v49, %s4947_s16  ;;  %3934 = vrot.lane.b32.xlu1 %v8746_v5, %s4947_s16  ;;  %10353 = vst [vmem:[#allocation39_spill] sm:$0xff] %v8755_v61  ;;  %v8763_v8 = vsel %vm3889_vm14, %v3873_v16, %v3905_v13  ;;  %v8769_v44 = vsel %vm3890_vm15, %v3874_v30, %v3906_v23 }
 0xfa4   :  { %10355 = vst [vmem:[#allocation32_spill] sm:$0xff] %v8763_v8  ;;  %10356 = vst [vmem:[#allocation16_spill] sm:$0xff] %v8769_v44  ;;  %v3840_v21 = vmul.f32 %v3824_v25, %v8641_v48  ;;  %v3841_v9 = vmul.f32 %v3824_v25, %v8652_v40  ;;  %v3842_v40 = vmul.f32 %v3824_v25, %v8655_v46 }
 0xfa5   :  { %v8859_v36 = vpop.permute.xlu1 %3828 }
 0xfa6   :  { %v3843_v53 = vmul.f32 %v8859_v36, %v8646_v28  ;;  %v3844_v3 = vmul.f32 %v8859_v36, %v8648_v19  ;;  %v3845_v23 = vmul.f32 %v8859_v36, %v8657_v56 }
 0xfa7   :  { %3948 = vrot.lane.b32.xlu0 %v8753_v27, %s4947_s16  ;;  %3942 = vrot.lane.b32.xlu1 %v8755_v61, %s4947_s16 }
 0xfa9   :  { %v3860_v62 = vpop.permute.xlu1 %3859 }
 0xfaa   :  { %v3875_v26 = vadd.f32 %v3860_v62, %v3839_v32  ;;  %v3876_v24 = vadd.f32 %v3860_v62, %v3840_v21  ;;  %v3877_v16 = vadd.f32 %v3860_v62, %v3841_v9  ;;  %v3878_v21 = vadd.f32 %v3860_v62, %v3842_v40 }
 0xfab   :  { %3956 = vrot.lane.b32.xlu0 %v8761_v55, %s4947_s16  ;;  %3950 = vrot.lane.b32.xlu1 %v8763_v8, %s4947_s16 }
 0xfac   :  { %v3907_v48 = vmul.f32 0.2, %v3875_v26  ;;  %vm3891_vm8 = vcmp.ge.f32.partialorder %v3875_v26, 0.0  ;;  %v3908_v17 = vmul.f32 0.2, %v3876_v24  ;;  %vm3892_vm9 = vcmp.ge.f32.partialorder %v3876_v24, 0.0 }
 0xfad   :  { %v8873_v54 = vpop.permute.xlu1 %3864  ;;  %vm3893_vm12 = vcmp.ge.f32.partialorder %v3877_v16, 0.0  ;;  %v3909_v25 = vmul.f32 0.2, %v3877_v16  ;;  %vm3894_vm14 = vcmp.ge.f32.partialorder %v3878_v21, 0.0 }
 0xfae   :  { %v3879_v51 = vadd.f32 %v8873_v54, %v3843_v53  ;;  %v3880_v59 = vadd.f32 %v8873_v54, %v3844_v3  ;;  %v8905_v32 = vsel %vm3891_vm8, %v3875_v26, %v3907_v48  ;;  %v3881_v56 = vadd.f32 %v8873_v54, %v3845_v23  ;;  %v10358_v3 = vld [vmem:[#allocation4_spill] sm:$0xff] }
 0xfaf   :  { %3996 = vrot.lane.b32.xlu0 %v8738_v47, %s4946_s15  ;;  %3958 = vrot.lane.b32.xlu1 %v8769_v44, %s4947_s16  ;;  %v8918_v62 = vsel %vm3892_vm9, %v3876_v24, %v3908_v17  ;;  %v3910_v17 = vmul.f32 0.2, %v3878_v21  ;;  %v8947_v23 = vsel %vm3893_vm12, %v3877_v16, %v3909_v25 }
 0xfb0   :  { %v3911_v37 = vmul.f32 0.2, %v3879_v51  ;;  %vm3895_vm11 = vcmp.ge.f32.partialorder %v3879_v51, 0.0  ;;  %vm3896_vm13 = vcmp.ge.f32.partialorder %v3880_v59, 0.0  ;;  %vm3897_vm15 = vcmp.ge.f32.partialorder %v3881_v56, 0.0 }
 0xfb2   :  { %v8920_v9 = vsel %vm3895_vm11, %v3879_v51, %v3911_v37 }
 0xfb3   :  { %4004 = vrot.lane.b32.xlu0 %v8744_v49, %s4946_s15  ;;  %3998 = vrot.lane.b32.xlu1 %v8746_v5, %s4946_s15 }
 0xfb7   :  { %4012 = vrot.lane.b32.xlu0 %v8753_v27, %s4946_s15  ;;  %4006 = vrot.lane.b32.xlu1 %v8755_v61, %s4946_s15 }
 0xfbb   :  { %4020 = vrot.lane.b32.xlu0 %v8761_v55, %s4946_s15  ;;  %4014 = vrot.lane.b32.xlu1 %v8763_v8, %s4946_s15 }
 0xfbf   :  { %4060 = vrot.lane.b32.xlu0 %v8738_v47, %s4948_s23  ;;  %4022 = vrot.lane.b32.xlu1 %v8769_v44, %s4946_s15 }
 0xfc3   :  { %4068 = vrot.lane.b32.xlu0 %v8744_v49, %s4948_s23  ;;  %4062 = vrot.lane.b32.xlu1 %v8746_v5, %s4948_s23 }
 0xfc7   :  { %4076 = vrot.lane.b32.xlu0 %v8753_v27, %s4948_s23  ;;  %4070 = vrot.lane.b32.xlu1 %v8755_v61, %s4948_s23 }
 0xfcb   :  { %4084 = vrot.lane.b32.xlu0 %v8761_v55, %s4948_s23  ;;  %4078 = vrot.lane.b32.xlu1 %v8763_v8, %s4948_s23 }
 0xfcf   :  { %4124 = vrot.lane.b32.xlu0 %v8738_v47, %s4949_s24  ;;  %4086 = vrot.lane.b32.xlu1 %v8769_v44, %s4948_s23 }
 0xfd3   :  { %4132 = vrot.lane.b32.xlu0 %v8744_v49, %s4949_s24  ;;  %4126 = vrot.lane.b32.xlu1 %v8746_v5, %s4949_s24 }
 0xfd7   :  { %4140 = vrot.lane.b32.xlu0 %v8753_v27, %s4949_s24  ;;  %4134 = vrot.lane.b32.xlu1 %v8755_v61, %s4949_s24 }
 0xfdb   :  { %4148 = vrot.lane.b32.xlu0 %v8761_v55, %s4949_s24  ;;  %4142 = vrot.lane.b32.xlu1 %v8763_v8, %s4949_s24 }
 0xfdf   :  { %4188 = vrot.lane.b32.xlu0 %v8738_v47, %s4950_s1  ;;  %4150 = vrot.lane.b32.xlu1 %v8769_v44, %s4949_s24 }
 0xfe3   :  { %4196 = vrot.lane.b32.xlu0 %v8744_v49, %s4950_s1  ;;  %4190 = vrot.lane.b32.xlu1 %v8746_v5, %s4950_s1 }
 0xfe7   :  { %4204 = vrot.lane.b32.xlu0 %v8753_v27, %s4950_s1  ;;  %4198 = vrot.lane.b32.xlu1 %v8755_v61, %s4950_s1 }
 0xfeb   :  { %4212 = vrot.lane.b32.xlu0 %v8761_v55, %s4950_s1  ;;  %4206 = vrot.lane.b32.xlu1 %v8763_v8, %s4950_s1 }
 0xfef   :  { %4252 = vrot.lane.b32.xlu0 %v8738_v47, %s4951_s25  ;;  %4214 = vrot.lane.b32.xlu1 %v8769_v44, %s4950_s1 }
 0xff3   :  { %4260 = vrot.lane.b32.xlu0 %v8744_v49, %s4951_s25  ;;  %4254 = vrot.lane.b32.xlu1 %v8746_v5, %s4951_s25 }
 0xff7   :  { %4268 = vrot.lane.b32.xlu0 %v8753_v27, %s4951_s25  ;;  %4262 = vrot.lane.b32.xlu1 %v8755_v61, %s4951_s25 }
 0xffb   :  { %4276 = vrot.lane.b32.xlu0 %v8761_v55, %s4951_s25  ;;  %4270 = vrot.lane.b32.xlu1 %v8763_v8, %s4951_s25 }
 0xfff   :  { %4316 = vrot.lane.b32.xlu0 %v8738_v47, %s4952_s26  ;;  %4278 = vrot.lane.b32.xlu1 %v8769_v44, %s4951_s25 }
0x1003   :  { %4324 = vrot.lane.b32.xlu0 %v8744_v49, %s4952_s26  ;;  %4318 = vrot.lane.b32.xlu1 %v8746_v5, %s4952_s26 }
0x1007   :  { %4332 = vrot.lane.b32.xlu0 %v8753_v27, %s4952_s26  ;;  %4326 = vrot.lane.b32.xlu1 %v8755_v61, %s4952_s26 }
0x100b   :  { %4340 = vrot.lane.b32.xlu0 %v8761_v55, %s4952_s26  ;;  %4334 = vrot.lane.b32.xlu1 %v8763_v8, %s4952_s26 }
0x100f   :  { %4380 = vrot.lane.b32.xlu0 %v8738_v47, %s4954_s27  ;;  %4342 = vrot.lane.b32.xlu1 %v8769_v44, %s4952_s26 }
0x1011   :  { %v3933_v42 = vpop.permute.xlu0 %3932 }
0x1013   :  { %4388 = vrot.lane.b32.xlu0 %v8744_v49, %s4954_s27  ;;  %4382 = vrot.lane.b32.xlu1 %v8746_v5, %s4954_s27 }
0x1015   :  { %v3941_v2 = vpop.permute.xlu0 %3940  ;;  %v3935_v63 = vpop.permute.xlu1 %3934 }
0x1016   :  { %v3972_v22 = vsel %vm54_vm1, %v3933_v42, %v3941_v2 }
0x1017   :  { %4396 = vrot.lane.b32.xlu0 %v8753_v27, %s4954_s27  ;;  %4390 = vrot.lane.b32.xlu1 %v8755_v61, %s4954_s27  ;;  %v3981_v10 = vmul.f32 %v3972_v22, %v10357_v58  ;;  %v3912_v22 = vmul.f32 0.2, %v3880_v59 }
0x1019   :  { %v3949_v45 = vpop.permute.xlu0 %3948  ;;  %v3943_v34 = vpop.permute.xlu1 %3942 }
0x101a   :  { %v3973_v28 = vsel %vm54_vm1, %v3935_v63, %v3943_v34 }
0x101b   :  { %v3985_v20 = vmul.f32 %v3973_v28, %v10357_v58  ;;  %4404 = vrot.lane.b32.xlu0 %v8761_v55, %s4954_s27  ;;  %4398 = vrot.lane.b32.xlu1 %v8763_v8, %s4954_s27 }
0x101d   :  { %v3957_v30 = vpop.permute.xlu0 %3956  ;;  %v3951_v19 = vpop.permute.xlu1 %3950  ;;  %v4445_v13 = vpack.c.bf16 %v3985_v20, %v3981_v10 }
0x101e   :  { %v3964_v53 = vsel %vm54_vm1, %v3949_v45, %v3957_v30  ;;  %v3976_v46 = vsel %vm54_vm1, %v3957_v30, %v3933_v42  ;;  %v3969_v26 = vsel %vm54_vm1, %v3943_v34, %v3951_v19  ;;  %v3968_v42 = vsel %vm54_vm1, %v3941_v2, %v3949_v45 }
0x101f   :  { %4406 = vrot.lane.b32.xlu1 %v8769_v44, %s4954_s27  ;;  %3936 = vrot.lane.b32.xlu0 %v8905_v32, %s4947_s16  ;;  %v3980_v10 = vmul.f32 %v3976_v46, %v10358_v3  ;;  %v3983_v20 = vmul.f32 %v3964_v53, %v5149_v31  ;;  %v3986_v51 = vmul.f32 %v3969_v26, %v5157_v35  ;;  %v3913_v46 = vmul.f32 0.2, %v3881_v56 }
0x1020   :  { %4544 = vmatprep.subr.bf16.mxu0 %v4445_v13  ;;  %v3846_v45 = vmul.f32 %v8859_v36, %v8661_v52  ;;  %v3982_v37 = vmul.f32 %v3968_v42, %v5157_v35  ;;  %v8951_v26 = vsel %vm3896_vm13, %v3880_v59, %v3912_v22 }
0x1021   :  { %v8924_v48 = vpop.permute.xlu0 %3996  ;;  %v3959_v28 = vpop.permute.xlu1 %3958  ;;  %v8963_v25 = vsel %vm3897_vm15, %v3881_v56, %v3913_v46 }
0x1022   :  { %v3965_v40 = vsel %vm54_vm1, %v3951_v19, %v3959_v28  ;;  %v3977_v24 = vsel %vm54_vm1, %v3959_v28, %v3935_v63  ;;  %v3882_v53 = vadd.f32 %v8873_v54, %v3846_v45  ;;  %v4446_v52 = vpack.c.bf16 %v3986_v51, %v3982_v37 }
0x1023   :  { %v3984_v34 = vmul.f32 %v3977_v24, %v10358_v3  ;;  %v3987_v2 = vmul.f32 %v3965_v40, %v5149_v31  ;;  %3944 = vrot.lane.b32.xlu0 %v8918_v62, %s4947_s16  ;;  %3938 = vrot.lane.b32.xlu1 %v8920_v9, %s4947_s16  ;;  %v8961_v54 = vsel %vm3894_vm14, %v3878_v21, %v3910_v17 }
0x1024   :  { %v3914_v59 = vmul.f32 0.2, %v3882_v53  ;;  %vm3898_vm8 = vcmp.ge.f32.partialorder %v3882_v53, 0.0 }
0x1025   :  { %v4444_v63 = vpack.c.bf16 %v3984_v34, %v3980_v10  ;;  %v8942_v30 = vpop.permute.xlu0 %4004  ;;  %v8944_v19 = vpop.permute.xlu1 %3998  ;;  %v4447_v13 = vpack.c.bf16 %v3987_v2, %v3983_v20 }
0x1026   :  { %v8973_v28 = vsel %vm3898_vm8, %v3882_v53, %v3914_v59 }
0x1027   :  { %3952 = vrot.lane.b32.xlu0 %v8947_v23, %s4947_s16  ;;  %3946 = vrot.lane.b32.xlu1 %v8951_v26, %s4947_s16 }
0x1028   :  { %4545 = vmatpush1.bf16.msra.mxu0 %v4444_v63  ;;  %4626 = vmatprep.subr.bf16.mxu1 %v4447_v13 }
0x1029   :  { %4627 = vmatpush1.bf16.msra.mxu1 %v4446_v52  ;;  %v8957_v36 = vpop.permute.xlu0 %4012  ;;  %v8959_v16 = vpop.permute.xlu1 %4006 }
0x102b   :  { %3960 = vrot.lane.b32.xlu0 %v8961_v54, %s4947_s16  ;;  %3954 = vrot.lane.b32.xlu1 %v8963_v25, %s4947_s16 }
0x102d   :  { %v8969_v22 = vpop.permute.xlu0 %4020  ;;  %v8971_v42 = vpop.permute.xlu1 %4014 }
0x102f   :  { %4000 = vrot.lane.b32.xlu0 %v8905_v32, %s4946_s15  ;;  %3962 = vrot.lane.b32.xlu1 %v8973_v28, %s4947_s16 }
0x1031   :  { %v8979_v21 = vpop.permute.xlu0 %4060  ;;  %v8981_v56 = vpop.permute.xlu1 %4022 }
0x1033   :  { %4008 = vrot.lane.b32.xlu0 %v8918_v62, %s4946_s15  ;;  %4002 = vrot.lane.b32.xlu1 %v8920_v9, %s4946_s15 }
0x1035   :  { %v8987_v10 = vpop.permute.xlu0 %4068  ;;  %v8989_v20 = vpop.permute.xlu1 %4062 }
0x1037   :  { %4016 = vrot.lane.b32.xlu0 %v8947_v23, %s4946_s15  ;;  %4010 = vrot.lane.b32.xlu1 %v8951_v26, %s4946_s15 }
0x1039   :  { %v8995_v40 = vpop.permute.xlu0 %4076  ;;  %v8997_v24 = vpop.permute.xlu1 %4070 }
0x103b   :  { %4024 = vrot.lane.b32.xlu0 %v8961_v54, %s4946_s15  ;;  %4018 = vrot.lane.b32.xlu1 %v8963_v25, %s4946_s15 }
0x103d   :  { %v9003_v51 = vpop.permute.xlu0 %4084  ;;  %v9005_v34 = vpop.permute.xlu1 %4078 }
0x103f   :  { %4064 = vrot.lane.b32.xlu0 %v8905_v32, %s4948_s23  ;;  %4026 = vrot.lane.b32.xlu1 %v8973_v28, %s4946_s15 }
0x1041   :  { %v9011_v2 = vpop.permute.xlu0 %4124  ;;  %v9013_v45 = vpop.permute.xlu1 %4086 }
0x1042   :  { %10359 = vst [vmem:[#allocation36_spill] sm:$0xff] %v9011_v2 }
0x1043   :  { %4072 = vrot.lane.b32.xlu0 %v8918_v62, %s4948_s23  ;;  %4066 = vrot.lane.b32.xlu1 %v8920_v9, %s4948_s23 }
0x1045   :  { %v9019_v17 = vpop.permute.xlu0 %4132  ;;  %v9021_v37 = vpop.permute.xlu1 %4126 }
0x1046   :  { %10360 = vst [vmem:[#allocation34_spill] sm:$0xff] %v9019_v17 }
0x1047   :  { %4080 = vrot.lane.b32.xlu0 %v8947_v23, %s4948_s23  ;;  %4074 = vrot.lane.b32.xlu1 %v8951_v26, %s4948_s23 }
0x1049   :  { %v9027_v63 = vpop.permute.xlu0 %4140  ;;  %v9029_v13 = vpop.permute.xlu1 %4134 }
0x104a   :  { %10361 = vst [vmem:[#allocation51_spill] sm:$0xff] %v9027_v63 }
0x104b   :  { %4088 = vrot.lane.b32.xlu0 %v8961_v54, %s4948_s23  ;;  %4082 = vrot.lane.b32.xlu1 %v8963_v25, %s4948_s23 }
0x104d   :  { %v9035_v53 = vpop.permute.xlu0 %4148  ;;  %v9037_v46 = vpop.permute.xlu1 %4142 }
0x104e   :  { %10362 = vst [vmem:[#allocation33_spill] sm:$0xff] %v9035_v53 }
0x104f   :  { %4128 = vrot.lane.b32.xlu0 %v8905_v32, %s4949_s24  ;;  %4090 = vrot.lane.b32.xlu1 %v8973_v28, %s4948_s23 }
0x1051   :  { %v4189_v52 = vpop.permute.xlu0 %4188  ;;  %v9043_v59 = vpop.permute.xlu1 %4150 }
0x1053   :  { %4136 = vrot.lane.b32.xlu0 %v8918_v62, %s4949_s24  ;;  %4130 = vrot.lane.b32.xlu1 %v8920_v9, %s4949_s24 }
0x1055   :  { %v4197_v29 = vpop.permute.xlu0 %4196  ;;  %v4191_v8 = vpop.permute.xlu1 %4190 }
0x1056   :  { %v4228_v27 = vsel %vm213_vm4, %v4189_v52, %v4197_v29 }
0x1057   :  { %4144 = vrot.lane.b32.xlu0 %v8947_v23, %s4949_s24  ;;  %4138 = vrot.lane.b32.xlu1 %v8951_v26, %s4949_s24  ;;  %v9060_v61 = vmul.f32 %v4228_v27, %v10307_v39 }
0x1059   :  { %v4205_v5 = vpop.permute.xlu0 %4204  ;;  %v4199_v47 = vpop.permute.xlu1 %4198  ;;  %10363 = vst [vmem:[#allocation42_spill] sm:$0xff] %v9060_v61 }
0x105a   :  { %v4224_v44 = vsel %vm213_vm4, %v4197_v29, %v4205_v5  ;;  %v4229_v55 = vsel %vm213_vm4, %v4191_v8, %v4199_v47 }
0x105b   :  { %v9063_v49 = vmul.f32 %v4229_v55, %v10307_v39  ;;  %4152 = vrot.lane.b32.xlu0 %v8961_v54, %s4949_s24  ;;  %4146 = vrot.lane.b32.xlu1 %v8963_v25, %s4949_s24  ;;  %v9078_v39 = vmul.f32 %v4224_v44, %v10296_v57 }
0x105d   :  { %10364 = vst [vmem:[#allocation37_spill] sm:$0xff] %v9063_v49  ;;  %v4213_v53 = vpop.permute.xlu0 %4212  ;;  %v4207_v29 = vpop.permute.xlu1 %4206 }
0x105e   :  { %v4220_v2 = vsel %vm213_vm4, %v4205_v5, %v4213_v53  ;;  %v4232_v27 = vsel %vm213_vm4, %v4213_v53, %v4189_v52  ;;  %v4225_v55 = vsel %vm213_vm4, %v4199_v47, %v4207_v29 }
0x105f   :  { %v9081_v17 = vmul.f32 %v4225_v55, %v10296_v57  ;;  %4192 = vrot.lane.b32.xlu0 %v8905_v32, %s4950_s1  ;;  %4154 = vrot.lane.b32.xlu1 %v8973_v28, %s4949_s24  ;;  %v9090_v52 = vmul.f32 %v4220_v2, %v10310_v60  ;;  %v9097_v55 = vmul.f32 %v4232_v27, %v10311_v0 }
0x1061   :  { %v4253_v63 = vpop.permute.xlu0 %4252  ;;  %v4215_v5 = vpop.permute.xlu1 %4214  ;;  %10365 = vst [vmem:[#allocation35_spill] sm:$0xff] %v9090_v52  ;;  %10366 = vst [vmem:[#allocation43_spill] sm:$0xff] %v9097_v55 }
0x1062   :  { %v4221_v47 = vsel %vm213_vm4, %v4207_v29, %v4215_v5  ;;  %v4233_v44 = vsel %vm213_vm4, %v4215_v5, %v4191_v8 }
0x1063   :  { %v9100_v61 = vmul.f32 %v4221_v47, %v10310_v60  ;;  %v9103_v49 = vmul.f32 %v4233_v44, %v10311_v0  ;;  %4200 = vrot.lane.b32.xlu0 %v8918_v62, %s4950_s1  ;;  %4194 = vrot.lane.b32.xlu1 %v8920_v9, %s4950_s1 }
0x1065   :  { %10367 = vst [vmem:[#allocation48_spill] sm:$0xff] %v9100_v61  ;;  %v4261_v29 = vpop.permute.xlu0 %4260  ;;  %v4255_v8 = vpop.permute.xlu1 %4254 }
0x1066   :  { %v4292_v5 = vsel %vm253_vm5, %v4253_v63, %v4261_v29 }
0x1067   :  { %4208 = vrot.lane.b32.xlu0 %v8947_v23, %s4950_s1  ;;  %4202 = vrot.lane.b32.xlu1 %v8951_v26, %s4950_s1  ;;  %v9124_v52 = vmul.f32 %v4292_v5, %v10320_v18 }
0x1069   :  { %v4269_v47 = vpop.permute.xlu0 %4268  ;;  %v4263_v44 = vpop.permute.xlu1 %4262  ;;  %10368 = vst [vmem:[#allocation41_spill] sm:$0xff] %v9124_v52 }
0x106a   :  { %v4288_v53 = vsel %vm253_vm5, %v4261_v29, %v4269_v47  ;;  %v4293_v2 = vsel %vm253_vm5, %v4255_v8, %v4263_v44 }
0x106b   :  { %v9127_v27 = vmul.f32 %v4293_v2, %v10320_v18  ;;  %4216 = vrot.lane.b32.xlu0 %v8961_v54, %s4950_s1  ;;  %4210 = vrot.lane.b32.xlu1 %v8963_v25, %s4950_s1  ;;  %v9142_v18 = vmul.f32 %v4288_v53, %v10316_v15 }
0x106d   :  { %10369 = vst [vmem:[#allocation46_spill] sm:$0xff] %v9127_v27  ;;  %v4277_v0 = vpop.permute.xlu0 %4276  ;;  %v4271_v29 = vpop.permute.xlu1 %4270 }
0x106e   :  { %v4284_v60 = vsel %vm253_vm5, %v4269_v47, %v4277_v0  ;;  %v4296_v5 = vsel %vm253_vm5, %v4277_v0, %v4253_v63  ;;  %v4289_v2 = vsel %vm253_vm5, %v4263_v44, %v4271_v29 }
0x106f   :  { %v9145_v55 = vmul.f32 %v4289_v2, %v10316_v15  ;;  %4256 = vrot.lane.b32.xlu0 %v8905_v32, %s4951_s25  ;;  %4218 = vrot.lane.b32.xlu1 %v8973_v28, %s4950_s1  ;;  %v9154_v63 = vmul.f32 %v4284_v60, %v10323_v33  ;;  %v9161_v2 = vmul.f32 %v4296_v5, %v10322_v4 }
0x1071   :  { %v4317_v61 = vpop.permute.xlu0 %4316  ;;  %v4279_v47 = vpop.permute.xlu1 %4278  ;;  %10370 = vst [vmem:[#allocation40_spill] sm:$0xff] %v9154_v63  ;;  %10371 = vst [vmem:[#allocation55_spill] sm:$0xff] %v9161_v2 }
0x1072   :  { %v4285_v53 = vsel %vm253_vm5, %v4271_v29, %v4279_v47  ;;  %v4297_v44 = vsel %vm253_vm5, %v4279_v47, %v4255_v8 }
0x1073   :  { %v9164_v15 = vmul.f32 %v4285_v53, %v10323_v33  ;;  %v9167_v52 = vmul.f32 %v4297_v44, %v10322_v4  ;;  %4264 = vrot.lane.b32.xlu0 %v8918_v62, %s4951_s25  ;;  %4258 = vrot.lane.b32.xlu1 %v8920_v9, %s4951_s25 }
0x1075   :  { %10372 = vst [vmem:[#allocation50_spill] sm:$0xff] %v9164_v15  ;;  %10373 = vst [vmem:[#allocation53_spill] sm:$0xff] %v9167_v52  ;;  %v4325_v29 = vpop.permute.xlu0 %4324  ;;  %v4319_v8 = vpop.permute.xlu1 %4318 }
0x1076   :  { %v4356_v47 = vsel %vm293_vm6, %v4317_v61, %v4325_v29 }
0x1077   :  { %4272 = vrot.lane.b32.xlu0 %v8947_v23, %s4951_s25  ;;  %4266 = vrot.lane.b32.xlu1 %v8951_v26, %s4951_s25  ;;  %v9188_v4 = vmul.f32 %v4356_v47, %v10332_v50 }
0x1079   :  { %v4333_v53 = vpop.permute.xlu0 %4332  ;;  %v4327_v44 = vpop.permute.xlu1 %4326  ;;  %10374 = vst [vmem:[#allocation47_spill] sm:$0xff] %v9188_v4 }
0x107a   :  { %v4352_v0 = vsel %vm293_vm6, %v4325_v29, %v4333_v53  ;;  %v4357_v60 = vsel %vm293_vm6, %v4319_v8, %v4327_v44 }
0x107b   :  { %v9191_v5 = vmul.f32 %v4357_v60, %v10332_v50  ;;  %4280 = vrot.lane.b32.xlu0 %v8961_v54, %s4951_s25  ;;  %4274 = vrot.lane.b32.xlu1 %v8963_v25, %s4951_s25  ;;  %v4958_v50 = vmov 1983009808   ;;  %v9206_v2 = vmul.f32 %v4352_v0, %v10328_v1 }
0x107c   :  { %v4525_v27 = vunpack.c.l.s4 %v4958_v50 }
0x107d   :  { %10375 = vst [vmem:[#allocation44_spill] sm:$0xff] %v9191_v5  ;;  %v4341_v63 = vpop.permute.xlu0 %4340  ;;  %v4335_v29 = vpop.permute.xlu1 %4334 }
0x107e   :  { %v4348_v15 = vsel %vm293_vm6, %v4333_v53, %v4341_v63  ;;  %v4360_v47 = vsel %vm293_vm6, %v4341_v63, %v4317_v61  ;;  %v4353_v60 = vsel %vm293_vm6, %v4327_v44, %v4335_v29  ;;  %v4526_v53 = vunpack.c.0.s8 %v4525_v27 }
0x107f   :  { %v9209_v52 = vmul.f32 %v4353_v60, %v10328_v1  ;;  %4320 = vrot.lane.b32.xlu0 %v8905_v32, %s4952_s26  ;;  %4282 = vrot.lane.b32.xlu1 %v8973_v28, %s4951_s25  ;;  %v9218_v50 = vmul.f32 %v4348_v15, %v10335_v12  ;;  %v10377_v60 = vld [vmem:[#allocation2_spill] sm:$0xff]  ;;  %v9226_v4 = vmul.f32 %v4360_v47, %v10334_v11 }
0x1080   :  { %v4529_v1 = vsub.s32 %v4526_v53, %v10377_v60  ;;  %v3931_v15 = vld [vmem:[%s9726_s6] sm:$0x3f] }
0x1081   :  { %v4381_v33 = vpop.permute.xlu0 %4380  ;;  %v4343_v61 = vpop.permute.xlu1 %4342  ;;  %10376 = vst [vmem:[#allocation52_spill] sm:$0xff] %v9218_v50  ;;  %10378 = vst [vmem:[#allocation56_spill] sm:$0xff] %v9226_v4 }
0x1082   :  { %v4349_v0 = vsel %vm293_vm6, %v4335_v29, %v4343_v61  ;;  %v4361_v44 = vsel %vm293_vm6, %v4343_v61, %v4319_v8  ;;  %v9241_v8 = vrot.slane %v3931_v15, %v4529_v1 }
0x1083   :  { %v9229_v27 = vmul.f32 %v4349_v0, %v10335_v12  ;;  %v9232_v5 = vmul.f32 %v4361_v44, %v10334_v11  ;;  %4328 = vrot.lane.b32.xlu0 %v8918_v62, %s4952_s26  ;;  %4322 = vrot.lane.b32.xlu1 %v8920_v9, %s4952_s26 }
0x1084   :  { %10380 = vst [vmem:[#allocation63_spill] sm:$0xff] %v9241_v8  ;;  %v4538_v44 = vcombine.high %v9241_v8, %v9241_v8 }
0x1085   :  { %10379 = vst [vmem:[#allocation57_spill] sm:$0xff] %v9229_v27  ;;  %v4389_v47 = vpop.permute.xlu0 %4388  ;;  %v4383_v53 = vpop.permute.xlu1 %4382 }
0x1086   :  { %v4420_v0 = vsel %vm333_vm7, %v4381_v33, %v4389_v47  ;;  %4576 = vmatprep.mubr.bf16.mxu0 %v4538_v44  ;;  %4658 = vmatprep.mubr.bf16.mxu1 %v4538_v44 }
0x1087   :  { %4336 = vrot.lane.b32.xlu0 %v8947_v23, %s4952_s26  ;;  %4330 = vrot.lane.b32.xlu1 %v8951_v26, %s4952_s26  ;;  %v9260_v11 = vmul.f32 %v4420_v0, %v10344_v43 }
0x1089   :  { %v4397_v60 = vpop.permute.xlu0 %4396  ;;  %v4391_v29 = vpop.permute.xlu1 %4390  ;;  %10381 = vst [vmem:[#allocation58_spill] sm:$0xff] %v9260_v11 }
0x108a   :  { %v4416_v63 = vsel %vm333_vm7, %v4389_v47, %v4397_v60  ;;  %v4421_v61 = vsel %vm333_vm7, %v4383_v53, %v4391_v29 }
0x108b   :  { %v9263_v8 = vmul.f32 %v4421_v61, %v10344_v43  ;;  %4344 = vrot.lane.b32.xlu0 %v8961_v54, %s4952_s26  ;;  %4338 = vrot.lane.b32.xlu1 %v8963_v25, %s4952_s26  ;;  %v9278_v43 = vmul.f32 %v4416_v63, %v10340_v6 }
0x108d   :  { %10382 = vst [vmem:[#allocation61_spill] sm:$0xff] %v9263_v8  ;;  %v4405_v12 = vpop.permute.xlu0 %4404  ;;  %v4399_v47 = vpop.permute.xlu1 %4398  ;;  %10383 = vst [vmem:[#allocation54_spill] sm:$0xff] %v9278_v43 }
0x108e   :  { %v4412_v50 = vsel %vm333_vm7, %v4397_v60, %v4405_v12  ;;  %v4424_v0 = vsel %vm333_vm7, %v4405_v12, %v4381_v33  ;;  %v4417_v61 = vsel %vm333_vm7, %v4391_v29, %v4399_v47  ;;  %v4523_v12 = vcombine.high %v3931_v15, %v3931_v15 }
0x108f   :  { %v9281_v27 = vmul.f32 %v4417_v61, %v10340_v6  ;;  %4384 = vrot.lane.b32.xlu0 %v8905_v32, %s4954_s27  ;;  %4346 = vrot.lane.b32.xlu1 %v8973_v28, %s4952_s26  ;;  %v9290_v29 = vmul.f32 %v4412_v50, %v10347_v38  ;;  %v9297_v6 = vmul.f32 %v4424_v0, %v10346_v41 }
0x1090   :  { %v9313_v0 = vrot.slane %v4523_v12, %v4529_v1  ;;  %v4037_v1 = vsel %vm93_vm0, %v8944_v19, %v8959_v16 }
0x1091   :  { %10384 = vst [vmem:[#allocation59_spill] sm:$0xff] %v9281_v27  ;;  %v3937_v44 = vpop.permute.xlu0 %3936  ;;  %v4407_v60 = vpop.permute.xlu1 %4406  ;;  %10385 = vst [vmem:[#allocation60_spill] sm:$0xff] %v9290_v29 }
0x1092   :  { %v4413_v63 = vsel %vm333_vm7, %v4399_v47, %v4407_v60  ;;  %v4425_v61 = vsel %vm333_vm7, %v4407_v60, %v4383_v53  ;;  %10386 = vst [vmem:[#allocation64_spill] sm:$0xff] %v9297_v6  ;;  %10389 = vst [vmem:[#allocation66_spill] sm:$0xff] %v9313_v0 }
0x1093   :  { %v9300_v11 = vmul.f32 %v4413_v63, %v10347_v38  ;;  %v9303_v8 = vmul.f32 %v4425_v61, %v10346_v41  ;;  %4392 = vrot.lane.b32.xlu0 %v8918_v62, %s4954_s27  ;;  %4386 = vrot.lane.b32.xlu1 %v8920_v9, %s4954_s27 }
0x1095   :  { %10387 = vst [vmem:[#allocation65_spill] sm:$0xff] %v9300_v11  ;;  %10388 = vst [vmem:[#allocation71_spill] sm:$0xff] %v9303_v8  ;;  %v3945_v15 = vpop.permute.xlu0 %3944  ;;  %v3939_v53 = vpop.permute.xlu1 %3938 }
0x1096   :  { %v3974_v60 = vsel %vm54_vm1, %v3937_v44, %v3945_v15 }
0x1097   :  { %4400 = vrot.lane.b32.xlu0 %v8947_v23, %s4954_s27  ;;  %4394 = vrot.lane.b32.xlu1 %v8951_v26, %s4954_s27  ;;  %v3989_v33 = vmul.f32 %v3974_v60, %v10357_v58  ;;  %v4516_v60 = vld [vmem:[%s9727_s7] sm:$0x7] }
0x1099   :  { %v3953_v63 = vpop.permute.xlu0 %3952  ;;  %v3947_v61 = vpop.permute.xlu1 %3946 }
0x109a   :  { %v3975_v50 = vsel %vm54_vm1, %v3939_v53, %v3947_v61  ;;  %v3970_v11 = vsel %vm54_vm1, %v3945_v15, %v3953_v63 }
0x109b   :  { %v3993_v47 = vmul.f32 %v3975_v50, %v10357_v58  ;;  %4408 = vrot.lane.b32.xlu0 %v8961_v54, %s4954_s27  ;;  %4402 = vrot.lane.b32.xlu1 %v8963_v25, %s4954_s27  ;;  %v4029_v58 = vsel %vm93_vm0, %v8971_v42, %v8981_v56 }
0x109d   :  { %v3961_v12 = vpop.permute.xlu0 %3960  ;;  %v3955_v0 = vpop.permute.xlu1 %3954  ;;  %v4449_v41 = vpack.c.bf16 %v3993_v47, %v3989_v33  ;;  %v4036_v33 = vsel %vm93_vm0, %v8924_v48, %v8942_v30  ;;  %v4049_v47 = vmul.f32 %v4037_v1, %v5121_v14  ;;  %v4041_v1 = vsel %vm93_vm0, %v8981_v56, %v8944_v19 }
0x109e   :  { %v3971_v50 = vsel %vm54_vm1, %v3947_v61, %v3955_v0  ;;  %v3966_v38 = vsel %vm54_vm1, %v3953_v63, %v3961_v12  ;;  %v3978_v29 = vsel %vm54_vm1, %v3961_v12, %v3937_v44  ;;  %v4028_v61 = vsel %vm93_vm0, %v8957_v36, %v8969_v22 }
0x109f   :  { %4410 = vrot.lane.b32.xlu1 %v8973_v28, %s4954_s27  ;;  %4546 = vmatprep.subr.bf16.mxu0 %v4449_v41  ;;  %v4033_v41 = vsel %vm93_vm0, %v8959_v16, %v8971_v42  ;;  %v3994_v8 = vmul.f32 %v3971_v50, %v5157_v35  ;;  %v3988_v42 = vmul.f32 %v3978_v29, %v10358_v3 }
0x10a0   :  { %4519 = vperm.xlu0 %4854, %v4516_v60   ;;  %v10390_v60 = vld [vmem:[#allocation6_spill] sm:$0xff]  ;;  %v3991_v27 = vmul.f32 %v3966_v38, %v5149_v31  ;;  %v4045_v15 = vmul.f32 %v4036_v33, %v5121_v14  ;;  %v4032_v63 = vsel %vm93_vm0, %v8942_v30, %v8957_v36  ;;  %v3990_v29 = vmul.f32 %v3970_v11, %v5157_v35  ;;  %v10392_v33 = vld [vmem:[#allocation7_spill] sm:$0xff] }
0x10a1   :  { %v4001_v44 = vpop.permute.xlu0 %4000  ;;  %v3963_v12 = vpop.permute.xlu1 %3962  ;;  %v4051_v6 = vmul.f32 %v4029_v58, %v10390_v60  ;;  %v4047_v38 = vmul.f32 %v4028_v61, %v10390_v60 }
0x10a2   :  { %v3967_v43 = vsel %vm54_vm1, %v3955_v0, %v3963_v12  ;;  %v3979_v16 = vsel %vm54_vm1, %v3963_v12, %v3939_v53  ;;  %v4040_v53 = vsel %vm93_vm0, %v8969_v22, %v8924_v48  ;;  %v10391_v0 = vld [vmem:[#allocation5_spill] sm:$0xff]  ;;  %v4050_v12 = vmul.f32 %v4033_v41, %v10392_v33 }
0x10a3   :  { %v3992_v19 = vmul.f32 %v3979_v16, %v10358_v3  ;;  %v3995_v56 = vmul.f32 %v3967_v43, %v5149_v31  ;;  %v4048_v3 = vmul.f32 %v4041_v1, %v10391_v0  ;;  %v4450_v16 = vpack.c.bf16 %v3994_v8, %v3990_v29 }
0x10a4   :  { %v4453_v4 = vpack.c.bf16 %v4049_v47, %v4045_v15  ;;  %v4044_v30 = vmul.f32 %v4040_v53, %v10391_v0  ;;  %v4455_v36 = vpack.c.bf16 %v4051_v6, %v4047_v38  ;;  %v4046_v48 = vmul.f32 %v4032_v63, %v10392_v33  ;;  %v10393_v15 = vld [vmem:[#allocation8_spill] sm:$0xff] }
0x10a5   :  { %v4448_v58 = vpack.c.bf16 %v3992_v19, %v3988_v42  ;;  %v4009_v31 = vpop.permute.xlu0 %4008  ;;  %v4003_v43 = vpop.permute.xlu1 %4002  ;;  %v4451_v50 = vpack.c.bf16 %v3995_v56, %v3991_v27  ;;  %v4093_v19 = vsel %vm133_vm2, %v9005_v34, %v9013_v45  ;;  %v4092_v38 = vsel %vm133_vm2, %v8995_v40, %v9003_v51 }
0x10a6   :  { %v4038_v35 = vsel %vm93_vm0, %v4001_v44, %v4009_v31  ;;  %v4452_v11 = vpack.c.bf16 %v4048_v3, %v4044_v30  ;;  %v4454_v61 = vpack.c.bf16 %v4050_v12, %v4046_v48  ;;  %v4097_v3 = vsel %vm133_vm2, %v8997_v24, %v9005_v34 }
0x10a7   :  { %4547 = vmatpush1.bf16.msra.mxu0 %v4448_v58  ;;  %4628 = vmatprep.subr.bf16.mxu1 %v4451_v50  ;;  %v4053_v47 = vmul.f32 %v4038_v35, %v5121_v14  ;;  %v4105_v58 = vsel %vm133_vm2, %v9013_v45, %v8989_v20 }
0x10a8   :  { %4548 = vmatprep.subr.bf16.mxu0 %v4453_v4  ;;  %4629 = vmatpush1.bf16.msra.mxu1 %v4450_v16  ;;  %v4101_v4 = vsel %vm133_vm2, %v8989_v20, %v8997_v24  ;;  %v10394_v16 = vld [vmem:[#allocation15_spill] sm:$0xff] }
0x10a9   :  { %v4017_v22 = vpop.permute.xlu0 %4016  ;;  %4630 = vmatprep.subr.bf16.mxu1 %v4455_v36  ;;  %v4011_v27 = vpop.permute.xlu1 %4010  ;;  %v4113_v63 = vmul.f32 %v4101_v4, %v10393_v15  ;;  %v4115_v30 = vmul.f32 %v4093_v19, %v10394_v16  ;;  %v10396_v4 = vld [vmem:[#allocation14_spill] sm:$0xff] }
0x10aa   :  { %v4039_v8 = vsel %vm93_vm0, %v4003_v43, %v4011_v27  ;;  %v4034_v50 = vsel %vm93_vm0, %v4009_v31, %v4017_v22 }
0x10ab   :  { %v4057_v41 = vmul.f32 %v4039_v8, %v5121_v14  ;;  %4549 = vmatpush1.bf16.msra.mxu0 %v4452_v11  ;;  %v4100_v14 = vsel %vm133_vm2, %v8979_v21, %v8987_v10  ;;  %v4096_v11 = vsel %vm133_vm2, %v8987_v10, %v8995_v40 }
0x10ac   :  { %4631 = vmatpush1.bf16.msra.mxu1 %v4454_v61  ;;  %v4109_v31 = vmul.f32 %v4100_v14, %v10393_v15  ;;  %v10395_v61 = vld [vmem:[#allocation11_spill] sm:$0xff] }
0x10ad   :  { %v4025_v6 = vpop.permute.xlu0 %4024  ;;  %v4019_v1 = vpop.permute.xlu1 %4018  ;;  %v4457_v42 = vpack.c.bf16 %v4057_v41, %v4053_v47 }
0x10ae   :  { %v4035_v56 = vsel %vm93_vm0, %v4011_v27, %v4019_v1  ;;  %v4030_v53 = vsel %vm93_vm0, %v4017_v22, %v4025_v6  ;;  %v4042_v29 = vsel %vm93_vm0, %v4025_v6, %v4001_v44  ;;  %v4054_v22 = vmul.f32 %v4034_v50, %v10392_v33 }
0x10af   :  { %4550 = vmatprep.subr.bf16.mxu0 %v4457_v42  ;;  %v4058_v36 = vmul.f32 %v4035_v56, %v10392_v33  ;;  %v4052_v34 = vmul.f32 %v4042_v29, %v10391_v0  ;;  %v4055_v35 = vmul.f32 %v4030_v53, %v10390_v60  ;;  %v4111_v27 = vmul.f32 %v4092_v38, %v10394_v16 }
0x10b0   :  { %v4114_v6 = vmul.f32 %v4097_v3, %v10396_v4  ;;  %v4461_v42 = vpack.c.bf16 %v4113_v63, %v4109_v31  ;;  %v4165_v38 = vsel %vm173_vm3, %v9021_v37, %v9029_v13  ;;  %v10401_v31 = vld [vmem:[#allocation51_spill] sm:$0xff] }
0x10b1   :  { %v4065_v12 = vpop.permute.xlu0 %4064  ;;  %v4027_v44 = vpop.permute.xlu1 %4026  ;;  %v4463_v40 = vpack.c.bf16 %v4115_v30, %v4111_v27 }
0x10b2   :  { %v4031_v48 = vsel %vm93_vm0, %v4019_v1, %v4027_v44  ;;  %v4043_v24 = vsel %vm93_vm0, %v4027_v44, %v4003_v43  ;;  %v4104_v43 = vsel %vm133_vm2, %v9003_v51, %v8979_v21  ;;  %v4458_v1 = vpack.c.bf16 %v4058_v36, %v4054_v22  ;;  %v10398_v36 = vld [vmem:[#allocation36_spill] sm:$0xff] }
0x10b3   :  { %v4056_v20 = vmul.f32 %v4043_v24, %v10391_v0  ;;  %v4059_v45 = vmul.f32 %v4031_v48, %v10390_v60  ;;  %v4112_v0 = vmul.f32 %v4105_v58, %v10395_v61  ;;  %v4108_v10 = vmul.f32 %v4104_v43, %v10395_v61  ;;  %v10399_v24 = vld [vmem:[#allocation9_spill] sm:$0xff] }
0x10b4   :  { %v4110_v21 = vmul.f32 %v4096_v11, %v10396_v4  ;;  %v4157_v44 = vsel %vm173_vm3, %v9037_v46, %v9043_v59  ;;  %v4161_v43 = vsel %vm173_vm3, %v9029_v13, %v9037_v46  ;;  %v4169_v22 = vsel %vm173_vm3, %v9043_v59, %v9021_v37 }
0x10b5   :  { %v4456_v8 = vpack.c.bf16 %v4056_v20, %v4052_v34  ;;  %v4073_v60 = vpop.permute.xlu0 %4072  ;;  %v4067_v47 = vpop.permute.xlu1 %4066  ;;  %v4459_v41 = vpack.c.bf16 %v4059_v45, %v4055_v35  ;;  %v4460_v33 = vpack.c.bf16 %v4112_v0, %v4108_v10  ;;  %v4177_v34 = vmul.f32 %v4165_v38, %v10399_v24  ;;  %v10400_v45 = vld [vmem:[#allocation33_spill] sm:$0xff] }
0x10b6   :  { %v4102_v51 = vsel %vm133_vm2, %v4065_v12, %v4073_v60  ;;  %v4462_v14 = vpack.c.bf16 %v4114_v6, %v4110_v21  ;;  %v4156_v11 = vsel %vm173_vm3, %v10401_v31, %v10400_v45 }
0x10b7   :  { %4551 = vmatpush1.bf16.msra.mxu0 %v4456_v8  ;;  %4632 = vmatprep.subr.bf16.mxu1 %v4459_v41  ;;  %v4117_v53 = vmul.f32 %v4102_v51, %v10393_v15  ;;  %v10402_v8 = vld [vmem:[#allocation13_spill] sm:$0xff]  ;;  %v10403_v51 = vld [vmem:[#allocation10_spill] sm:$0xff] }
0x10b8   :  { %4552 = vmatprep.subr.bf16.mxu0 %v4461_v42  ;;  %4633 = vmatpush1.bf16.msra.mxu1 %v4458_v1  ;;  %v4179_v41 = vmul.f32 %v4157_v44, %v10402_v8  ;;  %v4175_v21 = vmul.f32 %v4156_v11, %v10402_v8 }
0x10b9   :  { %v4081_v19 = vpop.permute.xlu0 %4080  ;;  %4634 = vmatprep.subr.bf16.mxu1 %v4463_v40  ;;  %v4075_v56 = vpop.permute.xlu1 %4074 }
0x10ba   :  { %v4103_v63 = vsel %vm133_vm2, %v4067_v47, %v4075_v56  ;;  %v4098_v27 = vsel %vm133_vm2, %v4073_v60, %v4081_v19 }
0x10bb   :  { %v4121_v29 = vmul.f32 %v4103_v63, %v10393_v15  ;;  %4553 = vmatpush1.bf16.msra.mxu0 %v4460_v33  ;;  %v10397_v15 = vld [vmem:[#allocation34_spill] sm:$0xff]  ;;  %v4118_v40 = vmul.f32 %v4098_v27, %v10396_v4 }
0x10bc   :  { %4635 = vmatpush1.bf16.msra.mxu1 %v4462_v14  ;;  %v4164_v48 = vsel %vm173_vm3, %v10398_v36, %v10397_v15  ;;  %v4160_v10 = vsel %vm173_vm3, %v10397_v15, %v10401_v31  ;;  %v10404_v14 = vld [vmem:[#allocation12_spill] sm:$0xff] }
0x10bd   :  { %v4089_v3 = vpop.permute.xlu0 %4088  ;;  %v4083_v58 = vpop.permute.xlu1 %4082  ;;  %v4465_v50 = vpack.c.bf16 %v4121_v29, %v4117_v53  ;;  %v4173_v60 = vmul.f32 %v4164_v48, %v10399_v24  ;;  %v4178_v63 = vmul.f32 %v4161_v43, %v10404_v14 }
0x10be   :  { %v4099_v30 = vsel %vm133_vm2, %v4075_v56, %v4083_v58  ;;  %v4094_v35 = vsel %vm133_vm2, %v4081_v19, %v4089_v3  ;;  %v4106_v20 = vsel %vm133_vm2, %v4089_v3, %v4065_v12  ;;  %v4471_v3 = vpack.c.bf16 %v4179_v41, %v4175_v21  ;;  %v10406_v21 = vld [vmem:[#allocation39_spill] sm:$0xff] }
0x10bf   :  { %4554 = vmatprep.subr.bf16.mxu0 %v4465_v50  ;;  %v4122_v6 = vmul.f32 %v4099_v30, %v10396_v4  ;;  %v4116_v46 = vmul.f32 %v4106_v20, %v10395_v61  ;;  %v4119_v42 = vmul.f32 %v4094_v35, %v10394_v16  ;;  %v4469_v29 = vpack.c.bf16 %v4177_v34, %v4173_v60 }
0x10c1   :  { %v4129_v0 = vpop.permute.xlu0 %4128  ;;  %v4091_v12 = vpop.permute.xlu1 %4090  ;;  %v4466_v53 = vpack.c.bf16 %v4122_v6, %v4118_v40  ;;  %v10405_v40 = vld [vmem:[#allocation45_spill] sm:$0xff] }
0x10c2   :  { %v4095_v1 = vsel %vm133_vm2, %v4083_v58, %v4091_v12  ;;  %v4107_v13 = vsel %vm133_vm2, %v4091_v12, %v4067_v47  ;;  %v4168_v47 = vsel %vm173_vm3, %v10400_v45, %v10398_v36  ;;  %v4174_v58 = vmul.f32 %v4160_v10, %v10404_v14 }
0x10c3   :  { %v4120_v37 = vmul.f32 %v4107_v13, %v10395_v61  ;;  %v4123_v59 = vmul.f32 %v4095_v1, %v10394_v16  ;;  %v4176_v61 = vmul.f32 %v4169_v22, %v10403_v51  ;;  %v4172_v38 = vmul.f32 %v4168_v47, %v10403_v51 }
0x10c4   :  { %v4470_v15 = vpack.c.bf16 %v4178_v63, %v4174_v58  ;;  %v4483_v58 = vpack.c.bf16 %v8973_v28, %v8961_v54  ;;  %v4482_v54 = vpack.c.bf16 %v8963_v25, %v8947_v23  ;;  %v10414_v23 = vld [vmem:[#allocation18_spill] sm:$0xff] }
0x10c5   :  { %v4464_v33 = vpack.c.bf16 %v4120_v37, %v4116_v46  ;;  %v4137_v16 = vpop.permute.xlu0 %4136  ;;  %v4131_v19 = vpop.permute.xlu1 %4130  ;;  %v4467_v56 = vpack.c.bf16 %v4123_v59, %v4119_v42  ;;  %v4468_v50 = vpack.c.bf16 %v4176_v61, %v4172_v38  ;;  %v4477_v61 = vpack.c.bf16 %v10406_v21, %v10405_v40  ;;  %v10412_v38 = vld [vmem:[#allocation32_spill] sm:$0xff]  ;;  %v10426_v40 = vld [vmem:[#allocation53_spill] sm:$0xff]  ;;  %v10427_v21 = vld [vmem:[#allocation55_spill] sm:$0xff] }
0x10c6   :  { %v4166_v4 = vsel %vm173_vm3, %v4129_v0, %v4137_v16 }
0x10c7   :  { %4555 = vmatpush1.bf16.msra.mxu0 %v4464_v33  ;;  %4636 = vmatprep.subr.bf16.mxu1 %v4467_v56  ;;  %v4181_v48 = vmul.f32 %v4166_v4, %v10399_v24  ;;  %v10407_v33 = vld [vmem:[#allocation49_spill] sm:$0xff]  ;;  %v10409_v56 = vld [vmem:[#allocation70_spill] sm:$0xff] }
0x10c8   :  { %4556 = vmatprep.subr.bf16.mxu0 %v4469_v29  ;;  %4637 = vmatpush1.bf16.msra.mxu1 %v4466_v53  ;;  %v4481_v53 = vpack.c.bf16 %v8951_v26, %v8918_v62  ;;  %v10411_v29 = vld [vmem:[#allocation72_spill] sm:$0xff] }
0x10c9   :  { %v4145_v44 = vpop.permute.xlu0 %4144  ;;  %4638 = vmatprep.subr.bf16.mxu1 %v4471_v3  ;;  %v4139_v30 = vpop.permute.xlu1 %4138  ;;  %v4478_v3 = vpack.c.bf16 %v10412_v38, %v10411_v29  ;;  %v10435_v38 = vld [vmem:[#allocation23_spill] sm:$0xff] }
0x10ca   :  { %v4167_v36 = vsel %vm173_vm3, %v4131_v19, %v4139_v30  ;;  %v4162_v22 = vsel %vm173_vm3, %v4137_v16, %v4145_v44  ;;  %v10408_v16 = vld [vmem:[#allocation16_spill] sm:$0xff] }
0x10cb   :  { %v4185_v34 = vmul.f32 %v4167_v36, %v10399_v24  ;;  %4557 = vmatpush1.bf16.msra.mxu0 %v4468_v50  ;;  %v4182_v42 = vmul.f32 %v4162_v22, %v10404_v14  ;;  %v10418_v22 = vld [vmem:[#allocation19_spill] sm:$0xff] }
0x10cc   :  { %4639 = vmatpush1.bf16.msra.mxu1 %v4470_v15 }
0x10cd   :  { %v4153_v35 = vpop.permute.xlu0 %4152  ;;  %v4147_v20 = vpop.permute.xlu1 %4146  ;;  %v4473_v45 = vpack.c.bf16 %v4185_v34, %v4181_v48  ;;  %v10413_v48 = vpack.c.bf16 %v9081_v17, %v9078_v39  ;;  %v10417_v39 = vld [vmem:[#allocation17_spill] sm:$0xff] }
0x10ce   :  { %v4163_v31 = vsel %vm173_vm3, %v4139_v30, %v4147_v20  ;;  %v4158_v11 = vsel %vm173_vm3, %v4145_v44, %v4153_v35  ;;  %v4170_v43 = vsel %vm173_vm3, %v4153_v35, %v4129_v0  ;;  %v4480_v30 = vpack.c.bf16 %v8920_v9, %v8905_v32  ;;  %v10415_v35 = vld [vmem:[#allocation43_spill] sm:$0xff] }
0x10cf   :  { %4558 = vmatprep.subr.bf16.mxu0 %v4473_v45  ;;  %v4186_v12 = vmul.f32 %v4163_v31, %v10404_v14  ;;  %v4180_v1 = vmul.f32 %v4170_v43, %v10403_v51  ;;  %v4183_v13 = vmul.f32 %v4158_v11, %v10402_v8  ;;  %v10410_v14 = vld [vmem:[#allocation38_spill] sm:$0xff] }
0x10d0   :  { %v4476_v63 = vpack.c.bf16 %v10410_v14, %v10409_v56  ;;  %v10432_v14 = vld [vmem:[#allocation50_spill] sm:$0xff] }
0x10d1   :  { %v4193_v27 = vpop.permute.xlu0 %4192  ;;  %v4155_v24 = vpop.permute.xlu1 %4154  ;;  %v4474_v47 = vpack.c.bf16 %v4186_v12, %v4182_v42 }
0x10d2   :  { %v4159_v41 = vsel %vm173_vm3, %v4147_v20, %v4155_v24  ;;  %v4171_v6 = vsel %vm173_vm3, %v4155_v24, %v4131_v19  ;;  %v4479_v19 = vpack.c.bf16 %v10408_v16, %v10407_v33  ;;  %v10416_v20 = vpack.c.bf16 %v9103_v49, %v10415_v35  ;;  %v10419_v49 = vld [vmem:[#allocation37_spill] sm:$0xff] }
0x10d3   :  { %v4184_v46 = vmul.f32 %v4171_v6, %v10403_v51  ;;  %v4187_v0 = vmul.f32 %v4159_v41, %v10402_v8  ;;  %v10420_v41 = vld [vmem:[#allocation42_spill] sm:$0xff] }
0x10d4   :  { %v10421_v6 = vpack.c.bf16 %v10419_v49, %v10420_v41 }
0x10d5   :  { %v4472_v37 = vpack.c.bf16 %v4184_v46, %v4180_v1  ;;  %v4201_v59 = vpop.permute.xlu0 %4200  ;;  %v4195_v60 = vpop.permute.xlu1 %4194  ;;  %v4475_v10 = vpack.c.bf16 %v4187_v0, %v4183_v13  ;;  %v10422_v1 = vld [vmem:[#allocation48_spill] sm:$0xff]  ;;  %v10423_v13 = vld [vmem:[#allocation35_spill] sm:$0xff] }
0x10d6   :  { %v4230_v28 = vsel %vm213_vm4, %v4193_v27, %v4201_v59  ;;  %v10424_v46 = vpack.c.bf16 %v10422_v1, %v10423_v13 }
0x10d7   :  { %4559 = vmatpush1.bf16.msra.mxu0 %v4472_v37  ;;  %4640 = vmatprep.subr.bf16.mxu1 %v4475_v10  ;;  %v4244_v31 = vmul.f32 %v4230_v28, %v10414_v23  ;;  %v10425_v10 = vpack.c.bf16 %v9145_v55, %v9142_v18  ;;  %v10433_v18 = vld [vmem:[#allocation40_spill] sm:$0xff] }
0x10d8   :  { %4560 = vmatprep.subr.bf16.mxu0 %v4477_v61  ;;  %4641 = vmatpush1.bf16.msra.mxu1 %v4474_v47  ;;  %v10428_v61 = vpack.c.bf16 %v10426_v40, %v10427_v21  ;;  %v10434_v55 = vpack.c.bf16 %v10432_v14, %v10433_v18  ;;  %v10451_v18 = vld [vmem:[#allocation25_spill] sm:$0xff] }
0x10d9   :  { %v4209_v51 = vpop.permute.xlu0 %4208  ;;  %4642 = vmatprep.subr.bf16.mxu1 %v4479_v19  ;;  %v4203_v8 = vpop.permute.xlu1 %4202  ;;  %v10429_v19 = vld [vmem:[#allocation46_spill] sm:$0xff] }
0x10da   :  { %v4226_v4 = vsel %vm213_vm4, %v4201_v59, %v4209_v51  ;;  %v4231_v62 = vsel %vm213_vm4, %v4195_v60, %v4203_v8 }
0x10db   :  { %4561 = vmatpush1.bf16.msra.mxu0 %v4476_v63  ;;  %v4245_v15 = vmul.f32 %v4226_v4, %v10296_v57  ;;  %v4248_v25 = vmul.f32 %v4231_v62, %v10414_v23  ;;  %v10436_v4 = vld [vmem:[#allocation20_spill] sm:$0xff] }
0x10dc   :  { %4562 = vmatprep.subr.bf16.mxu0 %v4481_v53  ;;  %4643 = vmatpush1.bf16.msra.mxu1 %v4478_v3 }
0x10dd   :  { %v4217_v50 = vpop.permute.xlu0 %4216  ;;  %4644 = vmatprep.subr.bf16.mxu1 %v4483_v58  ;;  %v4211_v44 = vpop.permute.xlu1 %4210  ;;  %v4488_v0 = vpack.c.bf16 %v4248_v25, %v4244_v31  ;;  %v10438_v25 = vld [vmem:[#allocation27_spill] sm:$0xff]  ;;  %v10439_v31 = vpack.c.bf16 %v9209_v52, %v9206_v2  ;;  %v10445_v2 = vld [vmem:[#allocation57_spill] sm:$0xff] }
0x10de   :  { %v4227_v26 = vsel %vm213_vm4, %v4203_v8, %v4211_v44  ;;  %v4222_v32 = vsel %vm213_vm4, %v4209_v51, %v4217_v50  ;;  %v4234_v9 = vsel %vm213_vm4, %v4217_v50, %v4193_v27  ;;  %v10430_v51 = vld [vmem:[#allocation41_spill] sm:$0xff] }
0x10df   :  { %v4249_v36 = vmul.f32 %v4227_v26, %v10296_v57  ;;  %4563 = vmatpush1.bf16.msra.mxu0 %v4480_v30  ;;  %v4246_v17 = vmul.f32 %v4222_v32, %v10417_v39  ;;  %v4247_v27 = vmul.f32 %v4234_v9, %v10418_v22  ;;  %v10431_v8 = vpack.c.bf16 %v10429_v19, %v10430_v51 }
0x10e0   :  { %4564 = vmatprep.subr.bf16.mxu0 %v10413_v48  ;;  %4645 = vmatpush1.bf16.msra.mxu1 %v4482_v54  ;;  %v10437_v48 = vld [vmem:[#allocation26_spill] sm:$0xff] }
0x10e1   :  { %v4257_v34 = vpop.permute.xlu0 %4256  ;;  %4646 = vmatprep.subr.bf16.mxu1 %v10416_v20  ;;  %v4219_v57 = vpop.permute.xlu1 %4218  ;;  %v4489_v45 = vpack.c.bf16 %v4249_v36, %v4245_v15 }
0x10e2   :  { %v4223_v11 = vsel %vm213_vm4, %v4211_v44, %v4219_v57  ;;  %v4235_v43 = vsel %vm213_vm4, %v4219_v57, %v4195_v60 }
0x10e3   :  { %v4250_v24 = vmul.f32 %v4223_v11, %v10417_v39  ;;  %v4251_v12 = vmul.f32 %v4235_v43, %v10418_v22  ;;  %4565 = vmatpush1.bf16.msra.mxu0 %v10421_v6  ;;  %v10440_v39 = vld [vmem:[#allocation44_spill] sm:$0xff] }
0x10e4   :  { %4566 = vmatprep.subr.bf16.mxu0 %v4489_v45  ;;  %4647 = vmatpush1.bf16.msra.mxu1 %v10424_v46  ;;  %v10446_v6 = vld [vmem:[#allocation52_spill] sm:$0xff] }
0x10e5   :  { %v4490_v42 = vpack.c.bf16 %v4250_v24, %v4246_v17  ;;  %v4265_v37 = vpop.permute.xlu0 %4264  ;;  %v4259_v59 = vpop.permute.xlu1 %4258  ;;  %v4491_v60 = vpack.c.bf16 %v4251_v12, %v4247_v27  ;;  %v10441_v17 = vld [vmem:[#allocation47_spill] sm:$0xff]  ;;  %v10443_v24 = vld [vmem:[#allocation56_spill] sm:$0xff]  ;;  %v10447_v1 = vpack.c.bf16 %v10445_v2, %v10446_v6 }
0x10e6   :  { %v4294_v63 = vsel %vm253_vm5, %v4257_v34, %v4265_v37  ;;  %v10442_v22 = vpack.c.bf16 %v10440_v39, %v10441_v17  ;;  %v10444_v12 = vpack.c.bf16 %v9232_v5, %v10443_v24  ;;  %v10467_v17 = vld [vmem:[#allocation30_spill] sm:$0xff] }
0x10e7   :  { %4567 = vmatpush1.bf16.msra.mxu0 %v4488_v0  ;;  %4648 = vmatprep.subr.bf16.mxu1 %v4491_v60  ;;  %v4308_v30 = vmul.f32 %v4294_v63, %v10435_v38 }
0x10e8   :  { %4568 = vmatprep.subr.bf16.mxu0 %v10425_v10  ;;  %4649 = vmatpush1.bf16.msra.mxu1 %v4490_v42  ;;  %v10448_v42 = vld [vmem:[#allocation22_spill] sm:$0xff] }
0x10e9   :  { %v4273_v47 = vpop.permute.xlu0 %4272  ;;  %4650 = vmatprep.subr.bf16.mxu1 %v10428_v61  ;;  %v4267_v33 = vpop.permute.xlu1 %4266 }
0x10ea   :  { %v4295_v16 = vsel %vm253_vm5, %v4259_v59, %v4267_v33  ;;  %v4290_v56 = vsel %vm253_vm5, %v4265_v37, %v4273_v47 }
0x10eb   :  { %4569 = vmatpush1.bf16.msra.mxu0 %v10431_v8  ;;  %v4312_v3 = vmul.f32 %v4295_v16, %v10435_v38  ;;  %v4309_v50 = vmul.f32 %v4290_v56, %v10436_v4  ;;  %v10450_v56 = vld [vmem:[#allocation24_spill] sm:$0xff] }
0x10ec   :  { %4651 = vmatpush1.bf16.msra.mxu1 %v10434_v55 }
0x10ed   :  { %v4281_v53 = vpop.permute.xlu0 %4280  ;;  %v4275_v29 = vpop.permute.xlu1 %4274  ;;  %v4496_v36 = vpack.c.bf16 %v4312_v3, %v4308_v30  ;;  %v10452_v3 = vld [vmem:[#allocation59_spill] sm:$0xff] }
0x10ee   :  { %v4291_v58 = vsel %vm253_vm5, %v4267_v33, %v4275_v29  ;;  %v4286_v62 = vsel %vm253_vm5, %v4273_v47, %v4281_v53  ;;  %v4298_v26 = vsel %vm253_vm5, %v4281_v53, %v4257_v34  ;;  %v10455_v30 = vld [vmem:[#allocation63_spill] sm:$0xff] }
0x10ef   :  { %v4313_v44 = vmul.f32 %v4291_v58, %v10436_v4  ;;  %v4310_v23 = vmul.f32 %v4286_v62, %v10437_v48  ;;  %v4311_v35 = vmul.f32 %v4298_v26, %v10438_v25  ;;  %v10453_v58 = vld [vmem:[#allocation54_spill] sm:$0xff]  ;;  %v10456_v62 = vld [vmem:[#allocation61_spill] sm:$0xff] }
0x10f0   :  { %v10454_v4 = vpack.c.bf16 %v10452_v3, %v10453_v58  ;;  %v10457_v26 = vld [vmem:[#allocation58_spill] sm:$0xff] }
0x10f1   :  { %v4321_v54 = vpop.permute.xlu0 %4320  ;;  %v4283_v28 = vpop.permute.xlu1 %4282  ;;  %v4497_v15 = vpack.c.bf16 %v4313_v44, %v4309_v50 }
0x10f2   :  { %v4287_v32 = vsel %vm253_vm5, %v4275_v29, %v4283_v28  ;;  %v4299_v9 = vsel %vm253_vm5, %v4283_v28, %v4259_v59  ;;  %v10449_v59 = vld [vmem:[#allocation21_spill] sm:$0xff] }
0x10f3   :  { %v4314_v20 = vmul.f32 %v4287_v32, %v10437_v48  ;;  %v4315_v57 = vmul.f32 %v4299_v9, %v10438_v25  ;;  %4570 = vmatprep.subr.bf16.mxu0 %v4497_v15  ;;  %v10459_v15 = vld [vmem:[#allocation71_spill] sm:$0xff]  ;;  %v10462_v48 = vmov 0  }
0x10f4   :  { %4571 = vmatpush1.bf16.msra.mxu0 %v4496_v36  ;;  %v10460_v36 = vld [vmem:[#allocation64_spill] sm:$0xff] }
0x10f5   :  { %v4498_v34 = vpack.c.bf16 %v4314_v20, %v4310_v23  ;;  %v4329_v45 = vpop.permute.xlu0 %4328  ;;  %4572 = vmatprep.subr.bf16.mxu0 %v10439_v31  ;;  %v4323_v11 = vpop.permute.xlu1 %4322  ;;  %v4499_v43 = vpack.c.bf16 %v4315_v57, %v4311_v35  ;;  %v10461_v32 = vpack.c.bf16 %v10459_v15, %v10460_v36  ;;  %v10463_v35 = vld [vmem:[#allocation65_spill] sm:$0xff]  ;;  %v10464_v20 = vld [vmem:[#allocation60_spill] sm:$0xff] }
0x10f6   :  { %v4358_v13 = vsel %vm293_vm6, %v4321_v54, %v4329_v45  ;;  %v10465_v57 = vpack.c.bf16 %v10463_v35, %v10464_v20 }
0x10f7   :  { %4652 = vmatprep.subr.bf16.mxu1 %v4499_v43  ;;  %v4372_v47 = vmul.f32 %v4358_v13, %v10448_v42  ;;  %v10468_v13 = vld [vmem:[#allocation31_spill] sm:$0xff] }
0x10f8   :  { %4573 = vmatpush1.bf16.msra.mxu0 %v10442_v22  ;;  %4653 = vmatpush1.bf16.msra.mxu1 %v4498_v34 }
0x10f9   :  { %v4337_v27 = vpop.permute.xlu0 %4336  ;;  %4654 = vmatprep.subr.bf16.mxu1 %v10444_v12  ;;  %v4331_v49 = vpop.permute.xlu1 %4330 }
0x10fa   :  { %v4359_v41 = vsel %vm293_vm6, %v4323_v11, %v4331_v49  ;;  %v4354_v52 = vsel %vm293_vm6, %v4329_v45, %v4337_v27 }
0x10fb   :  { %v4376_v37 = vmul.f32 %v4359_v41, %v10448_v42  ;;  %v4373_v60 = vmul.f32 %v4354_v52, %v10449_v59 }
0x10fc   :  { %4655 = vmatpush1.bf16.msra.mxu1 %v10447_v1 }
0x10fd   :  { %v4345_v46 = vpop.permute.xlu0 %4344  ;;  %v4339_v0 = vpop.permute.xlu1 %4338  ;;  %v4504_v19 = vpack.c.bf16 %v4376_v37, %v4372_v47 }
0x10fe   :  { %v4355_v5 = vsel %vm293_vm6, %v4331_v49, %v4339_v0  ;;  %v4350_v40 = vsel %vm293_vm6, %v4337_v27, %v4345_v46  ;;  %v4362_v21 = vsel %vm293_vm6, %v4345_v46, %v4321_v54  ;;  %v10458_v54 = vpack.c.bf16 %v10456_v62, %v10457_v26 }
0x10ff   :  { %v4377_v10 = vmul.f32 %v4355_v5, %v10449_v59  ;;  %v4374_v14 = vmul.f32 %v4350_v40, %v10450_v56  ;;  %v4375_v55 = vmul.f32 %v4362_v21, %v10451_v18 }
0x1101   :  { %v4385_v61 = vpop.permute.xlu0 %4384  ;;  %v4347_v33 = vpop.permute.xlu1 %4346  ;;  %v4505_v16 = vpack.c.bf16 %v4377_v10, %v4373_v60  ;;  %v10470_v10 = vld [vmem:[#allocation66_spill] sm:$0xff] }
0x1102   :  { %v4351_v51 = vsel %vm293_vm6, %v4339_v0, %v4347_v33  ;;  %v4363_v8 = vsel %vm293_vm6, %v4347_v33, %v4323_v11  ;;  %v10466_v11 = vld [vmem:[#allocation28_spill] sm:$0xff]  ;;  %v10469_v0 = vld [vmem:[#allocation29_spill] sm:$0xff] }
0x1103   :  { %v4378_v63 = vmul.f32 %v4351_v51, %v10450_v56  ;;  %v4379_v53 = vmul.f32 %v4363_v8, %v10451_v18  ;;  %4574 = vmatprep.subr.bf16.mxu0 %v4505_v16 }
0x1104   :  { %4575 = vmatpush1.bf16.msra.mxu0 %v4504_v19 }
0x1105   :  { %v4506_v29 = vpack.c.bf16 %v4378_v63, %v4374_v14  ;;  %v4393_v38 = vpop.permute.xlu0 %4392  ;;  %4585 = vmatprep.subr.bf16.mxu0 %v10454_v4  ;;  %v4387_v50 = vpop.permute.xlu1 %4386  ;;  %v4507_v44 = vpack.c.bf16 %v4379_v53, %v4375_v55 }
0x1106   :  { %v4422_v34 = vsel %vm333_vm7, %v4385_v61, %v4393_v38 }
0x1107   :  { %4656 = vmatprep.subr.bf16.mxu1 %v4507_v44  ;;  %4577 = vmatmul.mubr.bf16.vlgmr.msra.gmra.mrb[32].mxu0 %v10455_v30  ;;  %v4436_v24 = vmul.f32 %v4422_v34, %v10466_v11 }
0x1108   :  { %4586 = vmatpush1.bf16.msra.mxu0 %v10458_v54  ;;  %4657 = vmatpush1.bf16.msra.mxu1 %v4506_v29 }
0x1109   :  { %v4401_v28 = vpop.permute.xlu0 %4400  ;;  %4667 = vmatprep.subr.bf16.mxu1 %v10461_v32  ;;  %v4395_v9 = vpop.permute.xlu1 %4394  ;;  %4617 = vmatprep.mubr.bf16.mxu0 %v10462_v48 }
0x110a   :  { %v4423_v23 = vsel %vm333_vm7, %v4387_v50, %v4395_v9  ;;  %v4418_v25 = vsel %vm333_vm7, %v4393_v38, %v4401_v28 }
0x110b   :  { %4659 = vmatmul.mubr.bf16.vlgmr.msra.gmra.mrb[32].mxu1 %v10455_v30  ;;  %v4440_v43 = vmul.f32 %v4423_v23, %v10466_v11  ;;  %v4437_v22 = vmul.f32 %v4418_v25, %v10467_v17 }
0x110c   :  { %4668 = vmatpush1.bf16.msra.mxu1 %v10465_v57  ;;  %4699 = vmatprep.mubr.bf16.mxu1 %v10462_v48 }
0x110d   :  { %v4409_v45 = vpop.permute.xlu0 %4408  ;;  %v4403_v31 = vpop.permute.xlu1 %4402  ;;  %v4512_v2 = vpack.c.bf16 %v4440_v43, %v4436_v24 }
0x110e   :  { %v4419_v39 = vsel %vm333_vm7, %v4395_v9, %v4403_v31  ;;  %v4414_v12 = vsel %vm333_vm7, %v4401_v28, %v4409_v45  ;;  %v4426_v49 = vsel %vm333_vm7, %v4409_v45, %v4385_v61 }
0x110f   :  { %v4441_v27 = vmul.f32 %v4419_v39, %v10467_v17  ;;  %v4438_v46 = vmul.f32 %v4414_v12, %v10468_v13  ;;  %v4439_v42 = vmul.f32 %v4426_v49, %v10469_v0 }
0x1111   :  { %v4411_v41 = vpop.permute.xlu1 %4410  ;;  %v4513_v52 = vpack.c.bf16 %v4441_v27, %v4437_v22 }
0x1112   :  { %v4415_v6 = vsel %vm333_vm7, %v4403_v31, %v4411_v41  ;;  %v4427_v1 = vsel %vm333_vm7, %v4411_v41, %v4387_v50 }
0x1113   :  { %v4442_v37 = vmul.f32 %v4415_v6, %v10468_v13  ;;  %v4443_v5 = vmul.f32 %v4427_v1, %v10469_v0  ;;  %4587 = vmatprep.subr.bf16.mxu0 %v4513_v52 }
0x1114   :  { %4588 = vmatpush1.bf16.msra.mxu0 %v4512_v2 }
0x1115   :  { %v4514_v59 = vpack.c.bf16 %v4442_v37, %v4438_v46  ;;  %v4515_v60 = vpack.c.bf16 %v4443_v5, %v4439_v42 }
0x1117   :  { %4771 = vmatmul.mubr.msk.bf16.vlgmr.msra.gmra.mrb[32].mxu0 %vm1372_vm10, %v10470_v10  ;;  %4669 = vmatprep.subr.bf16.mxu1 %v4515_v60 }
0x1118   :  { %4670 = vmatpush1.bf16.msra.mxu1 %v4514_v59 }
0x111b   :  { %4772 = vmatmul.mubr.msk.bf16.vlgmr.msra.gmra.mrb[32].mxu1 %vm1372_vm10, %v10470_v10 }
0x111f   :  { %v4520_v7 = vpop.permute.xlu0 %4519 }
0x11ea   :  { %v4619_v47 = vpop.f32.mrb[32].mxu0 }
0x11eb   :  { %v4773_v40 = vadd.f32 %v4619_v47, %v4520_v7  ;;  %v4621_v21 = vpop.f32.mrb[33].mxu0 }
0x11ec   :  { %v4774_v61 = vadd.f32 %v4621_v21, %v4520_v7  ;;  %v4623_v33 = vpop.f32.mrb[34].mxu0 }
0x11ed   :  { %4914 = vtanh.f32 %v4773_v40  ;;  %v4624_v16 = vpop.f32.mrb[35].mxu0 }
0x11ee   :  { %4916 = vtanh.f32 %v4774_v61  ;;  %v4701_v19 = vpop.f32.mrb[32].mxu1 }
0x11ef   :  { %v4775_v51 = vadd.f32 %v4701_v19, %v4520_v7  ;;  %v4703_v8 = vpop.f32.mrb[33].mxu1 }
0x11f0   :  { %v4776_v56 = vadd.f32 %v4703_v8, %v4520_v7  ;;  %v4705_v14 = vpop.f32.mrb[34].mxu1 }
0x11f1   :  { %4918 = vtanh.f32 %v4775_v51  ;;  %v4706_v18 = vpop.f32.mrb[35].mxu1 }
0x11f2   :  { %4920 = vtanh.f32 %v4776_v56 }
0x11f7   :  { %v4915_v55 = vpop.eup %4914 }
0x11f8   :  { %v4917_v63 = vpop.eup %4916 }
0x11f9   :  { %v4716_v53 = vcombine.low %v4915_v55, %v4917_v63 }
0x11fb   :  { %v4919_v29 = vpop.eup %4918  ;;  %4720 = vst [vmem:[%s9728_s10] sm:$0x77] %v4716_v53 }
0x11fc   :  { %v4921_v38 = vpop.eup %4920 }
0x11fd   :  { %v4717_v3 = vcombine.low %v4919_v29, %v4921_v38 }
0x11ff   :  { %4721 = vst [vmem:[%s9728_s10 + $0x8] sm:$0x77] %v4717_v3 }

</bundles_post_ra>
